<compile_context>
chip_gen: v7x
topology: tpu7x:2x2x1
jax: 0.10.0
libtpu: 0.0.40
codegen_flags: <defaults>
</compile_context>

<pallas_src>
import functools
import math

import jax
import jax.numpy as jnp
from jax import lax
from jax.experimental import pallas as pl
from jax.experimental.pallas import tpu as pltpu


def _sha_attention_kernel(x_ref, wq_ref, bq_ref, wk_ref, bk_ref, wv_ref,
                          bv_ref, wo_ref, bo_ref, o_ref,
                          k_scratch, v_scratch,
                          *, heads, dim_head, tile_q, use_bf16):
    """One (batch, query-tile) grid step.

    x_ref  : (1, S, C)            full-spatial input of this batch element
    wq_ref : (heads, C, dh)       query weights (softmax scale pre-folded)
    bq_ref : (heads, 1, dh)       query bias (scale pre-folded)
    wk_ref / wv_ref : (heads, C, dh)
    bk_ref / bv_ref : (heads, 1, dh)
    wo_ref : (heads, dh, C_out)   head-major rows of to_out[0].weight^T
    bo_ref : (1, C_out)
    o_ref  : (1, TQ, C_out)

    k_scratch / v_scratch : (heads, S, dh) VMEM, resident across the query
    tiles of one batch element (requires qi axis to be sequential from 0).
    """
    mm_dtype = jnp.bfloat16 if use_bf16 else jnp.float32
    qi = pl.program_id(1)

    # --- K/V for the whole spatial extent: once per batch element ----------
    @pl.when(qi == 0)
    def _():
        xkv = x_ref[0].astype(mm_dtype)                        # (S, C)
        for h in range(heads):                                 # static unroll
            k_scratch[h] = (
                jnp.dot(xkv, wk_ref[h], preferred_element_type=jnp.float32)
                + bk_ref[h]).astype(k_scratch.dtype)
            v_scratch[h] = (
                jnp.dot(xkv, wv_ref[h], preferred_element_type=jnp.float32)
                + bv_ref[h]).astype(v_scratch.dtype)

    # --- query tile: sliced from the resident block (no extra DMA) ---------
    start = pl.multiple_of(qi * tile_q, tile_q)
    xq = x_ref[0, pl.ds(start, tile_q), :].astype(mm_dtype)    # (TQ, C)

    c_out = o_ref.shape[-1]
    acc = jnp.zeros((tile_q, c_out), jnp.float32)

    # heads is small & static; keep unrolled so head h's softmax (VPU/EUP/XLU)
    # overlaps head h+1's matmuls (MXU).
    # TODO(synk): for heads >= 16 switch to lax.fori_loop(..., unroll=True).
    for h in range(heads):
        # per-head Q projection (scale already folded into wq/bq)
        q = (jnp.dot(xq, wq_ref[h], preferred_element_type=jnp.float32)
             + bq_ref[h]).astype(mm_dtype)                     # (TQ, dh)
        k = k_scratch[h]                                       # (S, dh)
        v = v_scratch[h]                                       # (S, dh)

        # scores (TQ, S): contract the head dim, f32 accumulation
        s = lax.dot_general(q, k, (((1,), (1,)), ((), ())),
                            preferred_element_type=jnp.float32)
        s = s - jnp.max(s, axis=-1, keepdims=True)
        p = jnp.exp(s)                                         # unnormalized
        denom = jnp.sum(p, axis=-1, keepdims=True)             # (TQ, 1)

        pv = jnp.dot(p.astype(mm_dtype), v,
                     preferred_element_type=jnp.float32)       # (TQ, dh)
        # normalize AFTER P@V: TQ*dh multiplies instead of TQ*S
        pv = pv * pl.reciprocal(denom, approx=True)

        # fold head-concat + to_out[0] matmul into an accumulation
        acc = acc + jnp.dot(pv.astype(mm_dtype), wo_ref[h],
                            preferred_element_type=jnp.float32)

    o_ref[0] = (acc + bo_ref[...]).astype(o_ref.dtype)


def _pick_tile_q(S, cap):
    """Largest divisor of S that is a multiple of 8 and <= cap."""
    best = None
    t = 8
    limit = min(S, cap)
    while t <= limit:
        if S % t == 0:
            best = t
        t += 8
    if best is None:
        # TODO(synk): pad + mask instead of the full-S fallback for awkward S
        best = S
    return best


def sha_attention(x_nchw, params, *, heads, dim_head, tile_q=None,
                  use_bf16=True):
    """x_nchw: (B, C, H, W) float32 -> (B, C_out, H, W) float32."""
    Wq, bq, Wk, bk, Wv, bv, Wo, bo = params
    B, C, H, W = x_nchw.shape
    S = H * W
    inner = heads * dim_head
    C_out = Wo.shape[-1]
    scale = 1.0 / math.sqrt(dim_head)

    mm_dtype = jnp.bfloat16 if use_bf16 else jnp.float32
    mm_it = 2 if use_bf16 else 4

    # physical VMEM for this generation (fallback: 128 MiB = v5e/v6e)
    try:
        info = pltpu.get_tpu_info()
        vmem_cap = int(getattr(info, "vmem_capacity_bytes", 128 * 1024 * 1024))
    except Exception:  # pragma: no cover - conservative fallback
        vmem_cap = 128 * 1024 * 1024
    vmem_budget = int(0.75 * vmem_cap)   # ~96 MiB v5e/v6e, ~48 MiB v7x

    # query-tile size: largest divisor of S that is a multiple of 8,
    # capped at 512 (256 when VMEM is tight, e.g. v7x).
    tq_cap = 512 if vmem_budget >= (80 << 20) else 256
    if tile_q is None or tile_q > S or S % tile_q != 0 or tile_q % 8 != 0:
        tile_q = _pick_tile_q(S, tq_cap)
    n_q_tiles = S // tile_q

    # NCHW -> (B, S, C)
    x = jnp.transpose(x_nchw, (0, 2, 3, 1)).reshape(B, S, C)

    # Per-head weight stacks with a leading head axis (no lane-offset slicing
    # in the kernel); softmax scale folded into the query projection.
    Wq_f = (Wq * scale).astype(mm_dtype)                 # (heads, C, dh)
    bq_f = (bq * scale).astype(jnp.float32)              # (heads, 1, dh)
    Wk_f = Wk.astype(mm_dtype)
    bk_f = bk.astype(jnp.float32)
    Wv_f = Wv.astype(mm_dtype)
    bv_f = bv.astype(jnp.float32)
    Wo_f = Wo.reshape(heads, dim_head, C_out).astype(mm_dtype)
    bo_f = bo.reshape(1, C_out).astype(jnp.float32)

    # scoped-VMEM budget from the chosen tiles (lane-padded where relevant)
    dh_pad = ((dim_head + 127) // 128) * 128
    c_pad = ((C + 127) // 128) * 128
    co_pad = ((C_out + 127) // 128) * 128
    est = (2 * S * c_pad * 4                              # x block (dbl-buffered)
           + 2 * 3 * heads * C * dh_pad * mm_it           # Wq / Wk / Wv
           + 2 * heads * dim_head * co_pad * mm_it        # Wo
           + 2 * tile_q * co_pad * 4                      # output block
           + 2 * heads * S * dh_pad * mm_it               # resident K/V scratch
           + S * c_pad * mm_it                            # xkv cast temp
           + 4 * tile_q * S * 4)                          # live score tiles
    vmem_limit = int(min(max(int(1.3 * est), 16 << 20), vmem_budget))

    # advisory cost estimate so XLA schedules surrounding transposes sensibly
    flops = B * (6 * S * C * inner + 4 * S * S * inner + 2 * S * inner * C_out)
    transcendentals = B * heads * S * S
    bytes_accessed = (B * S * C * 4 + B * S * C_out * 4
                      + (3 * heads * C * dim_head
                         + heads * dim_head * C_out) * mm_it)
    cost = pl.CostEstimate(flops=int(flops),
                           transcendentals=int(transcendentals),
                           bytes_accessed=int(bytes_accessed))

    kernel = functools.partial(_sha_attention_kernel, heads=heads,
                               dim_head=dim_head, tile_q=tile_q,
                               use_bf16=use_bf16)

    out = pl.pallas_call(
        kernel,
        out_shape=jax.ShapeDtypeStruct((B, S, C_out), jnp.float32),
        grid_spec=pltpu.PrefetchScalarGridSpec(
            num_scalar_prefetch=0,
            grid=(B, n_q_tiles),
            in_specs=[
                pl.BlockSpec((1, S, C), lambda b, qi: (b, 0, 0)),              # x
                pl.BlockSpec((heads, C, dim_head), lambda b, qi: (0, 0, 0)),   # Wq
                pl.BlockSpec((heads, 1, dim_head), lambda b, qi: (0, 0, 0)),   # bq
                pl.BlockSpec((heads, C, dim_head), lambda b, qi: (0, 0, 0)),   # Wk
                pl.BlockSpec((heads, 1, dim_head), lambda b, qi: (0, 0, 0)),   # bk
                pl.BlockSpec((heads, C, dim_head), lambda b, qi: (0, 0, 0)),   # Wv
                pl.BlockSpec((heads, 1, dim_head), lambda b, qi: (0, 0, 0)),   # bv
                pl.BlockSpec((heads, dim_head, C_out), lambda b, qi: (0, 0, 0)),  # Wo
                pl.BlockSpec((1, C_out), lambda b, qi: (0, 0)),                # bo
            ],
            out_specs=pl.BlockSpec((1, tile_q, C_out), lambda b, qi: (b, qi, 0)),
            scratch_shapes=[
                pltpu.VMEM((heads, S, dim_head), mm_dtype),   # K (per-batch resident)
                pltpu.VMEM((heads, S, dim_head), mm_dtype),   # V (per-batch resident)
            ],
        ),
        compiler_params=pltpu.CompilerParams(
            # batch axis may shard across cores; the q-tile axis MUST stay
            # "arbitrary" (sequential) — K/V residency depends on it.
            dimension_semantics=("parallel", "arbitrary"),
            vmem_limit_bytes=vmem_limit,
        ),
        cost_estimate=cost,
    )(x, Wq_f, bq_f, Wk_f, bk_f, Wv_f, bv_f, Wo_f, bo_f)

    # (B, S, C_out) -> NCHW
    return jnp.transpose(out.reshape(B, H, W, C_out), (0, 3, 1, 2))


def sha_attention_ref(x_nchw, params, *, heads, dim_head):
    """Pure-JAX reference mirroring the PyTorch forward (self-attn, no mask)."""
    Wq, bq, Wk, bk, Wv, bv, Wo, bo = params
    B, C, H, W = x_nchw.shape
    scale = 1.0 / math.sqrt(dim_head)
    x = jnp.transpose(x_nchw, (0, 2, 3, 1)).reshape(B, H * W, C)
    outs = []
    for h in range(heads):
        q = x @ Wq[h] + bq[h]
        k = x @ Wk[h] + bk[h]
        v = x @ Wv[h] + bv[h]
        s = jnp.einsum("bqd,bkd->bqk", q, k) * scale
        p = jax.nn.softmax(s, axis=-1)
        outs.append(jnp.einsum("bqk,bkd->bqd", p, v))
    a = jnp.concatenate(outs, axis=-1) @ Wo + bo
    return jnp.transpose(a.reshape(B, H, W, -1), (0, 3, 1, 2))


if __name__ == "__main__":
    # Small shapes consistent with the module: NCHW input, heads*dim_head == C.
    B, C, H, W = 2, 32, 16, 16
    heads = 4
    dim_head = C // heads          # 8
    inner_dim = heads * dim_head   # 32
    C_out = C                      # to_out[0]: Linear(inner_dim, query_dim=C)

    key = jax.random.PRNGKey(0)
    keys = jax.random.split(key, 10)

    # Deterministic synthetic parameters (torch Linear weight (out,in) is stored
    # here pre-transposed as (in,out) per head for direct matmul).
    Wq = jax.random.normal(keys[0], (heads, C, dim_head), jnp.float32) * 0.05
    bq = jax.random.normal(keys[1], (heads, 1, dim_head), jnp.float32) * 0.05
    Wk = jax.random.normal(keys[2], (heads, C, dim_head), jnp.float32) * 0.05
    bk = jax.random.normal(keys[3], (heads, 1, dim_head), jnp.float32) * 0.05
    Wv = jax.random.normal(keys[4], (heads, C, dim_head), jnp.float32) * 0.05
    bv = jax.random.normal(keys[5], (heads, 1, dim_head), jnp.float32) * 0.05
    Wo = jax.random.normal(keys[6], (inner_dim, C_out), jnp.float32) * 0.05
    bo = jax.random.normal(keys[7], (1, C_out), jnp.float32) * 0.05
    params = (Wq, bq, Wk, bk, Wv, bv, Wo, bo)

    x = jax.random.normal(keys[8], (B, C, H, W), jnp.float32)

    ref = jax.block_until_ready(
        sha_attention_ref(x, params, heads=heads, dim_head=dim_head))

    # Default path: bf16 MXU operands (f32 accumulation), auto tile_q.
    out_bf16 = jax.block_until_ready(
        sha_attention(x, params, heads=heads, dim_head=dim_head))
    assert out_bf16.shape == (B, C_out, H, W), out_bf16.shape
    assert jnp.allclose(out_bf16, ref, atol=3e-2, rtol=3e-2), float(
        jnp.max(jnp.abs(out_bf16 - ref)))

    # f32 MXU-operand path with explicit tile_q=128 (exercises the multi-tile
    # query path and the resident K/V reuse across tiles); tight tolerance.
    out_f32 = jax.block_until_ready(
        sha_attention(x, params, heads=heads, dim_head=dim_head,
                      tile_q=128, use_bf16=False))
    assert jnp.allclose(out_f32, ref, atol=2e-3, rtol=2e-3), float(
        jnp.max(jnp.abs(out_f32 - ref)))

    print("KERNEL_OK")
</pallas_src>

<mosaic_0001>
module attributes {stable_mosaic.version = 11 : i64} {
  func.func @_sha_attention_kernel(%arg0: i32, %arg1: i32, %arg2: memref<1x256x32xf32, #tpu.memory_space<vmem>>, %arg3: memref<4x32x8xbf16, #tpu.memory_space<vmem>>, %arg4: memref<4x1x8xf32, #tpu.memory_space<vmem>>, %arg5: memref<4x32x8xbf16, #tpu.memory_space<vmem>>, %arg6: memref<4x1x8xf32, #tpu.memory_space<vmem>>, %arg7: memref<4x32x8xbf16, #tpu.memory_space<vmem>>, %arg8: memref<4x1x8xf32, #tpu.memory_space<vmem>>, %arg9: memref<4x8x32xbf16, #tpu.memory_space<vmem>>, %arg10: memref<1x32xf32, #tpu.memory_space<vmem>>, %arg11: memref<1x256x32xf32, #tpu.memory_space<vmem>>, %arg12: memref<4x256x8xbf16, #tpu.memory_space<vmem>>, %arg13: memref<4x256x8xbf16, #tpu.memory_space<vmem>>) attributes {dimension_semantics = [#tpu.dimension_semantics<parallel>, #tpu.dimension_semantics<arbitrary>], iteration_bounds = array<i64: 2, 1>, scalar_prefetch = 0 : i64, scratch_operands = 2 : i64, tpu.core_type = #tpu.core_type<tc>, window_params = [{transform_indices = @transform_0, window_bounds = array<i64: 1, 256, 32>}, {pipeline_mode = #tpu.pipeline_mode<synchronous>, transform_indices = @transform_1, window_bounds = array<i64: 4, 32, 8>}, {pipeline_mode = #tpu.pipeline_mode<synchronous>, transform_indices = @transform_2, window_bounds = array<i64: 4, 1, 8>}, {pipeline_mode = #tpu.pipeline_mode<synchronous>, transform_indices = @transform_3, window_bounds = array<i64: 4, 32, 8>}, {pipeline_mode = #tpu.pipeline_mode<synchronous>, transform_indices = @transform_4, window_bounds = array<i64: 4, 1, 8>}, {pipeline_mode = #tpu.pipeline_mode<synchronous>, transform_indices = @transform_5, window_bounds = array<i64: 4, 32, 8>}, {pipeline_mode = #tpu.pipeline_mode<synchronous>, transform_indices = @transform_6, window_bounds = array<i64: 4, 1, 8>}, {pipeline_mode = #tpu.pipeline_mode<synchronous>, transform_indices = @transform_7, window_bounds = array<i64: 4, 8, 32>}, {pipeline_mode = #tpu.pipeline_mode<synchronous>, transform_indices = @transform_8, window_bounds = array<i64: 1, 32>}, {transform_indices = @transform_9, window_bounds = array<i64: 1, 256, 32>}]} {
    %c0_i32 = arith.constant 0 : i32
    %0 = arith.cmpi eq, %arg1, %c0_i32 : i32
    %1 = arith.extui %0 : i1 to i32
    %c0_i32_0 = arith.constant 0 : i32
    %2 = arith.cmpi ne, %1, %c0_i32_0 : i32
    scf.if %2 {
      %c0_88 = arith.constant 0 : index
      %c0_89 = arith.constant 0 : index
      %c0_90 = arith.constant 0 : index
      %136 = vector.load %arg2[%c0_88, %c0_89, %c0_90] : memref<1x256x32xf32, #tpu.memory_space<vmem>>, vector<1x256x32xf32>
      %137 = vector.shape_cast %136 : vector<1x256x32xf32> to vector<256x32xf32>
      %138 = arith.truncf %137 : vector<256x32xf32> to vector<256x32xbf16>
      %c0_91 = arith.constant 0 : index
      %c0_92 = arith.constant 0 : index
      %c0_93 = arith.constant 0 : index
      %139 = vector.load %arg5[%c0_91, %c0_92, %c0_93] : memref<4x32x8xbf16, #tpu.memory_space<vmem>>, vector<1x32x8xbf16>
      %140 = vector.shape_cast %139 : vector<1x32x8xbf16> to vector<32x8xbf16>
      %cst_94 = arith.constant dense<0.000000e+00> : vector<256x8xf32>
      %141 = tpu.matmul %138, %140, %cst_94 {dimension_numbers = #tpu.dot_dimension_numbers<[1], [0], [0], [1], [0, 0, 1, 1], [], []>} : vector<256x32xbf16>, vector<32x8xbf16>, vector<256x8xf32> -> vector<256x8xf32>
      %c0_95 = arith.constant 0 : index
      %c0_96 = arith.constant 0 : index
      %c0_97 = arith.constant 0 : index
      %142 = vector.load %arg6[%c0_95, %c0_96, %c0_97] : memref<4x1x8xf32, #tpu.memory_space<vmem>>, vector<1x1x8xf32>
      %143 = vector.shape_cast %142 : vector<1x1x8xf32> to vector<1x8xf32>
      %144 = vector.broadcast %143 : vector<1x8xf32> to vector<256x8xf32>
      %145 = arith.addf %141, %144 : vector<256x8xf32>
      %146 = arith.truncf %145 : vector<256x8xf32> to vector<256x8xbf16>
      %c0_98 = arith.constant 0 : index
      %c0_99 = arith.constant 0 : index
      %c0_100 = arith.constant 0 : index
      %147 = vector.load %arg12[%c0_98, %c0_99, %c0_100] : memref<4x256x8xbf16, #tpu.memory_space<vmem>>, vector<1x256x8xbf16>
      %148 = vector.shape_cast %147 : vector<1x256x8xbf16> to vector<256x8xbf16>
      %149 = vector.shape_cast %146 : vector<256x8xbf16> to vector<1x256x8xbf16>
      tpu.vector_store %arg12[%c0_98, %c0_99, %c0_100], %149 {strides = array<i32>} : memref<4x256x8xbf16, #tpu.memory_space<vmem>>, vector<1x256x8xbf16>,
      %c0_101 = arith.constant 0 : index
      %c0_102 = arith.constant 0 : index
      %c0_103 = arith.constant 0 : index
      %150 = vector.load %arg7[%c0_101, %c0_102, %c0_103] : memref<4x32x8xbf16, #tpu.memory_space<vmem>>, vector<1x32x8xbf16>
      %151 = vector.shape_cast %150 : vector<1x32x8xbf16> to vector<32x8xbf16>
      %cst_104 = arith.constant dense<0.000000e+00> : vector<256x8xf32>
      %152 = tpu.matmul %138, %151, %cst_104 {dimension_numbers = #tpu.dot_dimension_numbers<[1], [0], [0], [1], [0, 0, 1, 1], [], []>} : vector<256x32xbf16>, vector<32x8xbf16>, vector<256x8xf32> -> vector<256x8xf32>
      %c0_105 = arith.constant 0 : index
      %c0_106 = arith.constant 0 : index
      %c0_107 = arith.constant 0 : index
      %153 = vector.load %arg8[%c0_105, %c0_106, %c0_107] : memref<4x1x8xf32, #tpu.memory_space<vmem>>, vector<1x1x8xf32>
      %154 = vector.shape_cast %153 : vector<1x1x8xf32> to vector<1x8xf32>
      %155 = vector.broadcast %154 : vector<1x8xf32> to vector<256x8xf32>
      %156 = arith.addf %152, %155 : vector<256x8xf32>
      %157 = arith.truncf %156 : vector<256x8xf32> to vector<256x8xbf16>
      %c0_108 = arith.constant 0 : index
      %c0_109 = arith.constant 0 : index
      %c0_110 = arith.constant 0 : index
      %158 = vector.load %arg13[%c0_108, %c0_109, %c0_110] : memref<4x256x8xbf16, #tpu.memory_space<vmem>>, vector<1x256x8xbf16>
      %159 = vector.shape_cast %158 : vector<1x256x8xbf16> to vector<256x8xbf16>
      %160 = vector.shape_cast %157 : vector<256x8xbf16> to vector<1x256x8xbf16>
      tpu.vector_store %arg13[%c0_108, %c0_109, %c0_110], %160 {strides = array<i32>} : memref<4x256x8xbf16, #tpu.memory_space<vmem>>, vector<1x256x8xbf16>,
      %c1_111 = arith.constant 1 : index
      %c0_112 = arith.constant 0 : index
      %c0_113 = arith.constant 0 : index
      %161 = vector.load %arg5[%c1_111, %c0_112, %c0_113] : memref<4x32x8xbf16, #tpu.memory_space<vmem>>, vector<1x32x8xbf16>
      %162 = vector.shape_cast %161 : vector<1x32x8xbf16> to vector<32x8xbf16>
      %cst_114 = arith.constant dense<0.000000e+00> : vector<256x8xf32>
      %163 = tpu.matmul %138, %162, %cst_114 {dimension_numbers = #tpu.dot_dimension_numbers<[1], [0], [0], [1], [0, 0, 1, 1], [], []>} : vector<256x32xbf16>, vector<32x8xbf16>, vector<256x8xf32> -> vector<256x8xf32>
      %c1_115 = arith.constant 1 : index
      %c0_116 = arith.constant 0 : index
      %c0_117 = arith.constant 0 : index
      %164 = vector.load %arg6[%c1_115, %c0_116, %c0_117] : memref<4x1x8xf32, #tpu.memory_space<vmem>>, vector<1x1x8xf32>
      %165 = vector.shape_cast %164 : vector<1x1x8xf32> to vector<1x8xf32>
      %166 = vector.broadcast %165 : vector<1x8xf32> to vector<256x8xf32>
      %167 = arith.addf %163, %166 : vector<256x8xf32>
      %168 = arith.truncf %167 : vector<256x8xf32> to vector<256x8xbf16>
      %c1_118 = arith.constant 1 : index
      %c0_119 = arith.constant 0 : index
      %c0_120 = arith.constant 0 : index
      %169 = vector.load %arg12[%c1_118, %c0_119, %c0_120] : memref<4x256x8xbf16, #tpu.memory_space<vmem>>, vector<1x256x8xbf16>
      %170 = vector.shape_cast %169 : vector<1x256x8xbf16> to vector<256x8xbf16>
      %171 = vector.shape_cast %168 : vector<256x8xbf16> to vector<1x256x8xbf16>
      tpu.vector_store %arg12[%c1_118, %c0_119, %c0_120], %171 {strides = array<i32>} : memref<4x256x8xbf16, #tpu.memory_space<vmem>>, vector<1x256x8xbf16>,
      %c1_121 = arith.constant 1 : index
      %c0_122 = arith.constant 0 : index
      %c0_123 = arith.constant 0 : index
      %172 = vector.load %arg7[%c1_121, %c0_122, %c0_123] : memref<4x32x8xbf16, #tpu.memory_space<vmem>>, vector<1x32x8xbf16>
      %173 = vector.shape_cast %172 : vector<1x32x8xbf16> to vector<32x8xbf16>
      %cst_124 = arith.constant dense<0.000000e+00> : vector<256x8xf32>
      %174 = tpu.matmul %138, %173, %cst_124 {dimension_numbers = #tpu.dot_dimension_numbers<[1], [0], [0], [1], [0, 0, 1, 1], [], []>} : vector<256x32xbf16>, vector<32x8xbf16>, vector<256x8xf32> -> vector<256x8xf32>
      %c1_125 = arith.constant 1 : index
      %c0_126 = arith.constant 0 : index
      %c0_127 = arith.constant 0 : index
      %175 = vector.load %arg8[%c1_125, %c0_126, %c0_127] : memref<4x1x8xf32, #tpu.memory_space<vmem>>, vector<1x1x8xf32>
      %176 = vector.shape_cast %175 : vector<1x1x8xf32> to vector<1x8xf32>
      %177 = vector.broadcast %176 : vector<1x8xf32> to vector<256x8xf32>
      %178 = arith.addf %174, %177 : vector<256x8xf32>
      %179 = arith.truncf %178 : vector<256x8xf32> to vector<256x8xbf16>
      %c1_128 = arith.constant 1 : index
      %c0_129 = arith.constant 0 : index
      %c0_130 = arith.constant 0 : index
      %180 = vector.load %arg13[%c1_128, %c0_129, %c0_130] : memref<4x256x8xbf16, #tpu.memory_space<vmem>>, vector<1x256x8xbf16>
      %181 = vector.shape_cast %180 : vector<1x256x8xbf16> to vector<256x8xbf16>
      %182 = vector.shape_cast %179 : vector<256x8xbf16> to vector<1x256x8xbf16>
      tpu.vector_store %arg13[%c1_128, %c0_129, %c0_130], %182 {strides = array<i32>} : memref<4x256x8xbf16, #tpu.memory_space<vmem>>, vector<1x256x8xbf16>,
      %c2_131 = arith.constant 2 : index
      %c0_132 = arith.constant 0 : index
      %c0_133 = arith.constant 0 : index
      %183 = vector.load %arg5[%c2_131, %c0_132, %c0_133] : memref<4x32x8xbf16, #tpu.memory_space<vmem>>, vector<1x32x8xbf16>
      %184 = vector.shape_cast %183 : vector<1x32x8xbf16> to vector<32x8xbf16>
      %cst_134 = arith.constant dense<0.000000e+00> : vector<256x8xf32>
      %185 = tpu.matmul %138, %184, %cst_134 {dimension_numbers = #tpu.dot_dimension_numbers<[1], [0], [0], [1], [0, 0, 1, 1], [], []>} : vector<256x32xbf16>, vector<32x8xbf16>, vector<256x8xf32> -> vector<256x8xf32>
      %c2_135 = arith.constant 2 : index
      %c0_136 = arith.constant 0 : index
      %c0_137 = arith.constant 0 : index
      %186 = vector.load %arg6[%c2_135, %c0_136, %c0_137] : memref<4x1x8xf32, #tpu.memory_space<vmem>>, vector<1x1x8xf32>
      %187 = vector.shape_cast %186 : vector<1x1x8xf32> to vector<1x8xf32>
      %188 = vector.broadcast %187 : vector<1x8xf32> to vector<256x8xf32>
      %189 = arith.addf %185, %188 : vector<256x8xf32>
      %190 = arith.truncf %189 : vector<256x8xf32> to vector<256x8xbf16>
      %c2_138 = arith.constant 2 : index
      %c0_139 = arith.constant 0 : index
      %c0_140 = arith.constant 0 : index
      %191 = vector.load %arg12[%c2_138, %c0_139, %c0_140] : memref<4x256x8xbf16, #tpu.memory_space<vmem>>, vector<1x256x8xbf16>
      %192 = vector.shape_cast %191 : vector<1x256x8xbf16> to vector<256x8xbf16>
      %193 = vector.shape_cast %190 : vector<256x8xbf16> to vector<1x256x8xbf16>
      tpu.vector_store %arg12[%c2_138, %c0_139, %c0_140], %193 {strides = array<i32>} : memref<4x256x8xbf16, #tpu.memory_space<vmem>>, vector<1x256x8xbf16>,
      %c2_141 = arith.constant 2 : index
      %c0_142 = arith.constant 0 : index
      %c0_143 = arith.constant 0 : index
      %194 = vector.load %arg7[%c2_141, %c0_142, %c0_143] : memref<4x32x8xbf16, #tpu.memory_space<vmem>>, vector<1x32x8xbf16>
      %195 = vector.shape_cast %194 : vector<1x32x8xbf16> to vector<32x8xbf16>
      %cst_144 = arith.constant dense<0.000000e+00> : vector<256x8xf32>
      %196 = tpu.matmul %138, %195, %cst_144 {dimension_numbers = #tpu.dot_dimension_numbers<[1], [0], [0], [1], [0, 0, 1, 1], [], []>} : vector<256x32xbf16>, vector<32x8xbf16>, vector<256x8xf32> -> vector<256x8xf32>
      %c2_145 = arith.constant 2 : index
      %c0_146 = arith.constant 0 : index
      %c0_147 = arith.constant 0 : index
      %197 = vector.load %arg8[%c2_145, %c0_146, %c0_147] : memref<4x1x8xf32, #tpu.memory_space<vmem>>, vector<1x1x8xf32>
      %198 = vector.shape_cast %197 : vector<1x1x8xf32> to vector<1x8xf32>
      %199 = vector.broadcast %198 : vector<1x8xf32> to vector<256x8xf32>
      %200 = arith.addf %196, %199 : vector<256x8xf32>
      %201 = arith.truncf %200 : vector<256x8xf32> to vector<256x8xbf16>
      %c2_148 = arith.constant 2 : index
      %c0_149 = arith.constant 0 : index
      %c0_150 = arith.constant 0 : index
      %202 = vector.load %arg13[%c2_148, %c0_149, %c0_150] : memref<4x256x8xbf16, #tpu.memory_space<vmem>>, vector<1x256x8xbf16>
      %203 = vector.shape_cast %202 : vector<1x256x8xbf16> to vector<256x8xbf16>
      %204 = vector.shape_cast %201 : vector<256x8xbf16> to vector<1x256x8xbf16>
      tpu.vector_store %arg13[%c2_148, %c0_149, %c0_150], %204 {strides = array<i32>} : memref<4x256x8xbf16, #tpu.memory_space<vmem>>, vector<1x256x8xbf16>,
      %c3_151 = arith.constant 3 : index
      %c0_152 = arith.constant 0 : index
      %c0_153 = arith.constant 0 : index
      %205 = vector.load %arg5[%c3_151, %c0_152, %c0_153] : memref<4x32x8xbf16, #tpu.memory_space<vmem>>, vector<1x32x8xbf16>
      %206 = vector.shape_cast %205 : vector<1x32x8xbf16> to vector<32x8xbf16>
      %cst_154 = arith.constant dense<0.000000e+00> : vector<256x8xf32>
      %207 = tpu.matmul %138, %206, %cst_154 {dimension_numbers = #tpu.dot_dimension_numbers<[1], [0], [0], [1], [0, 0, 1, 1], [], []>} : vector<256x32xbf16>, vector<32x8xbf16>, vector<256x8xf32> -> vector<256x8xf32>
      %c3_155 = arith.constant 3 : index
      %c0_156 = arith.constant 0 : index
      %c0_157 = arith.constant 0 : index
      %208 = vector.load %arg6[%c3_155, %c0_156, %c0_157] : memref<4x1x8xf32, #tpu.memory_space<vmem>>, vector<1x1x8xf32>
      %209 = vector.shape_cast %208 : vector<1x1x8xf32> to vector<1x8xf32>
      %210 = vector.broadcast %209 : vector<1x8xf32> to vector<256x8xf32>
      %211 = arith.addf %207, %210 : vector<256x8xf32>
      %212 = arith.truncf %211 : vector<256x8xf32> to vector<256x8xbf16>
      %c3_158 = arith.constant 3 : index
      %c0_159 = arith.constant 0 : index
      %c0_160 = arith.constant 0 : index
      %213 = vector.load %arg12[%c3_158, %c0_159, %c0_160] : memref<4x256x8xbf16, #tpu.memory_space<vmem>>, vector<1x256x8xbf16>
      %214 = vector.shape_cast %213 : vector<1x256x8xbf16> to vector<256x8xbf16>
      %215 = vector.shape_cast %212 : vector<256x8xbf16> to vector<1x256x8xbf16>
      tpu.vector_store %arg12[%c3_158, %c0_159, %c0_160], %215 {strides = array<i32>} : memref<4x256x8xbf16, #tpu.memory_space<vmem>>, vector<1x256x8xbf16>,
      %c3_161 = arith.constant 3 : index
      %c0_162 = arith.constant 0 : index
      %c0_163 = arith.constant 0 : index
      %216 = vector.load %arg7[%c3_161, %c0_162, %c0_163] : memref<4x32x8xbf16, #tpu.memory_space<vmem>>, vector<1x32x8xbf16>
      %217 = vector.shape_cast %216 : vector<1x32x8xbf16> to vector<32x8xbf16>
      %cst_164 = arith.constant dense<0.000000e+00> : vector<256x8xf32>
      %218 = tpu.matmul %138, %217, %cst_164 {dimension_numbers = #tpu.dot_dimension_numbers<[1], [0], [0], [1], [0, 0, 1, 1], [], []>} : vector<256x32xbf16>, vector<32x8xbf16>, vector<256x8xf32> -> vector<256x8xf32>
      %c3_165 = arith.constant 3 : index
      %c0_166 = arith.constant 0 : index
      %c0_167 = arith.constant 0 : index
      %219 = vector.load %arg8[%c3_165, %c0_166, %c0_167] : memref<4x1x8xf32, #tpu.memory_space<vmem>>, vector<1x1x8xf32>
      %220 = vector.shape_cast %219 : vector<1x1x8xf32> to vector<1x8xf32>
      %221 = vector.broadcast %220 : vector<1x8xf32> to vector<256x8xf32>
      %222 = arith.addf %218, %221 : vector<256x8xf32>
      %223 = arith.truncf %222 : vector<256x8xf32> to vector<256x8xbf16>
      %c3_168 = arith.constant 3 : index
      %c0_169 = arith.constant 0 : index
      %c0_170 = arith.constant 0 : index
      %224 = vector.load %arg13[%c3_168, %c0_169, %c0_170] : memref<4x256x8xbf16, #tpu.memory_space<vmem>>, vector<1x256x8xbf16>
      %225 = vector.shape_cast %224 : vector<1x256x8xbf16> to vector<256x8xbf16>
      %226 = vector.shape_cast %223 : vector<256x8xbf16> to vector<1x256x8xbf16>
      tpu.vector_store %arg13[%c3_168, %c0_169, %c0_170], %226 {strides = array<i32>} : memref<4x256x8xbf16, #tpu.memory_space<vmem>>, vector<1x256x8xbf16>,
    } else {
    }
    %c256_i32 = arith.constant 256 : i32
    %3 = arith.muli %arg1, %c256_i32 : i32
    %4 = tpu.assume_multiple %3, 256 : i32
    %c0 = arith.constant 0 : index
    %5 = arith.index_cast %4 : i32 to index
    %c0_1 = arith.constant 0 : index
    %6 = vector.load %arg2[%c0, %5, %c0_1] : memref<1x256x32xf32, #tpu.memory_space<vmem>>, vector<1x256x32xf32>
    %7 = vector.shape_cast %6 : vector<1x256x32xf32> to vector<256x32xf32>
    %8 = arith.truncf %7 : vector<256x32xf32> to vector<256x32xbf16>
    %cst = arith.constant 0.000000e+00 : f32
    %9 = vector.broadcast %cst : f32 to vector<256x32xf32>
    %c0_2 = arith.constant 0 : index
    %c0_3 = arith.constant 0 : index
    %c0_4 = arith.constant 0 : index
    %10 = vector.load %arg3[%c0_2, %c0_3, %c0_4] : memref<4x32x8xbf16, #tpu.memory_space<vmem>>, vector<1x32x8xbf16>
    %11 = vector.shape_cast %10 : vector<1x32x8xbf16> to vector<32x8xbf16>
    %cst_5 = arith.constant dense<0.000000e+00> : vector<256x8xf32>
    %12 = tpu.matmul %8, %11, %cst_5 {dimension_numbers = #tpu.dot_dimension_numbers<[1], [0], [0], [1], [0, 0, 1, 1], [], []>} : vector<256x32xbf16>, vector<32x8xbf16>, vector<256x8xf32> -> vector<256x8xf32>
    %c0_6 = arith.constant 0 : index
    %c0_7 = arith.constant 0 : index
    %c0_8 = arith.constant 0 : index
    %13 = vector.load %arg4[%c0_6, %c0_7, %c0_8] : memref<4x1x8xf32, #tpu.memory_space<vmem>>, vector<1x1x8xf32>
    %14 = vector.shape_cast %13 : vector<1x1x8xf32> to vector<1x8xf32>
    %15 = vector.broadcast %14 : vector<1x8xf32> to vector<256x8xf32>
    %16 = arith.addf %12, %15 : vector<256x8xf32>
    %17 = arith.truncf %16 : vector<256x8xf32> to vector<256x8xbf16>
    %c0_9 = arith.constant 0 : index
    %c0_10 = arith.constant 0 : index
    %c0_11 = arith.constant 0 : index
    %18 = vector.load %arg12[%c0_9, %c0_10, %c0_11] : memref<4x256x8xbf16, #tpu.memory_space<vmem>>, vector<1x256x8xbf16>
    %19 = vector.shape_cast %18 : vector<1x256x8xbf16> to vector<256x8xbf16>
    %c0_12 = arith.constant 0 : index
    %c0_13 = arith.constant 0 : index
    %c0_14 = arith.constant 0 : index
    %20 = vector.load %arg13[%c0_12, %c0_13, %c0_14] : memref<4x256x8xbf16, #tpu.memory_space<vmem>>, vector<1x256x8xbf16>
    %21 = vector.shape_cast %20 : vector<1x256x8xbf16> to vector<256x8xbf16>
    %cst_15 = arith.constant dense<0.000000e+00> : vector<256x256xf32>
    %22 = tpu.matmul %17, %19, %cst_15 {dimension_numbers = #tpu.dot_dimension_numbers<[1], [1], [0], [0], [0, 0, 1, 0], [], []>} : vector<256x8xbf16>, vector<256x8xbf16>, vector<256x256xf32> -> vector<256x256xf32>
    %cst_16 = arith.constant dense<0xFF800000> : vector<256xf32>
    %23 = vector.multi_reduction <maximumf>, %22, %cst_16 [1] : vector<256x256xf32> to vector<256xf32>
    %24 = vector.shape_cast %23 : vector<256xf32> to vector<256x1xf32>
    %25 = vector.broadcast %24 : vector<256x1xf32> to vector<256x256xf32>
    %26 = arith.subf %22, %25 : vector<256x256xf32>
    %27 = math.exp %26 : vector<256x256xf32>
    %cst_17 = arith.constant dense<0.000000e+00> : vector<256xf32>
    %28 = vector.multi_reduction <add>, %27, %cst_17 [1] : vector<256x256xf32> to vector<256xf32>
    %29 = vector.shape_cast %28 : vector<256xf32> to vector<256x1xf32>
    %30 = arith.truncf %27 : vector<256x256xf32> to vector<256x256xbf16>
    %cst_18 = arith.constant dense<0.000000e+00> : vector<256x8xf32>
    %31 = tpu.matmul %30, %21, %cst_18 {dimension_numbers = #tpu.dot_dimension_numbers<[1], [0], [0], [1], [0, 0, 1, 1], [], []>} : vector<256x256xbf16>, vector<256x8xbf16>, vector<256x8xf32> -> vector<256x8xf32>
    %32 = tpu.reciprocal %29 {approx = true} : vector<256x1xf32> -> vector<256x1xf32>
    %33 = vector.broadcast %32 : vector<256x1xf32> to vector<256x8xf32>
    %34 = arith.mulf %31, %33 : vector<256x8xf32>
    %35 = arith.truncf %34 : vector<256x8xf32> to vector<256x8xbf16>
    %c0_19 = arith.constant 0 : index
    %c0_20 = arith.constant 0 : index
    %c0_21 = arith.constant 0 : index
    %36 = vector.load %arg9[%c0_19, %c0_20, %c0_21] : memref<4x8x32xbf16, #tpu.memory_space<vmem>>, vector<1x8x32xbf16>
    %37 = vector.shape_cast %36 : vector<1x8x32xbf16> to vector<8x32xbf16>
    %cst_22 = arith.constant dense<0.000000e+00> : vector<256x32xf32>
    %38 = tpu.matmul %35, %37, %cst_22 {dimension_numbers = #tpu.dot_dimension_numbers<[1], [0], [0], [1], [0, 0, 1, 1], [], []>} : vector<256x8xbf16>, vector<8x32xbf16>, vector<256x32xf32> -> vector<256x32xf32>
    %39 = arith.addf %9, %38 : vector<256x32xf32>
    %c1 = arith.constant 1 : index
    %c0_23 = arith.constant 0 : index
    %c0_24 = arith.constant 0 : index
    %40 = vector.load %arg3[%c1, %c0_23, %c0_24] : memref<4x32x8xbf16, #tpu.memory_space<vmem>>, vector<1x32x8xbf16>
    %41 = vector.shape_cast %40 : vector<1x32x8xbf16> to vector<32x8xbf16>
    %cst_25 = arith.constant dense<0.000000e+00> : vector<256x8xf32>
    %42 = tpu.matmul %8, %41, %cst_25 {dimension_numbers = #tpu.dot_dimension_numbers<[1], [0], [0], [1], [0, 0, 1, 1], [], []>} : vector<256x32xbf16>, vector<32x8xbf16>, vector<256x8xf32> -> vector<256x8xf32>
    %c1_26 = arith.constant 1 : index
    %c0_27 = arith.constant 0 : index
    %c0_28 = arith.constant 0 : index
    %43 = vector.load %arg4[%c1_26, %c0_27, %c0_28] : memref<4x1x8xf32, #tpu.memory_space<vmem>>, vector<1x1x8xf32>
    %44 = vector.shape_cast %43 : vector<1x1x8xf32> to vector<1x8xf32>
    %45 = vector.broadcast %44 : vector<1x8xf32> to vector<256x8xf32>
    %46 = arith.addf %42, %45 : vector<256x8xf32>
    %47 = arith.truncf %46 : vector<256x8xf32> to vector<256x8xbf16>
    %c1_29 = arith.constant 1 : index
    %c0_30 = arith.constant 0 : index
    %c0_31 = arith.constant 0 : index
    %48 = vector.load %arg12[%c1_29, %c0_30, %c0_31] : memref<4x256x8xbf16, #tpu.memory_space<vmem>>, vector<1x256x8xbf16>
    %49 = vector.shape_cast %48 : vector<1x256x8xbf16> to vector<256x8xbf16>
    %c1_32 = arith.constant 1 : index
    %c0_33 = arith.constant 0 : index
    %c0_34 = arith.constant 0 : index
    %50 = vector.load %arg13[%c1_32, %c0_33, %c0_34] : memref<4x256x8xbf16, #tpu.memory_space<vmem>>, vector<1x256x8xbf16>
    %51 = vector.shape_cast %50 : vector<1x256x8xbf16> to vector<256x8xbf16>
    %cst_35 = arith.constant dense<0.000000e+00> : vector<256x256xf32>
    %52 = tpu.matmul %47, %49, %cst_35 {dimension_numbers = #tpu.dot_dimension_numbers<[1], [1], [0], [0], [0, 0, 1, 0], [], []>} : vector<256x8xbf16>, vector<256x8xbf16>, vector<256x256xf32> -> vector<256x256xf32>
    %cst_36 = arith.constant dense<0xFF800000> : vector<256xf32>
    %53 = vector.multi_reduction <maximumf>, %52, %cst_36 [1] : vector<256x256xf32> to vector<256xf32>
    %54 = vector.shape_cast %53 : vector<256xf32> to vector<256x1xf32>
    %55 = vector.broadcast %54 : vector<256x1xf32> to vector<256x256xf32>
    %56 = arith.subf %52, %55 : vector<256x256xf32>
    %57 = math.exp %56 : vector<256x256xf32>
    %cst_37 = arith.constant dense<0.000000e+00> : vector<256xf32>
    %58 = vector.multi_reduction <add>, %57, %cst_37 [1] : vector<256x256xf32> to vector<256xf32>
    %59 = vector.shape_cast %58 : vector<256xf32> to vector<256x1xf32>
    %60 = arith.truncf %57 : vector<256x256xf32> to vector<256x256xbf16>
    %cst_38 = arith.constant dense<0.000000e+00> : vector<256x8xf32>
    %61 = tpu.matmul %60, %51, %cst_38 {dimension_numbers = #tpu.dot_dimension_numbers<[1], [0], [0], [1], [0, 0, 1, 1], [], []>} : vector<256x256xbf16>, vector<256x8xbf16>, vector<256x8xf32> -> vector<256x8xf32>
    %62 = tpu.reciprocal %59 {approx = true} : vector<256x1xf32> -> vector<256x1xf32>
    %63 = vector.broadcast %62 : vector<256x1xf32> to vector<256x8xf32>
    %64 = arith.mulf %61, %63 : vector<256x8xf32>
    %65 = arith.truncf %64 : vector<256x8xf32> to vector<256x8xbf16>
    %c1_39 = arith.constant 1 : index
    %c0_40 = arith.constant 0 : index
    %c0_41 = arith.constant 0 : index
    %66 = vector.load %arg9[%c1_39, %c0_40, %c0_41] : memref<4x8x32xbf16, #tpu.memory_space<vmem>>, vector<1x8x32xbf16>
    %67 = vector.shape_cast %66 : vector<1x8x32xbf16> to vector<8x32xbf16>
    %cst_42 = arith.constant dense<0.000000e+00> : vector<256x32xf32>
    %68 = tpu.matmul %65, %67, %cst_42 {dimension_numbers = #tpu.dot_dimension_numbers<[1], [0], [0], [1], [0, 0, 1, 1], [], []>} : vector<256x8xbf16>, vector<8x32xbf16>, vector<256x32xf32> -> vector<256x32xf32>
    %69 = arith.addf %39, %68 : vector<256x32xf32>
    %c2 = arith.constant 2 : index
    %c0_43 = arith.constant 0 : index
    %c0_44 = arith.constant 0 : index
    %70 = vector.load %arg3[%c2, %c0_43, %c0_44] : memref<4x32x8xbf16, #tpu.memory_space<vmem>>, vector<1x32x8xbf16>
    %71 = vector.shape_cast %70 : vector<1x32x8xbf16> to vector<32x8xbf16>
    %cst_45 = arith.constant dense<0.000000e+00> : vector<256x8xf32>
    %72 = tpu.matmul %8, %71, %cst_45 {dimension_numbers = #tpu.dot_dimension_numbers<[1], [0], [0], [1], [0, 0, 1, 1], [], []>} : vector<256x32xbf16>, vector<32x8xbf16>, vector<256x8xf32> -> vector<256x8xf32>
    %c2_46 = arith.constant 2 : index
    %c0_47 = arith.constant 0 : index
    %c0_48 = arith.constant 0 : index
    %73 = vector.load %arg4[%c2_46, %c0_47, %c0_48] : memref<4x1x8xf32, #tpu.memory_space<vmem>>, vector<1x1x8xf32>
    %74 = vector.shape_cast %73 : vector<1x1x8xf32> to vector<1x8xf32>
    %75 = vector.broadcast %74 : vector<1x8xf32> to vector<256x8xf32>
    %76 = arith.addf %72, %75 : vector<256x8xf32>
    %77 = arith.truncf %76 : vector<256x8xf32> to vector<256x8xbf16>
    %c2_49 = arith.constant 2 : index
    %c0_50 = arith.constant 0 : index
    %c0_51 = arith.constant 0 : index
    %78 = vector.load %arg12[%c2_49, %c0_50, %c0_51] : memref<4x256x8xbf16, #tpu.memory_space<vmem>>, vector<1x256x8xbf16>
    %79 = vector.shape_cast %78 : vector<1x256x8xbf16> to vector<256x8xbf16>
    %c2_52 = arith.constant 2 : index
    %c0_53 = arith.constant 0 : index
    %c0_54 = arith.constant 0 : index
    %80 = vector.load %arg13[%c2_52, %c0_53, %c0_54] : memref<4x256x8xbf16, #tpu.memory_space<vmem>>, vector<1x256x8xbf16>
    %81 = vector.shape_cast %80 : vector<1x256x8xbf16> to vector<256x8xbf16>
    %cst_55 = arith.constant dense<0.000000e+00> : vector<256x256xf32>
    %82 = tpu.matmul %77, %79, %cst_55 {dimension_numbers = #tpu.dot_dimension_numbers<[1], [1], [0], [0], [0, 0, 1, 0], [], []>} : vector<256x8xbf16>, vector<256x8xbf16>, vector<256x256xf32> -> vector<256x256xf32>
    %cst_56 = arith.constant dense<0xFF800000> : vector<256xf32>
    %83 = vector.multi_reduction <maximumf>, %82, %cst_56 [1] : vector<256x256xf32> to vector<256xf32>
    %84 = vector.shape_cast %83 : vector<256xf32> to vector<256x1xf32>
    %85 = vector.broadcast %84 : vector<256x1xf32> to vector<256x256xf32>
    %86 = arith.subf %82, %85 : vector<256x256xf32>
    %87 = math.exp %86 : vector<256x256xf32>
    %cst_57 = arith.constant dense<0.000000e+00> : vector<256xf32>
    %88 = vector.multi_reduction <add>, %87, %cst_57 [1] : vector<256x256xf32> to vector<256xf32>
    %89 = vector.shape_cast %88 : vector<256xf32> to vector<256x1xf32>
    %90 = arith.truncf %87 : vector<256x256xf32> to vector<256x256xbf16>
    %cst_58 = arith.constant dense<0.000000e+00> : vector<256x8xf32>
    %91 = tpu.matmul %90, %81, %cst_58 {dimension_numbers = #tpu.dot_dimension_numbers<[1], [0], [0], [1], [0, 0, 1, 1], [], []>} : vector<256x256xbf16>, vector<256x8xbf16>, vector<256x8xf32> -> vector<256x8xf32>
    %92 = tpu.reciprocal %89 {approx = true} : vector<256x1xf32> -> vector<256x1xf32>
    %93 = vector.broadcast %92 : vector<256x1xf32> to vector<256x8xf32>
    %94 = arith.mulf %91, %93 : vector<256x8xf32>
    %95 = arith.truncf %94 : vector<256x8xf32> to vector<256x8xbf16>
    %c2_59 = arith.constant 2 : index
    %c0_60 = arith.constant 0 : index
    %c0_61 = arith.constant 0 : index
    %96 = vector.load %arg9[%c2_59, %c0_60, %c0_61] : memref<4x8x32xbf16, #tpu.memory_space<vmem>>, vector<1x8x32xbf16>
    %97 = vector.shape_cast %96 : vector<1x8x32xbf16> to vector<8x32xbf16>
    %cst_62 = arith.constant dense<0.000000e+00> : vector<256x32xf32>
    %98 = tpu.matmul %95, %97, %cst_62 {dimension_numbers = #tpu.dot_dimension_numbers<[1], [0], [0], [1], [0, 0, 1, 1], [], []>} : vector<256x8xbf16>, vector<8x32xbf16>, vector<256x32xf32> -> vector<256x32xf32>
    %99 = arith.addf %69, %98 : vector<256x32xf32>
    %c3 = arith.constant 3 : index
    %c0_63 = arith.constant 0 : index
    %c0_64 = arith.constant 0 : index
    %100 = vector.load %arg3[%c3, %c0_63, %c0_64] : memref<4x32x8xbf16, #tpu.memory_space<vmem>>, vector<1x32x8xbf16>
    %101 = vector.shape_cast %100 : vector<1x32x8xbf16> to vector<32x8xbf16>
    %cst_65 = arith.constant dense<0.000000e+00> : vector<256x8xf32>
    %102 = tpu.matmul %8, %101, %cst_65 {dimension_numbers = #tpu.dot_dimension_numbers<[1], [0], [0], [1], [0, 0, 1, 1], [], []>} : vector<256x32xbf16>, vector<32x8xbf16>, vector<256x8xf32> -> vector<256x8xf32>
    %c3_66 = arith.constant 3 : index
    %c0_67 = arith.constant 0 : index
    %c0_68 = arith.constant 0 : index
    %103 = vector.load %arg4[%c3_66, %c0_67, %c0_68] : memref<4x1x8xf32, #tpu.memory_space<vmem>>, vector<1x1x8xf32>
    %104 = vector.shape_cast %103 : vector<1x1x8xf32> to vector<1x8xf32>
    %105 = vector.broadcast %104 : vector<1x8xf32> to vector<256x8xf32>
    %106 = arith.addf %102, %105 : vector<256x8xf32>
    %107 = arith.truncf %106 : vector<256x8xf32> to vector<256x8xbf16>
    %c3_69 = arith.constant 3 : index
    %c0_70 = arith.constant 0 : index
    %c0_71 = arith.constant 0 : index
    %108 = vector.load %arg12[%c3_69, %c0_70, %c0_71] : memref<4x256x8xbf16, #tpu.memory_space<vmem>>, vector<1x256x8xbf16>
    %109 = vector.shape_cast %108 : vector<1x256x8xbf16> to vector<256x8xbf16>
    %c3_72 = arith.constant 3 : index
    %c0_73 = arith.constant 0 : index
    %c0_74 = arith.constant 0 : index
    %110 = vector.load %arg13[%c3_72, %c0_73, %c0_74] : memref<4x256x8xbf16, #tpu.memory_space<vmem>>, vector<1x256x8xbf16>
    %111 = vector.shape_cast %110 : vector<1x256x8xbf16> to vector<256x8xbf16>
    %cst_75 = arith.constant dense<0.000000e+00> : vector<256x256xf32>
    %112 = tpu.matmul %107, %109, %cst_75 {dimension_numbers = #tpu.dot_dimension_numbers<[1], [1], [0], [0], [0, 0, 1, 0], [], []>} : vector<256x8xbf16>, vector<256x8xbf16>, vector<256x256xf32> -> vector<256x256xf32>
    %cst_76 = arith.constant dense<0xFF800000> : vector<256xf32>
    %113 = vector.multi_reduction <maximumf>, %112, %cst_76 [1] : vector<256x256xf32> to vector<256xf32>
    %114 = vector.shape_cast %113 : vector<256xf32> to vector<256x1xf32>
    %115 = vector.broadcast %114 : vector<256x1xf32> to vector<256x256xf32>
    %116 = arith.subf %112, %115 : vector<256x256xf32>
    %117 = math.exp %116 : vector<256x256xf32>
    %cst_77 = arith.constant dense<0.000000e+00> : vector<256xf32>
    %118 = vector.multi_reduction <add>, %117, %cst_77 [1] : vector<256x256xf32> to vector<256xf32>
    %119 = vector.shape_cast %118 : vector<256xf32> to vector<256x1xf32>
    %120 = arith.truncf %117 : vector<256x256xf32> to vector<256x256xbf16>
    %cst_78 = arith.constant dense<0.000000e+00> : vector<256x8xf32>
    %121 = tpu.matmul %120, %111, %cst_78 {dimension_numbers = #tpu.dot_dimension_numbers<[1], [0], [0], [1], [0, 0, 1, 1], [], []>} : vector<256x256xbf16>, vector<256x8xbf16>, vector<256x8xf32> -> vector<256x8xf32>
    %122 = tpu.reciprocal %119 {approx = true} : vector<256x1xf32> -> vector<256x1xf32>
    %123 = vector.broadcast %122 : vector<256x1xf32> to vector<256x8xf32>
    %124 = arith.mulf %121, %123 : vector<256x8xf32>
    %125 = arith.truncf %124 : vector<256x8xf32> to vector<256x8xbf16>
    %c3_79 = arith.constant 3 : index
    %c0_80 = arith.constant 0 : index
    %c0_81 = arith.constant 0 : index
    %126 = vector.load %arg9[%c3_79, %c0_80, %c0_81] : memref<4x8x32xbf16, #tpu.memory_space<vmem>>, vector<1x8x32xbf16>
    %127 = vector.shape_cast %126 : vector<1x8x32xbf16> to vector<8x32xbf16>
    %cst_82 = arith.constant dense<0.000000e+00> : vector<256x32xf32>
    %128 = tpu.matmul %125, %127, %cst_82 {dimension_numbers = #tpu.dot_dimension_numbers<[1], [0], [0], [1], [0, 0, 1, 1], [], []>} : vector<256x8xbf16>, vector<8x32xbf16>, vector<256x32xf32> -> vector<256x32xf32>
    %129 = arith.addf %99, %128 : vector<256x32xf32>
    %c0_83 = arith.constant 0 : index
    %c0_84 = arith.constant 0 : index
    %130 = vector.load %arg10[%c0_83, %c0_84] : memref<1x32xf32, #tpu.memory_space<vmem>>, vector<1x32xf32>
    %131 = vector.broadcast %130 : vector<1x32xf32> to vector<256x32xf32>
    %132 = arith.addf %129, %131 : vector<256x32xf32>
    %c0_85 = arith.constant 0 : index
    %c0_86 = arith.constant 0 : index
    %c0_87 = arith.constant 0 : index
    %133 = vector.load %arg11[%c0_85, %c0_86, %c0_87] : memref<1x256x32xf32, #tpu.memory_space<vmem>>, vector<1x256x32xf32>
    %134 = vector.shape_cast %133 : vector<1x256x32xf32> to vector<256x32xf32>
    %135 = vector.shape_cast %132 : vector<256x32xf32> to vector<1x256x32xf32>
    tpu.vector_store %arg11[%c0_85, %c0_86, %c0_87], %135 {strides = array<i32>} : memref<1x256x32xf32, #tpu.memory_space<vmem>>, vector<1x256x32xf32>,
    return
  }
  func.func @transform_0(%arg0: i32, %arg1: i32) -> (i32, i32, i32) {
    %c0_i32 = arith.constant 0 : i32
    %c0_i32_0 = arith.constant 0 : i32
    %c0_i32_1 = arith.constant 0 : i32
    return %arg0, %c0_i32, %c0_i32_0 : i32, i32, i32
  }
  func.func @transform_1(%arg0: i32, %arg1: i32) -> (i32, i32, i32) {
    %c0_i32 = arith.constant 0 : i32
    %c0_i32_0 = arith.constant 0 : i32
    %c0_i32_1 = arith.constant 0 : i32
    %c0_i32_2 = arith.constant 0 : i32
    return %c0_i32, %c0_i32_0, %c0_i32_1 : i32, i32, i32
  }
  func.func @transform_2(%arg0: i32, %arg1: i32) -> (i32, i32, i32) {
    %c0_i32 = arith.constant 0 : i32
    %c0_i32_0 = arith.constant 0 : i32
    %c0_i32_1 = arith.constant 0 : i32
    %c0_i32_2 = arith.constant 0 : i32
    return %c0_i32, %c0_i32_0, %c0_i32_1 : i32, i32, i32
  }
  func.func @transform_3(%arg0: i32, %arg1: i32) -> (i32, i32, i32) {
    %c0_i32 = arith.constant 0 : i32
    %c0_i32_0 = arith.constant 0 : i32
    %c0_i32_1 = arith.constant 0 : i32
    %c0_i32_2 = arith.constant 0 : i32
    return %c0_i32, %c0_i32_0, %c0_i32_1 : i32, i32, i32
  }
  func.func @transform_4(%arg0: i32, %arg1: i32) -> (i32, i32, i32) {
    %c0_i32 = arith.constant 0 : i32
    %c0_i32_0 = arith.constant 0 : i32
    %c0_i32_1 = arith.constant 0 : i32
    %c0_i32_2 = arith.constant 0 : i32
    return %c0_i32, %c0_i32_0, %c0_i32_1 : i32, i32, i32
  }
  func.func @transform_5(%arg0: i32, %arg1: i32) -> (i32, i32, i32) {
    %c0_i32 = arith.constant 0 : i32
    %c0_i32_0 = arith.constant 0 : i32
    %c0_i32_1 = arith.constant 0 : i32
    %c0_i32_2 = arith.constant 0 : i32
    return %c0_i32, %c0_i32_0, %c0_i32_1 : i32, i32, i32
  }
  func.func @transform_6(%arg0: i32, %arg1: i32) -> (i32, i32, i32) {
    %c0_i32 = arith.constant 0 : i32
    %c0_i32_0 = arith.constant 0 : i32
    %c0_i32_1 = arith.constant 0 : i32
    %c0_i32_2 = arith.constant 0 : i32
    return %c0_i32, %c0_i32_0, %c0_i32_1 : i32, i32, i32
  }
  func.func @transform_7(%arg0: i32, %arg1: i32) -> (i32, i32, i32) {
    %c0_i32 = arith.constant 0 : i32
    %c0_i32_0 = arith.constant 0 : i32
    %c0_i32_1 = arith.constant 0 : i32
    %c0_i32_2 = arith.constant 0 : i32
    return %c0_i32, %c0_i32_0, %c0_i32_1 : i32, i32, i32
  }
  func.func @transform_8(%arg0: i32, %arg1: i32) -> (i32, i32) {
    %c0_i32 = arith.constant 0 : i32
    %c0_i32_0 = arith.constant 0 : i32
    %c0_i32_1 = arith.constant 0 : i32
    return %c0_i32, %c0_i32_0 : i32, i32
  }
  func.func @transform_9(%arg0: i32, %arg1: i32) -> (i32, i32, i32) {
    %c0_i32 = arith.constant 0 : i32
    %c0_i32_0 = arith.constant 0 : i32
    return %arg0, %arg1, %c0_i32 : i32, i32, i32
  }
}

</mosaic_0001>

<bundles_post_ra>
// kernel: tpu_custom_call.1
= control target key start
LH: loop header
LB: loop body
LE: loop exit
PB: predicated region body
PF: predicated region fallthrough
CT: control target
= control target key end

     0   :  { %s11035_s30 = smov 0   ;;  %s11037_s10 = smov 0   ;;  %s14162_s0 = inlined_call_operand.vmem [shape: f32[2,256,32], index: 0, kind: input, shape index: {}]   ;;  %s14163_s1 = inlined_call_operand.vmem [shape: bf16[4,32,8], index: 1, kind: input, shape index: {}]   ;;  %s14164_s2 = inlined_call_operand.vmem [shape: f32[4,1,8], index: 2, kind: input, shape index: {}]   ;;  %s14165_s3 = inlined_call_operand.vmem [shape: bf16[4,32,8], index: 3, kind: input, shape index: {}]   ;;  %s14166_s4 = inlined_call_operand.vmem [shape: f32[4,1,8], index: 4, kind: input, shape index: {}]   ;;  %s14167_s5 = inlined_call_operand.vmem [shape: bf16[4,32,8], index: 5, kind: input, shape index: {}]   ;;  %s14168_s6 = inlined_call_operand.vmem [shape: f32[4,1,8], index: 6, kind: input, shape index: {}]   ;;  %s14169_s7 = inlined_call_operand.vmem [shape: bf16[4,8,32], index: 7, kind: input, shape index: {}]   ;;  %s14170_s8 = inlined_call_operand.vmem [shape: f32[1,32], index: 8, kind: input, shape index: {}]   ;;  %s14171_s9 = inlined_call_operand.vmem [shape: f32[2,256,32], index: 9, kind: output, shape index: {}]  }
   0x1   :  { %s11039_s11 = smov 0  }
   0x2 LB: > { %s31_s12 = sadd.s32 1, %s10979_s10  ;;  %p8107_p0 = scmp.ge.s32.totalorder %s10983_s11, 1  ;;  %s10983_s11 = sphi %s11039_s11, %s19_s11   ;;  %s10979_s10 = sphi %s11037_s10, %s14586_s10   ;;  %s10975_s30 = sphi %s11035_s30, %s14585_s30  }
   0x3   : > { %p33_p1 = scmp.ge.s32.totalorder %s31_s12, 2  ;;  %p301_p2 = scmp.lt.s32.totalorder %s10983_s11, 3 }
   0x5   : > { %s14588_s12 = smov (%p33_p1, %s31_s12), 0  ;;  %p302_p3 = pnand %p8107_p0, %p301_p2 }
   0x7   : > { %305 = sbr.rel (%p302_p3) target bundleno = 2957 (0xb8d), region = 56 }
   0xe   : > { %v10169_v0 = vld [vmem:[%s14165_s3] sm:$0xff]   ;;  %p341_p4 = scmp.lt.s32.totalorder %s10975_s30, 1  ;;  %v10170_v1 = vld [vmem:[%s14165_s3 + $0x10] sm:$0xff]   ;;  %v10171_v2 = vld [vmem:[%s14165_s3 + $0x8] sm:$0xff]   ;;  %vm432_vm0 = vcmask 261120   ;;  %vm658_vm1 = vcmask 64512  }
   0xf   : > { %9445 = vmatprep.subr.bf16.mxu1 %v10169_v0  ;;  %9517 = vmatprep.subr.bf16.mxu0 %v10170_v1  ;;  %v10172_v3 = vld [vmem:[%s14165_s3 + $0x18] sm:$0xff]   ;;  %v10173_v4 = vld [vmem:[%s14165_s3 + $0x20] sm:$0xff]   ;;  %v10174_v14 = vld [vmem:[%s14165_s3 + $0x28] sm:$0xff]   ;;  %vm4716_vm2 = vcmask 1043456  }
  0x10   : > { %s14590_s30 = smov (!%p341_p4, %s10975_s30), 1  ;;  %9446 = vmatpush3.bf16.msra.mxu1 %v10169_v0  ;;  %9518 = vmatpush3.bf16.msra.mxu0 %v10170_v1  ;;  %v10175_v23 = vld [vmem:[%s14167_s5] sm:$0xff]   ;;  %v10176_v25 = vld [vmem:[%s14167_s5 + $0x8] sm:$0xff]   ;;  %v11131_v26 = vld [vmem:[%s14165_s3 + $0x30] sm:$0xff]  }
  0x11   : > { %9447 = vmatprep.subr.bf16.mxu1 %v10171_v2  ;;  %s8519_s21 = sshll.u32 %s14590_s30, 8  ;;  %9519 = vmatprep.subr.bf16.mxu0 %v10172_v3  ;;  %v10180_v34 = vld [vmem:[%s14167_s5 + $0x10] sm:$0xff]   ;;  %v10178_v58 = vld [vmem:[%s14165_s3 + $0x38] sm:$0xff]   ;;  %v10179_v60 = vld [vmem:[%s14163_s1] sm:$0xff]  }
  0x12   : > { %s11073_s24 = scalar_lea.vmem %s14162_s0, %s8519_s21  ;;  %v10181_v59 = vld [vmem:[%s14167_s5 + $0x18] sm:$0xff]   ;;  %v10183_v61 = vld [vmem:[%s14167_s5 + $0x20] sm:$0xff]   ;;  %v10182_v62 = vld [vmem:[%s14163_s1 + $0x8] sm:$0xff]   ;;  %s14055_s20 = scalar_lea.vmem %s14171_s9, %s8519_s21 }
  0x13   : > { %v361_v5 = vld [vmem:[%s11073_s24] sm:$0xff]  ;;  %v362_v6 = vld [vmem:[%s11073_s24 + $0x8] sm:$0xff]  ;;  %v363_v7 = vld [vmem:[%s11073_s24 + $0x10] sm:$0xff] }
  0x14   : > { %9448 = vmatpush3.bf16.msra.mxu1 %v10171_v2  ;;  %v11081_v8 = vpack.c.bf16 %v362_v6, %v361_v5  ;;  %v364_v9 = vld [vmem:[%s11073_s24 + $0x18] sm:$0xff]  ;;  %v365_v10 = vld [vmem:[%s11073_s24 + $0x20] sm:$0xff]  ;;  %v366_v11 = vld [vmem:[%s11073_s24 + $0x28] sm:$0xff]  ;;  %9520 = vmatpush3.bf16.msra.mxu0 %v10172_v3 }
  0x15   : > { %v11086_v12 = vpack.c.bf16 %v364_v9, %v363_v7  ;;  %v11088_v13 = vpack.c.bf16 %v366_v11, %v365_v10  ;;  %9589 = vmatprep.subr.bf16.mxu0 %v10173_v4  ;;  %v367_v15 = vld [vmem:[%s11073_s24 + $0x30] sm:$0xff]  ;;  %v368_v16 = vld [vmem:[%s11073_s24 + $0x38] sm:$0xff]  ;;  %v369_v17 = vld [vmem:[%s11073_s24 + $0x40] sm:$0xff]  ;;  %9481 = vmatprep.subr.bf16.mxu1 %v10175_v23 }
  0x16   : > { %14272 = vst [vmem:[#allocation4_spill] sm:$0xff] %v11081_v8  ;;  %9449 = vmatprep.mubr.msk.bf16.mxu1 %vm432_vm0, %v11081_v8  ;;  %9521 = vmatprep.mubr.msk.bf16.mxu0 %vm432_vm0, %v11081_v8  ;;  %v370_v18 = vld [vmem:[%s11073_s24 + $0x48] sm:$0xff]  ;;  %v11109_v19 = vpack.c.bf16 %v368_v16, %v367_v15  ;;  %v371_v21 = vld [vmem:[%s11073_s24 + $0x50] sm:$0xff]  ;;  %v372_v22 = vld [vmem:[%s11073_s24 + $0x58] sm:$0xff] }
  0x17   : > { %14273 = vst [vmem:[#allocation5_spill] sm:$0xff] %v11086_v12  ;;  %14274 = vst [vmem:[#allocation6_spill] sm:$0xff] %v11088_v13  ;;  %9450 = vmatmul.mubr.msk.bf16.vlgmr.msra.gmra.mrb[0].mxu1 %vm432_vm0, %v11086_v12  ;;  %9522 = vmatmul.mubr.msk.bf16.vlgmr.msra.gmra.mrb[0].mxu0 %vm432_vm0, %v11086_v12  ;;  %v11111_v20 = vpack.c.bf16 %v370_v18, %v369_v17  ;;  %v373_v24 = vld [vmem:[%s11073_s24 + $0x60] sm:$0xff]  ;;  %v374_v27 = vld [vmem:[%s11073_s24 + $0x68] sm:$0xff]  ;;  %v11137_v28 = vpack.c.bf16 %v372_v22, %v371_v21 }
  0x18   : > { %9453 = vmatprep.mubr.msk.bf16.mxu1 %vm432_vm0, %v11088_v13  ;;  %9590 = vmatpush3.bf16.msra.mxu0 %v10173_v4  ;;  %14275 = vst [vmem:[#allocation7_spill] sm:$0xff] %v11109_v19  ;;  %v11139_v29 = vpack.c.bf16 %v374_v27, %v373_v24  ;;  %v375_v30 = vld [vmem:[%s11073_s24 + $0x70] sm:$0xff]  ;;  %v376_v31 = vld [vmem:[%s11073_s24 + $0x78] sm:$0xff]  ;;  %v377_v32 = vld [vmem:[%s11073_s24 + $0x80] sm:$0xff] }
  0x19   : > { %9525 = vmatprep.mubr.msk.bf16.mxu0 %vm432_vm0, %v11088_v13  ;;  %9591 = vmatprep.subr.bf16.mxu0 %v10174_v14  ;;  %14276 = vst [vmem:[#allocation8_spill] sm:$0xff] %v11111_v20  ;;  %14277 = vst [vmem:[#allocation9_spill] sm:$0xff] %v11137_v28  ;;  %v378_v33 = vld [vmem:[%s11073_s24 + $0x88] sm:$0xff]  ;;  %v11156_v35 = vpack.c.bf16 %v376_v31, %v375_v30  ;;  %v379_v37 = vld [vmem:[%s11073_s24 + $0x90] sm:$0xff] }
  0x1a   : > { %9482 = vmatpush3.bf16.msra.mxu1 %v10175_v23  ;;  %14278 = vst [vmem:[#allocation10_spill] sm:$0xff] %v11139_v29  ;;  %v11158_v36 = vpack.c.bf16 %v378_v33, %v377_v32  ;;  %v380_v38 = vld [vmem:[%s11073_s24 + $0x98] sm:$0xff]  ;;  %v381_v39 = vld [vmem:[%s11073_s24 + $0xa0] sm:$0xff]  ;;  %v382_v40 = vld [vmem:[%s11073_s24 + $0xa8] sm:$0xff] }
  0x1b   : > { %9483 = vmatprep.subr.bf16.mxu1 %v10176_v25  ;;  %14279 = vst [vmem:[#allocation11_spill] sm:$0xff] %v11156_v35  ;;  %v11172_v41 = vpack.c.bf16 %v380_v38, %v379_v37  ;;  %v11174_v42 = vpack.c.bf16 %v382_v40, %v381_v39  ;;  %v383_v43 = vld [vmem:[%s11073_s24 + $0xb0] sm:$0xff]  ;;  %v384_v44 = vld [vmem:[%s11073_s24 + $0xb8] sm:$0xff]  ;;  %v385_v45 = vld [vmem:[%s11073_s24 + $0xc0] sm:$0xff] }
  0x1c   : > { %9592 = vmatpush3.bf16.msra.mxu0 %v10174_v14  ;;  %14280 = vst [vmem:[#allocation12_spill] sm:$0xff] %v11158_v36  ;;  %v386_v46 = vld [vmem:[%s11073_s24 + $0xc8] sm:$0xff]  ;;  %v11188_v47 = vpack.c.bf16 %v384_v44, %v383_v43  ;;  %v387_v49 = vld [vmem:[%s11073_s24 + $0xd0] sm:$0xff]  ;;  %v388_v50 = vld [vmem:[%s11073_s24 + $0xd8] sm:$0xff] }
  0x1d   : > { %9661 = vmatprep.subr.bf16.mxu0 %v11131_v26  ;;  %14281 = vst [vmem:[#allocation13_spill] sm:$0xff] %v11172_v41  ;;  %14282 = vst [vmem:[#allocation14_spill] sm:$0xff] %v11174_v42  ;;  %v11190_v48 = vpack.c.bf16 %v386_v46, %v385_v45  ;;  %v389_v51 = vld [vmem:[%s11073_s24 + $0xe0] sm:$0xff]  ;;  %v390_v52 = vld [vmem:[%s11073_s24 + $0xe8] sm:$0xff]  ;;  %v11204_v53 = vpack.c.bf16 %v388_v50, %v387_v49 }
  0x1e   : > { %9484 = vmatpush3.bf16.msra.mxu1 %v10176_v25  ;;  %14283 = vst [vmem:[#allocation15_spill] sm:$0xff] %v11188_v47  ;;  %v11206_v54 = vpack.c.bf16 %v390_v52, %v389_v51  ;;  %v391_v55 = vld [vmem:[%s11073_s24 + $0xf0] sm:$0xff]  ;;  %v392_v56 = vld [vmem:[%s11073_s24 + $0xf8] sm:$0xff]  ;;  %v10184_v63 = vld [vmem:[%s14167_s5 + $0x28] sm:$0xff]  }
  0x1f   : > { %9454 = vmatmul.mubr.msk.bf16.gmra.mrb[4].mxu1 %vm432_vm0, %v11109_v19  ;;  %9526 = vmatmul.mubr.msk.bf16.gmra.mrb[4].mxu0 %vm432_vm0, %v11109_v19  ;;  %14284 = vst [vmem:[#allocation16_spill] sm:$0xff] %v11190_v48  ;;  %14285 = vst [vmem:[#allocation17_spill] sm:$0xff] %v11204_v53  ;;  %v11218_v57 = vpack.c.bf16 %v392_v56, %v391_v55  ;;  %v10185_v0 = vld [vmem:[%s14167_s5 + $0x30] sm:$0xff]   ;;  %v10186_v1 = vld [vmem:[%s14167_s5 + $0x38] sm:$0xff]  }
  0x20   : > { %9457 = vmatprep.mubr.msk.bf16.mxu1 %vm432_vm0, %v11111_v20  ;;  %9529 = vmatprep.mubr.msk.bf16.mxu0 %vm432_vm0, %v11111_v20  ;;  %14286 = vst [vmem:[#allocation18_spill] sm:$0xff] %v11206_v54  ;;  %v11408_v2 = vld [vmem:[%s14166_s4] ss:$0 sm:$0xff]  ;;  %v11413_v5 = vld [vmem:[%s14166_s4 + $0x1] ss:$0 sm:$0xff] }
  0x21   : > { %9553 = vmatprep.subr.bf16.mxu1 %v10180_v34  ;;  %14287 = vst [vmem:[#allocation19_spill] sm:$0xff] %v11218_v57 }
  0x27   : > { %9458 = vmatmul.mubr.msk.bf16.gmra.mrb[8].mxu1 %vm432_vm0, %v11137_v28  ;;  %9530 = vmatmul.mubr.msk.bf16.gmra.mrb[8].mxu0 %vm432_vm0, %v11137_v28 }
  0x28   : > { %9461 = vmatprep.mubr.msk.bf16.mxu1 %vm432_vm0, %v11139_v29  ;;  %9533 = vmatprep.mubr.msk.bf16.mxu0 %vm432_vm0, %v11139_v29 }
  0x2f   : > { %9462 = vmatmul.mubr.msk.bf16.gmra.mrb[12].mxu1 %vm432_vm0, %v11156_v35  ;;  %9534 = vmatmul.mubr.msk.bf16.gmra.mrb[12].mxu0 %vm432_vm0, %v11156_v35 }
  0x30   : > { %9465 = vmatprep.mubr.msk.bf16.mxu1 %vm432_vm0, %v11158_v36  ;;  %9537 = vmatprep.mubr.msk.bf16.mxu0 %vm432_vm0, %v11158_v36 }
  0x37   : > { %9466 = vmatmul.mubr.msk.bf16.gmra.mrb[16].mxu1 %vm432_vm0, %v11172_v41  ;;  %9538 = vmatmul.mubr.msk.bf16.gmra.mrb[16].mxu0 %vm432_vm0, %v11172_v41 }
  0x38   : > { %9469 = vmatprep.mubr.msk.bf16.mxu1 %vm432_vm0, %v11174_v42  ;;  %9541 = vmatprep.mubr.msk.bf16.mxu0 %vm432_vm0, %v11174_v42 }
  0x3f   : > { %9470 = vmatmul.mubr.msk.bf16.gmra.mrb[20].mxu1 %vm432_vm0, %v11188_v47  ;;  %9542 = vmatmul.mubr.msk.bf16.gmra.mrb[20].mxu0 %vm432_vm0, %v11188_v47 }
  0x40   : > { %9473 = vmatprep.mubr.msk.bf16.mxu1 %vm432_vm0, %v11190_v48  ;;  %9545 = vmatprep.mubr.msk.bf16.mxu0 %vm432_vm0, %v11190_v48 }
  0x47   : > { %9474 = vmatmul.mubr.msk.bf16.gmra.mrb[24].mxu1 %vm432_vm0, %v11204_v53  ;;  %9546 = vmatmul.mubr.msk.bf16.gmra.mrb[24].mxu0 %vm432_vm0, %v11204_v53 }
  0x48   : > { %9477 = vmatprep.mubr.msk.bf16.mxu1 %vm432_vm0, %v11206_v54  ;;  %9549 = vmatprep.mubr.msk.bf16.mxu0 %vm432_vm0, %v11206_v54 }
  0x4f   : > { %9478 = vmatmul.mubr.msk.bf16.gmra.mrb[28].mxu1 %vm432_vm0, %v11218_v57  ;;  %9550 = vmatmul.mubr.msk.bf16.gmra.mrb[28].mxu0 %vm432_vm0, %v11218_v57 }
  0x50   : > { %9485 = vmatprep.mubr.msk.bf16.mxu1 %vm432_vm0, %v11081_v8  ;;  %9593 = vmatprep.mubr.msk.bf16.mxu0 %vm432_vm0, %v11081_v8 }
  0x57   : > { %9486 = vmatmul.mubr.msk.bf16.vlgmr.msra.gmra.mrb[32].mxu1 %vm432_vm0, %v11086_v12  ;;  %9594 = vmatmul.mubr.msk.bf16.vlgmr.msra.gmra.mrb[32].mxu0 %vm432_vm0, %v11086_v12 }
  0x58   : > { %9489 = vmatprep.mubr.msk.bf16.mxu1 %vm432_vm0, %v11088_v13  ;;  %9662 = vmatpush3.bf16.msra.mxu0 %v11131_v26 }
  0x59   : > { %9597 = vmatprep.mubr.msk.bf16.mxu0 %vm432_vm0, %v11088_v13  ;;  %9663 = vmatprep.subr.bf16.mxu0 %v10178_v58 }
  0x5a   : > { %9554 = vmatpush3.bf16.msra.mxu1 %v10180_v34 }
  0x5b   : > { %9555 = vmatprep.subr.bf16.mxu1 %v10181_v59 }
  0x5c   : > { %9664 = vmatpush3.bf16.msra.mxu0 %v10178_v58 }
  0x5d   : > { %9733 = vmatprep.subr.bf16.mxu0 %v10179_v60 }
  0x5e   : > { %9556 = vmatpush3.bf16.msra.mxu1 %v10181_v59 }
  0x5f   : > { %9490 = vmatmul.mubr.msk.bf16.gmra.mrb[36].mxu1 %vm432_vm0, %v11109_v19  ;;  %9598 = vmatmul.mubr.msk.bf16.gmra.mrb[36].mxu0 %vm432_vm0, %v11109_v19 }
  0x60   : > { %9493 = vmatprep.mubr.msk.bf16.mxu1 %vm432_vm0, %v11111_v20  ;;  %9601 = vmatprep.mubr.msk.bf16.mxu0 %vm432_vm0, %v11111_v20 }
  0x61   : > { %9625 = vmatprep.subr.bf16.mxu1 %v10183_v61 }
  0x67   : > { %9494 = vmatmul.mubr.msk.bf16.gmra.mrb[40].mxu1 %vm432_vm0, %v11137_v28  ;;  %9602 = vmatmul.mubr.msk.bf16.gmra.mrb[40].mxu0 %vm432_vm0, %v11137_v28 }
  0x68   : > { %9497 = vmatprep.mubr.msk.bf16.mxu1 %vm432_vm0, %v11139_v29  ;;  %9605 = vmatprep.mubr.msk.bf16.mxu0 %vm432_vm0, %v11139_v29 }
  0x6f   : > { %9498 = vmatmul.mubr.msk.bf16.gmra.mrb[44].mxu1 %vm432_vm0, %v11156_v35  ;;  %9606 = vmatmul.mubr.msk.bf16.gmra.mrb[44].mxu0 %vm432_vm0, %v11156_v35 }
  0x70   : > { %9501 = vmatprep.mubr.msk.bf16.mxu1 %vm432_vm0, %v11158_v36  ;;  %9609 = vmatprep.mubr.msk.bf16.mxu0 %vm432_vm0, %v11158_v36 }
  0x77   : > { %9502 = vmatmul.mubr.msk.bf16.gmra.mrb[48].mxu1 %vm432_vm0, %v11172_v41  ;;  %9610 = vmatmul.mubr.msk.bf16.gmra.mrb[48].mxu0 %vm432_vm0, %v11172_v41 }
  0x78   : > { %9505 = vmatprep.mubr.msk.bf16.mxu1 %vm432_vm0, %v11174_v42  ;;  %9613 = vmatprep.mubr.msk.bf16.mxu0 %vm432_vm0, %v11174_v42 }
  0x7f   : > { %9506 = vmatmul.mubr.msk.bf16.gmra.mrb[52].mxu1 %vm432_vm0, %v11188_v47  ;;  %9614 = vmatmul.mubr.msk.bf16.gmra.mrb[52].mxu0 %vm432_vm0, %v11188_v47 }
  0x80   : > { %9509 = vmatprep.mubr.msk.bf16.mxu1 %vm432_vm0, %v11190_v48  ;;  %9617 = vmatprep.mubr.msk.bf16.mxu0 %vm432_vm0, %v11190_v48 }
  0x87   : > { %9510 = vmatmul.mubr.msk.bf16.gmra.mrb[56].mxu1 %vm432_vm0, %v11204_v53  ;;  %9618 = vmatmul.mubr.msk.bf16.gmra.mrb[56].mxu0 %vm432_vm0, %v11204_v53 }
  0x88   : > { %9513 = vmatprep.mubr.msk.bf16.mxu1 %vm432_vm0, %v11206_v54  ;;  %9621 = vmatprep.mubr.msk.bf16.mxu0 %vm432_vm0, %v11206_v54 }
  0x8f   : > { %9514 = vmatmul.mubr.msk.bf16.gmra.mrb[60].mxu1 %vm432_vm0, %v11218_v57  ;;  %9622 = vmatmul.mubr.msk.bf16.gmra.mrb[60].mxu0 %vm432_vm0, %v11218_v57 }
  0x90   : > { %9557 = vmatprep.mubr.msk.bf16.mxu1 %vm432_vm0, %v11081_v8  ;;  %9665 = vmatprep.mubr.msk.bf16.mxu0 %vm432_vm0, %v11081_v8 }
  0x97   : > { %9558 = vmatmul.mubr.msk.bf16.vlgmr.msra.gmra.mrb[64].mxu1 %vm432_vm0, %v11086_v12  ;;  %9666 = vmatmul.mubr.msk.bf16.vlgmr.msra.gmra.mrb[64].mxu0 %vm432_vm0, %v11086_v12 }
  0x98   : > { %9561 = vmatprep.mubr.msk.bf16.mxu1 %vm432_vm0, %v11088_v13  ;;  %9734 = vmatpush3.bf16.msra.mxu0 %v10179_v60 }
  0x99   : > { %9669 = vmatprep.mubr.msk.bf16.mxu0 %vm432_vm0, %v11088_v13  ;;  %9735 = vmatprep.subr.bf16.mxu0 %v10182_v62 }
  0x9a   : > { %9626 = vmatpush3.bf16.msra.mxu1 %v10183_v61 }
  0x9b   : > { %9627 = vmatprep.subr.bf16.mxu1 %v10184_v63 }
  0x9c   : > { %9736 = vmatpush3.bf16.msra.mxu0 %v10182_v62 }
  0x9e   : > { %9628 = vmatpush3.bf16.msra.mxu1 %v10184_v63 }
  0x9f   : > { %9562 = vmatmul.mubr.msk.bf16.gmra.mrb[68].mxu1 %vm432_vm0, %v11109_v19  ;;  %9670 = vmatmul.mubr.msk.bf16.gmra.mrb[68].mxu0 %vm432_vm0, %v11109_v19 }
  0xa0   : > { %9565 = vmatprep.mubr.msk.bf16.mxu1 %vm432_vm0, %v11111_v20  ;;  %9673 = vmatprep.mubr.msk.bf16.mxu0 %vm432_vm0, %v11111_v20 }
  0xa1   : > { %9697 = vmatprep.subr.bf16.mxu1 %v10185_v0 }
  0xa7   : > { %9566 = vmatmul.mubr.msk.bf16.gmra.mrb[72].mxu1 %vm432_vm0, %v11137_v28  ;;  %9674 = vmatmul.mubr.msk.bf16.gmra.mrb[72].mxu0 %vm432_vm0, %v11137_v28 }
  0xa8   : > { %9569 = vmatprep.mubr.msk.bf16.mxu1 %vm432_vm0, %v11139_v29  ;;  %9677 = vmatprep.mubr.msk.bf16.mxu0 %vm432_vm0, %v11139_v29 }
  0xaf   : > { %9570 = vmatmul.mubr.msk.bf16.gmra.mrb[76].mxu1 %vm432_vm0, %v11156_v35  ;;  %9678 = vmatmul.mubr.msk.bf16.gmra.mrb[76].mxu0 %vm432_vm0, %v11156_v35 }
  0xb0   : > { %9573 = vmatprep.mubr.msk.bf16.mxu1 %vm432_vm0, %v11158_v36  ;;  %9681 = vmatprep.mubr.msk.bf16.mxu0 %vm432_vm0, %v11158_v36 }
  0xb7   : > { %9574 = vmatmul.mubr.msk.bf16.gmra.mrb[80].mxu1 %vm432_vm0, %v11172_v41  ;;  %9682 = vmatmul.mubr.msk.bf16.gmra.mrb[80].mxu0 %vm432_vm0, %v11172_v41 }
  0xb8   : > { %9577 = vmatprep.mubr.msk.bf16.mxu1 %vm432_vm0, %v11174_v42  ;;  %9685 = vmatprep.mubr.msk.bf16.mxu0 %vm432_vm0, %v11174_v42 }
  0xbf   : > { %9578 = vmatmul.mubr.msk.bf16.gmra.mrb[84].mxu1 %vm432_vm0, %v11188_v47  ;;  %9686 = vmatmul.mubr.msk.bf16.gmra.mrb[84].mxu0 %vm432_vm0, %v11188_v47 }
  0xc0   : > { %9581 = vmatprep.mubr.msk.bf16.mxu1 %vm432_vm0, %v11190_v48  ;;  %9689 = vmatprep.mubr.msk.bf16.mxu0 %vm432_vm0, %v11190_v48 }
  0xc7   : > { %9582 = vmatmul.mubr.msk.bf16.gmra.mrb[88].mxu1 %vm432_vm0, %v11204_v53  ;;  %9690 = vmatmul.mubr.msk.bf16.gmra.mrb[88].mxu0 %vm432_vm0, %v11204_v53 }
  0xc8   : > { %9585 = vmatprep.mubr.msk.bf16.mxu1 %vm432_vm0, %v11206_v54  ;;  %9693 = vmatprep.mubr.msk.bf16.mxu0 %vm432_vm0, %v11206_v54 }
  0xcf   : > { %9586 = vmatmul.mubr.msk.bf16.gmra.mrb[92].mxu1 %vm432_vm0, %v11218_v57  ;;  %9694 = vmatmul.mubr.msk.bf16.gmra.mrb[92].mxu0 %vm432_vm0, %v11218_v57 }
  0xd0   : > { %9629 = vmatprep.mubr.msk.bf16.mxu1 %vm432_vm0, %v11081_v8  ;;  %9737 = vmatprep.mubr.msk.bf16.mxu0 %vm432_vm0, %v11081_v8 }
  0xd7   : > { %9630 = vmatmul.mubr.msk.bf16.vlgmr.msra.gmra.mrb[96].mxu1 %vm432_vm0, %v11086_v12  ;;  %9738 = vmatmul.mubr.msk.bf16.vlgmr.msra.gmra.mrb[96].mxu0 %vm432_vm0, %v11086_v12 }
  0xd8   : > { %9633 = vmatprep.mubr.msk.bf16.mxu1 %vm432_vm0, %v11088_v13  ;;  %9741 = vmatprep.mubr.msk.bf16.mxu0 %vm432_vm0, %v11088_v13 }
  0xd9   : > { %9698 = vmatpush3.bf16.msra.mxu1 %v10185_v0 }
  0xda   : > { %9699 = vmatprep.subr.bf16.mxu1 %v10186_v1 }
  0xdd   : > { %9700 = vmatpush3.bf16.msra.mxu1 %v10186_v1 }
  0xdf   : > { %9634 = vmatmul.mubr.msk.bf16.gmra.mrb[100].mxu1 %vm432_vm0, %v11109_v19  ;;  %9742 = vmatmul.mubr.msk.bf16.gmra.mrb[100].mxu0 %vm432_vm0, %v11109_v19 }
  0xe0   : > { %9637 = vmatprep.mubr.msk.bf16.mxu1 %vm432_vm0, %v11111_v20  ;;  %9745 = vmatprep.mubr.msk.bf16.mxu0 %vm432_vm0, %v11111_v20 }
  0xe7   : > { %9638 = vmatmul.mubr.msk.bf16.gmra.mrb[104].mxu1 %vm432_vm0, %v11137_v28  ;;  %9746 = vmatmul.mubr.msk.bf16.gmra.mrb[104].mxu0 %vm432_vm0, %v11137_v28 }
  0xe8   : > { %9641 = vmatprep.mubr.msk.bf16.mxu1 %vm432_vm0, %v11139_v29  ;;  %9749 = vmatprep.mubr.msk.bf16.mxu0 %vm432_vm0, %v11139_v29 }
  0xea   : > { %v9451_v3 = vpop.f32.mrb[0].mxu1  ;;  %v9523_v4 = vpop.f32.mrb[0].mxu0 }
  0xeb   : > { %v524_v6 = vadd.f32 %v9451_v3, %v11408_v2  ;;  %v515_v7 = vpop.f32.mrb[1].mxu1  ;;  %v950_v9 = vpop.f32.mrb[1].mxu0  ;;  %v959_v17 = vadd.f32 %v9523_v4, %v11413_v5 }
  0xec   : > { %v516_v10 = vadd.f32 %v11408_v2, %v515_v7  ;;  %v9452_v11 = vpop.f32.mrb[2].mxu1  ;;  %v9524_v14 = vpop.f32.mrb[2].mxu0  ;;  %v951_v23 = vadd.f32 %v11413_v5, %v950_v9 }
  0xed   : > { %v527_v15 = vadd.f32 %v9452_v11, %v11408_v2  ;;  %v518_v16 = vpop.f32.mrb[3].mxu1  ;;  %v962_v18 = vadd.f32 %v9524_v14, %v11413_v5  ;;  %v953_v21 = vpop.f32.mrb[3].mxu0 }
  0xee   : > { %v519_v22 = vadd.f32 %v11408_v2, %v518_v16  ;;  %v954_v24 = vadd.f32 %v11413_v5, %v953_v21 }
  0xef   : > { %9642 = vmatmul.mubr.msk.bf16.gmra.mrb[108].mxu1 %vm432_vm0, %v11156_v35  ;;  %v643_v25 = vpack.c.bf16 %v527_v15, %v524_v6  ;;  %v1078_v26 = vpack.c.bf16 %v962_v18, %v959_v17  ;;  %9750 = vmatmul.mubr.msk.bf16.gmra.mrb[108].mxu0 %vm432_vm0, %v11156_v35 }
  0xf0   : > { %9645 = vmatprep.mubr.msk.bf16.mxu1 %vm432_vm0, %v11158_v36  ;;  %v642_v27 = vpack.c.bf16 %v519_v22, %v516_v10  ;;  %v1077_v30 = vpack.c.bf16 %v954_v24, %v951_v23  ;;  %9753 = vmatprep.mubr.msk.bf16.mxu0 %vm432_vm0, %v11158_v36 }
  0xf1   : > { %660 = vst.msk [vmem:[#allocation2 + $0x8] sm:$0xff] %vm658_vm1, %v643_v25  ;;  %1095 = vst.msk [vmem:[#allocation2 + $0x88] sm:$0xff] %vm658_vm1, %v1078_v26 }
  0xf2   : > { %659 = vst.msk [vmem:[#allocation2] sm:$0xff] %vm658_vm1, %v642_v27  ;;  %v9455_v31 = vpop.f32.mrb[4].mxu1  ;;  %1094 = vst.msk [vmem:[#allocation2 + $0x80] sm:$0xff] %vm658_vm1, %v1077_v30  ;;  %v9527_v32 = vpop.f32.mrb[4].mxu0 }
  0xf3   : > { %v540_v33 = vadd.f32 %v9455_v31, %v11408_v2  ;;  %v531_v34 = vpop.f32.mrb[5].mxu1  ;;  %v966_v37 = vpop.f32.mrb[5].mxu0  ;;  %v975_v45 = vadd.f32 %v9527_v32, %v11413_v5 }
  0xf4   : > { %v532_v38 = vadd.f32 %v11408_v2, %v531_v34  ;;  %v9456_v39 = vpop.f32.mrb[6].mxu1  ;;  %v9528_v40 = vpop.f32.mrb[6].mxu0  ;;  %v967_v51 = vadd.f32 %v11413_v5, %v966_v37 }
  0xf5   : > { %v543_v43 = vadd.f32 %v9456_v39, %v11408_v2  ;;  %v534_v44 = vpop.f32.mrb[7].mxu1  ;;  %v978_v46 = vadd.f32 %v9528_v40, %v11413_v5  ;;  %v969_v49 = vpop.f32.mrb[7].mxu0 }
  0xf6   : > { %v535_v50 = vadd.f32 %v11408_v2, %v534_v44  ;;  %v970_v52 = vadd.f32 %v11413_v5, %v969_v49 }
  0xf7   : > { %9646 = vmatmul.mubr.msk.bf16.gmra.mrb[112].mxu1 %vm432_vm0, %v11172_v41  ;;  %v645_v55 = vpack.c.bf16 %v543_v43, %v540_v33  ;;  %v1080_v56 = vpack.c.bf16 %v978_v46, %v975_v45  ;;  %9754 = vmatmul.mubr.msk.bf16.gmra.mrb[112].mxu0 %vm432_vm0, %v11172_v41 }
  0xf8   : > { %v644_v58 = vpack.c.bf16 %v535_v50, %v532_v38  ;;  %9649 = vmatprep.mubr.msk.bf16.mxu1 %vm432_vm0, %v11174_v42  ;;  %v1079_v59 = vpack.c.bf16 %v970_v52, %v967_v51  ;;  %9757 = vmatprep.mubr.msk.bf16.mxu0 %vm432_vm0, %v11174_v42 }
  0xf9   : > { %662 = vst.msk [vmem:[#allocation2 + $0x18] sm:$0xff] %vm658_vm1, %v645_v55  ;;  %1097 = vst.msk [vmem:[#allocation2 + $0x98] sm:$0xff] %vm658_vm1, %v1080_v56 }
  0xfa   : > { %661 = vst.msk [vmem:[#allocation2 + $0x10] sm:$0xff] %vm658_vm1, %v644_v58  ;;  %v9459_v60 = vpop.f32.mrb[8].mxu1  ;;  %1096 = vst.msk [vmem:[#allocation2 + $0x90] sm:$0xff] %vm658_vm1, %v1079_v59  ;;  %v9531_v61 = vpop.f32.mrb[8].mxu0 }
  0xfb   : > { %v556_v62 = vadd.f32 %v9459_v60, %v11408_v2  ;;  %v547_v63 = vpop.f32.mrb[9].mxu1  ;;  %v982_v0 = vpop.f32.mrb[9].mxu0  ;;  %v991_v9 = vadd.f32 %v9531_v61, %v11413_v5 }
  0xfc   : > { %v548_v1 = vadd.f32 %v11408_v2, %v547_v63  ;;  %v9460_v3 = vpop.f32.mrb[10].mxu1  ;;  %v9532_v4 = vpop.f32.mrb[10].mxu0  ;;  %v983_v15 = vadd.f32 %v11413_v5, %v982_v0 }
  0xfd   : > { %v559_v6 = vadd.f32 %v9460_v3, %v11408_v2  ;;  %v550_v7 = vpop.f32.mrb[11].mxu1  ;;  %v994_v10 = vadd.f32 %v9532_v4, %v11413_v5  ;;  %v985_v11 = vpop.f32.mrb[11].mxu0 }
  0xfe   : > { %v551_v14 = vadd.f32 %v11408_v2, %v550_v7  ;;  %v986_v16 = vadd.f32 %v11413_v5, %v985_v11 }
  0xff   : > { %9650 = vmatmul.mubr.msk.bf16.gmra.mrb[116].mxu1 %vm432_vm0, %v11188_v47  ;;  %v647_v17 = vpack.c.bf16 %v559_v6, %v556_v62  ;;  %v1082_v18 = vpack.c.bf16 %v994_v10, %v991_v9  ;;  %9758 = vmatmul.mubr.msk.bf16.gmra.mrb[116].mxu0 %vm432_vm0, %v11188_v47 }
 0x100   : > { %v646_v21 = vpack.c.bf16 %v551_v14, %v548_v1  ;;  %9653 = vmatprep.mubr.msk.bf16.mxu1 %vm432_vm0, %v11190_v48  ;;  %v1081_v22 = vpack.c.bf16 %v986_v16, %v983_v15  ;;  %9761 = vmatprep.mubr.msk.bf16.mxu0 %vm432_vm0, %v11190_v48 }
 0x101   : > { %664 = vst.msk [vmem:[#allocation2 + $0x28] sm:$0xff] %vm658_vm1, %v647_v17  ;;  %1099 = vst.msk [vmem:[#allocation2 + $0xa8] sm:$0xff] %vm658_vm1, %v1082_v18 }
 0x102   : > { %663 = vst.msk [vmem:[#allocation2 + $0x20] sm:$0xff] %vm658_vm1, %v646_v21  ;;  %v9463_v23 = vpop.f32.mrb[12].mxu1  ;;  %1098 = vst.msk [vmem:[#allocation2 + $0xa0] sm:$0xff] %vm658_vm1, %v1081_v22  ;;  %v9535_v24 = vpop.f32.mrb[12].mxu0 }
 0x103   : > { %v572_v25 = vadd.f32 %v9463_v23, %v11408_v2  ;;  %v563_v26 = vpop.f32.mrb[13].mxu1  ;;  %v998_v27 = vpop.f32.mrb[13].mxu0  ;;  %v1007_v37 = vadd.f32 %v9535_v24, %v11413_v5 }
 0x104   : > { %v564_v30 = vadd.f32 %v11408_v2, %v563_v26  ;;  %v9464_v31 = vpop.f32.mrb[14].mxu1  ;;  %v9536_v32 = vpop.f32.mrb[14].mxu0  ;;  %v999_v43 = vadd.f32 %v11413_v5, %v998_v27  ;;  %v2504_v27 = vld [vmem:[#allocation2] sm:$0xff] }
 0x105   : > { %v575_v33 = vadd.f32 %v9464_v31, %v11408_v2  ;;  %v566_v34 = vpop.f32.mrb[15].mxu1  ;;  %v1010_v38 = vadd.f32 %v9536_v32, %v11413_v5  ;;  %v1001_v39 = vpop.f32.mrb[15].mxu0 }
 0x106   : > { %v567_v40 = vadd.f32 %v11408_v2, %v566_v34  ;;  %v1002_v44 = vadd.f32 %v11413_v5, %v1001_v39 }
 0x107   : > { %v649_v45 = vpack.c.bf16 %v575_v33, %v572_v25  ;;  %9654 = vmatmul.mubr.msk.bf16.gmra.mrb[120].mxu1 %vm432_vm0, %v11204_v53  ;;  %v1084_v46 = vpack.c.bf16 %v1010_v38, %v1007_v37  ;;  %9762 = vmatmul.mubr.msk.bf16.gmra.mrb[120].mxu0 %vm432_vm0, %v11204_v53 }
 0x108   : > { %v648_v49 = vpack.c.bf16 %v567_v40, %v564_v30  ;;  %9657 = vmatprep.mubr.msk.bf16.mxu1 %vm432_vm0, %v11206_v54  ;;  %v1083_v50 = vpack.c.bf16 %v1002_v44, %v999_v43  ;;  %9765 = vmatprep.mubr.msk.bf16.mxu0 %vm432_vm0, %v11206_v54  ;;  %v2586_v43 = vsel %vm658_vm1, %v2504_v27, 0 }
 0x109   : > { %666 = vst.msk [vmem:[#allocation2 + $0x38] sm:$0xff] %vm658_vm1, %v649_v45  ;;  %1101 = vst.msk [vmem:[#allocation2 + $0xb8] sm:$0xff] %vm658_vm1, %v1084_v46 }
 0x10a   : > { %665 = vst.msk [vmem:[#allocation2 + $0x30] sm:$0xff] %vm658_vm1, %v648_v49  ;;  %v9467_v51 = vpop.f32.mrb[16].mxu1  ;;  %1100 = vst.msk [vmem:[#allocation2 + $0xb0] sm:$0xff] %vm658_vm1, %v1083_v50  ;;  %v9539_v52 = vpop.f32.mrb[16].mxu0 }
 0x10b   : > { %v588_v55 = vadd.f32 %v9467_v51, %v11408_v2  ;;  %v579_v56 = vpop.f32.mrb[17].mxu1  ;;  %v1014_v58 = vpop.f32.mrb[17].mxu0  ;;  %v1023_v0 = vadd.f32 %v9539_v52, %v11413_v5 }
 0x10c   : > { %v580_v59 = vadd.f32 %v11408_v2, %v579_v56  ;;  %v9468_v60 = vpop.f32.mrb[18].mxu1  ;;  %v9540_v61 = vpop.f32.mrb[18].mxu0  ;;  %v1015_v6 = vadd.f32 %v11413_v5, %v1014_v58 }
 0x10d   : > { %v591_v62 = vadd.f32 %v9468_v60, %v11408_v2  ;;  %v582_v63 = vpop.f32.mrb[19].mxu1  ;;  %v1026_v1 = vadd.f32 %v9540_v61, %v11413_v5  ;;  %v1017_v3 = vpop.f32.mrb[19].mxu0 }
 0x10e   : > { %v583_v4 = vadd.f32 %v11408_v2, %v582_v63  ;;  %v1018_v7 = vadd.f32 %v11413_v5, %v1017_v3 }
 0x10f   : > { %v651_v9 = vpack.c.bf16 %v591_v62, %v588_v55  ;;  %9658 = vmatmul.mubr.msk.bf16.gmra.mrb[124].mxu1 %vm432_vm0, %v11218_v57  ;;  %v1086_v10 = vpack.c.bf16 %v1026_v1, %v1023_v0  ;;  %9766 = vmatmul.mubr.msk.bf16.gmra.mrb[124].mxu0 %vm432_vm0, %v11218_v57  ;;  %v2505_v62 = vld [vmem:[#allocation2 + $0x8] sm:$0xff] }
 0x110   : > { %v650_v11 = vpack.c.bf16 %v583_v4, %v580_v59  ;;  %9701 = vmatprep.mubr.msk.bf16.mxu1 %vm432_vm0, %v11081_v8  ;;  %v1085_v14 = vpack.c.bf16 %v1018_v7, %v1015_v6 }
 0x111   : > { %668 = vst.msk [vmem:[#allocation2 + $0x48] sm:$0xff] %vm658_vm1, %v651_v9  ;;  %1103 = vst.msk [vmem:[#allocation2 + $0xc8] sm:$0xff] %vm658_vm1, %v1086_v10 }
 0x112   : > { %667 = vst.msk [vmem:[#allocation2 + $0x40] sm:$0xff] %vm658_vm1, %v650_v11  ;;  %v9471_v15 = vpop.f32.mrb[20].mxu1  ;;  %1102 = vst.msk [vmem:[#allocation2 + $0xc0] sm:$0xff] %vm658_vm1, %v1085_v14  ;;  %v9543_v16 = vpop.f32.mrb[20].mxu0  ;;  %v2589_v11 = vsel %vm658_vm1, %v2505_v62, 0  ;;  %v2507_v62 = vld [vmem:[#allocation2 + $0x18] sm:$0xff] }
 0x113   : > { %v604_v17 = vadd.f32 %v9471_v15, %v11408_v2  ;;  %v595_v18 = vpop.f32.mrb[21].mxu1  ;;  %v1030_v21 = vpop.f32.mrb[21].mxu0  ;;  %v1039_v30 = vadd.f32 %v9543_v16, %v11413_v5 }
 0x114   : > { %v596_v22 = vadd.f32 %v11408_v2, %v595_v18  ;;  %v9472_v23 = vpop.f32.mrb[22].mxu1  ;;  %v9544_v24 = vpop.f32.mrb[22].mxu0  ;;  %v1031_v34 = vadd.f32 %v11413_v5, %v1030_v21 }
 0x115   : > { %v607_v25 = vadd.f32 %v9472_v23, %v11408_v2  ;;  %v598_v26 = vpop.f32.mrb[23].mxu1  ;;  %v1042_v31 = vadd.f32 %v9544_v24, %v11413_v5  ;;  %v1033_v32 = vpop.f32.mrb[23].mxu0 }
 0x116   : > { %v599_v33 = vadd.f32 %v11408_v2, %v598_v26  ;;  %v1034_v37 = vadd.f32 %v11413_v5, %v1033_v32 }
 0x117   : > { %v653_v38 = vpack.c.bf16 %v607_v25, %v604_v17  ;;  %9702 = vmatmul.mubr.msk.bf16.vlgmr.msra.gmra.mrb[128].mxu1 %vm432_vm0, %v11086_v12  ;;  %v1088_v39 = vpack.c.bf16 %v1042_v31, %v1039_v30  ;;  %v2506_v30 = vld [vmem:[#allocation2 + $0x10] sm:$0xff] }
 0x118   : > { %v652_v40 = vpack.c.bf16 %v599_v33, %v596_v22  ;;  %9705 = vmatprep.mubr.msk.bf16.mxu1 %vm432_vm0, %v11088_v13  ;;  %v1087_v44 = vpack.c.bf16 %v1034_v37, %v1031_v34  ;;  %v2513_v46 = vld [vmem:[#allocation2 + $0x48] sm:$0xff] }
 0x119   : > { %670 = vst.msk [vmem:[#allocation2 + $0x58] sm:$0xff] %vm658_vm1, %v653_v38  ;;  %v2512_v45 = vld [vmem:[#allocation2 + $0x40] sm:$0xff]  ;;  %1105 = vst.msk [vmem:[#allocation2 + $0xd8] sm:$0xff] %vm658_vm1, %v1088_v39 }
 0x11a   : > { %10109 = vmatprep.subr.msk.bf16.mxu1 %vm658_vm1, %v2512_v45  ;;  %669 = vst.msk [vmem:[#allocation2 + $0x50] sm:$0xff] %vm658_vm1, %v652_v40  ;;  %v9475_v49 = vpop.f32.mrb[24].mxu1  ;;  %1104 = vst.msk [vmem:[#allocation2 + $0xd0] sm:$0xff] %vm658_vm1, %v1087_v44  ;;  %v9547_v50 = vpop.f32.mrb[24].mxu0  ;;  %v2592_v44 = vsel %vm658_vm1, %v2506_v30, 0  ;;  %v2508_v30 = vld [vmem:[#allocation2 + $0x20] sm:$0xff] }
 0x11b   : > { %8684 = vmatpush3.bf16.xpose.msra.mxu1 %v2586_v43  ;;  %v620_v51 = vadd.f32 %v9475_v49, %v11408_v2  ;;  %v611_v52 = vpop.f32.mrb[25].mxu1  ;;  %v1046_v55 = vpop.f32.mrb[25].mxu0  ;;  %v1055_v63 = vadd.f32 %v9547_v50, %v11413_v5  ;;  %v11575_v50 = vld [vmem:[%s14166_s4 + $0x2] ss:$0 sm:$0xff] }
 0x11c   : > { %v612_v56 = vadd.f32 %v11408_v2, %v611_v52  ;;  %v9476_v58 = vpop.f32.mrb[26].mxu1  ;;  %10110 = vmatprep.subr.msk.bf16.mxu1 %vm658_vm1, %v2513_v46  ;;  %v9548_v59 = vpop.f32.mrb[26].mxu0  ;;  %v1047_v4 = vadd.f32 %v11413_v5, %v1046_v55 }
 0x11d   : > { %v623_v60 = vadd.f32 %v9476_v58, %v11408_v2  ;;  %v614_v61 = vpop.f32.mrb[27].mxu1  ;;  %v1058_v0 = vadd.f32 %v9548_v59, %v11413_v5  ;;  %v1049_v1 = vpop.f32.mrb[27].mxu0 }
 0x11e   : > { %v615_v3 = vadd.f32 %v11408_v2, %v614_v61  ;;  %v1050_v6 = vadd.f32 %v11413_v5, %v1049_v1 }
 0x11f   : > { %v655_v7 = vpack.c.bf16 %v623_v60, %v620_v51  ;;  %9706 = vmatmul.mubr.msk.bf16.gmra.mrb[132].mxu1 %vm432_vm0, %v11109_v19  ;;  %v1090_v9 = vpack.c.bf16 %v1058_v0, %v1055_v63 }
 0x120   : > { %v654_v10 = vpack.c.bf16 %v615_v3, %v612_v56  ;;  %9709 = vmatprep.mubr.msk.bf16.mxu1 %vm432_vm0, %v11111_v20  ;;  %v1089_v14 = vpack.c.bf16 %v1050_v6, %v1047_v4 }
 0x121   : > { %672 = vst.msk [vmem:[#allocation2 + $0x68] sm:$0xff] %vm658_vm1, %v655_v7  ;;  %v2514_v15 = vld [vmem:[#allocation2 + $0x50] sm:$0xff]  ;;  %1107 = vst.msk [vmem:[#allocation2 + $0xe8] sm:$0xff] %vm658_vm1, %v1090_v9 }
 0x122   : > { %671 = vst.msk [vmem:[#allocation2 + $0x60] sm:$0xff] %vm658_vm1, %v654_v10  ;;  %v9479_v16 = vpop.f32.mrb[28].mxu1  ;;  %1106 = vst.msk [vmem:[#allocation2 + $0xe0] sm:$0xff] %vm658_vm1, %v1089_v14  ;;  %v9551_v17 = vpop.f32.mrb[28].mxu0 }
 0x123   : > { %v636_v18 = vadd.f32 %v9479_v16, %v11408_v2  ;;  %v627_v21 = vpop.f32.mrb[29].mxu1  ;;  %8686 = vmatpush3.bf16.xpose.msra.mxu1 %v2589_v11  ;;  %v1062_v22 = vpop.f32.mrb[29].mxu0  ;;  %v1071_v31 = vadd.f32 %v9551_v17, %v11413_v5  ;;  %v2595_v11 = vsel %vm658_vm1, %v2507_v62, 0  ;;  %v2509_v62 = vld [vmem:[#allocation2 + $0x28] sm:$0xff] }
 0x124   : > { %v628_v23 = vadd.f32 %v11408_v2, %v627_v21  ;;  %v9480_v24 = vpop.f32.mrb[30].mxu1  ;;  %10111 = vmatprep.subr.msk.bf16.mxu1 %vm658_vm1, %v2514_v15  ;;  %v9552_v25 = vpop.f32.mrb[30].mxu0  ;;  %v1063_v37 = vadd.f32 %v11413_v5, %v1062_v22 }
 0x125   : > { %v639_v26 = vadd.f32 %v9480_v24, %v11408_v2  ;;  %v630_v27 = vpop.f32.mrb[31].mxu1  ;;  %v1074_v32 = vadd.f32 %v9552_v25, %v11413_v5  ;;  %v1065_v33 = vpop.f32.mrb[31].mxu0 }
 0x126   : > { %v631_v34 = vadd.f32 %v11408_v2, %v630_v27  ;;  %v1066_v38 = vadd.f32 %v11413_v5, %v1065_v33  ;;  %v11567_v2 = vld [vmem:[%s14168_s6] ss:$0 sm:$0xff]  ;;  %v2515_v5 = vld [vmem:[#allocation2 + $0x58] sm:$0xff] }
 0x127   : > { %v657_v39 = vpack.c.bf16 %v639_v26, %v636_v18  ;;  %9710 = vmatmul.mubr.msk.bf16.gmra.mrb[136].mxu1 %vm432_vm0, %v11137_v28  ;;  %v1092_v40 = vpack.c.bf16 %v1074_v32, %v1071_v31 }
 0x128   : > { %v656_v43 = vpack.c.bf16 %v631_v34, %v628_v23  ;;  %9713 = vmatprep.mubr.msk.bf16.mxu1 %vm432_vm0, %v11139_v29  ;;  %v1091_v45 = vpack.c.bf16 %v1066_v38, %v1063_v37 }
 0x129   : > { %674 = vst.msk [vmem:[#allocation2 + $0x78] sm:$0xff] %vm658_vm1, %v657_v39  ;;  %1109 = vst.msk [vmem:[#allocation2 + $0xf8] sm:$0xff] %vm658_vm1, %v1092_v40  ;;  %v2516_v15 = vld [vmem:[#allocation2 + $0x60] sm:$0xff] }
 0x12a   : > { %673 = vst.msk [vmem:[#allocation2 + $0x70] sm:$0xff] %vm658_vm1, %v656_v43  ;;  %v9487_v46 = vpop.f32.mrb[32].mxu1  ;;  %1108 = vst.msk [vmem:[#allocation2 + $0xf0] sm:$0xff] %vm658_vm1, %v1091_v45  ;;  %v9595_v49 = vpop.f32.mrb[32].mxu0 }
 0x12b   : > { %v741_v51 = vadd.f32 %v9487_v46, %v11567_v2  ;;  %v732_v52 = vpop.f32.mrb[33].mxu1  ;;  %8688 = vmatpush3.bf16.xpose.msra.mxu1 %v2592_v44  ;;  %v1388_v55 = vpop.f32.mrb[33].mxu0  ;;  %v1397_v63 = vadd.f32 %v9595_v49, %v11575_v50  ;;  %v2598_v44 = vsel %vm658_vm1, %v2508_v30, 0  ;;  %v2510_v30 = vld [vmem:[#allocation2 + $0x30] sm:$0xff] }
 0x12c   : > { %v733_v56 = vadd.f32 %v11567_v2, %v732_v52  ;;  %v9488_v58 = vpop.f32.mrb[34].mxu1  ;;  %10112 = vmatprep.subr.msk.bf16.mxu1 %vm658_vm1, %v2515_v5  ;;  %v9596_v59 = vpop.f32.mrb[34].mxu0  ;;  %v1389_v4 = vadd.f32 %v11575_v50, %v1388_v55  ;;  %v2517_v5 = vld [vmem:[#allocation2 + $0x68] sm:$0xff] }
 0x12d   : > { %v744_v60 = vadd.f32 %v9488_v58, %v11567_v2  ;;  %v735_v61 = vpop.f32.mrb[35].mxu1  ;;  %v1400_v0 = vadd.f32 %v9596_v59, %v11575_v50  ;;  %v1391_v1 = vpop.f32.mrb[35].mxu0 }
 0x12e   : > { %v736_v3 = vadd.f32 %v11567_v2, %v735_v61  ;;  %v1392_v6 = vadd.f32 %v11575_v50, %v1391_v1 }
 0x12f   : > { %v860_v7 = vpack.c.bf16 %v744_v60, %v741_v51  ;;  %9714 = vmatmul.mubr.msk.bf16.gmra.mrb[140].mxu1 %vm432_vm0, %v11156_v35  ;;  %v1516_v9 = vpack.c.bf16 %v1400_v0, %v1397_v63 }
 0x130   : > { %v859_v10 = vpack.c.bf16 %v736_v3, %v733_v56  ;;  %9717 = vmatprep.mubr.msk.bf16.mxu1 %vm432_vm0, %v11158_v36  ;;  %v1515_v14 = vpack.c.bf16 %v1392_v6, %v1389_v4 }
 0x131   : > { %876 = vst.msk [vmem:[#allocation3 + $0x8] sm:$0xff] %vm658_vm1, %v860_v7  ;;  %1533 = vst.msk [vmem:[#allocation2 + $0x108] sm:$0xff] %vm658_vm1, %v1516_v9 }
 0x132   : > { %875 = vst.msk [vmem:[#allocation3] sm:$0xff] %vm658_vm1, %v859_v10  ;;  %v9491_v16 = vpop.f32.mrb[36].mxu1  ;;  %1532 = vst.msk [vmem:[#allocation2 + $0x100] sm:$0xff] %vm658_vm1, %v1515_v14  ;;  %v9599_v17 = vpop.f32.mrb[36].mxu0 }
 0x133   : > { %v757_v18 = vadd.f32 %v9491_v16, %v11567_v2  ;;  %v748_v21 = vpop.f32.mrb[37].mxu1  ;;  %8690 = vmatpush3.bf16.xpose.msra.mxu1 %v2595_v11  ;;  %v1404_v22 = vpop.f32.mrb[37].mxu0  ;;  %v1413_v31 = vadd.f32 %v9599_v17, %v11575_v50  ;;  %v2601_v11 = vsel %vm658_vm1, %v2509_v62, 0  ;;  %v2511_v62 = vld [vmem:[#allocation2 + $0x38] sm:$0xff] }
 0x134   : > { %v749_v23 = vadd.f32 %v11567_v2, %v748_v21  ;;  %v9492_v24 = vpop.f32.mrb[38].mxu1  ;;  %10113 = vmatprep.subr.msk.bf16.mxu1 %vm658_vm1, %v2516_v15  ;;  %v9600_v25 = vpop.f32.mrb[38].mxu0  ;;  %v1405_v37 = vadd.f32 %v11575_v50, %v1404_v22  ;;  %v2518_v15 = vld [vmem:[#allocation2 + $0x70] sm:$0xff] }
 0x135   : > { %v760_v26 = vadd.f32 %v9492_v24, %v11567_v2  ;;  %v751_v27 = vpop.f32.mrb[39].mxu1  ;;  %v1416_v32 = vadd.f32 %v9600_v25, %v11575_v50  ;;  %v1407_v33 = vpop.f32.mrb[39].mxu0 }
 0x136   : > { %v752_v34 = vadd.f32 %v11567_v2, %v751_v27  ;;  %v1408_v38 = vadd.f32 %v11575_v50, %v1407_v33 }
 0x137   : > { %v862_v39 = vpack.c.bf16 %v760_v26, %v757_v18  ;;  %9718 = vmatmul.mubr.msk.bf16.gmra.mrb[144].mxu1 %vm432_vm0, %v11172_v41  ;;  %v1518_v40 = vpack.c.bf16 %v1416_v32, %v1413_v31 }
 0x138   : > { %v861_v43 = vpack.c.bf16 %v752_v34, %v749_v23  ;;  %9721 = vmatprep.mubr.msk.bf16.mxu1 %vm432_vm0, %v11174_v42  ;;  %v1517_v45 = vpack.c.bf16 %v1408_v38, %v1405_v37 }
 0x139   : > { %878 = vst.msk [vmem:[#allocation3 + $0x18] sm:$0xff] %vm658_vm1, %v862_v39  ;;  %1535 = vst.msk [vmem:[#allocation2 + $0x118] sm:$0xff] %vm658_vm1, %v1518_v40 }
 0x13a   : > { %877 = vst.msk [vmem:[#allocation3 + $0x10] sm:$0xff] %vm658_vm1, %v861_v43  ;;  %v9495_v46 = vpop.f32.mrb[40].mxu1  ;;  %1534 = vst.msk [vmem:[#allocation2 + $0x110] sm:$0xff] %vm658_vm1, %v1517_v45  ;;  %v9603_v49 = vpop.f32.mrb[40].mxu0 }
 0x13b   : > { %v773_v51 = vadd.f32 %v9495_v46, %v11567_v2  ;;  %v764_v52 = vpop.f32.mrb[41].mxu1  ;;  %8692 = vmatpush3.bf16.xpose.msra.mxu1 %v2598_v44  ;;  %v1420_v55 = vpop.f32.mrb[41].mxu0  ;;  %v1429_v63 = vadd.f32 %v9603_v49, %v11575_v50  ;;  %v2604_v44 = vsel %vm658_vm1, %v2510_v30, 0 }
 0x13c   : > { %v765_v56 = vadd.f32 %v11567_v2, %v764_v52  ;;  %v9496_v58 = vpop.f32.mrb[42].mxu1  ;;  %10114 = vmatprep.subr.msk.bf16.mxu1 %vm658_vm1, %v2517_v5  ;;  %v9604_v59 = vpop.f32.mrb[42].mxu0  ;;  %v1421_v4 = vadd.f32 %v11575_v50, %v1420_v55  ;;  %v2519_v5 = vld [vmem:[#allocation2 + $0x78] sm:$0xff] }
 0x13d   : > { %v776_v60 = vadd.f32 %v9496_v58, %v11567_v2  ;;  %v767_v61 = vpop.f32.mrb[43].mxu1  ;;  %v1432_v0 = vadd.f32 %v9604_v59, %v11575_v50  ;;  %v1423_v1 = vpop.f32.mrb[43].mxu0 }
 0x13e   : > { %v768_v3 = vadd.f32 %v11567_v2, %v767_v61  ;;  %v1424_v6 = vadd.f32 %v11575_v50, %v1423_v1 }
 0x13f   : > { %v864_v7 = vpack.c.bf16 %v776_v60, %v773_v51  ;;  %9722 = vmatmul.mubr.msk.bf16.gmra.mrb[148].mxu1 %vm432_vm0, %v11188_v47  ;;  %v1520_v9 = vpack.c.bf16 %v1432_v0, %v1429_v63 }
 0x140   : > { %v863_v10 = vpack.c.bf16 %v768_v3, %v765_v56  ;;  %9725 = vmatprep.mubr.msk.bf16.mxu1 %vm432_vm0, %v11190_v48  ;;  %v1519_v14 = vpack.c.bf16 %v1424_v6, %v1421_v4 }
 0x141   : > { %880 = vst.msk [vmem:[#allocation3 + $0x28] sm:$0xff] %vm658_vm1, %v864_v7  ;;  %1537 = vst.msk [vmem:[#allocation2 + $0x128] sm:$0xff] %vm658_vm1, %v1520_v9 }
 0x142   : > { %879 = vst.msk [vmem:[#allocation3 + $0x20] sm:$0xff] %vm658_vm1, %v863_v10  ;;  %v9499_v16 = vpop.f32.mrb[44].mxu1  ;;  %1536 = vst.msk [vmem:[#allocation2 + $0x120] sm:$0xff] %vm658_vm1, %v1519_v14  ;;  %v9607_v17 = vpop.f32.mrb[44].mxu0 }
 0x143   : > { %v789_v18 = vadd.f32 %v9499_v16, %v11567_v2  ;;  %v780_v21 = vpop.f32.mrb[45].mxu1  ;;  %8694 = vmatpush3.bf16.xpose.msra.mxu1 %v2601_v11  ;;  %v1436_v22 = vpop.f32.mrb[45].mxu0  ;;  %v1445_v31 = vadd.f32 %v9607_v17, %v11575_v50  ;;  %v2607_v11 = vsel %vm658_vm1, %v2511_v62, 0 }
 0x144   : > { %v781_v23 = vadd.f32 %v11567_v2, %v780_v21  ;;  %v9500_v24 = vpop.f32.mrb[46].mxu1  ;;  %10115 = vmatprep.subr.msk.bf16.mxu1 %vm658_vm1, %v2518_v15  ;;  %v9608_v25 = vpop.f32.mrb[46].mxu0  ;;  %v1437_v37 = vadd.f32 %v11575_v50, %v1436_v22 }
 0x145   : > { %v792_v26 = vadd.f32 %v9500_v24, %v11567_v2  ;;  %v783_v27 = vpop.f32.mrb[47].mxu1  ;;  %v1448_v32 = vadd.f32 %v9608_v25, %v11575_v50  ;;  %v1439_v33 = vpop.f32.mrb[47].mxu0 }
 0x146   : > { %v784_v34 = vadd.f32 %v11567_v2, %v783_v27  ;;  %v1440_v38 = vadd.f32 %v11575_v50, %v1439_v33 }
 0x147   : > { %v866_v39 = vpack.c.bf16 %v792_v26, %v789_v18  ;;  %9726 = vmatmul.mubr.msk.bf16.gmra.mrb[152].mxu1 %vm432_vm0, %v11204_v53  ;;  %v1522_v40 = vpack.c.bf16 %v1448_v32, %v1445_v31 }
 0x148   : > { %v865_v43 = vpack.c.bf16 %v784_v34, %v781_v23  ;;  %9729 = vmatprep.mubr.msk.bf16.mxu1 %vm432_vm0, %v11206_v54  ;;  %v1521_v45 = vpack.c.bf16 %v1440_v38, %v1437_v37 }
 0x149   : > { %882 = vst.msk [vmem:[#allocation3 + $0x38] sm:$0xff] %vm658_vm1, %v866_v39  ;;  %1539 = vst.msk [vmem:[#allocation2 + $0x138] sm:$0xff] %vm658_vm1, %v1522_v40  ;;  %v2520_v40 = vld [vmem:[#allocation3] sm:$0xff] }
 0x14a   : > { %881 = vst.msk [vmem:[#allocation3 + $0x30] sm:$0xff] %vm658_vm1, %v865_v43  ;;  %v9503_v46 = vpop.f32.mrb[48].mxu1  ;;  %1538 = vst.msk [vmem:[#allocation2 + $0x130] sm:$0xff] %vm658_vm1, %v1521_v45  ;;  %v9611_v51 = vpop.f32.mrb[48].mxu0 }
 0x14b   : > { %v805_v49 = vadd.f32 %v9503_v46, %v11567_v2  ;;  %v796_v52 = vpop.f32.mrb[49].mxu1  ;;  %8696 = vmatpush3.bf16.xpose.msra.mxu1 %v2604_v44  ;;  %v1452_v56 = vpop.f32.mrb[49].mxu0  ;;  %v1461_v63 = vadd.f32 %v9611_v51, %v11575_v50 }
 0x14c   : > { %v797_v55 = vadd.f32 %v11567_v2, %v796_v52  ;;  %v9504_v58 = vpop.f32.mrb[50].mxu1  ;;  %10116 = vmatprep.subr.msk.bf16.mxu1 %vm658_vm1, %v2519_v5  ;;  %v9612_v60 = vpop.f32.mrb[50].mxu0  ;;  %v1453_v4 = vadd.f32 %v11575_v50, %v1452_v56 }
 0x14d   : > { %v808_v59 = vadd.f32 %v9504_v58, %v11567_v2  ;;  %v799_v61 = vpop.f32.mrb[51].mxu1  ;;  %v1464_v0 = vadd.f32 %v9612_v60, %v11575_v50  ;;  %v1455_v3 = vpop.f32.mrb[51].mxu0  ;;  %v2521_v58 = vld [vmem:[#allocation3 + $0x8] sm:$0xff] }
 0x14e   : > { %v800_v1 = vadd.f32 %v11567_v2, %v799_v61  ;;  %v1456_v7 = vadd.f32 %v11575_v50, %v1455_v3 }
 0x14f   : > { %v868_v6 = vpack.c.bf16 %v808_v59, %v805_v49  ;;  %9730 = vmatmul.mubr.msk.bf16.gmra.mrb[156].mxu1 %vm432_vm0, %v11218_v57  ;;  %v1524_v9 = vpack.c.bf16 %v1464_v0, %v1461_v63 }
 0x150   : > { %v867_v10 = vpack.c.bf16 %v800_v1, %v797_v55  ;;  %v1523_v14 = vpack.c.bf16 %v1456_v7, %v1453_v4 }
 0x151   : > { %884 = vst.msk [vmem:[#allocation3 + $0x48] sm:$0xff] %vm658_vm1, %v868_v6  ;;  %1541 = vst.msk [vmem:[#allocation2 + $0x148] sm:$0xff] %vm658_vm1, %v1524_v9 }
 0x152   : > { %883 = vst.msk [vmem:[#allocation3 + $0x40] sm:$0xff] %vm658_vm1, %v867_v10  ;;  %v9507_v15 = vpop.f32.mrb[52].mxu1  ;;  %1540 = vst.msk [vmem:[#allocation2 + $0x140] sm:$0xff] %vm658_vm1, %v1523_v14  ;;  %v9615_v17 = vpop.f32.mrb[52].mxu0  ;;  %v2522_v10 = vld [vmem:[#allocation3 + $0x10] sm:$0xff] }
 0x153   : > { %v821_v16 = vadd.f32 %v9507_v15, %v11567_v2  ;;  %v812_v18 = vpop.f32.mrb[53].mxu1  ;;  %8698 = vmatpush3.bf16.xpose.msra.mxu1 %v2607_v11  ;;  %v1468_v22 = vpop.f32.mrb[53].mxu0  ;;  %v1477_v27 = vadd.f32 %v9615_v17, %v11575_v50 }
 0x154   : > { %v813_v21 = vadd.f32 %v11567_v2, %v812_v18  ;;  %v9508_v23 = vpop.f32.mrb[54].mxu1  ;;  %v9616_v25 = vpop.f32.mrb[54].mxu0  ;;  %v1469_v33 = vadd.f32 %v11575_v50, %v1468_v22 }
 0x155   : > { %v824_v24 = vadd.f32 %v9508_v23, %v11567_v2  ;;  %v815_v26 = vpop.f32.mrb[55].mxu1  ;;  %v1480_v30 = vadd.f32 %v9616_v25, %v11575_v50  ;;  %v1471_v32 = vpop.f32.mrb[55].mxu0  ;;  %v2523_v25 = vld [vmem:[#allocation3 + $0x18] sm:$0xff] }
 0x156   : > { %v816_v31 = vadd.f32 %v11567_v2, %v815_v26  ;;  %v1472_v37 = vadd.f32 %v11575_v50, %v1471_v32 }
 0x157   : > { %v870_v34 = vpack.c.bf16 %v824_v24, %v821_v16  ;;  %v1526_v38 = vpack.c.bf16 %v1480_v30, %v1477_v27 }
 0x158   : > { %v869_v39 = vpack.c.bf16 %v816_v31, %v813_v21  ;;  %v1525_v43 = vpack.c.bf16 %v1472_v37, %v1469_v33  ;;  %v2529_v45 = vld [vmem:[#allocation3 + $0x48] sm:$0xff] }
 0x159   : > { %886 = vst.msk [vmem:[#allocation3 + $0x58] sm:$0xff] %vm658_vm1, %v870_v34  ;;  %v2528_v44 = vld [vmem:[#allocation3 + $0x40] sm:$0xff]  ;;  %1543 = vst.msk [vmem:[#allocation2 + $0x158] sm:$0xff] %vm658_vm1, %v1526_v38 }
 0x15a   : > { %885 = vst.msk [vmem:[#allocation3 + $0x50] sm:$0xff] %vm658_vm1, %v869_v39  ;;  %v9511_v5 = vpop.f32.mrb[56].mxu1  ;;  %8731 = vmatprep.subr.bf16.mxu0 %v2528_v44  ;;  %1542 = vst.msk [vmem:[#allocation2 + $0x150] sm:$0xff] %vm658_vm1, %v1525_v43  ;;  %v9619_v49 = vpop.f32.mrb[56].mxu0  ;;  %v2524_v44 = vld [vmem:[#allocation3 + $0x20] sm:$0xff] }
 0x15b   : > { %v837_v46 = vadd.f32 %v9511_v5, %v11567_v2  ;;  %v828_v51 = vpop.f32.mrb[57].mxu1  ;;  %8732 = vmatpush3.bf16.msra.mxu0 %v2520_v40  ;;  %v1484_v55 = vpop.f32.mrb[57].mxu0  ;;  %v1493_v62 = vadd.f32 %v9619_v49, %v11575_v50 }
 0x15c   : > { %v829_v52 = vadd.f32 %v11567_v2, %v828_v51  ;;  %v9512_v56 = vpop.f32.mrb[58].mxu1  ;;  %8733 = vmatprep.subr.bf16.mxu0 %v2529_v45  ;;  %v9620_v60 = vpop.f32.mrb[58].mxu0  ;;  %v1485_v3 = vadd.f32 %v11575_v50, %v1484_v55  ;;  %v11700_v45 = vld [vmem:[%s14168_s6 + $0x1] ss:$0 sm:$0xff]  ;;  %v11709_v51 = vld [vmem:[%s14166_s4 + $0x3] ss:$0 sm:$0xff] }
 0x15d   : > { %v840_v59 = vadd.f32 %v9512_v56, %v11567_v2  ;;  %v831_v61 = vpop.f32.mrb[59].mxu1  ;;  %v1496_v63 = vadd.f32 %v9620_v60, %v11575_v50  ;;  %v1487_v1 = vpop.f32.mrb[59].mxu0 }
 0x15e   : > { %v832_v0 = vadd.f32 %v11567_v2, %v831_v61  ;;  %v1488_v6 = vadd.f32 %v11575_v50, %v1487_v1  ;;  %v11716_v61 = vld [vmem:[%s14163_s1 + $0x10] sm:$0xff]  }
 0x15f   : > { %v872_v4 = vpack.c.bf16 %v840_v59, %v837_v46  ;;  %8734 = vmatpush3.bf16.msra.mxu0 %v2521_v58  ;;  %v1528_v7 = vpack.c.bf16 %v1496_v63, %v1493_v62  ;;  %v2525_v58 = vld [vmem:[#allocation3 + $0x28] sm:$0xff]  ;;  %9769 = vmatprep.subr.bf16.mxu1 %v11716_v61 }
 0x160   : > { %v871_v9 = vpack.c.bf16 %v832_v0, %v829_v52  ;;  %v1527_v11 = vpack.c.bf16 %v1488_v6, %v1485_v3  ;;  %v2531_v15 = vld [vmem:[#allocation3 + $0x58] sm:$0xff] }
 0x161   : > { %888 = vst.msk [vmem:[#allocation3 + $0x68] sm:$0xff] %vm658_vm1, %v872_v4  ;;  %v2530_v14 = vld [vmem:[#allocation3 + $0x50] sm:$0xff]  ;;  %1545 = vst.msk [vmem:[#allocation2 + $0x168] sm:$0xff] %vm658_vm1, %v1528_v7 }
 0x162   : > { %887 = vst.msk [vmem:[#allocation3 + $0x60] sm:$0xff] %vm658_vm1, %v871_v9  ;;  %v9515_v16 = vpop.f32.mrb[60].mxu1  ;;  %8735 = vmatprep.subr.bf16.mxu0 %v2530_v14  ;;  %1544 = vst.msk [vmem:[#allocation2 + $0x160] sm:$0xff] %vm658_vm1, %v1527_v11  ;;  %v9623_v18 = vpop.f32.mrb[60].mxu0  ;;  %v2526_v14 = vld [vmem:[#allocation3 + $0x30] sm:$0xff] }
 0x163   : > { %v853_v17 = vadd.f32 %v9515_v16, %v11567_v2  ;;  %v844_v21 = vpop.f32.mrb[61].mxu1  ;;  %8736 = vmatpush3.bf16.msra.mxu0 %v2522_v10  ;;  %v1500_v23 = vpop.f32.mrb[61].mxu0  ;;  %v1509_v31 = vadd.f32 %v9623_v18, %v11575_v50 }
 0x164   : > { %v845_v22 = vadd.f32 %v11567_v2, %v844_v21  ;;  %v9516_v24 = vpop.f32.mrb[62].mxu1  ;;  %8737 = vmatprep.subr.bf16.mxu0 %v2531_v15  ;;  %v9624_v27 = vpop.f32.mrb[62].mxu0  ;;  %v1501_v37 = vadd.f32 %v11575_v50, %v1500_v23 }
 0x165   : > { %v856_v26 = vadd.f32 %v9516_v24, %v11567_v2  ;;  %v847_v30 = vpop.f32.mrb[63].mxu1  ;;  %v1512_v32 = vadd.f32 %v9624_v27, %v11575_v50  ;;  %v1503_v34 = vpop.f32.mrb[63].mxu0 }
 0x166   : > { %v848_v33 = vadd.f32 %v11567_v2, %v847_v30  ;;  %v1504_v39 = vadd.f32 %v11575_v50, %v1503_v34 }
 0x167   : > { %v874_v38 = vpack.c.bf16 %v856_v26, %v853_v17  ;;  %8738 = vmatpush3.bf16.msra.mxu0 %v2523_v25  ;;  %v1530_v40 = vpack.c.bf16 %v1512_v32, %v1509_v31  ;;  %v2527_v26 = vld [vmem:[#allocation3 + $0x38] sm:$0xff] }
 0x168   : > { %v873_v43 = vpack.c.bf16 %v848_v33, %v845_v22  ;;  %v1529_v5 = vpack.c.bf16 %v1504_v39, %v1501_v37  ;;  %v2533_v2 = vld [vmem:[#allocation3 + $0x68] sm:$0xff] }
 0x169   : > { %890 = vst.msk [vmem:[#allocation3 + $0x78] sm:$0xff] %vm658_vm1, %v874_v38  ;;  %v2532_v46 = vld [vmem:[#allocation3 + $0x60] sm:$0xff]  ;;  %1547 = vst.msk [vmem:[#allocation2 + $0x178] sm:$0xff] %vm658_vm1, %v1530_v40 }
 0x16a   : > { %889 = vst.msk [vmem:[#allocation3 + $0x70] sm:$0xff] %vm658_vm1, %v873_v43  ;;  %8739 = vmatprep.subr.bf16.mxu0 %v2532_v46  ;;  %v9559_v50 = vpop.f32.mrb[64].mxu1  ;;  %1546 = vst.msk [vmem:[#allocation2 + $0x170] sm:$0xff] %vm658_vm1, %v1529_v5  ;;  %v9667_v49 = vpop.f32.mrb[64].mxu0 }
 0x16b   : > { %8740 = vmatpush3.bf16.msra.mxu0 %v2524_v44  ;;  %v1178_v52 = vadd.f32 %v9559_v50, %v11700_v45  ;;  %v1169_v55 = vpop.f32.mrb[65].mxu1  ;;  %v1826_v56 = vpop.f32.mrb[65].mxu0  ;;  %v1835_v1 = vadd.f32 %v9667_v49, %v11709_v51  ;;  %v3695_v44 = vld [vmem:[#allocation2 + $0xc0] sm:$0xff] }
 0x16c   : > { %8741 = vmatprep.subr.bf16.mxu0 %v2533_v2  ;;  %v1170_v59 = vadd.f32 %v11700_v45, %v1169_v55  ;;  %v9560_v60 = vpop.f32.mrb[66].mxu1  ;;  %v9668_v62 = vpop.f32.mrb[66].mxu0  ;;  %v1827_v7 = vadd.f32 %v11709_v51, %v1826_v56 }
 0x16d   : > { %v1181_v63 = vadd.f32 %v9560_v60, %v11700_v45  ;;  %v1172_v0 = vpop.f32.mrb[67].mxu1  ;;  %v1838_v3 = vadd.f32 %v9668_v62, %v11709_v51  ;;  %v1829_v4 = vpop.f32.mrb[67].mxu0 }
 0x16e   : > { %v1173_v6 = vadd.f32 %v11700_v45, %v1172_v0  ;;  %v1830_v9 = vadd.f32 %v11709_v51, %v1829_v4 }
 0x16f   : > { %8742 = vmatpush3.bf16.msra.mxu0 %v2525_v58  ;;  %v1297_v10 = vpack.c.bf16 %v1181_v63, %v1178_v52  ;;  %v1954_v11 = vpack.c.bf16 %v1838_v3, %v1835_v1 }
 0x170   : > { %v1296_v15 = vpack.c.bf16 %v1173_v6, %v1170_v59  ;;  %v1953_v16 = vpack.c.bf16 %v1830_v9, %v1827_v7  ;;  %v2535_v18 = vld [vmem:[#allocation3 + $0x78] sm:$0xff] }
 0x171   : > { %v2534_v17 = vld [vmem:[#allocation3 + $0x70] sm:$0xff]  ;;  %1314 = vst.msk [vmem:[#allocation3 + $0x88] sm:$0xff] %vm658_vm1, %v1297_v10  ;;  %1971 = vst.msk [vmem:[#allocation2 + $0x188] sm:$0xff] %vm658_vm1, %v1954_v11 }
 0x172   : > { %8743 = vmatprep.subr.bf16.mxu0 %v2534_v17  ;;  %1313 = vst.msk [vmem:[#allocation3 + $0x80] sm:$0xff] %vm658_vm1, %v1296_v15  ;;  %v9563_v21 = vpop.f32.mrb[68].mxu1  ;;  %1970 = vst.msk [vmem:[#allocation2 + $0x180] sm:$0xff] %vm658_vm1, %v1953_v16  ;;  %v9671_v22 = vpop.f32.mrb[68].mxu0 }
 0x173   : > { %8744 = vmatpush3.bf16.msra.mxu0 %v2526_v14  ;;  %v1194_v23 = vadd.f32 %v9563_v21, %v11700_v45  ;;  %v1185_v24 = vpop.f32.mrb[69].mxu1  ;;  %v1842_v25 = vpop.f32.mrb[69].mxu0  ;;  %v1851_v34 = vadd.f32 %v9671_v22, %v11709_v51 }
 0x174   : > { %8745 = vmatprep.subr.bf16.mxu0 %v2535_v18  ;;  %v1186_v27 = vadd.f32 %v11700_v45, %v1185_v24  ;;  %v9564_v30 = vpop.f32.mrb[70].mxu1  ;;  %v9672_v31 = vpop.f32.mrb[70].mxu0  ;;  %v1843_v40 = vadd.f32 %v11709_v51, %v1842_v25 }
 0x175   : > { %v1197_v32 = vadd.f32 %v9564_v30, %v11700_v45  ;;  %v1188_v33 = vpop.f32.mrb[71].mxu1  ;;  %v1854_v37 = vadd.f32 %v9672_v31, %v11709_v51  ;;  %v1845_v38 = vpop.f32.mrb[71].mxu0 }
 0x176   : > { %v1189_v39 = vadd.f32 %v11700_v45, %v1188_v33  ;;  %v1846_v43 = vadd.f32 %v11709_v51, %v1845_v38 }
 0x177   : > { %8746 = vmatpush3.bf16.msra.mxu0 %v2527_v26  ;;  %v1299_v5 = vpack.c.bf16 %v1197_v32, %v1194_v23  ;;  %v1956_v46 = vpack.c.bf16 %v1854_v37, %v1851_v34 }
 0x178   : > { %10117 = vmatprep.subr.msk.bf16.mxu0 %vm658_vm1, %v3695_v44  ;;  %v1298_v2 = vpack.c.bf16 %v1189_v39, %v1186_v27  ;;  %v1955_v50 = vpack.c.bf16 %v1846_v43, %v1843_v40 }
 0x179   : > { %1316 = vst.msk [vmem:[#allocation3 + $0x98] sm:$0xff] %vm658_vm1, %v1299_v5  ;;  %1973 = vst.msk [vmem:[#allocation2 + $0x198] sm:$0xff] %vm658_vm1, %v1956_v46 }
 0x17a   : > { %1315 = vst.msk [vmem:[#allocation3 + $0x90] sm:$0xff] %vm658_vm1, %v1298_v2  ;;  %v9567_v49 = vpop.f32.mrb[72].mxu1  ;;  %1972 = vst.msk [vmem:[#allocation2 + $0x190] sm:$0xff] %vm658_vm1, %v1955_v50  ;;  %v9675_v52 = vpop.f32.mrb[72].mxu0 }
 0x17b   : > { %v1210_v55 = vadd.f32 %v9567_v49, %v11700_v45  ;;  %v1201_v56 = vpop.f32.mrb[73].mxu1  ;;  %v1858_v58 = vpop.f32.mrb[73].mxu0  ;;  %v1867_v1 = vadd.f32 %v9675_v52, %v11709_v51 }
 0x17c   : > { %v1202_v59 = vadd.f32 %v11700_v45, %v1201_v56  ;;  %v9568_v60 = vpop.f32.mrb[74].mxu1  ;;  %v9676_v62 = vpop.f32.mrb[74].mxu0  ;;  %v1859_v7 = vadd.f32 %v11709_v51, %v1858_v58 }
 0x17d   : > { %v1213_v63 = vadd.f32 %v9568_v60, %v11700_v45  ;;  %v1204_v0 = vpop.f32.mrb[75].mxu1  ;;  %v1870_v3 = vadd.f32 %v9676_v62, %v11709_v51  ;;  %v1861_v4 = vpop.f32.mrb[75].mxu0 }
 0x17e   : > { %v1205_v6 = vadd.f32 %v11700_v45, %v1204_v0  ;;  %v1862_v9 = vadd.f32 %v11709_v51, %v1861_v4 }
 0x17f   : > { %v1301_v10 = vpack.c.bf16 %v1213_v63, %v1210_v55  ;;  %v1958_v11 = vpack.c.bf16 %v1870_v3, %v1867_v1 }
 0x180   : > { %v1300_v14 = vpack.c.bf16 %v1205_v6, %v1202_v59  ;;  %v1957_v15 = vpack.c.bf16 %v1862_v9, %v1859_v7 }
 0x181   : > { %1318 = vst.msk [vmem:[#allocation3 + $0xa8] sm:$0xff] %vm658_vm1, %v1301_v10  ;;  %1975 = vst.msk [vmem:[#allocation2 + $0x1a8] sm:$0xff] %vm658_vm1, %v1958_v11 }
 0x182   : > { %1317 = vst.msk [vmem:[#allocation3 + $0xa0] sm:$0xff] %vm658_vm1, %v1300_v14  ;;  %v9571_v16 = vpop.f32.mrb[76].mxu1  ;;  %1974 = vst.msk [vmem:[#allocation2 + $0x1a0] sm:$0xff] %vm658_vm1, %v1957_v15  ;;  %v9679_v17 = vpop.f32.mrb[76].mxu0 }
 0x183   : > { %v1226_v18 = vadd.f32 %v9571_v16, %v11700_v45  ;;  %v1217_v21 = vpop.f32.mrb[77].mxu1  ;;  %v1874_v22 = vpop.f32.mrb[77].mxu0  ;;  %v1883_v30 = vadd.f32 %v9679_v17, %v11709_v51 }
 0x184   : > { %v1218_v23 = vadd.f32 %v11700_v45, %v1217_v21  ;;  %v9572_v24 = vpop.f32.mrb[78].mxu1  ;;  %v9680_v25 = vpop.f32.mrb[78].mxu0  ;;  %v1875_v34 = vadd.f32 %v11709_v51, %v1874_v22 }
 0x185   : > { %v1229_v26 = vadd.f32 %v9572_v24, %v11700_v45  ;;  %v1220_v27 = vpop.f32.mrb[79].mxu1  ;;  %v1886_v31 = vadd.f32 %v9680_v25, %v11709_v51  ;;  %v1877_v32 = vpop.f32.mrb[79].mxu0 }
 0x186   : > { %v1221_v33 = vadd.f32 %v11700_v45, %v1220_v27  ;;  %v1878_v37 = vadd.f32 %v11709_v51, %v1877_v32 }
 0x187   : > { %v1303_v38 = vpack.c.bf16 %v1229_v26, %v1226_v18  ;;  %v1960_v39 = vpack.c.bf16 %v1886_v31, %v1883_v30 }
 0x188   : > { %v1302_v40 = vpack.c.bf16 %v1221_v33, %v1218_v23  ;;  %v1959_v43 = vpack.c.bf16 %v1878_v37, %v1875_v34 }
 0x189   : > { %1320 = vst.msk [vmem:[#allocation3 + $0xb8] sm:$0xff] %vm658_vm1, %v1303_v38  ;;  %1977 = vst.msk [vmem:[#allocation2 + $0x1b8] sm:$0xff] %vm658_vm1, %v1960_v39 }
 0x18a   : > { %1319 = vst.msk [vmem:[#allocation3 + $0xb0] sm:$0xff] %vm658_vm1, %v1302_v40  ;;  %v9575_v44 = vpop.f32.mrb[80].mxu1  ;;  %1976 = vst.msk [vmem:[#allocation2 + $0x1b0] sm:$0xff] %vm658_vm1, %v1959_v43  ;;  %v9683_v5 = vpop.f32.mrb[80].mxu0 }
 0x18b   : > { %v1242_v46 = vadd.f32 %v9575_v44, %v11700_v45  ;;  %v1233_v2 = vpop.f32.mrb[81].mxu1  ;;  %v1890_v50 = vpop.f32.mrb[81].mxu0  ;;  %v1899_v59 = vadd.f32 %v9683_v5, %v11709_v51 }
 0x18c   : > { %v1234_v49 = vadd.f32 %v11700_v45, %v1233_v2  ;;  %v9576_v52 = vpop.f32.mrb[82].mxu1  ;;  %v9684_v55 = vpop.f32.mrb[82].mxu0  ;;  %v1891_v0 = vadd.f32 %v11709_v51, %v1890_v50 }
 0x18d   : > { %v1245_v56 = vadd.f32 %v9576_v52, %v11700_v45  ;;  %v1236_v58 = vpop.f32.mrb[83].mxu1  ;;  %v1902_v60 = vadd.f32 %v9684_v55, %v11709_v51  ;;  %v1893_v62 = vpop.f32.mrb[83].mxu0 }
 0x18e   : > { %v1237_v63 = vadd.f32 %v11700_v45, %v1236_v58  ;;  %v1894_v1 = vadd.f32 %v11709_v51, %v1893_v62 }
 0x18f   : > { %v1305_v3 = vpack.c.bf16 %v1245_v56, %v1242_v46  ;;  %v1962_v4 = vpack.c.bf16 %v1902_v60, %v1899_v59 }
 0x190   : > { %v1304_v6 = vpack.c.bf16 %v1237_v63, %v1234_v49  ;;  %v1961_v7 = vpack.c.bf16 %v1894_v1, %v1891_v0 }
 0x191   : > { %1322 = vst.msk [vmem:[#allocation3 + $0xc8] sm:$0xff] %vm658_vm1, %v1305_v3  ;;  %1979 = vst.msk [vmem:[#allocation2 + $0x1c8] sm:$0xff] %vm658_vm1, %v1962_v4 }
 0x192   : > { %1321 = vst.msk [vmem:[#allocation3 + $0xc0] sm:$0xff] %vm658_vm1, %v1304_v6  ;;  %v9579_v9 = vpop.f32.mrb[84].mxu1  ;;  %1978 = vst.msk [vmem:[#allocation2 + $0x1c0] sm:$0xff] %vm658_vm1, %v1961_v7  ;;  %v9687_v10 = vpop.f32.mrb[84].mxu0 }
 0x193   : > { %v1258_v11 = vadd.f32 %v9579_v9, %v11700_v45  ;;  %v1249_v14 = vpop.f32.mrb[85].mxu1  ;;  %v1906_v15 = vpop.f32.mrb[85].mxu0  ;;  %v1915_v23 = vadd.f32 %v9687_v10, %v11709_v51 }
 0x194   : > { %v1250_v16 = vadd.f32 %v11700_v45, %v1249_v14  ;;  %v9580_v17 = vpop.f32.mrb[86].mxu1  ;;  %v9688_v18 = vpop.f32.mrb[86].mxu0  ;;  %v1907_v27 = vadd.f32 %v11709_v51, %v1906_v15 }
 0x195   : > { %v1261_v21 = vadd.f32 %v9580_v17, %v11700_v45  ;;  %v1252_v22 = vpop.f32.mrb[87].mxu1  ;;  %v1918_v24 = vadd.f32 %v9688_v18, %v11709_v51  ;;  %v1909_v25 = vpop.f32.mrb[87].mxu0 }
 0x196   : > { %v1253_v26 = vadd.f32 %v11700_v45, %v1252_v22  ;;  %v1910_v30 = vadd.f32 %v11709_v51, %v1909_v25 }
 0x197   : > { %v1307_v31 = vpack.c.bf16 %v1261_v21, %v1258_v11  ;;  %v1964_v32 = vpack.c.bf16 %v1918_v24, %v1915_v23 }
 0x198   : > { %v1306_v33 = vpack.c.bf16 %v1253_v26, %v1250_v16  ;;  %v1963_v34 = vpack.c.bf16 %v1910_v30, %v1907_v27  ;;  %v11813_v27 = vld [vmem:[%s14168_s6 + $0x2] ss:$0 sm:$0xff] }
 0x199   : > { %1324 = vst.msk [vmem:[#allocation3 + $0xd8] sm:$0xff] %vm658_vm1, %v1307_v31  ;;  %1981 = vst.msk [vmem:[#allocation2 + $0x1d8] sm:$0xff] %vm658_vm1, %v1964_v32 }
 0x19a   : > { %1323 = vst.msk [vmem:[#allocation3 + $0xd0] sm:$0xff] %vm658_vm1, %v1306_v33  ;;  %v9583_v37 = vpop.f32.mrb[88].mxu1  ;;  %1980 = vst.msk [vmem:[#allocation2 + $0x1d0] sm:$0xff] %vm658_vm1, %v1963_v34  ;;  %v9691_v38 = vpop.f32.mrb[88].mxu0 }
 0x19b   : > { %v1274_v39 = vadd.f32 %v9583_v37, %v11700_v45  ;;  %v1265_v40 = vpop.f32.mrb[89].mxu1  ;;  %v1922_v43 = vpop.f32.mrb[89].mxu0  ;;  %v1931_v49 = vadd.f32 %v9691_v38, %v11709_v51 }
 0x19c   : > { %v1266_v44 = vadd.f32 %v11700_v45, %v1265_v40  ;;  %v9584_v5 = vpop.f32.mrb[90].mxu1  ;;  %v9692_v46 = vpop.f32.mrb[90].mxu0  ;;  %v1923_v58 = vadd.f32 %v11709_v51, %v1922_v43 }
 0x19d   : > { %v1277_v2 = vadd.f32 %v9584_v5, %v11700_v45  ;;  %v1268_v50 = vpop.f32.mrb[91].mxu1  ;;  %v1934_v52 = vadd.f32 %v9692_v46, %v11709_v51  ;;  %v1925_v55 = vpop.f32.mrb[91].mxu0 }
 0x19e   : > { %v1269_v56 = vadd.f32 %v11700_v45, %v1268_v50  ;;  %v1926_v59 = vadd.f32 %v11709_v51, %v1925_v55 }
 0x19f   : > { %v1309_v60 = vpack.c.bf16 %v1277_v2, %v1274_v39  ;;  %v1966_v62 = vpack.c.bf16 %v1934_v52, %v1931_v49 }
 0x1a0   : > { %v1308_v63 = vpack.c.bf16 %v1269_v56, %v1266_v44  ;;  %v1965_v0 = vpack.c.bf16 %v1926_v59, %v1923_v58  ;;  %v10188_v59 = vld [vmem:[%s14163_s1 + $0x18] sm:$0xff]  }
 0x1a1   : > { %1326 = vst.msk [vmem:[#allocation3 + $0xe8] sm:$0xff] %vm658_vm1, %v1309_v60  ;;  %1983 = vst.msk [vmem:[#allocation2 + $0x1e8] sm:$0xff] %vm658_vm1, %v1966_v62 }
 0x1a2   : > { %1325 = vst.msk [vmem:[#allocation3 + $0xe0] sm:$0xff] %vm658_vm1, %v1308_v63  ;;  %v9587_v1 = vpop.f32.mrb[92].mxu1  ;;  %1982 = vst.msk [vmem:[#allocation2 + $0x1e0] sm:$0xff] %vm658_vm1, %v1965_v0  ;;  %v9695_v3 = vpop.f32.mrb[92].mxu0 }
 0x1a3   : > { %v1290_v4 = vadd.f32 %v9587_v1, %v11700_v45  ;;  %v1281_v6 = vpop.f32.mrb[93].mxu1  ;;  %v1938_v7 = vpop.f32.mrb[93].mxu0  ;;  %v1947_v16 = vadd.f32 %v9695_v3, %v11709_v51 }
 0x1a4   : > { %v1282_v9 = vadd.f32 %v11700_v45, %v1281_v6  ;;  %v9588_v10 = vpop.f32.mrb[94].mxu1  ;;  %v9696_v11 = vpop.f32.mrb[94].mxu0  ;;  %v1939_v22 = vadd.f32 %v11709_v51, %v1938_v7 }
 0x1a5   : > { %v1293_v14 = vadd.f32 %v9588_v10, %v11700_v45  ;;  %v1284_v15 = vpop.f32.mrb[95].mxu1  ;;  %v1950_v17 = vadd.f32 %v9696_v11, %v11709_v51  ;;  %v1941_v18 = vpop.f32.mrb[95].mxu0 }
 0x1a6   : > { %v1285_v21 = vadd.f32 %v11700_v45, %v1284_v15  ;;  %v1942_v23 = vadd.f32 %v11709_v51, %v1941_v18  ;;  %v11822_v51 = vld [vmem:[%s14164_s2] ss:$0 sm:$0xff] }
 0x1a7   : > { %v1311_v24 = vpack.c.bf16 %v1293_v14, %v1290_v4  ;;  %v1968_v25 = vpack.c.bf16 %v1950_v17, %v1947_v16  ;;  %v3712_v18 = vld [vmem:[#allocation3 + $0xc0] sm:$0xff] }
 0x1a8   : > { %v1310_v26 = vpack.c.bf16 %v1285_v21, %v1282_v9  ;;  %v1967_v30 = vpack.c.bf16 %v1942_v23, %v1939_v22 }
 0x1a9   : > { %1328 = vst.msk [vmem:[#allocation3 + $0xf8] sm:$0xff] %vm658_vm1, %v1311_v24  ;;  %1985 = vst.msk [vmem:[#allocation2 + $0x1f8] sm:$0xff] %vm658_vm1, %v1968_v25 }
 0x1aa   : > { %1327 = vst.msk [vmem:[#allocation3 + $0xf0] sm:$0xff] %vm658_vm1, %v1310_v26  ;;  %v9631_v45 = vpop.f32.mrb[96].mxu1  ;;  %1984 = vst.msk [vmem:[#allocation2 + $0x1f0] sm:$0xff] %vm658_vm1, %v1967_v30  ;;  %v9739_v31 = vpop.f32.mrb[96].mxu0 }
 0x1ab   : > { %v1616_v32 = vadd.f32 %v9631_v45, %v11813_v27  ;;  %v1607_v33 = vpop.f32.mrb[97].mxu1  ;;  %v2361_v34 = vpop.f32.mrb[97].mxu0  ;;  %v2370_v44 = vadd.f32 %v9739_v31, %v11822_v51 }
 0x1ac   : > { %v1608_v37 = vadd.f32 %v11813_v27, %v1607_v33  ;;  %v9632_v38 = vpop.f32.mrb[98].mxu1  ;;  %v9740_v39 = vpop.f32.mrb[98].mxu0  ;;  %v2362_v50 = vadd.f32 %v11822_v51, %v2361_v34 }
 0x1ad   : > { %v1619_v40 = vadd.f32 %v9632_v38, %v11813_v27  ;;  %v1610_v43 = vpop.f32.mrb[99].mxu1  ;;  %v2373_v5 = vadd.f32 %v9740_v39, %v11822_v51  ;;  %v2364_v46 = vpop.f32.mrb[99].mxu0 }
 0x1ae   : > { %v1611_v2 = vadd.f32 %v11813_v27, %v1610_v43  ;;  %v2365_v49 = vadd.f32 %v11822_v51, %v2364_v46 }
 0x1af   : > { %v1735_v52 = vpack.c.bf16 %v1619_v40, %v1616_v32  ;;  %v2489_v55 = vpack.c.bf16 %v2373_v5, %v2370_v44 }
 0x1b0   : > { %v1734_v56 = vpack.c.bf16 %v1611_v2, %v1608_v37  ;;  %v2488_v58 = vpack.c.bf16 %v2365_v49, %v2362_v50 }
 0x1b1   : > { %1752 = vst.msk [vmem:[#allocation3 + $0x108] sm:$0xff] %vm658_vm1, %v1735_v52 }
 0x1b2   : > { %1751 = vst.msk [vmem:[#allocation3 + $0x100] sm:$0xff] %vm658_vm1, %v1734_v56  ;;  %v9635_v60 = vpop.f32.mrb[100].mxu1  ;;  %8699 = vmatprep.mubr.msk.bf16.mxu1 %vm658_vm1, %v2488_v58  ;;  %v9743_v62 = vpop.f32.mrb[100].mxu0 }
 0x1b3   : > { %v1632_v63 = vadd.f32 %v9635_v60, %v11813_v27  ;;  %v1623_v0 = vpop.f32.mrb[101].mxu1  ;;  %8700 = vmatmul.mubr.msk.bf16.vlgmr.msra.gmra.mrb[160].mxu1 %vm658_vm1, %v2488_v58  ;;  %v2386_v1 = vadd.f32 %v9743_v62, %v11822_v51  ;;  %v2377_v3 = vpop.f32.mrb[101].mxu0 }
 0x1b4   : > { %v1624_v4 = vadd.f32 %v11813_v27, %v1623_v0  ;;  %v9636_v6 = vpop.f32.mrb[102].mxu1  ;;  %8701 = vmatprep.mubr.msk.bf16.mxu1 %vm658_vm1, %v2489_v55  ;;  %v2378_v7 = vadd.f32 %v11822_v51, %v2377_v3  ;;  %v9744_v9 = vpop.f32.mrb[102].mxu0  ;;  %9770 = vmatpush3.bf16.msra.mxu1 %v11716_v61 }
 0x1b5   : > { %v1635_v10 = vadd.f32 %v9636_v6, %v11813_v27  ;;  %v1626_v11 = vpop.f32.mrb[103].mxu1  ;;  %v2389_v14 = vadd.f32 %v9744_v9, %v11822_v51  ;;  %v2380_v15 = vpop.f32.mrb[103].mxu0  ;;  %9771 = vmatprep.subr.bf16.mxu1 %v10188_v59 }
 0x1b6   : > { %v1627_v16 = vadd.f32 %v11813_v27, %v1626_v11  ;;  %v2381_v17 = vadd.f32 %v11822_v51, %v2380_v15 }
 0x1b7   : > { %v1737_v21 = vpack.c.bf16 %v1635_v10, %v1632_v63  ;;  %v2491_v22 = vpack.c.bf16 %v2389_v14, %v2386_v1 }
 0x1b8   : > { %v1736_v23 = vpack.c.bf16 %v1627_v16, %v1624_v4  ;;  %v2490_v24 = vpack.c.bf16 %v2381_v17, %v2378_v7  ;;  %9772 = vmatpush3.bf16.msra.mxu1 %v10188_v59 }
 0x1b9   : > { %1754 = vst.msk [vmem:[#allocation3 + $0x118] sm:$0xff] %vm658_vm1, %v1737_v21  ;;  %8909 = vmatprep.subr.bf16.mxu1 %v3712_v18 }
 0x1ba   : > { %1753 = vst.msk [vmem:[#allocation3 + $0x110] sm:$0xff] %vm658_vm1, %v1736_v23  ;;  %v9639_v61 = vpop.f32.mrb[104].mxu1  ;;  %v9747_v25 = vpop.f32.mrb[104].mxu0 }
 0x1bb   : > { %v1648_v26 = vadd.f32 %v9639_v61, %v11813_v27  ;;  %v1639_v30 = vpop.f32.mrb[105].mxu1  ;;  %8702 = vmatmul.mubr.msk.bf16.gmra.mrb[164].mxu1 %vm658_vm1, %v2489_v55  ;;  %v2402_v45 = vadd.f32 %v9747_v25, %v11822_v51  ;;  %v2393_v31 = vpop.f32.mrb[105].mxu0 }
 0x1bc   : > { %v1640_v32 = vadd.f32 %v11813_v27, %v1639_v30  ;;  %v9640_v33 = vpop.f32.mrb[106].mxu1  ;;  %8703 = vmatprep.mubr.msk.bf16.mxu1 %vm658_vm1, %v2490_v24  ;;  %v2394_v34 = vadd.f32 %v11822_v51, %v2393_v31  ;;  %v9748_v37 = vpop.f32.mrb[106].mxu0 }
 0x1bd   : > { %v1651_v38 = vadd.f32 %v9640_v33, %v11813_v27  ;;  %v1642_v39 = vpop.f32.mrb[107].mxu1  ;;  %v2405_v40 = vadd.f32 %v9748_v37, %v11822_v51  ;;  %v2396_v43 = vpop.f32.mrb[107].mxu0 }
 0x1be   : > { %v1643_v44 = vadd.f32 %v11813_v27, %v1642_v39  ;;  %v2397_v5 = vadd.f32 %v11822_v51, %v2396_v43 }
 0x1bf   : > { %v1739_v46 = vpack.c.bf16 %v1651_v38, %v1648_v26  ;;  %v11861_v2 = vpack.c.bf16 %v2405_v40, %v2402_v45 }
 0x1c0   : > { %v1738_v50 = vpack.c.bf16 %v1643_v44, %v1640_v32  ;;  %v2492_v49 = vpack.c.bf16 %v2397_v5, %v2394_v34 }
 0x1c1   : > { %1756 = vst.msk [vmem:[#allocation3 + $0x128] sm:$0xff] %vm658_vm1, %v1739_v46 }
 0x1c2   : > { %1755 = vst.msk [vmem:[#allocation3 + $0x120] sm:$0xff] %vm658_vm1, %v1738_v50  ;;  %v9643_v52 = vpop.f32.mrb[108].mxu1  ;;  %v9751_v55 = vpop.f32.mrb[108].mxu0 }
 0x1c3   : > { %v1664_v56 = vadd.f32 %v9643_v52, %v11813_v27  ;;  %v1655_v58 = vpop.f32.mrb[109].mxu1  ;;  %8704 = vmatmul.mubr.msk.bf16.gmra.mrb[168].mxu1 %vm658_vm1, %v2490_v24  ;;  %v2418_v59 = vadd.f32 %v9751_v55, %v11822_v51  ;;  %v2409_v60 = vpop.f32.mrb[109].mxu0 }
 0x1c4   : > { %v1656_v62 = vadd.f32 %v11813_v27, %v1655_v58  ;;  %v9644_v63 = vpop.f32.mrb[110].mxu1  ;;  %8705 = vmatprep.mubr.msk.bf16.mxu1 %vm658_vm1, %v2491_v22  ;;  %v2410_v0 = vadd.f32 %v11822_v51, %v2409_v60  ;;  %v9752_v1 = vpop.f32.mrb[110].mxu0 }
 0x1c5   : > { %v1667_v3 = vadd.f32 %v9644_v63, %v11813_v27  ;;  %v1658_v4 = vpop.f32.mrb[111].mxu1  ;;  %v2421_v6 = vadd.f32 %v9752_v1, %v11822_v51  ;;  %v2412_v7 = vpop.f32.mrb[111].mxu0 }
 0x1c6   : > { %v1659_v9 = vadd.f32 %v11813_v27, %v1658_v4  ;;  %v2413_v10 = vadd.f32 %v11822_v51, %v2412_v7 }
 0x1c7   : > { %v1741_v11 = vpack.c.bf16 %v1667_v3, %v1664_v56  ;;  %v11875_v14 = vpack.c.bf16 %v2421_v6, %v2418_v59 }
 0x1c8   : > { %v1740_v15 = vpack.c.bf16 %v1659_v9, %v1656_v62  ;;  %v11877_v16 = vpack.c.bf16 %v2413_v10, %v2410_v0 }
 0x1c9   : > { %1758 = vst.msk [vmem:[#allocation3 + $0x138] sm:$0xff] %vm658_vm1, %v1741_v11 }
 0x1ca   : > { %1757 = vst.msk [vmem:[#allocation3 + $0x130] sm:$0xff] %vm658_vm1, %v1740_v15  ;;  %v9647_v17 = vpop.f32.mrb[112].mxu1  ;;  %v9755_v18 = vpop.f32.mrb[112].mxu0 }
 0x1cb   : > { %v1680_v21 = vadd.f32 %v9647_v17, %v11813_v27  ;;  %v1671_v23 = vpop.f32.mrb[113].mxu1  ;;  %8706 = vmatmul.mubr.msk.bf16.gmra.mrb[172].mxu1 %vm658_vm1, %v2491_v22  ;;  %v2434_v24 = vadd.f32 %v9755_v18, %v11822_v51  ;;  %v2425_v61 = vpop.f32.mrb[113].mxu0 }
 0x1cc   : > { %v1672_v25 = vadd.f32 %v11813_v27, %v1671_v23  ;;  %v9648_v26 = vpop.f32.mrb[114].mxu1  ;;  %8707 = vmatprep.mubr.msk.bf16.mxu1 %vm658_vm1, %v2492_v49  ;;  %v2426_v30 = vadd.f32 %v11822_v51, %v2425_v61  ;;  %v9756_v45 = vpop.f32.mrb[114].mxu0 }
 0x1cd   : > { %v1683_v31 = vadd.f32 %v9648_v26, %v11813_v27  ;;  %v1674_v32 = vpop.f32.mrb[115].mxu1  ;;  %v2437_v33 = vadd.f32 %v9756_v45, %v11822_v51  ;;  %v2428_v34 = vpop.f32.mrb[115].mxu0 }
 0x1ce   : > { %v1675_v37 = vadd.f32 %v11813_v27, %v1674_v32  ;;  %v2429_v22 = vadd.f32 %v11822_v51, %v2428_v34 }
 0x1cf   : > { %v1743_v38 = vpack.c.bf16 %v1683_v31, %v1680_v21  ;;  %v11891_v39 = vpack.c.bf16 %v2437_v33, %v2434_v24 }
 0x1d0   : > { %v1742_v40 = vpack.c.bf16 %v1675_v37, %v1672_v25  ;;  %v11893_v43 = vpack.c.bf16 %v2429_v22, %v2426_v30 }
 0x1d1   : > { %1760 = vst.msk [vmem:[#allocation3 + $0x148] sm:$0xff] %vm658_vm1, %v1743_v38 }
 0x1d2   : > { %1759 = vst.msk [vmem:[#allocation3 + $0x140] sm:$0xff] %vm658_vm1, %v1742_v40  ;;  %v9651_v44 = vpop.f32.mrb[116].mxu1  ;;  %v9759_v5 = vpop.f32.mrb[116].mxu0 }
 0x1d3   : > { %v1696_v46 = vadd.f32 %v9651_v44, %v11813_v27  ;;  %v1687_v50 = vpop.f32.mrb[117].mxu1  ;;  %8708 = vmatmul.mubr.msk.bf16.gmra.mrb[176].mxu1 %vm658_vm1, %v2492_v49  ;;  %v2450_v52 = vadd.f32 %v9759_v5, %v11822_v51  ;;  %v2441_v55 = vpop.f32.mrb[117].mxu0 }
 0x1d4   : > { %v1688_v56 = vadd.f32 %v11813_v27, %v1687_v50  ;;  %v9652_v58 = vpop.f32.mrb[118].mxu1  ;;  %8709 = vmatprep.mubr.msk.bf16.mxu1 %vm658_vm1, %v11861_v2  ;;  %v2442_v59 = vadd.f32 %v11822_v51, %v2441_v55  ;;  %v9760_v60 = vpop.f32.mrb[118].mxu0 }
 0x1d5   : > { %v1699_v62 = vadd.f32 %v9652_v58, %v11813_v27  ;;  %v1690_v63 = vpop.f32.mrb[119].mxu1  ;;  %v2453_v0 = vadd.f32 %v9760_v60, %v11822_v51  ;;  %v2444_v1 = vpop.f32.mrb[119].mxu0 }
 0x1d6   : > { %v1691_v49 = vadd.f32 %v11813_v27, %v1690_v63  ;;  %v2445_v3 = vadd.f32 %v11822_v51, %v2444_v1 }
 0x1d7   : > { %v1745_v4 = vpack.c.bf16 %v1699_v62, %v1696_v46  ;;  %v11908_v6 = vpack.c.bf16 %v2453_v0, %v2450_v52 }
 0x1d8   : > { %v1744_v7 = vpack.c.bf16 %v1691_v49, %v1688_v56  ;;  %v11910_v9 = vpack.c.bf16 %v2445_v3, %v2442_v59 }
 0x1d9   : > { %1762 = vst.msk [vmem:[#allocation3 + $0x158] sm:$0xff] %vm658_vm1, %v1745_v4  ;;  %v11949_v4 = vld [vmem:[%s14168_s6 + $0x3] ss:$0 sm:$0xff] }
 0x1da   : > { %1761 = vst.msk [vmem:[#allocation3 + $0x150] sm:$0xff] %vm658_vm1, %v1744_v7  ;;  %v9655_v10 = vpop.f32.mrb[120].mxu1  ;;  %v9763_v11 = vpop.f32.mrb[120].mxu0 }
 0x1db   : > { %v1712_v15 = vadd.f32 %v9655_v10, %v11813_v27  ;;  %v1703_v17 = vpop.f32.mrb[121].mxu1  ;;  %8710 = vmatmul.mubr.msk.bf16.gmra.mrb[180].mxu1 %vm658_vm1, %v11861_v2  ;;  %v2466_v18 = vadd.f32 %v9763_v11, %v11822_v51  ;;  %v2457_v21 = vpop.f32.mrb[121].mxu0 }
 0x1dc   : > { %v1704_v23 = vadd.f32 %v11813_v27, %v1703_v17  ;;  %v9656_v24 = vpop.f32.mrb[122].mxu1  ;;  %8711 = vmatprep.mubr.msk.bf16.mxu1 %vm658_vm1, %v11877_v16  ;;  %v2458_v61 = vadd.f32 %v11822_v51, %v2457_v21  ;;  %v9764_v25 = vpop.f32.mrb[122].mxu0 }
 0x1dd   : > { %v1715_v26 = vadd.f32 %v9656_v24, %v11813_v27  ;;  %v1706_v30 = vpop.f32.mrb[123].mxu1  ;;  %v2469_v45 = vadd.f32 %v9764_v25, %v11822_v51  ;;  %v2460_v31 = vpop.f32.mrb[123].mxu0 }
 0x1de   : > { %v1707_v2 = vadd.f32 %v11813_v27, %v1706_v30  ;;  %v2461_v32 = vadd.f32 %v11822_v51, %v2460_v31 }
 0x1df   : > { %v1747_v33 = vpack.c.bf16 %v1715_v26, %v1712_v15  ;;  %v11926_v34 = vpack.c.bf16 %v2469_v45, %v2466_v18 }
 0x1e0   : > { %v1746_v37 = vpack.c.bf16 %v1707_v2, %v1704_v23  ;;  %v11928_v22 = vpack.c.bf16 %v2461_v32, %v2458_v61 }
 0x1e1   : > { %1764 = vst.msk [vmem:[#allocation3 + $0x168] sm:$0xff] %vm658_vm1, %v1747_v33 }
 0x1e2   : > { %1763 = vst.msk [vmem:[#allocation3 + $0x160] sm:$0xff] %vm658_vm1, %v1746_v37  ;;  %v9659_v38 = vpop.f32.mrb[124].mxu1  ;;  %v9767_v40 = vpop.f32.mrb[124].mxu0 }
 0x1e3   : > { %v1728_v44 = vadd.f32 %v9659_v38, %v11813_v27  ;;  %v1719_v5 = vpop.f32.mrb[125].mxu1  ;;  %8712 = vmatmul.mubr.msk.bf16.gmra.mrb[184].mxu1 %vm658_vm1, %v11877_v16  ;;  %v2482_v46 = vadd.f32 %v9767_v40, %v11822_v51  ;;  %v2473_v50 = vpop.f32.mrb[125].mxu0 }
 0x1e4   : > { %v1720_v52 = vadd.f32 %v11813_v27, %v1719_v5  ;;  %v9660_v55 = vpop.f32.mrb[126].mxu1  ;;  %8713 = vmatprep.mubr.msk.bf16.mxu1 %vm658_vm1, %v11875_v14  ;;  %v2474_v56 = vadd.f32 %v11822_v51, %v2473_v50  ;;  %v9768_v58 = vpop.f32.mrb[126].mxu0 }
 0x1e5   : > { %v1731_v59 = vadd.f32 %v9660_v55, %v11813_v27  ;;  %v1722_v60 = vpop.f32.mrb[127].mxu1  ;;  %v2485_v62 = vadd.f32 %v9768_v58, %v11822_v51  ;;  %v2476_v63 = vpop.f32.mrb[127].mxu0 }
 0x1e6   : > { %v1723_v16 = vadd.f32 %v11813_v27, %v1722_v60  ;;  %v2477_v0 = vadd.f32 %v11822_v51, %v2476_v63 }
 0x1e7   : > { %v1749_v1 = vpack.c.bf16 %v1731_v59, %v1728_v44  ;;  %v11944_v49 = vpack.c.bf16 %v2485_v62, %v2482_v46 }
 0x1e8   : > { %v1748_v3 = vpack.c.bf16 %v1723_v16, %v1720_v52  ;;  %v11951_v7 = vpack.c.bf16 %v2477_v0, %v2474_v56 }
 0x1e9   : > { %1766 = vst.msk [vmem:[#allocation3 + $0x178] sm:$0xff] %vm658_vm1, %v1749_v1 }
 0x1ea   : > { %1765 = vst.msk [vmem:[#allocation3 + $0x170] sm:$0xff] %vm658_vm1, %v1748_v3  ;;  %v9703_v10 = vpop.f32.mrb[128].mxu1 }
 0x1eb   : > { %v2054_v27 = vadd.f32 %v9703_v10, %v11949_v4  ;;  %v2045_v11 = vpop.f32.mrb[129].mxu1  ;;  %8714 = vmatmul.mubr.msk.bf16.gmra.mrb[188].mxu1 %vm658_vm1, %v11875_v14 }
 0x1ec   : > { %v2046_v51 = vadd.f32 %v11949_v4, %v2045_v11  ;;  %v9704_v15 = vpop.f32.mrb[130].mxu1  ;;  %8715 = vmatprep.mubr.msk.bf16.mxu1 %vm658_vm1, %v11893_v43 }
 0x1ed   : > { %v2057_v17 = vadd.f32 %v9704_v15, %v11949_v4  ;;  %v2048_v18 = vpop.f32.mrb[131].mxu1 }
 0x1ee   : > { %v2049_v21 = vadd.f32 %v11949_v4, %v2048_v18 }
 0x1ef   : > { %v2173_v23 = vpack.c.bf16 %v2057_v17, %v2054_v27 }
 0x1f0   : > { %v2172_v24 = vpack.c.bf16 %v2049_v21, %v2046_v51 }
 0x1f1   : > { %2190 = vst.msk [vmem:[#allocation3 + $0x188] sm:$0xff] %vm658_vm1, %v2173_v23 }
 0x1f2   : > { %2189 = vst.msk [vmem:[#allocation3 + $0x180] sm:$0xff] %vm658_vm1, %v2172_v24  ;;  %v9707_v61 = vpop.f32.mrb[132].mxu1 }
 0x1f3   : > { %v2070_v14 = vadd.f32 %v9707_v61, %v11949_v4  ;;  %v2061_v25 = vpop.f32.mrb[133].mxu1  ;;  %8716 = vmatmul.mubr.msk.bf16.gmra.mrb[192].mxu1 %vm658_vm1, %v11893_v43 }
 0x1f4   : > { %v2062_v26 = vadd.f32 %v11949_v4, %v2061_v25  ;;  %v9708_v30 = vpop.f32.mrb[134].mxu1  ;;  %8717 = vmatprep.mubr.msk.bf16.mxu1 %vm658_vm1, %v11891_v39 }
 0x1f5   : > { %v2073_v45 = vadd.f32 %v9708_v30, %v11949_v4  ;;  %v2064_v31 = vpop.f32.mrb[135].mxu1 }
 0x1f6   : > { %v2065_v2 = vadd.f32 %v11949_v4, %v2064_v31 }
 0x1f7   : > { %v2175_v32 = vpack.c.bf16 %v2073_v45, %v2070_v14 }
 0x1f8   : > { %v2174_v33 = vpack.c.bf16 %v2065_v2, %v2062_v26 }
 0x1f9   : > { %2192 = vst.msk [vmem:[#allocation3 + $0x198] sm:$0xff] %vm658_vm1, %v2175_v32 }
 0x1fa   : > { %2191 = vst.msk [vmem:[#allocation3 + $0x190] sm:$0xff] %vm658_vm1, %v2174_v33  ;;  %v9711_v37 = vpop.f32.mrb[136].mxu1 }
 0x1fb   : > { %v2086_v43 = vadd.f32 %v9711_v37, %v11949_v4  ;;  %v2077_v38 = vpop.f32.mrb[137].mxu1  ;;  %8718 = vmatmul.mubr.msk.bf16.gmra.mrb[196].mxu1 %vm658_vm1, %v11891_v39 }
 0x1fc   : > { %v2078_v40 = vadd.f32 %v11949_v4, %v2077_v38  ;;  %v9712_v44 = vpop.f32.mrb[138].mxu1  ;;  %8719 = vmatprep.mubr.msk.bf16.mxu1 %vm658_vm1, %v11910_v9 }
 0x1fd   : > { %v2089_v5 = vadd.f32 %v9712_v44, %v11949_v4  ;;  %v2080_v46 = vpop.f32.mrb[139].mxu1 }
 0x1fe   : > { %v2081_v50 = vadd.f32 %v11949_v4, %v2080_v46 }
 0x1ff   : > { %v2177_v52 = vpack.c.bf16 %v2089_v5, %v2086_v43 }
 0x200   : > { %v2176_v55 = vpack.c.bf16 %v2081_v50, %v2078_v40 }
 0x201   : > { %2194 = vst.msk [vmem:[#allocation3 + $0x1a8] sm:$0xff] %vm658_vm1, %v2177_v52 }
 0x202   : > { %2193 = vst.msk [vmem:[#allocation3 + $0x1a0] sm:$0xff] %vm658_vm1, %v2176_v55  ;;  %v9715_v56 = vpop.f32.mrb[140].mxu1 }
 0x203   : > { %v2102_v39 = vadd.f32 %v9715_v56, %v11949_v4  ;;  %v2093_v58 = vpop.f32.mrb[141].mxu1  ;;  %8720 = vmatmul.mubr.msk.bf16.gmra.mrb[200].mxu1 %vm658_vm1, %v11910_v9 }
 0x204   : > { %v2094_v59 = vadd.f32 %v11949_v4, %v2093_v58  ;;  %v9716_v60 = vpop.f32.mrb[142].mxu1  ;;  %8721 = vmatprep.mubr.msk.bf16.mxu1 %vm658_vm1, %v11908_v6 }
 0x205   : > { %v2105_v62 = vadd.f32 %v9716_v60, %v11949_v4  ;;  %v2096_v63 = vpop.f32.mrb[143].mxu1 }
 0x206   : > { %v2097_v16 = vadd.f32 %v11949_v4, %v2096_v63  ;;  %v3714_v63 = vld [vmem:[#allocation3 + $0xd0] sm:$0xff] }
 0x207   : > { %v2179_v0 = vpack.c.bf16 %v2105_v62, %v2102_v39  ;;  %v3713_v62 = vld [vmem:[#allocation3 + $0xc8] sm:$0xff] }
 0x208   : > { %v2178_v1 = vpack.c.bf16 %v2097_v16, %v2094_v59  ;;  %v3706_v16 = vld [vmem:[#allocation3 + $0x90] sm:$0xff] }
 0x209   : > { %2196 = vst.msk [vmem:[#allocation3 + $0x1b8] sm:$0xff] %vm658_vm1, %v2179_v0  ;;  %v3707_v0 = vld [vmem:[#allocation3 + $0x98] sm:$0xff] }
 0x20a   : > { %2195 = vst.msk [vmem:[#allocation3 + $0x1b0] sm:$0xff] %vm658_vm1, %v2178_v1  ;;  %v9719_v3 = vpop.f32.mrb[144].mxu1  ;;  %v3716_v1 = vld [vmem:[#allocation3 + $0xe0] sm:$0xff] }
 0x20b   : > { %v2118_v9 = vadd.f32 %v9719_v3, %v11949_v4  ;;  %v2109_v10 = vpop.f32.mrb[145].mxu1  ;;  %8722 = vmatmul.mubr.msk.bf16.gmra.mrb[204].mxu1 %vm658_vm1, %v11908_v6  ;;  %v3708_v3 = vld [vmem:[#allocation3 + $0xa0] sm:$0xff] }
 0x20c   : > { %v2110_v27 = vadd.f32 %v11949_v4, %v2109_v10  ;;  %v9720_v11 = vpop.f32.mrb[146].mxu1  ;;  %8723 = vmatprep.mubr.msk.bf16.mxu1 %vm658_vm1, %v11928_v22  ;;  %v3709_v10 = vld [vmem:[#allocation3 + $0xa8] sm:$0xff] }
 0x20d   : > { %v2121_v51 = vadd.f32 %v9720_v11, %v11949_v4  ;;  %v2112_v15 = vpop.f32.mrb[147].mxu1  ;;  %v3710_v11 = vld [vmem:[#allocation3 + $0xb0] sm:$0xff] }
 0x20e   : > { %v2113_v17 = vadd.f32 %v11949_v4, %v2112_v15  ;;  %v3711_v15 = vld [vmem:[#allocation3 + $0xb8] sm:$0xff] }
 0x20f   : > { %v2181_v18 = vpack.c.bf16 %v2121_v51, %v2118_v9  ;;  %v3717_v9 = vld [vmem:[#allocation3 + $0xe8] sm:$0xff]  ;;  %v3719_v51 = vld [vmem:[#allocation3 + $0xf8] sm:$0xff] }
 0x210   : > { %v2180_v21 = vpack.c.bf16 %v2113_v17, %v2110_v27  ;;  %v3718_v27 = vld [vmem:[#allocation3 + $0xf0] sm:$0xff] }
 0x211   : > { %2198 = vst.msk [vmem:[#allocation3 + $0x1c8] sm:$0xff] %vm658_vm1, %v2181_v18 }
 0x212   : > { %2197 = vst.msk [vmem:[#allocation3 + $0x1c0] sm:$0xff] %vm658_vm1, %v2180_v21  ;;  %v9723_v23 = vpop.f32.mrb[148].mxu1 }
 0x213   : > { %v2134_v6 = vadd.f32 %v9723_v23, %v11949_v4  ;;  %v2125_v24 = vpop.f32.mrb[149].mxu1  ;;  %8724 = vmatmul.mubr.msk.bf16.gmra.mrb[208].mxu1 %vm658_vm1, %v11928_v22 }
 0x214   : > { %v2126_v61 = vadd.f32 %v11949_v4, %v2125_v24  ;;  %v9724_v14 = vpop.f32.mrb[150].mxu1  ;;  %8725 = vmatprep.mubr.msk.bf16.mxu1 %vm658_vm1, %v11926_v34 }
 0x215   : > { %v2137_v25 = vadd.f32 %v9724_v14, %v11949_v4  ;;  %v2128_v26 = vpop.f32.mrb[151].mxu1 }
 0x216   : > { %v2129_v30 = vadd.f32 %v11949_v4, %v2128_v26 }
 0x217   : > { %v2183_v45 = vpack.c.bf16 %v2137_v25, %v2134_v6 }
 0x218   : > { %v2182_v31 = vpack.c.bf16 %v2129_v30, %v2126_v61 }
 0x219   : > { %2200 = vst.msk [vmem:[#allocation3 + $0x1d8] sm:$0xff] %vm658_vm1, %v2183_v45 }
 0x21a   : > { %2199 = vst.msk [vmem:[#allocation3 + $0x1d0] sm:$0xff] %vm658_vm1, %v2182_v31  ;;  %v9727_v2 = vpop.f32.mrb[152].mxu1 }
 0x21b   : > { %v2150_v22 = vadd.f32 %v9727_v2, %v11949_v4  ;;  %v2141_v32 = vpop.f32.mrb[153].mxu1  ;;  %8726 = vmatmul.mubr.msk.bf16.gmra.mrb[212].mxu1 %vm658_vm1, %v11926_v34 }
 0x21c   : > { %v2142_v33 = vadd.f32 %v11949_v4, %v2141_v32  ;;  %v9728_v37 = vpop.f32.mrb[154].mxu1  ;;  %8727 = vmatprep.mubr.msk.bf16.mxu1 %vm658_vm1, %v11951_v7 }
 0x21d   : > { %v2153_v43 = vadd.f32 %v9728_v37, %v11949_v4  ;;  %v2144_v38 = vpop.f32.mrb[155].mxu1 }
 0x21e   : > { %v2145_v40 = vadd.f32 %v11949_v4, %v2144_v38 }
 0x21f   : > { %v2185_v44 = vpack.c.bf16 %v2153_v43, %v2150_v22 }
 0x220   : > { %v2184_v5 = vpack.c.bf16 %v2145_v40, %v2142_v33 }
 0x221   : > { %2202 = vst.msk [vmem:[#allocation3 + $0x1e8] sm:$0xff] %vm658_vm1, %v2185_v44 }
 0x222   : > { %2201 = vst.msk [vmem:[#allocation3 + $0x1e0] sm:$0xff] %vm658_vm1, %v2184_v5  ;;  %v9731_v46 = vpop.f32.mrb[156].mxu1 }
 0x223   : > { %v2166_v34 = vadd.f32 %v9731_v46, %v11949_v4  ;;  %v2157_v50 = vpop.f32.mrb[157].mxu1  ;;  %8728 = vmatmul.mubr.msk.bf16.gmra.mrb[216].mxu1 %vm658_vm1, %v11951_v7  ;;  %v3704_v7 = vld [vmem:[#allocation3 + $0x80] sm:$0xff] }
 0x224   : > { %v2158_v52 = vadd.f32 %v11949_v4, %v2157_v50  ;;  %v9732_v55 = vpop.f32.mrb[158].mxu1  ;;  %8729 = vmatprep.mubr.msk.bf16.mxu1 %vm658_vm1, %v11944_v49 }
 0x225   : > { %v2169_v56 = vadd.f32 %v9732_v55, %v11949_v4  ;;  %v2160_v39 = vpop.f32.mrb[159].mxu1 }
 0x226   : > { %v2161_v58 = vadd.f32 %v11949_v4, %v2160_v39  ;;  %v3705_v4 = vld [vmem:[#allocation3 + $0x88] sm:$0xff] }
 0x227   : > { %v2187_v59 = vpack.c.bf16 %v2169_v56, %v2166_v34 }
 0x228   : > { %v2186_v60 = vpack.c.bf16 %v2161_v58, %v2158_v52 }
 0x229   : > { %2204 = vst.msk [vmem:[#allocation3 + $0x1f8] sm:$0xff] %vm658_vm1, %v2187_v59 }
 0x22a   : > { %2203 = vst.msk [vmem:[#allocation3 + $0x1f0] sm:$0xff] %vm658_vm1, %v2186_v60 }
 0x22b   : > { %8730 = vmatmul.mubr.msk.bf16.gmra.mrb[220].mxu1 %vm658_vm1, %v11944_v49  ;;  %v3715_v49 = vld [vmem:[#allocation3 + $0xd8] sm:$0xff] }
 0x22c   : > { %9773 = vmatprep.mubr.msk.bf16.mxu1 %vm432_vm0, %v11081_v8 }
 0x233   : > { %9774 = vmatmul.mubr.msk.bf16.vlgmr.msra.gmra.mrb[224].mxu1 %vm432_vm0, %v11086_v12 }
 0x234   : > { %8910 = vmatpush3.bf16.msra.mxu1 %v3704_v7  ;;  %9777 = vmatprep.mubr.msk.bf16.mxu1 %vm432_vm0, %v11088_v13 }
 0x235   : > { %8911 = vmatprep.subr.bf16.mxu1 %v3713_v62 }
 0x238   : > { %8912 = vmatpush3.bf16.msra.mxu1 %v3705_v4 }
 0x239   : > { %8913 = vmatprep.subr.bf16.mxu1 %v3714_v63 }
 0x23b   : > { %9778 = vmatmul.mubr.msk.bf16.gmra.mrb[228].mxu1 %vm432_vm0, %v11109_v19 }
 0x23c   : > { %8914 = vmatpush3.bf16.msra.mxu1 %v3706_v16  ;;  %9781 = vmatprep.mubr.msk.bf16.mxu1 %vm432_vm0, %v11111_v20 }
 0x23d   : > { %8915 = vmatprep.subr.bf16.mxu1 %v3715_v49 }
 0x240   : > { %8916 = vmatpush3.bf16.msra.mxu1 %v3707_v0 }
 0x241   : > { %8917 = vmatprep.subr.bf16.mxu1 %v3716_v1 }
 0x243   : > { %9782 = vmatmul.mubr.msk.bf16.gmra.mrb[232].mxu1 %vm432_vm0, %v11137_v28 }
 0x244   : > { %8918 = vmatpush3.bf16.msra.mxu1 %v3708_v3  ;;  %9785 = vmatprep.mubr.msk.bf16.mxu1 %vm432_vm0, %v11139_v29 }
 0x245   : > { %8919 = vmatprep.subr.bf16.mxu1 %v3717_v9 }
 0x248   : > { %8920 = vmatpush3.bf16.msra.mxu1 %v3709_v10 }
 0x249   : > { %8921 = vmatprep.subr.bf16.mxu1 %v3718_v27 }
 0x24b   : > { %9786 = vmatmul.mubr.msk.bf16.gmra.mrb[236].mxu1 %vm432_vm0, %v11156_v35 }
 0x24c   : > { %8922 = vmatpush3.bf16.msra.mxu1 %v3710_v11  ;;  %9789 = vmatprep.mubr.msk.bf16.mxu1 %vm432_vm0, %v11158_v36 }
 0x24d   : > { %8923 = vmatprep.subr.bf16.mxu1 %v3719_v51 }
 0x250   : > { %8924 = vmatpush3.bf16.msra.mxu1 %v3711_v15 }
 0x253   : > { %9790 = vmatmul.mubr.msk.bf16.gmra.mrb[240].mxu1 %vm432_vm0, %v11172_v41 }
 0x254   : > { %9793 = vmatprep.mubr.msk.bf16.mxu1 %vm432_vm0, %v11174_v42 }
 0x25b   : > { %9794 = vmatmul.mubr.msk.bf16.gmra.mrb[244].mxu1 %vm432_vm0, %v11188_v47 }
 0x25c   : > { %9797 = vmatprep.mubr.msk.bf16.mxu1 %vm432_vm0, %v11190_v48 }
 0x263   : > { %9798 = vmatmul.mubr.msk.bf16.gmra.mrb[248].mxu1 %vm432_vm0, %v11204_v53 }
 0x264   : > { %9801 = vmatprep.mubr.msk.bf16.mxu1 %vm432_vm0, %v11206_v54 }
 0x26b   : > { %9802 = vmatmul.mubr.msk.bf16.gmra.mrb[252].mxu1 %vm432_vm0, %v11218_v57 }
 0x286   : > { %v12069_v17 = vpop.f32.mrb[160].mxu1 }
 0x287   : > { %v12071_v18 = vpop.f32.mrb[161].mxu1 }
 0x288   : > { %v12073_v21 = vpop.f32.mrb[162].mxu1  ;;  %v2826_v23 = vmax.f32 %v12069_v17, %v12071_v18 }
 0x289   : > { %v12077_v6 = vpop.f32.mrb[163].mxu1 }
 0x28a   : > { %2827 = vmax.xlane.f32.xlu0 %v2826_v23  ;;  %v2829_v24 = vmax.f32 %v12073_v21, %v12077_v6 }
 0x28e   : > { %2830 = vmax.xlane.f32.xlu0 %v2829_v24  ;;  %v12081_v61 = vpop.f32.mrb[164].mxu1 }
 0x28f   : > { %v12083_v14 = vpop.f32.mrb[165].mxu1 }
 0x290   : > { %v12085_v25 = vpop.f32.mrb[166].mxu1  ;;  %v2832_v26 = vmax.f32 %v12081_v61, %v12083_v14 }
 0x291   : > { %v12089_v30 = vpop.f32.mrb[167].mxu1 }
 0x292   : > { %2833 = vmax.xlane.f32.xlu1 %v2832_v26  ;;  %v2835_v45 = vmax.f32 %v12085_v25, %v12089_v30 }
 0x296   : > { %2836 = vmax.xlane.f32.xlu1 %v2835_v45  ;;  %v12093_v31 = vpop.f32.mrb[168].mxu1 }
 0x297   : > { %v12095_v2 = vpop.f32.mrb[169].mxu1 }
 0x298   : > { %v12097_v22 = vpop.f32.mrb[170].mxu1  ;;  %v2838_v32 = vmax.f32 %v12093_v31, %v12095_v2 }
 0x299   : > { %v12101_v33 = vpop.f32.mrb[171].mxu1 }
 0x29a   : > { %2839 = vmax.xlane.f32.xlu0 %v2838_v32  ;;  %v2841_v37 = vmax.f32 %v12097_v22, %v12101_v33 }
 0x29c   : > { %2842 = vmax.xlane.f32.xlu1 %v2841_v37 }
 0x29e   : > { %v12105_v43 = vpop.f32.mrb[172].mxu1 }
 0x29f   : > { %v12107_v38 = vpop.f32.mrb[173].mxu1 }
 0x2a0   : > { %v12109_v40 = vpop.f32.mrb[174].mxu1  ;;  %v2844_v44 = vmax.f32 %v12105_v43, %v12107_v38 }
 0x2a1   : > { %v12113_v5 = vpop.f32.mrb[175].mxu1 }
 0x2a2   : > { %2845 = vmax.xlane.f32.xlu0 %v2844_v44  ;;  %v2847_v46 = vmax.f32 %v12109_v40, %v12113_v5 }
 0x2a4   : > { %2848 = vmax.xlane.f32.xlu1 %v2847_v46 }
 0x2a6   : > { %v12117_v34 = vpop.f32.mrb[176].mxu1 }
 0x2a7   : > { %v12119_v50 = vpop.f32.mrb[177].mxu1 }
 0x2a8   : > { %v12121_v52 = vpop.f32.mrb[178].mxu1  ;;  %v2850_v55 = vmax.f32 %v12117_v34, %v12119_v50 }
 0x2a9   : > { %v12125_v56 = vpop.f32.mrb[179].mxu1 }
 0x2aa   : > { %2851 = vmax.xlane.f32.xlu0 %v2850_v55  ;;  %v2853_v39 = vmax.f32 %v12121_v52, %v12125_v56 }
 0x2ac   : > { %2854 = vmax.xlane.f32.xlu1 %v2853_v39 }
 0x2ae   : > { %v12129_v58 = vpop.f32.mrb[180].mxu1 }
 0x2af   : > { %v12131_v59 = vpop.f32.mrb[181].mxu1 }
 0x2b0   : > { %v12133_v60 = vpop.f32.mrb[182].mxu1  ;;  %v2856_v7 = vmax.f32 %v12129_v58, %v12131_v59 }
 0x2b1   : > { %v12137_v62 = vpop.f32.mrb[183].mxu1 }
 0x2b2   : > { %2857 = vmax.xlane.f32.xlu0 %v2856_v7  ;;  %v2859_v4 = vmax.f32 %v12133_v60, %v12137_v62 }
 0x2b4   : > { %2860 = vmax.xlane.f32.xlu1 %v2859_v4 }
 0x2b6   : > { %v12141_v63 = vpop.f32.mrb[184].mxu1 }
 0x2b7   : > { %v12143_v16 = vpop.f32.mrb[185].mxu1 }
 0x2b8   : > { %v12145_v49 = vpop.f32.mrb[186].mxu1  ;;  %v2862_v0 = vmax.f32 %v12141_v63, %v12143_v16 }
 0x2b9   : > { %v12149_v1 = vpop.f32.mrb[187].mxu1 }
 0x2ba   : > { %2863 = vmax.xlane.f32.xlu0 %v2862_v0  ;;  %v2865_v3 = vmax.f32 %v12145_v49, %v12149_v1 }
 0x2bc   : > { %2866 = vmax.xlane.f32.xlu1 %v2865_v3 }
 0x2be   : > { %v12153_v9 = vpop.f32.mrb[188].mxu1 }
 0x2bf   : > { %v12155_v10 = vpop.f32.mrb[189].mxu1 }
 0x2c0   : > { %v12157_v27 = vpop.f32.mrb[190].mxu1  ;;  %v2868_v11 = vmax.f32 %v12153_v9, %v12155_v10 }
 0x2c1   : > { %v12161_v51 = vpop.f32.mrb[191].mxu1 }
 0x2c2   : > { %2869 = vmax.xlane.f32.xlu0 %v2868_v11  ;;  %v2871_v15 = vmax.f32 %v12157_v27, %v12161_v51 }
 0x2c4   : > { %2872 = vmax.xlane.f32.xlu1 %v2871_v15 }
 0x2c6   : > { %v12165_v23 = vpop.f32.mrb[192].mxu1 }
 0x2c7   : > { %v12167_v24 = vpop.f32.mrb[193].mxu1 }
 0x2c8   : > { %v12169_v26 = vpop.f32.mrb[194].mxu1  ;;  %v2874_v45 = vmax.f32 %v12165_v23, %v12167_v24 }
 0x2c9   : > { %v12173_v32 = vpop.f32.mrb[195].mxu1 }
 0x2ca   : > { %2875 = vmax.xlane.f32.xlu0 %v2874_v45  ;;  %v2877_v37 = vmax.f32 %v12169_v26, %v12173_v32 }
 0x2cc   : > { %2878 = vmax.xlane.f32.xlu1 %v2877_v37 }
 0x2ce   : > { %v12177_v44 = vpop.f32.mrb[196].mxu1 }
 0x2cf   : > { %v12179_v46 = vpop.f32.mrb[197].mxu1 }
 0x2d0   : > { %v12181_v55 = vpop.f32.mrb[198].mxu1  ;;  %v2880_v39 = vmax.f32 %v12177_v44, %v12179_v46 }
 0x2d1   : > { %v12185_v7 = vpop.f32.mrb[199].mxu1 }
 0x2d2   : > { %2881 = vmax.xlane.f32.xlu0 %v2880_v39  ;;  %v2883_v4 = vmax.f32 %v12181_v55, %v12185_v7 }
 0x2d4   : > { %2884 = vmax.xlane.f32.xlu1 %v2883_v4 }
 0x2d6   : > { %v12189_v0 = vpop.f32.mrb[200].mxu1 }
 0x2d7   : > { %v12191_v3 = vpop.f32.mrb[201].mxu1 }
 0x2d8   : > { %v12193_v11 = vpop.f32.mrb[202].mxu1  ;;  %v2886_v15 = vmax.f32 %v12189_v0, %v12191_v3 }
 0x2d9   : > { %v12197_v45 = vpop.f32.mrb[203].mxu1 }
 0x2da   : > { %2887 = vmax.xlane.f32.xlu0 %v2886_v15  ;;  %v2889_v37 = vmax.f32 %v12193_v11, %v12197_v45 }
 0x2dc   : > { %2890 = vmax.xlane.f32.xlu1 %v2889_v37 }
 0x2de   : > { %v12201_v39 = vpop.f32.mrb[204].mxu1 }
 0x2df   : > { %v12203_v57 = vpop.f32.mrb[205].mxu1 }
 0x2e0   : > { %v12205_v4 = vpop.f32.mrb[206].mxu1  ;;  %v2892_v54 = vmax.f32 %v12201_v39, %v12203_v57 }
 0x2e1   : > { %v12209_v53 = vpop.f32.mrb[207].mxu1 }
 0x2e2   : > { %2893 = vmax.xlane.f32.xlu0 %v2892_v54  ;;  %v2895_v48 = vmax.f32 %v12205_v4, %v12209_v53 }
 0x2e4   : > { %2896 = vmax.xlane.f32.xlu1 %v2895_v48 }
 0x2e6   : > { %v12213_v15 = vpop.f32.mrb[208].mxu1 }
 0x2e7   : > { %v12215_v47 = vpop.f32.mrb[209].mxu1 }
 0x2e8   : > { %v12217_v37 = vpop.f32.mrb[210].mxu1  ;;  %v2898_v42 = vmax.f32 %v12213_v15, %v12215_v47 }
 0x2e9   : > { %14288 = vst [vmem:[#allocation20_spill] sm:$0xff] %v12217_v37  ;;  %v12221_v41 = vpop.f32.mrb[211].mxu1 }
 0x2ea   : > { %14289 = vst [vmem:[#allocation21_spill] sm:$0xff] %v12221_v41  ;;  %2899 = vmax.xlane.f32.xlu0 %v2898_v42  ;;  %v2901_v36 = vmax.f32 %v12217_v37, %v12221_v41 }
 0x2ec   : > { %2902 = vmax.xlane.f32.xlu1 %v2901_v36 }
 0x2ee   : > { %v12225_v54 = vpop.f32.mrb[212].mxu1 }
 0x2ef   : > { %14290 = vst [vmem:[#allocation22_spill] sm:$0xff] %v12225_v54  ;;  %v12227_v35 = vpop.f32.mrb[213].mxu1 }
 0x2f0   : > { %14291 = vst [vmem:[#allocation23_spill] sm:$0xff] %v12227_v35  ;;  %v12229_v48 = vpop.f32.mrb[214].mxu1  ;;  %v2904_v29 = vmax.f32 %v12225_v54, %v12227_v35 }
 0x2f1   : > { %14292 = vst [vmem:[#allocation24_spill] sm:$0xff] %v12229_v48  ;;  %v12233_v28 = vpop.f32.mrb[215].mxu1 }
 0x2f2   : > { %14293 = vst [vmem:[#allocation25_spill] sm:$0xff] %v12233_v28  ;;  %2905 = vmax.xlane.f32.xlu0 %v2904_v29  ;;  %v2907_v20 = vmax.f32 %v12229_v48, %v12233_v28 }
 0x2f4   : > { %2908 = vmax.xlane.f32.xlu1 %v2907_v20 }
 0x2f6   : > { %v12237_v42 = vpop.f32.mrb[216].mxu1 }
 0x2f7   : > { %14294 = vst [vmem:[#allocation26_spill] sm:$0xff] %v12237_v42  ;;  %v12239_v19 = vpop.f32.mrb[217].mxu1 }
 0x2f8   : > { %14295 = vst [vmem:[#allocation27_spill] sm:$0xff] %v12239_v19  ;;  %v12241_v36 = vpop.f32.mrb[218].mxu1  ;;  %v2910_v13 = vmax.f32 %v12237_v42, %v12239_v19 }
 0x2f9   : > { %14296 = vst [vmem:[#allocation28_spill] sm:$0xff] %v12241_v36  ;;  %v12245_v12 = vpop.f32.mrb[219].mxu1 }
 0x2fa   : > { %14297 = vst [vmem:[#allocation29_spill] sm:$0xff] %v12245_v12  ;;  %2911 = vmax.xlane.f32.xlu0 %v2910_v13  ;;  %v2913_v8 = vmax.f32 %v12241_v36, %v12245_v12 }
 0x2fc   : > { %2914 = vmax.xlane.f32.xlu1 %v2913_v8 }
 0x2fe   : > { %v12249_v29 = vpop.f32.mrb[220].mxu1 }
 0x2ff   : > { %14298 = vst [vmem:[#allocation30_spill] sm:$0xff] %v12249_v29  ;;  %v12251_v28 = vpop.f32.mrb[221].mxu1 }
 0x300   : > { %14299 = vst [vmem:[#allocation31_spill] sm:$0xff] %v12251_v28  ;;  %v12253_v20 = vpop.f32.mrb[222].mxu1  ;;  %v2916_v48 = vmax.f32 %v12249_v29, %v12251_v28 }
 0x301   : > { %14300 = vst [vmem:[#allocation32_spill] sm:$0xff] %v12253_v20  ;;  %v12257_v35 = vpop.f32.mrb[223].mxu1 }
 0x302   : > { %14301 = vst [vmem:[#allocation33_spill] sm:$0xff] %v12257_v35  ;;  %2917 = vmax.xlane.f32.xlu0 %v2916_v48  ;;  %v2919_v19 = vmax.f32 %v12253_v20, %v12257_v35 }
 0x304   : > { %2920 = vmax.xlane.f32.xlu1 %v2919_v19 }
 0x317   : > { %v2828_v13 = vpop.xlane.xlu0 %2827 }
 0x318   : > { %v2922_v12 = vsub.f32 %v12069_v17, %v2828_v13  ;;  %v2923_v8 = vsub.f32 %v12071_v18, %v2828_v13  ;;  %v9775_v13 = vpop.f32.mrb[224].mxu1 }
 0x31a   : > { %v2986_v36 = vmul.f32 1.442695, %v2922_v12  ;;  %v2988_v42 = vmul.f32 1.442695, %v2923_v8 }
 0x31b   : > { %v2831_v54 = vpop.xlane.xlu0 %2830 }
 0x31c   : > { %10193 = vpow2.f32 %v2986_v36  ;;  %v2924_v41 = vsub.f32 %v12073_v21, %v2831_v54  ;;  %v2925_v28 = vsub.f32 %v12077_v6, %v2831_v54  ;;  %v3543_v6 = vpop.f32.mrb[225].mxu1 }
 0x31d   : > { %10195 = vpow2.f32 %v2988_v42 }
 0x31e   : > { %v2990_v29 = vmul.f32 1.442695, %v2924_v41  ;;  %v2992_v48 = vmul.f32 1.442695, %v2925_v28  ;;  %v12272_v28 = vld [vmem:[%s14164_s2 + $0x1] ss:$0 sm:$0xff] }
 0x31f   : > { %v2834_v37 = vpop.xlane.xlu1 %2833  ;;  %v3552_v41 = vadd.f32 %v9775_v13, %v12272_v28 }
 0x320   : > { %10197 = vpow2.f32 %v2990_v29  ;;  %v2926_v19 = vsub.f32 %v12081_v61, %v2834_v37  ;;  %v2927_v35 = vsub.f32 %v12083_v14, %v2834_v37 }
 0x321   : > { %10199 = vpow2.f32 %v2992_v48 }
 0x322   : > { %v2994_v17 = vmul.f32 1.442695, %v2926_v19  ;;  %v2996_v18 = vmul.f32 1.442695, %v2927_v35  ;;  %v9776_v35 = vpop.f32.mrb[226].mxu1 }
 0x323   : > { %v2837_v12 = vpop.xlane.xlu1 %2836  ;;  %v3546_v29 = vpop.f32.mrb[227].mxu1 }
 0x324   : > { %10201 = vpow2.f32 %v2994_v17  ;;  %v2928_v36 = vsub.f32 %v12085_v25, %v2837_v12  ;;  %v2929_v21 = vsub.f32 %v12089_v30, %v2837_v12  ;;  %v3544_v25 = vadd.f32 %v12272_v28, %v3543_v6 }
 0x325   : > { %10203 = vpow2.f32 %v2996_v18  ;;  %v3555_v30 = vadd.f32 %v9776_v35, %v12272_v28  ;;  %v3547_v19 = vadd.f32 %v12272_v28, %v3546_v29  ;;  %v3687_v29 = vld [vmem:[#allocation2 + $0x80] sm:$0xff] }
 0x326   : > { %v10194_v61 = vpop.eup %10193  ;;  %v2998_v14 = vmul.f32 1.442695, %v2928_v36  ;;  %v3000_v37 = vmul.f32 1.442695, %v2929_v21 }
 0x327   : > { %v10196_v54 = vpop.eup %10195  ;;  %v2840_v42 = vpop.xlane.xlu0 %2839  ;;  %v12280_v18 = vpack.c.bf16 %v3555_v30, %v3552_v41 }
 0x328   : > { %10205 = vpow2.f32 %v2998_v14  ;;  %v2930_v8 = vsub.f32 %v12093_v31, %v2840_v42  ;;  %v2931_v48 = vsub.f32 %v12095_v2, %v2840_v42  ;;  %v12282_v12 = vadd.f32 %v10196_v54, %v10194_v61 }
 0x329   : > { %10207 = vpow2.f32 %v3000_v37  ;;  %v2843_v17 = vpop.xlane.xlu1 %2842  ;;  %v12286_v31 = vpack.c.bf16 %v3547_v19, %v3544_v25 }
 0x32a   : > { %14302 = vst [vmem:[#allocation34_spill] sm:$0xff] %v12282_v12  ;;  %v10198_v36 = vpop.eup %10197  ;;  %v3002_v21 = vmul.f32 1.442695, %v2930_v8  ;;  %v3004_v13 = vmul.f32 1.442695, %v2931_v48  ;;  %v2932_v6 = vsub.f32 %v12097_v22, %v2843_v17  ;;  %v2933_v35 = vsub.f32 %v12101_v33, %v2843_v17 }
 0x32b   : > { %v10200_v14 = vpop.eup %10199  ;;  %v3210_v20 = vpack.c.bf16 %v10198_v36, %v10194_v61  ;;  %v3769_v22 = vsel %vm658_vm1, %v3687_v29, 0  ;;  %v3696_v61 = vld [vmem:[#allocation2 + $0xc8] sm:$0xff] }
 0x32c   : > { %10209 = vpow2.f32 %v3002_v21  ;;  %v3006_v2 = vmul.f32 1.442695, %v2932_v6  ;;  %v3008_v42 = vmul.f32 1.442695, %v2933_v35  ;;  %v3211_v37 = vpack.c.bf16 %v10200_v14, %v10196_v54  ;;  %v9779_v54 = vpop.f32.mrb[228].mxu1 }
 0x32d   : > { %10211 = vpow2.f32 %v3004_v13  ;;  %v12288_v41 = vadd.f32 %v10200_v14, %v10198_v36  ;;  %v3568_v36 = vadd.f32 %v9779_v54, %v12272_v28  ;;  %v3559_v21 = vpop.f32.mrb[229].mxu1  ;;  %v3688_v54 = vld [vmem:[#allocation2 + $0x88] sm:$0xff] }
 0x32e   : > { %v10202_v30 = vpop.eup %10201  ;;  %10213 = vpow2.f32 %v3006_v2  ;;  %3274 = vmatprep.mubr.bf16.mxu0 %v3211_v37  ;;  %v9780_v2 = vpop.f32.mrb[230].mxu1 }
 0x32f   : > { %14303 = vst [vmem:[#allocation35_spill] sm:$0xff] %v12288_v41  ;;  %v10204_v8 = vpop.eup %10203  ;;  %10215 = vpow2.f32 %v3008_v42  ;;  %3275 = vmatmul.mubr.bf16.vlgmr.msra.gmra.mrb[128].mxu0 %v3210_v20  ;;  %v2846_v33 = vpop.xlane.xlu0 %2845  ;;  %v3571_v37 = vadd.f32 %v9780_v2, %v12272_v28 }
 0x330   : > { %8862 = vmatpush3.bf16.xpose.msra.mxu0 %v3769_v22  ;;  %v2934_v25 = vsub.f32 %v12105_v43, %v2846_v33  ;;  %v2935_v48 = vsub.f32 %v12107_v38, %v2846_v33  ;;  %v12293_v19 = vadd.f32 %v10204_v8, %v10202_v30  ;;  %v3560_v38 = vadd.f32 %v12272_v28, %v3559_v21  ;;  %v3562_v29 = vpop.f32.mrb[231].mxu1 }
 0x331   : > { %10118 = vmatprep.subr.msk.bf16.mxu0 %vm658_vm1, %v3696_v61  ;;  %v2849_v17 = vpop.xlane.xlu1 %2848 }
 0x332   : > { %14304 = vst [vmem:[#allocation36_spill] sm:$0xff] %v12293_v19  ;;  %v10206_v13 = vpop.eup %10205  ;;  %v3010_v20 = vmul.f32 1.442695, %v2934_v25  ;;  %v3012_v6 = vmul.f32 1.442695, %v2935_v48  ;;  %v2936_v35 = vsub.f32 %v12109_v40, %v2849_v17  ;;  %v2937_v14 = vsub.f32 %v12113_v5, %v2849_v17 }
 0x333   : > { %v10208_v43 = vpop.eup %10207  ;;  %v3212_v42 = vpack.c.bf16 %v10206_v13, %v10202_v30  ;;  %v12301_v25 = vpack.c.bf16 %v3571_v37, %v3568_v36  ;;  %v3563_v40 = vadd.f32 %v12272_v28, %v3562_v29  ;;  %v3772_v17 = vsel %vm658_vm1, %v3688_v54, 0 }
 0x334   : > { %10217 = vpow2.f32 %v3010_v20  ;;  %v3014_v22 = vmul.f32 1.442695, %v2936_v35  ;;  %v3016_v33 = vmul.f32 1.442695, %v2937_v14  ;;  %v3213_v61 = vpack.c.bf16 %v10208_v43, %v10204_v8 }
 0x335   : > { %10219 = vpow2.f32 %v3012_v6  ;;  %v12304_v48 = vadd.f32 %v10208_v43, %v10206_v13  ;;  %v12307_v20 = vpack.c.bf16 %v3563_v40, %v3560_v38  ;;  %v3697_v6 = vld [vmem:[#allocation2 + $0xd0] sm:$0xff] }
 0x336   : > { %v10210_v5 = vpop.eup %10209  ;;  %10221 = vpow2.f32 %v3014_v22  ;;  %3282 = vmatprep.mubr.bf16.mxu0 %v3213_v61 }
 0x337   : > { %14305 = vst [vmem:[#allocation37_spill] sm:$0xff] %v12304_v48  ;;  %v10212_v30 = vpop.eup %10211  ;;  %10223 = vpow2.f32 %v3016_v33  ;;  %3283 = vmatmul.mubr.bf16.gmra.mrb[132].mxu0 %v3212_v42  ;;  %v2852_v21 = vpop.xlane.xlu0 %2851 }
 0x338   : > { %v10214_v8 = vpop.eup %10213  ;;  %8864 = vmatpush3.bf16.xpose.msra.mxu0 %v3772_v17  ;;  %v2938_v36 = vsub.f32 %v12117_v34, %v2852_v21  ;;  %v2939_v35 = vsub.f32 %v12119_v50, %v2852_v21  ;;  %v12311_v13 = vadd.f32 %v10212_v30, %v10210_v5  ;;  %v3689_v50 = vld [vmem:[#allocation2 + $0x90] sm:$0xff] }
 0x339   : > { %v10216_v14 = vpop.eup %10215  ;;  %10119 = vmatprep.subr.msk.bf16.mxu0 %vm658_vm1, %v3697_v6  ;;  %v2855_v2 = vpop.xlane.xlu1 %2854  ;;  %v3214_v43 = vpack.c.bf16 %v10214_v8, %v10210_v5  ;;  %v3775_v5 = vsel %vm658_vm1, %v3689_v50, 0 }
 0x33a   : > { %14306 = vst [vmem:[#allocation38_spill] sm:$0xff] %v12311_v13  ;;  %v3018_v42 = vmul.f32 1.442695, %v2938_v36  ;;  %v3020_v37 = vmul.f32 1.442695, %v2939_v35  ;;  %v2940_v29 = vsub.f32 %v12121_v52, %v2855_v2  ;;  %v2941_v38 = vsub.f32 %v12125_v56, %v2855_v2  ;;  %v3698_v56 = vld [vmem:[#allocation2 + $0xd8] sm:$0xff] }
 0x33b   : > { %v3215_v22 = vpack.c.bf16 %v10216_v14, %v10212_v30  ;;  %v12316_v33 = vadd.f32 %v10216_v14, %v10214_v8  ;;  %v9783_v8 = vpop.f32.mrb[232].mxu1 }
 0x33c   : > { %10225 = vpow2.f32 %v3018_v42  ;;  %v3022_v34 = vmul.f32 1.442695, %v2940_v29  ;;  %v3024_v61 = vmul.f32 1.442695, %v2941_v38  ;;  %v3584_v2 = vadd.f32 %v9783_v8, %v12272_v28 }
 0x33d   : > { %14307 = vst [vmem:[#allocation39_spill] sm:$0xff] %v12316_v33  ;;  %10227 = vpow2.f32 %v3020_v37  ;;  %3290 = vmatprep.mubr.bf16.mxu0 %v3215_v22 }
 0x33e   : > { %v10218_v54 = vpop.eup %10217  ;;  %10229 = vpow2.f32 %v3022_v34 }
 0x33f   : > { %v10220_v40 = vpop.eup %10219  ;;  %10231 = vpow2.f32 %v3024_v61  ;;  %3291 = vmatmul.mubr.bf16.gmra.mrb[136].mxu0 %v3214_v43  ;;  %v2858_v17 = vpop.xlane.xlu0 %2857 }
 0x340   : > { %v10222_v52 = vpop.eup %10221  ;;  %8866 = vmatpush3.bf16.xpose.msra.mxu0 %v3775_v5  ;;  %v2942_v30 = vsub.f32 %v12129_v58, %v2858_v17  ;;  %v2943_v21 = vsub.f32 %v12131_v59, %v2858_v17  ;;  %v12321_v6 = vadd.f32 %v10220_v40, %v10218_v54  ;;  %v3575_v43 = vpop.f32.mrb[233].mxu1  ;;  %v3690_v17 = vld [vmem:[#allocation2 + $0x98] sm:$0xff] }
 0x341   : > { %v10224_v36 = vpop.eup %10223  ;;  %10120 = vmatprep.subr.msk.bf16.mxu0 %vm658_vm1, %v3698_v56  ;;  %v2861_v35 = vpop.xlane.xlu1 %2860  ;;  %v3216_v14 = vpack.c.bf16 %v10222_v52, %v10218_v54  ;;  %v3576_v59 = vadd.f32 %v12272_v28, %v3575_v43 }
 0x342   : > { %14308 = vst [vmem:[#allocation40_spill] sm:$0xff] %v12321_v6  ;;  %v3026_v42 = vmul.f32 1.442695, %v2942_v30  ;;  %v3028_v37 = vmul.f32 1.442695, %v2943_v21  ;;  %v2944_v29 = vsub.f32 %v12133_v60, %v2861_v35  ;;  %v2945_v38 = vsub.f32 %v12137_v62, %v2861_v35  ;;  %v9784_v58 = vpop.f32.mrb[234].mxu1 }
 0x343   : > { %v3217_v22 = vpack.c.bf16 %v10224_v36, %v10220_v40  ;;  %v3587_v34 = vadd.f32 %v9784_v58, %v12272_v28  ;;  %v3578_v61 = vpop.f32.mrb[235].mxu1  ;;  %v12329_v50 = vadd.f32 %v10224_v36, %v10222_v52  ;;  %v3778_v52 = vsel %vm658_vm1, %v3690_v17, 0  ;;  %v3699_v36 = vld [vmem:[#allocation2 + $0xe0] sm:$0xff] }
 0x344   : > { %10233 = vpow2.f32 %v3026_v42  ;;  %v3030_v54 = vmul.f32 1.442695, %v2944_v29  ;;  %v3032_v5 = vmul.f32 1.442695, %v2945_v38  ;;  %v3579_v56 = vadd.f32 %v12272_v28, %v3578_v61 }
 0x345   : > { %14309 = vst [vmem:[#allocation41_spill] sm:$0xff] %v12329_v50  ;;  %10235 = vpow2.f32 %v3028_v37  ;;  %3298 = vmatprep.mubr.bf16.mxu0 %v3217_v22  ;;  %v12332_v60 = vpack.c.bf16 %v3587_v34, %v3584_v2 }
 0x346   : > { %v10226_v62 = vpop.eup %10225  ;;  %10237 = vpow2.f32 %v3030_v54  ;;  %v12334_v40 = vpack.c.bf16 %v3579_v56, %v3576_v59 }
 0x347   : > { %v10228_v30 = vpop.eup %10227  ;;  %10239 = vpow2.f32 %v3032_v5  ;;  %3299 = vmatmul.mubr.bf16.gmra.mrb[140].mxu0 %v3216_v14  ;;  %v2864_v21 = vpop.xlane.xlu0 %2863 }
 0x348   : > { %v10230_v8 = vpop.eup %10229  ;;  %8868 = vmatpush3.bf16.xpose.msra.mxu0 %v3778_v52  ;;  %v2946_v35 = vsub.f32 %v12141_v63, %v2864_v21  ;;  %v2947_v43 = vsub.f32 %v12143_v16, %v2864_v21  ;;  %v12339_v42 = vadd.f32 %v10228_v30, %v10226_v62  ;;  %v3691_v16 = vld [vmem:[#allocation2 + $0xa0] sm:$0xff]  ;;  %v9787_v52 = vpop.f32.mrb[236].mxu1 }
 0x349   : > { %v10232_v2 = vpop.eup %10231  ;;  %10121 = vmatprep.subr.msk.bf16.mxu0 %vm658_vm1, %v3699_v36  ;;  %v2867_v37 = vpop.xlane.xlu1 %2866  ;;  %v3218_v29 = vpack.c.bf16 %v10230_v8, %v10226_v62  ;;  %v3781_v17 = vsel %vm658_vm1, %v3691_v16, 0 }
 0x34a   : > { %14310 = vst [vmem:[#allocation42_spill] sm:$0xff] %v12339_v42  ;;  %v3034_v38 = vmul.f32 1.442695, %v2946_v35  ;;  %v3036_v58 = vmul.f32 1.442695, %v2947_v43  ;;  %v2948_v14 = vsub.f32 %v12145_v49, %v2867_v37  ;;  %v2949_v22 = vsub.f32 %v12149_v1, %v2867_v37  ;;  %v3700_v1 = vld [vmem:[#allocation2 + $0xe8] sm:$0xff] }
 0x34b   : > { %v3219_v59 = vpack.c.bf16 %v10232_v2, %v10228_v30  ;;  %v12344_v34 = vadd.f32 %v10232_v2, %v10230_v8  ;;  %v3600_v43 = vadd.f32 %v9787_v52, %v12272_v28  ;;  %v3591_v2 = vpop.f32.mrb[237].mxu1 }
 0x34c   : > { %10241 = vpow2.f32 %v3034_v38  ;;  %v3038_v63 = vmul.f32 1.442695, %v2948_v14  ;;  %v3040_v61 = vmul.f32 1.442695, %v2949_v22 }
 0x34d   : > { %14311 = vst [vmem:[#allocation43_spill] sm:$0xff] %v12344_v34  ;;  %10243 = vpow2.f32 %v3036_v58  ;;  %3306 = vmatprep.mubr.bf16.mxu0 %v3219_v59 }
 0x34e   : > { %v10234_v54 = vpop.eup %10233  ;;  %10245 = vpow2.f32 %v3038_v63 }
 0x34f   : > { %v10236_v5 = vpop.eup %10235  ;;  %10247 = vpow2.f32 %v3040_v61  ;;  %3307 = vmatmul.mubr.bf16.gmra.mrb[144].mxu0 %v3218_v29  ;;  %v2870_v56 = vpop.xlane.xlu0 %2869 }
 0x350   : > { %v10238_v49 = vpop.eup %10237  ;;  %8870 = vmatpush3.bf16.xpose.msra.mxu0 %v3781_v17  ;;  %v2950_v62 = vsub.f32 %v12153_v9, %v2870_v56  ;;  %v2951_v30 = vsub.f32 %v12155_v10, %v2870_v56  ;;  %v12349_v21 = vadd.f32 %v10236_v5, %v10234_v54  ;;  %v9788_v9 = vpop.f32.mrb[238].mxu1  ;;  %v3592_v10 = vadd.f32 %v12272_v28, %v3591_v2 }
 0x351   : > { %v10240_v8 = vpop.eup %10239  ;;  %10122 = vmatprep.subr.msk.bf16.mxu0 %vm658_vm1, %v3700_v1  ;;  %v2873_v36 = vpop.xlane.xlu1 %2872  ;;  %v3220_v35 = vpack.c.bf16 %v10238_v49, %v10234_v54  ;;  %v3603_v22 = vadd.f32 %v9788_v9, %v12272_v28  ;;  %v3692_v54 = vld [vmem:[#allocation2 + $0xa8] sm:$0xff] }
 0x352   : > { %14312 = vst [vmem:[#allocation44_spill] sm:$0xff] %v12349_v21  ;;  %v3042_v37 = vmul.f32 1.442695, %v2950_v62  ;;  %v3044_v29 = vmul.f32 1.442695, %v2951_v30  ;;  %v2952_v38 = vsub.f32 %v12157_v27, %v2873_v36  ;;  %v2953_v58 = vsub.f32 %v12161_v51, %v2873_v36  ;;  %v3594_v59 = vpop.f32.mrb[239].mxu1 }
 0x353   : > { %v3221_v14 = vpack.c.bf16 %v10240_v8, %v10236_v5  ;;  %v12357_v63 = vadd.f32 %v10240_v8, %v10238_v49  ;;  %v3595_v17 = vadd.f32 %v12272_v28, %v3594_v59  ;;  %v12360_v27 = vpack.c.bf16 %v3603_v22, %v3600_v43  ;;  %v3701_v30 = vld [vmem:[#allocation2 + $0xf0] sm:$0xff] }
 0x354   : > { %10249 = vpow2.f32 %v3042_v37  ;;  %v3046_v61 = vmul.f32 1.442695, %v2952_v38  ;;  %v3048_v16 = vmul.f32 1.442695, %v2953_v58  ;;  %v3784_v49 = vsel %vm658_vm1, %v3692_v54, 0 }
 0x355   : > { %14313 = vst [vmem:[#allocation45_spill] sm:$0xff] %v12357_v63  ;;  %10251 = vpow2.f32 %v3044_v29  ;;  %3314 = vmatprep.mubr.bf16.mxu0 %v3221_v14  ;;  %v12362_v5 = vpack.c.bf16 %v3595_v17, %v3592_v10 }
 0x356   : > { %v10242_v51 = vpop.eup %10241  ;;  %10253 = vpow2.f32 %v3046_v61 }
 0x357   : > { %v10244_v56 = vpop.eup %10243  ;;  %10255 = vpow2.f32 %v3048_v16  ;;  %3315 = vmatmul.mubr.bf16.gmra.mrb[148].mxu0 %v3220_v35  ;;  %v2876_v1 = vpop.xlane.xlu0 %2875 }
 0x358   : > { %v10246_v62 = vpop.eup %10245  ;;  %8872 = vmatpush3.bf16.xpose.msra.mxu0 %v3784_v49  ;;  %v2954_v52 = vsub.f32 %v12165_v23, %v2876_v1  ;;  %v2955_v8 = vsub.f32 %v12167_v24, %v2876_v1  ;;  %v12367_v36 = vadd.f32 %v10244_v56, %v10242_v51  ;;  %v3693_v24 = vld [vmem:[#allocation2 + $0xb0] sm:$0xff] }
 0x359   : > { %v10248_v43 = vpop.eup %10247  ;;  %10123 = vmatprep.subr.msk.bf16.mxu0 %vm658_vm1, %v3701_v30  ;;  %v2879_v2 = vpop.xlane.xlu1 %2878  ;;  %v3222_v37 = vpack.c.bf16 %v10246_v62, %v10242_v51  ;;  %v3787_v61 = vsel %vm658_vm1, %v3693_v24, 0 }
 0x35a   : > { %14314 = vst [vmem:[#allocation46_spill] sm:$0xff] %v12367_v36  ;;  %v3050_v29 = vmul.f32 1.442695, %v2954_v52  ;;  %v3052_v38 = vmul.f32 1.442695, %v2955_v8  ;;  %v2956_v35 = vsub.f32 %v12169_v26, %v2879_v2  ;;  %v2957_v58 = vsub.f32 %v12173_v32, %v2879_v2  ;;  %v3702_v32 = vld [vmem:[#allocation2 + $0xf8] sm:$0xff] }
 0x35b   : > { %v3223_v9 = vpack.c.bf16 %v10248_v43, %v10244_v56  ;;  %v12372_v14 = vadd.f32 %v10248_v43, %v10246_v62  ;;  %v9791_v51 = vpop.f32.mrb[240].mxu1 }
 0x35c   : > { %10257 = vpow2.f32 %v3050_v29  ;;  %v3054_v23 = vmul.f32 1.442695, %v2956_v35  ;;  %v3056_v10 = vmul.f32 1.442695, %v2957_v58  ;;  %v3616_v30 = vadd.f32 %v9791_v51, %v12272_v28  ;;  %v3607_v52 = vpop.f32.mrb[241].mxu1 }
 0x35d   : > { %14315 = vst [vmem:[#allocation47_spill] sm:$0xff] %v12372_v14  ;;  %10259 = vpow2.f32 %v3052_v38  ;;  %3322 = vmatprep.mubr.bf16.mxu0 %v3223_v9 }
 0x35e   : > { %v10250_v22 = vpop.eup %10249  ;;  %10261 = vpow2.f32 %v3054_v23 }
 0x35f   : > { %v10252_v59 = vpop.eup %10251  ;;  %10263 = vpow2.f32 %v3056_v10  ;;  %3323 = vmatmul.mubr.bf16.gmra.mrb[152].mxu0 %v3222_v37  ;;  %v2882_v16 = vpop.xlane.xlu0 %2881  ;;  %v3694_v10 = vld [vmem:[#allocation2 + $0xb8] sm:$0xff] }
 0x360   : > { %v10254_v26 = vpop.eup %10253  ;;  %8874 = vmatpush3.bf16.xpose.msra.mxu0 %v3787_v61  ;;  %v2958_v54 = vsub.f32 %v12177_v44, %v2882_v16  ;;  %v2959_v17 = vsub.f32 %v12179_v46, %v2882_v16  ;;  %v12377_v56 = vadd.f32 %v10252_v59, %v10250_v22  ;;  %v9792_v44 = vpop.f32.mrb[242].mxu1  ;;  %v3608_v46 = vadd.f32 %v12272_v28, %v3607_v52 }
 0x361   : > { %v10256_v49 = vpop.eup %10255  ;;  %10124 = vmatprep.subr.msk.bf16.mxu0 %vm658_vm1, %v3702_v32  ;;  %v2885_v1 = vpop.xlane.xlu1 %2884  ;;  %v3224_v62 = vpack.c.bf16 %v10254_v26, %v10250_v22  ;;  %v3619_v38 = vadd.f32 %v9792_v44, %v12272_v28  ;;  %v3790_v61 = vsel %vm658_vm1, %v3694_v10, 0 }
 0x362   : > { %14316 = vst [vmem:[#allocation48_spill] sm:$0xff] %v12377_v56  ;;  %v3058_v8 = vmul.f32 1.442695, %v2958_v54  ;;  %v3060_v43 = vmul.f32 1.442695, %v2959_v17  ;;  %v2960_v2 = vsub.f32 %v12181_v55, %v2885_v1  ;;  %v2961_v37 = vsub.f32 %v12185_v7, %v2885_v1  ;;  %v3610_v35 = vpop.f32.mrb[243].mxu1 }
 0x363   : > { %v3225_v29 = vpack.c.bf16 %v10256_v49, %v10252_v59  ;;  %v12385_v58 = vadd.f32 %v10256_v49, %v10254_v26  ;;  %v3611_v24 = vadd.f32 %v12272_v28, %v3610_v35  ;;  %v12388_v55 = vpack.c.bf16 %v3619_v38, %v3616_v30 }
 0x364   : > { %10265 = vpow2.f32 %v3058_v8  ;;  %v3062_v9 = vmul.f32 1.442695, %v2960_v2  ;;  %v3064_v23 = vmul.f32 1.442695, %v2961_v37 }
 0x365   : > { %14317 = vst [vmem:[#allocation49_spill] sm:$0xff] %v12385_v58  ;;  %10267 = vpow2.f32 %v3060_v43  ;;  %3330 = vmatprep.mubr.bf16.mxu0 %v3225_v29  ;;  %v12390_v22 = vpack.c.bf16 %v3611_v24, %v3608_v46 }
 0x366   : > { %v10258_v7 = vpop.eup %10257  ;;  %10269 = vpow2.f32 %v3062_v9 }
 0x367   : > { %v10260_v59 = vpop.eup %10259  ;;  %10271 = vpow2.f32 %v3064_v23  ;;  %3331 = vmatmul.mubr.bf16.gmra.mrb[156].mxu0 %v3224_v62  ;;  %v2888_v16 = vpop.xlane.xlu0 %2887 }
 0x368   : > { %v10262_v26 = vpop.eup %10261  ;;  %8876 = vmatpush3.bf16.xpose.msra.mxu0 %v3790_v61  ;;  %v2962_v32 = vsub.f32 %v12189_v0, %v2888_v16  ;;  %v2963_v54 = vsub.f32 %v12191_v3, %v2888_v16  ;;  %v12395_v17 = vadd.f32 %v10260_v59, %v10258_v7 }
 0x369   : > { %v10264_v51 = vpop.eup %10263  ;;  %v2891_v49 = vpop.xlane.xlu1 %2890  ;;  %v3226_v1 = vpack.c.bf16 %v10262_v26, %v10258_v7 }
 0x36a   : > { %14318 = vst [vmem:[#allocation50_spill] sm:$0xff] %v12395_v17  ;;  %v3066_v30 = vmul.f32 1.442695, %v2962_v32  ;;  %v3068_v52 = vmul.f32 1.442695, %v2963_v54  ;;  %v2964_v8 = vsub.f32 %v12193_v11, %v2891_v49  ;;  %v2965_v62 = vsub.f32 %v12197_v45, %v2891_v49  ;;  %v9795_v45 = vpop.f32.mrb[244].mxu1 }
 0x36b   : > { %v3227_v43 = vpack.c.bf16 %v10264_v51, %v10260_v59  ;;  %v12399_v2 = vadd.f32 %v10264_v51, %v10262_v26  ;;  %v3632_v24 = vadd.f32 %v9795_v45, %v12272_v28  ;;  %v3623_v7 = vpop.f32.mrb[245].mxu1 }
 0x36c   : > { %10273 = vpow2.f32 %v3066_v30  ;;  %v3070_v37 = vmul.f32 1.442695, %v2964_v8  ;;  %v3072_v44 = vmul.f32 1.442695, %v2965_v62  ;;  %v9796_v32 = vpop.f32.mrb[246].mxu1 }
 0x36d   : > { %14319 = vst [vmem:[#allocation51_spill] sm:$0xff] %v12399_v2  ;;  %10275 = vpow2.f32 %v3068_v52  ;;  %3338 = vmatprep.mubr.bf16.mxu0 %v3227_v43  ;;  %v3626_v51 = vpop.f32.mrb[247].mxu1 }
 0x36e   : > { %v10266_v0 = vpop.eup %10265  ;;  %10277 = vpow2.f32 %v3070_v37  ;;  %v3627_v52 = vadd.f32 %v12272_v28, %v3626_v51 }
 0x36f   : > { %v10268_v3 = vpop.eup %10267  ;;  %10279 = vpow2.f32 %v3072_v44  ;;  %3339 = vmatmul.mubr.bf16.gmra.mrb[160].mxu0 %v3226_v1  ;;  %v2894_v29 = vpop.xlane.xlu0 %2893 }
 0x370   : > { %v10270_v46 = vpop.eup %10269  ;;  %v2966_v38 = vsub.f32 %v12201_v39, %v2894_v29  ;;  %v2967_v11 = vsub.f32 %v12203_v57, %v2894_v29  ;;  %v12403_v35 = vadd.f32 %v10268_v3, %v10266_v0  ;;  %v3624_v39 = vadd.f32 %v12272_v28, %v3623_v7 }
 0x371   : > { %v10272_v9 = vpop.eup %10271  ;;  %v2897_v23 = vpop.xlane.xlu1 %2896  ;;  %v3228_v10 = vpack.c.bf16 %v10270_v46, %v10266_v0  ;;  %v3635_v57 = vadd.f32 %v9796_v32, %v12272_v28 }
 0x372   : > { %14320 = vst [vmem:[#allocation52_spill] sm:$0xff] %v12403_v35  ;;  %v3074_v59 = vmul.f32 1.442695, %v2966_v38  ;;  %v3076_v61 = vmul.f32 1.442695, %v2967_v11  ;;  %v2968_v16 = vsub.f32 %v12205_v4, %v2897_v23  ;;  %v2969_v26 = vsub.f32 %v12209_v53, %v2897_v23 }
 0x373   : > { %v3229_v54 = vpack.c.bf16 %v10272_v9, %v10268_v3  ;;  %v12410_v49 = vadd.f32 %v10272_v9, %v10270_v46  ;;  %v12413_v8 = vpack.c.bf16 %v3635_v57, %v3632_v24  ;;  %v12415_v53 = vpack.c.bf16 %v3627_v52, %v3624_v39  ;;  %v14323_v9 = vld [vmem:[#allocation20_spill] sm:$0xff]  ;;  %v14324_v24 = vld [vmem:[#allocation21_spill] sm:$0xff]  ;;  %v14327_v57 = vld [vmem:[#allocation23_spill] sm:$0xff] }
 0x374   : > { %10281 = vpow2.f32 %v3074_v59  ;;  %v3078_v1 = vmul.f32 1.442695, %v2968_v16  ;;  %v3080_v30 = vmul.f32 1.442695, %v2969_v26 }
 0x375   : > { %14321 = vst [vmem:[#allocation53_spill] sm:$0xff] %v12410_v49  ;;  %10283 = vpow2.f32 %v3076_v61  ;;  %3346 = vmatprep.mubr.bf16.mxu0 %v3229_v54  ;;  %v14326_v54 = vld [vmem:[#allocation22_spill] sm:$0xff] }
 0x376   : > { %v10274_v4 = vpop.eup %10273  ;;  %10285 = vpow2.f32 %v3078_v1 }
 0x377   : > { %v10276_v62 = vpop.eup %10275  ;;  %10287 = vpow2.f32 %v3080_v30  ;;  %3347 = vmatmul.mubr.bf16.gmra.mrb[164].mxu0 %v3228_v10  ;;  %v2900_v43 = vpop.xlane.xlu0 %2899 }
 0x378   : > { %v10278_v37 = vpop.eup %10277  ;;  %v2970_v44 = vsub.f32 %v12213_v15, %v2900_v43  ;;  %v2971_v0 = vsub.f32 %v12215_v47, %v2900_v43  ;;  %v12419_v3 = vadd.f32 %v10276_v62, %v10274_v4 }
 0x379   : > { %v10280_v29 = vpop.eup %10279  ;;  %v2903_v46 = vpop.xlane.xlu1 %2902  ;;  %v3230_v38 = vpack.c.bf16 %v10278_v37, %v10274_v4 }
 0x37a   : > { %14322 = vst [vmem:[#allocation54_spill] sm:$0xff] %v12419_v3  ;;  %v3082_v11 = vmul.f32 1.442695, %v2970_v44  ;;  %v3084_v45 = vmul.f32 1.442695, %v2971_v0  ;;  %v2972_v23 = vsub.f32 %v14323_v9, %v2903_v46  ;;  %v2973_v7 = vsub.f32 %v14324_v24, %v2903_v46  ;;  %v14330_v0 = vld [vmem:[#allocation25_spill] sm:$0xff] }
 0x37b   : > { %v3231_v59 = vpack.c.bf16 %v10280_v29, %v10276_v62  ;;  %v12423_v61 = vadd.f32 %v10280_v29, %v10278_v37  ;;  %v14329_v37 = vld [vmem:[#allocation24_spill] sm:$0xff]  ;;  %v9799_v9 = vpop.f32.mrb[248].mxu1 }
 0x37c   : > { %10289 = vpow2.f32 %v3082_v11  ;;  %v3086_v10 = vmul.f32 1.442695, %v2972_v23  ;;  %v3088_v16 = vmul.f32 1.442695, %v2973_v7  ;;  %v3648_v23 = vadd.f32 %v9799_v9, %v12272_v28  ;;  %v3639_v24 = vpop.f32.mrb[249].mxu1 }
 0x37d   : > { %14325 = vst [vmem:[#allocation20_spill] sm:$0xff] %v12423_v61  ;;  %10291 = vpow2.f32 %v3084_v45  ;;  %3354 = vmatprep.mubr.bf16.mxu0 %v3231_v59  ;;  %v9800_v59 = vpop.f32.mrb[250].mxu1 }
 0x37e   : > { %v10282_v47 = vpop.eup %10281  ;;  %10293 = vpow2.f32 %v3086_v10 }
 0x37f   : > { %v10284_v15 = vpop.eup %10283  ;;  %10295 = vpow2.f32 %v3088_v16  ;;  %3355 = vmatmul.mubr.bf16.gmra.mrb[168].mxu0 %v3230_v38  ;;  %v2906_v26 = vpop.xlane.xlu0 %2905 }
 0x380   : > { %v10286_v32 = vpop.eup %10285  ;;  %v2974_v39 = vsub.f32 %v14326_v54, %v2906_v26  ;;  %v2975_v51 = vsub.f32 %v14327_v57, %v2906_v26  ;;  %v12427_v1 = vadd.f32 %v10284_v15, %v10282_v47  ;;  %v3642_v26 = vpop.f32.mrb[251].mxu1  ;;  %v14332_v54 = vld [vmem:[#allocation26_spill] sm:$0xff]  ;;  %v14333_v57 = vld [vmem:[#allocation27_spill] sm:$0xff] }
 0x381   : > { %v10288_v30 = vpop.eup %10287  ;;  %v2909_v52 = vpop.xlane.xlu1 %2908  ;;  %v3232_v4 = vpack.c.bf16 %v10286_v32, %v10282_v47  ;;  %v3640_v47 = vadd.f32 %v12272_v28, %v3639_v24 }
 0x382   : > { %14328 = vst [vmem:[#allocation21_spill] sm:$0xff] %v12427_v1  ;;  %v3090_v62 = vmul.f32 1.442695, %v2974_v39  ;;  %v3092_v43 = vmul.f32 1.442695, %v2975_v51  ;;  %v2976_v44 = vsub.f32 %v14329_v37, %v2909_v52  ;;  %v2977_v29 = vsub.f32 %v14330_v0, %v2909_v52 }
 0x383   : > { %v3233_v46 = vpack.c.bf16 %v10288_v30, %v10284_v15  ;;  %v12431_v11 = vadd.f32 %v10288_v30, %v10286_v32  ;;  %v3651_v15 = vadd.f32 %v9800_v59, %v12272_v28  ;;  %v3643_v30 = vadd.f32 %v12272_v28, %v3642_v26 }
 0x384   : > { %10297 = vpow2.f32 %v3090_v62  ;;  %v3094_v38 = vmul.f32 1.442695, %v2976_v44  ;;  %v3096_v45 = vmul.f32 1.442695, %v2977_v29  ;;  %v14335_v29 = vld [vmem:[#allocation28_spill] sm:$0xff] }
 0x385   : > { %14331 = vst [vmem:[#allocation22_spill] sm:$0xff] %v12431_v11  ;;  %10299 = vpow2.f32 %v3092_v43  ;;  %3362 = vmatprep.mubr.bf16.mxu0 %v3233_v46  ;;  %v12441_v44 = vpack.c.bf16 %v3651_v15, %v3648_v23  ;;  %v12445_v24 = vpack.c.bf16 %v3643_v30, %v3640_v47 }
 0x386   : > { %v10290_v7 = vpop.eup %10289  ;;  %10301 = vpow2.f32 %v3094_v38  ;;  %v14336_v38 = vld [vmem:[#allocation29_spill] sm:$0xff] }
 0x387   : > { %v10292_v10 = vpop.eup %10291  ;;  %10303 = vpow2.f32 %v3096_v45  ;;  %3363 = vmatmul.mubr.bf16.gmra.mrb[172].mxu0 %v3232_v4  ;;  %v2912_v16 = vpop.xlane.xlu0 %2911 }
 0x388   : > { %v10294_v32 = vpop.eup %10293  ;;  %v2978_v39 = vsub.f32 %v14332_v54, %v2912_v16  ;;  %v2979_v51 = vsub.f32 %v14333_v57, %v2912_v16  ;;  %v12439_v52 = vadd.f32 %v10292_v10, %v10290_v7 }
 0x389   : > { %v10296_v62 = vpop.eup %10295  ;;  %v2915_v43 = vpop.xlane.xlu1 %2914  ;;  %v3234_v37 = vpack.c.bf16 %v10294_v32, %v10290_v7 }
 0x38a   : > { %14334 = vst [vmem:[#allocation23_spill] sm:$0xff] %v12439_v52  ;;  %v3098_v4 = vmul.f32 1.442695, %v2978_v39  ;;  %v3100_v0 = vmul.f32 1.442695, %v2979_v51  ;;  %v2980_v46 = vsub.f32 %v14335_v29, %v2915_v43  ;;  %v2981_v45 = vsub.f32 %v14336_v38, %v2915_v43  ;;  %v14338_v39 = vld [vmem:[#allocation30_spill] sm:$0xff] }
 0x38b   : > { %v3235_v9 = vpack.c.bf16 %v10296_v62, %v10292_v10  ;;  %v12447_v59 = vadd.f32 %v10296_v62, %v10294_v32  ;;  %v14339_v51 = vld [vmem:[#allocation31_spill] sm:$0xff] }
 0x38c   : > { %10305 = vpow2.f32 %v3098_v4  ;;  %v3102_v16 = vmul.f32 1.442695, %v2980_v46  ;;  %v3104_v26 = vmul.f32 1.442695, %v2981_v45  ;;  %v14342_v46 = vld [vmem:[#allocation33_spill] sm:$0xff] }
 0x38d   : > { %14337 = vst [vmem:[#allocation24_spill] sm:$0xff] %v12447_v59  ;;  %10307 = vpow2.f32 %v3100_v0  ;;  %3370 = vmatprep.mubr.bf16.mxu0 %v3235_v9  ;;  %v14341_v0 = vld [vmem:[#allocation32_spill] sm:$0xff] }
 0x38e   : > { %v10298_v54 = vpop.eup %10297  ;;  %10309 = vpow2.f32 %v3102_v16 }
 0x38f   : > { %v10300_v23 = vpop.eup %10299  ;;  %10311 = vpow2.f32 %v3104_v26  ;;  %3371 = vmatmul.mubr.bf16.gmra.mrb[176].mxu0 %v3234_v37  ;;  %v2918_v7 = vpop.xlane.xlu0 %2917 }
 0x390   : > { %v10302_v15 = vpop.eup %10301  ;;  %v2982_v57 = vsub.f32 %v14338_v39, %v2918_v7  ;;  %v2983_v10 = vsub.f32 %v14339_v51, %v2918_v7  ;;  %v12451_v47 = vadd.f32 %v10300_v23, %v10298_v54  ;;  %v9803_v26 = vpop.f32.mrb[252].mxu1 }
 0x391   : > { %v10304_v32 = vpop.eup %10303  ;;  %v2921_v30 = vpop.xlane.xlu1 %2920  ;;  %v3236_v62 = vpack.c.bf16 %v10302_v15, %v10298_v54  ;;  %v3664_v7 = vadd.f32 %v9803_v26, %v12272_v28 }
 0x392   : > { %14340 = vst [vmem:[#allocation25_spill] sm:$0xff] %v12451_v47  ;;  %v3106_v43 = vmul.f32 1.442695, %v2982_v57  ;;  %v3108_v4 = vmul.f32 1.442695, %v2983_v10  ;;  %v2984_v29 = vsub.f32 %v14341_v0, %v2921_v30  ;;  %v2985_v38 = vsub.f32 %v14342_v46, %v2921_v30  ;;  %v3655_v39 = vpop.f32.mrb[253].mxu1 }
 0x393   : > { %v3237_v45 = vpack.c.bf16 %v10304_v32, %v10300_v23  ;;  %v12455_v9 = vadd.f32 %v10304_v32, %v10302_v15  ;;  %v3656_v54 = vadd.f32 %v12272_v28, %v3655_v39  ;;  %v9804_v57 = vpop.f32.mrb[254].mxu1 }
 0x394   : > { %10313 = vpow2.f32 %v3106_v43  ;;  %v3110_v37 = vmul.f32 1.442695, %v2984_v29  ;;  %v3112_v16 = vmul.f32 1.442695, %v2985_v38  ;;  %v3667_v23 = vadd.f32 %v9804_v57, %v12272_v28  ;;  %v3658_v15 = vpop.f32.mrb[255].mxu1 }
 0x395   : > { %14343 = vst [vmem:[#allocation26_spill] sm:$0xff] %v12455_v9  ;;  %10315 = vpow2.f32 %v3108_v4  ;;  %3378 = vmatprep.mubr.bf16.mxu0 %v3237_v45  ;;  %v3659_v30 = vadd.f32 %v12272_v28, %v3658_v15 }
 0x396   : > { %v10306_v51 = vpop.eup %10305  ;;  %10317 = vpow2.f32 %v3110_v37  ;;  %v12463_v29 = vpack.c.bf16 %v3667_v23, %v3664_v7 }
 0x397   : > { %v10308_v10 = vpop.eup %10307  ;;  %10319 = vpow2.f32 %v3112_v16  ;;  %3379 = vmatmul.mubr.bf16.gmra.mrb[180].mxu0 %v3236_v62  ;;  %v12465_v38 = vpack.c.bf16 %v3659_v30, %v3656_v54 }
 0x398   : > { %v10310_v32 = vpop.eup %10309  ;;  %v12461_v43 = vadd.f32 %v10308_v10, %v10306_v51 }
 0x399   : > { %v10312_v4 = vpop.eup %10311  ;;  %v3238_v0 = vpack.c.bf16 %v10310_v32, %v10306_v51 }
 0x39a   : > { %14344 = vst [vmem:[#allocation27_spill] sm:$0xff] %v12461_v43  ;;  %v3239_v46 = vpack.c.bf16 %v10312_v4, %v10308_v10  ;;  %v12467_v45 = vadd.f32 %v10312_v4, %v10310_v32 }
 0x39c   : > { %14345 = vst [vmem:[#allocation28_spill] sm:$0xff] %v12467_v45  ;;  %3386 = vmatprep.mubr.bf16.mxu0 %v3239_v46 }
 0x39e   : > { %v10314_v37 = vpop.eup %10313 }
 0x39f   : > { %v10316_v62 = vpop.eup %10315  ;;  %3387 = vmatmul.mubr.bf16.gmra.mrb[184].mxu0 %v3238_v0 }
 0x3a0   : > { %v10318_v16 = vpop.eup %10317  ;;  %v12469_v26 = vadd.f32 %v10316_v62, %v10314_v37 }
 0x3a1   : > { %v10320_v39 = vpop.eup %10319  ;;  %v3240_v28 = vpack.c.bf16 %v10318_v16, %v10314_v37 }
 0x3a2   : > { %14346 = vst [vmem:[#allocation29_spill] sm:$0xff] %v12469_v26  ;;  %v3241_v57 = vpack.c.bf16 %v10320_v39, %v10316_v62  ;;  %v12471_v15 = vadd.f32 %v10320_v39, %v10318_v16 }
 0x3a4   : > { %14347 = vst [vmem:[#allocation30_spill] sm:$0xff] %v12471_v15  ;;  %3394 = vmatprep.mubr.bf16.mxu0 %v3241_v57 }
 0x3a7   : > { %3395 = vmatmul.mubr.bf16.gmra.mrb[188].mxu0 %v3240_v28 }
 0x3a8   : > { %8877 = vmatprep.mubr.msk.bf16.mxu0 %vm658_vm1, %v12286_v31 }
 0x3af   : > { %8878 = vmatmul.mubr.msk.bf16.vlgmr.msra.gmra.mrb[192].mxu0 %vm658_vm1, %v12286_v31 }
 0x3b0   : > { %8879 = vmatprep.mubr.msk.bf16.mxu0 %vm658_vm1, %v12280_v18 }
 0x3b7   : > { %8880 = vmatmul.mubr.msk.bf16.gmra.mrb[196].mxu0 %vm658_vm1, %v12280_v18 }
 0x3b8   : > { %8881 = vmatprep.mubr.msk.bf16.mxu0 %vm658_vm1, %v12307_v20 }
 0x3bf   : > { %8882 = vmatmul.mubr.msk.bf16.gmra.mrb[200].mxu0 %vm658_vm1, %v12307_v20 }
 0x3c0   : > { %8883 = vmatprep.mubr.msk.bf16.mxu0 %vm658_vm1, %v12301_v25 }
 0x3c7   : > { %8884 = vmatmul.mubr.msk.bf16.gmra.mrb[204].mxu0 %vm658_vm1, %v12301_v25 }
 0x3c8   : > { %8885 = vmatprep.mubr.msk.bf16.mxu0 %vm658_vm1, %v12334_v40 }
 0x3cf   : > { %8886 = vmatmul.mubr.msk.bf16.gmra.mrb[208].mxu0 %vm658_vm1, %v12334_v40 }
 0x3d0   : > { %8887 = vmatprep.mubr.msk.bf16.mxu0 %vm658_vm1, %v12332_v60 }
 0x3d7   : > { %8888 = vmatmul.mubr.msk.bf16.gmra.mrb[212].mxu0 %vm658_vm1, %v12332_v60 }
 0x3d8   : > { %8889 = vmatprep.mubr.msk.bf16.mxu0 %vm658_vm1, %v12362_v5 }
 0x3df   : > { %8890 = vmatmul.mubr.msk.bf16.gmra.mrb[216].mxu0 %vm658_vm1, %v12362_v5 }
 0x3e0   : > { %8891 = vmatprep.mubr.msk.bf16.mxu0 %vm658_vm1, %v12360_v27 }
 0x3e7   : > { %8892 = vmatmul.mubr.msk.bf16.gmra.mrb[220].mxu0 %vm658_vm1, %v12360_v27 }
 0x3e8   : > { %8893 = vmatprep.mubr.msk.bf16.mxu0 %vm658_vm1, %v12390_v22 }
 0x3ef   : > { %8894 = vmatmul.mubr.msk.bf16.gmra.mrb[224].mxu0 %vm658_vm1, %v12390_v22 }
 0x3f0   : > { %8895 = vmatprep.mubr.msk.bf16.mxu0 %vm658_vm1, %v12388_v55 }
 0x3f7   : > { %8896 = vmatmul.mubr.msk.bf16.gmra.mrb[228].mxu0 %vm658_vm1, %v12388_v55 }
 0x3f8   : > { %8897 = vmatprep.mubr.msk.bf16.mxu0 %vm658_vm1, %v12415_v53 }
 0x3ff   : > { %8898 = vmatmul.mubr.msk.bf16.gmra.mrb[232].mxu0 %vm658_vm1, %v12415_v53 }
 0x400   : > { %8899 = vmatprep.mubr.msk.bf16.mxu0 %vm658_vm1, %v12413_v8 }
 0x402   : > { %v8747_v18 = vpop.f32.mrb[128].mxu0 }
 0x403   : > { %v8748_v31 = vpop.f32.mrb[129].mxu0 }
 0x404   : > { %v12519_v25 = vadd.f32 %v8748_v31, %v8747_v18  ;;  %v8750_v20 = vpop.f32.mrb[130].mxu0 }
 0x405   : > { %v8751_v60 = vpop.f32.mrb[131].mxu0 }
 0x406   : > { %14348 = vst [vmem:[#allocation31_spill] sm:$0xff] %v12519_v25  ;;  %v12521_v40 = vadd.f32 %v8751_v60, %v8750_v20 }
 0x407   : > { %8900 = vmatmul.mubr.msk.bf16.gmra.mrb[236].mxu0 %vm658_vm1, %v12413_v8 }
 0x408   : > { %14349 = vst [vmem:[#allocation32_spill] sm:$0xff] %v12521_v40  ;;  %8901 = vmatprep.mubr.msk.bf16.mxu0 %vm658_vm1, %v12445_v24 }
 0x40a   : > { %v8753_v27 = vpop.f32.mrb[132].mxu0 }
 0x40b   : > { %v8754_v5 = vpop.f32.mrb[133].mxu0 }
 0x40c   : > { %v12527_v55 = vadd.f32 %v8754_v5, %v8753_v27  ;;  %v8756_v22 = vpop.f32.mrb[134].mxu0 }
 0x40d   : > { %v8757_v53 = vpop.f32.mrb[135].mxu0 }
 0x40e   : > { %14350 = vst [vmem:[#allocation33_spill] sm:$0xff] %v12527_v55  ;;  %v12529_v7 = vadd.f32 %v8757_v53, %v8756_v22 }
 0x40f   : > { %8902 = vmatmul.mubr.msk.bf16.gmra.mrb[240].mxu0 %vm658_vm1, %v12445_v24 }
 0x410   : > { %14351 = vst [vmem:[#allocation55_spill] sm:$0xff] %v12529_v7  ;;  %8903 = vmatprep.mubr.msk.bf16.mxu0 %vm658_vm1, %v12441_v44 }
 0x412   : > { %v8759_v51 = vpop.f32.mrb[136].mxu0 }
 0x413   : > { %v8760_v54 = vpop.f32.mrb[137].mxu0 }
 0x414   : > { %v12535_v8 = vadd.f32 %v8760_v54, %v8759_v51  ;;  %v8762_v10 = vpop.f32.mrb[138].mxu0 }
 0x415   : > { %v8763_v23 = vpop.f32.mrb[139].mxu0 }
 0x416   : > { %14352 = vst [vmem:[#allocation56_spill] sm:$0xff] %v12535_v8  ;;  %v12537_v32 = vadd.f32 %v8763_v23, %v8762_v10 }
 0x417   : > { %8904 = vmatmul.mubr.msk.bf16.gmra.mrb[244].mxu0 %vm658_vm1, %v12441_v44 }
 0x418   : > { %14353 = vst [vmem:[#allocation57_spill] sm:$0xff] %v12537_v32  ;;  %8905 = vmatprep.mubr.msk.bf16.mxu0 %vm658_vm1, %v12465_v38 }
 0x41a   : > { %v8765_v30 = vpop.f32.mrb[140].mxu0 }
 0x41b   : > { %v8766_v4 = vpop.f32.mrb[141].mxu0 }
 0x41c   : > { %v12543_v24 = vadd.f32 %v8766_v4, %v8765_v30  ;;  %v8768_v0 = vpop.f32.mrb[142].mxu0 }
 0x41d   : > { %v8769_v46 = vpop.f32.mrb[143].mxu0 }
 0x41e   : > { %14354 = vst [vmem:[#allocation58_spill] sm:$0xff] %v12543_v24  ;;  %v12545_v37 = vadd.f32 %v8769_v46, %v8768_v0 }
 0x41f   : > { %8906 = vmatmul.mubr.msk.bf16.gmra.mrb[248].mxu0 %vm658_vm1, %v12465_v38 }
 0x420   : > { %14355 = vst [vmem:[#allocation59_spill] sm:$0xff] %v12545_v37  ;;  %8907 = vmatprep.mubr.msk.bf16.mxu0 %vm658_vm1, %v12463_v29 }
 0x422   : > { %v8771_v62 = vpop.f32.mrb[144].mxu0 }
 0x423   : > { %v8772_v16 = vpop.f32.mrb[145].mxu0 }
 0x424   : > { %v12551_v44 = vadd.f32 %v8772_v16, %v8771_v62  ;;  %v8774_v39 = vpop.f32.mrb[146].mxu0 }
 0x425   : > { %v8775_v28 = vpop.f32.mrb[147].mxu0 }
 0x426   : > { %14356 = vst [vmem:[#allocation60_spill] sm:$0xff] %v12551_v44  ;;  %v12553_v57 = vadd.f32 %v8775_v28, %v8774_v39 }
 0x427   : > { %8908 = vmatmul.mubr.msk.bf16.gmra.mrb[252].mxu0 %vm658_vm1, %v12463_v29 }
 0x428   : > { %14357 = vst [vmem:[#allocation61_spill] sm:$0xff] %v12553_v57 }
 0x42a   : > { %v8777_v18 = vpop.f32.mrb[148].mxu0 }
 0x42b   : > { %v8778_v31 = vpop.f32.mrb[149].mxu0 }
 0x42c   : > { %v12557_v20 = vadd.f32 %v8778_v31, %v8777_v18  ;;  %v8780_v60 = vpop.f32.mrb[150].mxu0 }
 0x42d   : > { %v8781_v38 = vpop.f32.mrb[151].mxu0 }
 0x42e   : > { %14358 = vst [vmem:[#allocation62_spill] sm:$0xff] %v12557_v20  ;;  %v12559_v27 = vadd.f32 %v8781_v38, %v8780_v60 }
 0x430   : > { %14359 = vst [vmem:[#allocation63_spill] sm:$0xff] %v12559_v27 }
 0x432   : > { %v8783_v5 = vpop.f32.mrb[152].mxu0 }
 0x433   : > { %v8784_v22 = vpop.f32.mrb[153].mxu0 }
 0x434   : > { %v12561_v53 = vadd.f32 %v8784_v22, %v8783_v5  ;;  %v8786_v51 = vpop.f32.mrb[154].mxu0 }
 0x435   : > { %v8787_v54 = vpop.f32.mrb[155].mxu0 }
 0x436   : > { %14360 = vst [vmem:[#allocation64_spill] sm:$0xff] %v12561_v53  ;;  %v12563_v10 = vadd.f32 %v8787_v54, %v8786_v51 }
 0x438   : > { %14361 = vst [vmem:[#allocation65_spill] sm:$0xff] %v12563_v10 }
 0x43a   : > { %v8789_v23 = vpop.f32.mrb[156].mxu0 }
 0x43b   : > { %v8790_v30 = vpop.f32.mrb[157].mxu0 }
 0x43c   : > { %v12565_v4 = vadd.f32 %v8790_v30, %v8789_v23  ;;  %v8792_v29 = vpop.f32.mrb[158].mxu0 }
 0x43d   : > { %v8793_v0 = vpop.f32.mrb[159].mxu0 }
 0x43e   : > { %14362 = vst [vmem:[#allocation66_spill] sm:$0xff] %v12565_v4  ;;  %v12567_v46 = vadd.f32 %v8793_v0, %v8792_v29 }
 0x440   : > { %14363 = vst [vmem:[#allocation67_spill] sm:$0xff] %v12567_v46 }
 0x442   : > { %v8795_v62 = vpop.f32.mrb[160].mxu0 }
 0x443   : > { %v8796_v16 = vpop.f32.mrb[161].mxu0 }
 0x444   : > { %v12569_v39 = vadd.f32 %v8796_v16, %v8795_v62  ;;  %v8798_v28 = vpop.f32.mrb[162].mxu0 }
 0x445   : > { %v8799_v18 = vpop.f32.mrb[163].mxu0 }
 0x446   : > { %14364 = vst [vmem:[#allocation68_spill] sm:$0xff] %v12569_v39  ;;  %v12571_v31 = vadd.f32 %v8799_v18, %v8798_v28 }
 0x448   : > { %14365 = vst [vmem:[#allocation69_spill] sm:$0xff] %v12571_v31 }
 0x44a   : > { %v8801_v60 = vpop.f32.mrb[164].mxu0 }
 0x44b   : > { %v8802_v38 = vpop.f32.mrb[165].mxu0 }
 0x44c   : > { %v12573_v5 = vadd.f32 %v8802_v38, %v8801_v60  ;;  %v8804_v22 = vpop.f32.mrb[166].mxu0 }
 0x44d   : > { %v8805_v51 = vpop.f32.mrb[167].mxu0 }
 0x44e   : > { %14366 = vst [vmem:[#allocation70_spill] sm:$0xff] %v12573_v5  ;;  %v12575_v54 = vadd.f32 %v8805_v51, %v8804_v22 }
 0x450   : > { %14367 = vst [vmem:[#allocation71_spill] sm:$0xff] %v12575_v54 }
 0x452   : > { %v8807_v23 = vpop.f32.mrb[168].mxu0 }
 0x453   : > { %v8808_v30 = vpop.f32.mrb[169].mxu0 }
 0x454   : > { %v12577_v29 = vadd.f32 %v8808_v30, %v8807_v23  ;;  %v8810_v0 = vpop.f32.mrb[170].mxu0 }
 0x455   : > { %v8811_v46 = vpop.f32.mrb[171].mxu0 }
 0x456   : > { %14368 = vst [vmem:[#allocation72_spill] sm:$0xff] %v12577_v29  ;;  %v12579_v62 = vadd.f32 %v8811_v46, %v8810_v0 }
 0x458   : > { %14369 = vst [vmem:[#allocation73_spill] sm:$0xff] %v12579_v62 }
 0x45a   : > { %v8813_v16 = vpop.f32.mrb[172].mxu0 }
 0x45b   : > { %v8814_v39 = vpop.f32.mrb[173].mxu0 }
 0x45c   : > { %v12581_v28 = vadd.f32 %v8814_v39, %v8813_v16  ;;  %v8816_v18 = vpop.f32.mrb[174].mxu0 }
 0x45d   : > { %v8817_v31 = vpop.f32.mrb[175].mxu0 }
 0x45e   : > { %14370 = vst [vmem:[#allocation74_spill] sm:$0xff] %v12581_v28  ;;  %v12583_v60 = vadd.f32 %v8817_v31, %v8816_v18 }
 0x460   : > { %14371 = vst [vmem:[#allocation75_spill] sm:$0xff] %v12583_v60 }
 0x462   : > { %v8819_v38 = vpop.f32.mrb[176].mxu0 }
 0x463   : > { %v8820_v5 = vpop.f32.mrb[177].mxu0 }
 0x464   : > { %v12585_v22 = vadd.f32 %v8820_v5, %v8819_v38  ;;  %v8822_v51 = vpop.f32.mrb[178].mxu0 }
 0x465   : > { %v8823_v54 = vpop.f32.mrb[179].mxu0 }
 0x466   : > { %14372 = vst [vmem:[#allocation76_spill] sm:$0xff] %v12585_v22  ;;  %v12587_v23 = vadd.f32 %v8823_v54, %v8822_v51 }
 0x468   : > { %14373 = vst [vmem:[#allocation77_spill] sm:$0xff] %v12587_v23 }
 0x46a   : > { %v8825_v30 = vpop.f32.mrb[180].mxu0 }
 0x46b   : > { %v8826_v29 = vpop.f32.mrb[181].mxu0 }
 0x46c   : > { %v12589_v46 = vadd.f32 %v8826_v29, %v8825_v30  ;;  %v8828_v0 = vpop.f32.mrb[182].mxu0 }
 0x46d   : > { %v8829_v62 = vpop.f32.mrb[183].mxu0 }
 0x46e   : > { %14374 = vst [vmem:[#allocation78_spill] sm:$0xff] %v12589_v46  ;;  %v12591_v39 = vadd.f32 %v8829_v62, %v8828_v0 }
 0x470   : > { %14375 = vst [vmem:[#allocation79_spill] sm:$0xff] %v12591_v39 }
 0x472   : > { %v8831_v16 = vpop.f32.mrb[184].mxu0 }
 0x473   : > { %v8832_v28 = vpop.f32.mrb[185].mxu0 }
 0x474   : > { %v12593_v31 = vadd.f32 %v8832_v28, %v8831_v16  ;;  %v8834_v18 = vpop.f32.mrb[186].mxu0 }
 0x475   : > { %v8835_v60 = vpop.f32.mrb[187].mxu0 }
 0x476   : > { %14376 = vst [vmem:[#allocation80_spill] sm:$0xff] %v12593_v31  ;;  %v12595_v5 = vadd.f32 %v8835_v60, %v8834_v18 }
 0x478   : > { %14377 = vst [vmem:[#allocation81_spill] sm:$0xff] %v12595_v5 }
 0x47a   : > { %v8837_v38 = vpop.f32.mrb[188].mxu0 }
 0x47b   : > { %v8838_v22 = vpop.f32.mrb[189].mxu0 }
 0x47c   : > { %v12597_v54 = vadd.f32 %v8838_v22, %v8837_v38  ;;  %v8840_v51 = vpop.f32.mrb[190].mxu0 }
 0x47d   : > { %v8841_v23 = vpop.f32.mrb[191].mxu0 }
 0x47e   : > { %14378 = vst [vmem:[#allocation82_spill] sm:$0xff] %v12597_v54  ;;  %v12599_v29 = vadd.f32 %v8841_v23, %v8840_v51 }
 0x480   : > { %14379 = vst [vmem:[#allocation83_spill] sm:$0xff] %v12599_v29 }
 0x482   : > { %v12601_v30 = vpop.f32.mrb[192].mxu0 }
 0x483   : > { %v12603_v62 = vpop.f32.mrb[193].mxu0 }
 0x484   : > { %v12605_v0 = vpop.f32.mrb[194].mxu0  ;;  %v4009_v28 = vmax.f32 %v12601_v30, %v12603_v62 }
 0x485   : > { %v12609_v16 = vpop.f32.mrb[195].mxu0 }
 0x486   : > { %4010 = vmax.xlane.f32.xlu0 %v4009_v28  ;;  %v4012_v60 = vmax.f32 %v12605_v0, %v12609_v16 }
 0x488   : > { %4013 = vmax.xlane.f32.xlu1 %v4012_v60 }
 0x48a   : > { %v12613_v22 = vpop.f32.mrb[196].mxu0 }
 0x48b   : > { %v12615_v23 = vpop.f32.mrb[197].mxu0 }
 0x48c   : > { %v12617_v18 = vpop.f32.mrb[198].mxu0  ;;  %v4015_v38 = vmax.f32 %v12613_v22, %v12615_v23 }
 0x48d   : > { %v12621_v51 = vpop.f32.mrb[199].mxu0 }
 0x48e   : > { %4016 = vmax.xlane.f32.xlu0 %v4015_v38  ;;  %v4018_v29 = vmax.f32 %v12617_v18, %v12621_v51 }
 0x490   : > { %4019 = vmax.xlane.f32.xlu1 %v4018_v29 }
 0x492   : > { %v12625_v28 = vpop.f32.mrb[200].mxu0 }
 0x493   : > { %v12627_v54 = vpop.f32.mrb[201].mxu0 }
 0x494   : > { %v12629_v60 = vpop.f32.mrb[202].mxu0  ;;  %v4021_v5 = vmax.f32 %v12625_v28, %v12627_v54 }
 0x495   : > { %v12633_v31 = vpop.f32.mrb[203].mxu0 }
 0x496   : > { %4022 = vmax.xlane.f32.xlu0 %v4021_v5  ;;  %v4024_v39 = vmax.f32 %v12629_v60, %v12633_v31 }
 0x498   : > { %4025 = vmax.xlane.f32.xlu1 %v4024_v39 }
 0x49a   : > { %v12637_v38 = vpop.f32.mrb[204].mxu0 }
 0x49b   : > { %v12639_v46 = vpop.f32.mrb[205].mxu0 }
 0x49c   : > { %v12641_v29 = vpop.f32.mrb[206].mxu0  ;;  %v4027_v4 = vmax.f32 %v12637_v38, %v12639_v46 }
 0x49d   : > { %v12645_v10 = vpop.f32.mrb[207].mxu0 }
 0x49e   : > { %4028 = vmax.xlane.f32.xlu0 %v4027_v4  ;;  %v4030_v53 = vmax.f32 %v12641_v29, %v12645_v10  ;;  %v12664_v4 = vld [vmem:[%s14163_s1 + $0x20] sm:$0xff]  }
 0x49f   : > { %9873 = vmatprep.subr.bf16.mxu1 %v12664_v4 }
 0x4a0   : > { %4031 = vmax.xlane.f32.xlu1 %v4030_v53 }
 0x4a2   : > { %v12649_v5 = vpop.f32.mrb[208].mxu0 }
 0x4a3   : > { %v12651_v27 = vpop.f32.mrb[209].mxu0 }
 0x4a4   : > { %v12653_v39 = vpop.f32.mrb[210].mxu0  ;;  %v4033_v20 = vmax.f32 %v12649_v5, %v12651_v27 }
 0x4a5   : > { %v12657_v57 = vpop.f32.mrb[211].mxu0 }
 0x4a6   : > { %4034 = vmax.xlane.f32.xlu0 %v4033_v20  ;;  %v4036_v44 = vmax.f32 %v12653_v39, %v12657_v57 }
 0x4a8   : > { %4037 = vmax.xlane.f32.xlu1 %v4036_v44 }
 0x4aa   : > { %v12667_v53 = vpop.f32.mrb[212].mxu0 }
 0x4ab   : > { %v12669_v37 = vpop.f32.mrb[213].mxu0 }
 0x4ac   : > { %v12671_v24 = vpop.f32.mrb[214].mxu0  ;;  %v4039_v20 = vmax.f32 %v12667_v53, %v12669_v37 }
 0x4ad   : > { %v12675_v32 = vpop.f32.mrb[215].mxu0 }
 0x4ae   : > { %4040 = vmax.xlane.f32.xlu0 %v4039_v20  ;;  %v4042_v8 = vmax.f32 %v12671_v24, %v12675_v32 }
 0x4b0   : > { %4043 = vmax.xlane.f32.xlu1 %v4042_v8 }
 0x4b2   : > { %v12679_v7 = vpop.f32.mrb[216].mxu0 }
 0x4b3   : > { %v12681_v44 = vpop.f32.mrb[217].mxu0 }
 0x4b4   : > { %v12683_v55 = vpop.f32.mrb[218].mxu0  ;;  %v4045_v40 = vmax.f32 %v12679_v7, %v12681_v44 }
 0x4b5   : > { %v12687_v25 = vpop.f32.mrb[219].mxu0 }
 0x4b6   : > { %4046 = vmax.xlane.f32.xlu0 %v4045_v40  ;;  %v4048_v15 = vmax.f32 %v12683_v55, %v12687_v25 }
 0x4b8   : > { %4049 = vmax.xlane.f32.xlu1 %v4048_v15 }
 0x4ba   : > { %v12691_v20 = vpop.f32.mrb[220].mxu0 }
 0x4bb   : > { %v12693_v26 = vpop.f32.mrb[221].mxu0 }
 0x4bc   : > { %v12695_v8 = vpop.f32.mrb[222].mxu0  ;;  %v4051_v45 = vmax.f32 %v12691_v20, %v12693_v26 }
 0x4bd   : > { %v12699_v43 = vpop.f32.mrb[223].mxu0 }
 0x4be   : > { %4052 = vmax.xlane.f32.xlu0 %v4051_v45  ;;  %v4054_v9 = vmax.f32 %v12695_v8, %v12699_v43 }
 0x4c0   : > { %4055 = vmax.xlane.f32.xlu1 %v4054_v9 }
 0x4c2   : > { %v12703_v40 = vpop.f32.mrb[224].mxu0 }
 0x4c3   : > { %v12705_v47 = vpop.f32.mrb[225].mxu0 }
 0x4c4   : > { %v12707_v15 = vpop.f32.mrb[226].mxu0  ;;  %v4057_v59 = vmax.f32 %v12703_v40, %v12705_v47 }
 0x4c5   : > { %v12711_v52 = vpop.f32.mrb[227].mxu0 }
 0x4c6   : > { %4058 = vmax.xlane.f32.xlu0 %v4057_v59  ;;  %v4060_v11 = vmax.f32 %v12707_v15, %v12711_v52 }
 0x4c8   : > { %4061 = vmax.xlane.f32.xlu1 %v4060_v11 }
 0x4ca   : > { %v12715_v45 = vpop.f32.mrb[228].mxu0 }
 0x4cb   : > { %v12717_v1 = vpop.f32.mrb[229].mxu0 }
 0x4cc   : > { %v12719_v9 = vpop.f32.mrb[230].mxu0  ;;  %v4063_v61 = vmax.f32 %v12715_v45, %v12717_v1 }
 0x4cd   : > { %v12723_v3 = vpop.f32.mrb[231].mxu0 }
 0x4ce   : > { %4064 = vmax.xlane.f32.xlu0 %v4063_v61  ;;  %v4066_v49 = vmax.f32 %v12719_v9, %v12723_v3 }
 0x4d0   : > { %4067 = vmax.xlane.f32.xlu1 %v4066_v49 }
 0x4d2   : > { %v12727_v59 = vpop.f32.mrb[232].mxu0 }
 0x4d3   : > { %v12729_v35 = vpop.f32.mrb[233].mxu0 }
 0x4d4   : > { %v12731_v11 = vpop.f32.mrb[234].mxu0  ;;  %v4069_v2 = vmax.f32 %v12727_v59, %v12729_v35 }
 0x4d5   : > { %v12735_v17 = vpop.f32.mrb[235].mxu0 }
 0x4d6   : > { %4070 = vmax.xlane.f32.xlu0 %v4069_v2  ;;  %v4072_v58 = vmax.f32 %v12731_v11, %v12735_v17 }
 0x4d8   : > { %4073 = vmax.xlane.f32.xlu1 %v4072_v58 }
 0x4da   : > { %v12739_v61 = vpop.f32.mrb[236].mxu0 }
 0x4db   : > { %v12741_v56 = vpop.f32.mrb[237].mxu0 }
 0x4dc   : > { %v12743_v49 = vpop.f32.mrb[238].mxu0  ;;  %v4075_v14 = vmax.f32 %v12739_v61, %v12741_v56 }
 0x4dd   : > { %v12747_v36 = vpop.f32.mrb[239].mxu0 }
 0x4de   : > { %4076 = vmax.xlane.f32.xlu0 %v4075_v14  ;;  %v4078_v63 = vmax.f32 %v12743_v49, %v12747_v36 }
 0x4e0   : > { %4079 = vmax.xlane.f32.xlu1 %v4078_v63 }
 0x4e2   : > { %v12751_v2 = vpop.f32.mrb[240].mxu0 }
 0x4e3   : > { %v12753_v21 = vpop.f32.mrb[241].mxu0 }
 0x4e4   : > { %14380 = vst [vmem:[#allocation84_spill] sm:$0xff] %v12753_v21  ;;  %v12755_v58 = vpop.f32.mrb[242].mxu0  ;;  %v4081_v34 = vmax.f32 %v12751_v2, %v12753_v21 }
 0x4e5   : > { %14381 = vst [vmem:[#allocation85_spill] sm:$0xff] %v12755_v58  ;;  %v12759_v42 = vpop.f32.mrb[243].mxu0 }
 0x4e6   : > { %14382 = vst [vmem:[#allocation86_spill] sm:$0xff] %v12759_v42  ;;  %4082 = vmax.xlane.f32.xlu0 %v4081_v34  ;;  %v4084_v50 = vmax.f32 %v12755_v58, %v12759_v42 }
 0x4e8   : > { %4085 = vmax.xlane.f32.xlu1 %v4084_v50 }
 0x4ea   : > { %v12763_v14 = vpop.f32.mrb[244].mxu0 }
 0x4eb   : > { %14383 = vst [vmem:[#allocation87_spill] sm:$0xff] %v12763_v14  ;;  %v12765_v6 = vpop.f32.mrb[245].mxu0 }
 0x4ec   : > { %14384 = vst [vmem:[#allocation88_spill] sm:$0xff] %v12765_v6  ;;  %v12767_v63 = vpop.f32.mrb[246].mxu0  ;;  %v4087_v33 = vmax.f32 %v12763_v14, %v12765_v6 }
 0x4ed   : > { %14385 = vst [vmem:[#allocation89_spill] sm:$0xff] %v12767_v63  ;;  %v12771_v13 = vpop.f32.mrb[247].mxu0 }
 0x4ee   : > { %14386 = vst [vmem:[#allocation90_spill] sm:$0xff] %v12771_v13  ;;  %4088 = vmax.xlane.f32.xlu0 %v4087_v33  ;;  %v4090_v48 = vmax.f32 %v12767_v63, %v12771_v13 }
 0x4f0   : > { %4091 = vmax.xlane.f32.xlu1 %v4090_v48 }
 0x4f2   : > { %v12775_v34 = vpop.f32.mrb[248].mxu0 }
 0x4f3   : > { %14387 = vst [vmem:[#allocation91_spill] sm:$0xff] %v12775_v34  ;;  %v12777_v19 = vpop.f32.mrb[249].mxu0 }
 0x4f4   : > { %14388 = vst [vmem:[#allocation92_spill] sm:$0xff] %v12777_v19  ;;  %v12779_v50 = vpop.f32.mrb[250].mxu0  ;;  %v4093_v41 = vmax.f32 %v12775_v34, %v12777_v19 }
 0x4f5   : > { %14389 = vst [vmem:[#allocation93_spill] sm:$0xff] %v12779_v50  ;;  %v12783_v12 = vpop.f32.mrb[251].mxu0 }
 0x4f6   : > { %14390 = vst [vmem:[#allocation94_spill] sm:$0xff] %v12783_v12  ;;  %4094 = vmax.xlane.f32.xlu0 %v4093_v41  ;;  %v4096_v6 = vmax.f32 %v12779_v50, %v12783_v12 }
 0x4f8   : > { %4097 = vmax.xlane.f32.xlu1 %v4096_v6 }
 0x4fa   : > { %v12787_v33 = vpop.f32.mrb[252].mxu0 }
 0x4fb   : > { %14391 = vst [vmem:[#allocation95_spill] sm:$0xff] %v12787_v33  ;;  %v12789_v13 = vpop.f32.mrb[253].mxu0 }
 0x4fc   : > { %14392 = vst [vmem:[#allocation96_spill] sm:$0xff] %v12789_v13  ;;  %v12791_v48 = vpop.f32.mrb[254].mxu0  ;;  %v4099_v63 = vmax.f32 %v12787_v33, %v12789_v13 }
 0x4fd   : > { %v12795_v14 = vpop.f32.mrb[255].mxu0 }
 0x4fe   : > { %14393 = vst [vmem:[#allocation97_spill] sm:$0xff] %v12795_v14  ;;  %4100 = vmax.xlane.f32.xlu0 %v4099_v63  ;;  %v4102_v19 = vmax.f32 %v12791_v48, %v12795_v14 }
 0x500   : > { %4103 = vmax.xlane.f32.xlu1 %v4102_v19 }
 0x513   : > { %v4011_v41 = vpop.xlane.xlu0 %4010 }
 0x514   : > { %v4105_v12 = vsub.f32 %v12601_v30, %v4011_v41  ;;  %v4106_v6 = vsub.f32 %v12603_v62, %v4011_v41 }
 0x515   : > { %v4014_v50 = vpop.xlane.xlu1 %4013 }
 0x516   : > { %v4169_v34 = vmul.f32 1.442695, %v4105_v12  ;;  %v4171_v42 = vmul.f32 1.442695, %v4106_v6  ;;  %v4107_v58 = vsub.f32 %v12605_v0, %v4014_v50  ;;  %v4108_v21 = vsub.f32 %v12609_v16, %v4014_v50 }
 0x518   : > { %10321 = vpow2.f32 %v4169_v34  ;;  %v4173_v13 = vmul.f32 1.442695, %v4107_v58  ;;  %v4175_v33 = vmul.f32 1.442695, %v4108_v21 }
 0x519   : > { %10323 = vpow2.f32 %v4171_v42 }
 0x51a   : > { %10325 = vpow2.f32 %v4173_v13 }
 0x51b   : > { %10327 = vpow2.f32 %v4175_v33  ;;  %v4017_v63 = vpop.xlane.xlu0 %4016 }
 0x51c   : > { %v4109_v19 = vsub.f32 %v12613_v22, %v4017_v63  ;;  %v4110_v30 = vsub.f32 %v12615_v23, %v4017_v63 }
 0x51d   : > { %v4020_v14 = vpop.xlane.xlu1 %4019 }
 0x51e   : > { %v4177_v62 = vmul.f32 1.442695, %v4109_v19  ;;  %v4179_v41 = vmul.f32 1.442695, %v4110_v30  ;;  %v4111_v12 = vsub.f32 %v12617_v18, %v4020_v14  ;;  %v4112_v0 = vsub.f32 %v12621_v51, %v4020_v14 }
 0x520   : > { %10329 = vpow2.f32 %v4177_v62  ;;  %v4181_v16 = vmul.f32 1.442695, %v4111_v12  ;;  %v4183_v34 = vmul.f32 1.442695, %v4112_v0 }
 0x521   : > { %10331 = vpow2.f32 %v4179_v41 }
 0x522   : > { %v10322_v21 = vpop.eup %10321  ;;  %10333 = vpow2.f32 %v4181_v16 }
 0x523   : > { %v10324_v13 = vpop.eup %10323  ;;  %10335 = vpow2.f32 %v4183_v34  ;;  %v4023_v42 = vpop.xlane.xlu0 %4022 }
 0x524   : > { %v10326_v58 = vpop.eup %10325  ;;  %v4113_v22 = vsub.f32 %v12625_v28, %v4023_v42  ;;  %v4114_v23 = vsub.f32 %v12627_v54, %v4023_v42  ;;  %v4297_v50 = vadd.f32 %v10324_v13, %v10322_v21  ;;  %v10190_v54 = vld [vmem:[%s14163_s1 + $0x28] sm:$0xff]  }
 0x525   : > { %v10328_v33 = vpop.eup %10327  ;;  %v4393_v6 = vpack.c.bf16 %v10326_v58, %v10322_v21  ;;  %v4026_v18 = vpop.xlane.xlu1 %4025 }
 0x526   : > { %v4185_v63 = vmul.f32 1.442695, %v4113_v22  ;;  %v4187_v51 = vmul.f32 1.442695, %v4114_v23  ;;  %v4115_v14 = vsub.f32 %v12629_v60, %v4026_v18  ;;  %v4116_v19 = vsub.f32 %v12633_v31, %v4026_v18  ;;  %4298 = vadd.xlane.f32.xlu0 %v4297_v50 }
 0x527   : > { %v4394_v30 = vpack.c.bf16 %v10328_v33, %v10324_v13  ;;  %v4300_v62 = vadd.f32 %v10328_v33, %v10326_v58 }
 0x528   : > { %10337 = vpow2.f32 %v4185_v63  ;;  %v4189_v41 = vmul.f32 1.442695, %v4115_v14  ;;  %v4191_v12 = vmul.f32 1.442695, %v4116_v19 }
 0x529   : > { %10339 = vpow2.f32 %v4187_v51  ;;  %4457 = vmatprep.mubr.bf16.mxu1 %v4394_v30  ;;  %4301 = vadd.xlane.f32.xlu1 %v4300_v62 }
 0x52a   : > { %v10330_v28 = vpop.eup %10329  ;;  %10341 = vpow2.f32 %v4189_v41  ;;  %4458 = vmatmul.mubr.bf16.vlgmr.msra.gmra.mrb[0].mxu1 %v4393_v6 }
 0x52b   : > { %v10332_v0 = vpop.eup %10331  ;;  %10343 = vpow2.f32 %v4191_v12  ;;  %9874 = vmatpush3.bf16.msra.mxu1 %v12664_v4  ;;  %v4029_v31 = vpop.xlane.xlu0 %4028  ;;  %v5304_v4 = vld [vmem:[#allocation2 + $0x140] sm:$0xff] }
 0x52c   : > { %v10334_v60 = vpop.eup %10333  ;;  %9875 = vmatprep.subr.bf16.mxu1 %v10190_v54  ;;  %v4117_v16 = vsub.f32 %v12637_v38, %v4029_v31  ;;  %v4118_v34 = vsub.f32 %v12639_v46, %v4029_v31  ;;  %v4303_v21 = vadd.f32 %v10332_v0, %v10330_v28 }
 0x52d   : > { %v10336_v13 = vpop.eup %10335  ;;  %v4395_v42 = vpack.c.bf16 %v10334_v60, %v10330_v28  ;;  %v4032_v58 = vpop.xlane.xlu1 %4031 }
 0x52e   : > { %v4193_v22 = vmul.f32 1.442695, %v4117_v16  ;;  %v4195_v23 = vmul.f32 1.442695, %v4118_v34  ;;  %v4119_v50 = vsub.f32 %v12641_v29, %v4032_v58  ;;  %v4120_v33 = vsub.f32 %v12645_v10, %v4032_v58  ;;  %4304 = vadd.xlane.f32.xlu0 %v4303_v21 }
 0x52f   : > { %9876 = vmatpush3.bf16.msra.mxu1 %v10190_v54  ;;  %v4396_v6 = vpack.c.bf16 %v10336_v13, %v10332_v0  ;;  %v4306_v18 = vadd.f32 %v10336_v13, %v10334_v60 }
 0x530   : > { %10345 = vpow2.f32 %v4193_v22  ;;  %10127 = vmatprep.subr.msk.bf16.mxu1 %vm658_vm1, %v5304_v4  ;;  %v4197_v38 = vmul.f32 1.442695, %v4119_v50  ;;  %v4199_v46 = vmul.f32 1.442695, %v4120_v33 }
 0x531   : > { %10347 = vpow2.f32 %v4195_v23  ;;  %4465 = vmatprep.mubr.bf16.mxu1 %v4396_v6  ;;  %4307 = vadd.xlane.f32.xlu1 %v4306_v18 }
 0x532   : > { %v10338_v63 = vpop.eup %10337  ;;  %10349 = vpow2.f32 %v4197_v38  ;;  %4466 = vmatmul.mubr.bf16.gmra.mrb[4].mxu1 %v4395_v42 }
 0x533   : > { %v10340_v51 = vpop.eup %10339  ;;  %10351 = vpow2.f32 %v4199_v46  ;;  %v4035_v29 = vpop.xlane.xlu0 %4034 }
 0x534   : > { %v10342_v10 = vpop.eup %10341  ;;  %v4121_v14 = vsub.f32 %v12649_v5, %v4035_v29  ;;  %v4122_v19 = vsub.f32 %v12651_v27, %v4035_v29  ;;  %v4309_v30 = vadd.f32 %v10340_v51, %v10338_v63 }
 0x535   : > { %v10344_v62 = vpop.eup %10343  ;;  %v4397_v41 = vpack.c.bf16 %v10342_v10, %v10338_v63  ;;  %v4038_v12 = vpop.xlane.xlu1 %4037 }
 0x536   : > { %v4201_v54 = vmul.f32 1.442695, %v4121_v14  ;;  %v4203_v28 = vmul.f32 1.442695, %v4122_v19  ;;  %v4123_v0 = vsub.f32 %v12653_v39, %v4038_v12  ;;  %v4124_v31 = vsub.f32 %v12657_v57, %v4038_v12  ;;  %4310 = vadd.xlane.f32.xlu0 %v4309_v30 }
 0x537   : > { %v4398_v60 = vpack.c.bf16 %v10344_v62, %v10340_v51  ;;  %v4312_v16 = vadd.f32 %v10344_v62, %v10342_v10 }
 0x538   : > { %10353 = vpow2.f32 %v4201_v54  ;;  %v4205_v34 = vmul.f32 1.442695, %v4123_v0  ;;  %v4207_v21 = vmul.f32 1.442695, %v4124_v31 }
 0x539   : > { %10355 = vpow2.f32 %v4203_v28  ;;  %4473 = vmatprep.mubr.bf16.mxu1 %v4398_v60  ;;  %4313 = vadd.xlane.f32.xlu1 %v4312_v16 }
 0x53a   : > { %v10346_v27 = vpop.eup %10345  ;;  %10357 = vpow2.f32 %v4205_v34  ;;  %4474 = vmatmul.mubr.bf16.gmra.mrb[8].mxu1 %v4397_v41 }
 0x53b   : > { %v10348_v5 = vpop.eup %10347  ;;  %10359 = vpow2.f32 %v4207_v21  ;;  %v4041_v13 = vpop.xlane.xlu0 %4040 }
 0x53c   : > { %v10350_v42 = vpop.eup %10349  ;;  %v4125_v39 = vsub.f32 %v12667_v53, %v4041_v13  ;;  %v4126_v57 = vsub.f32 %v12669_v37, %v4041_v13  ;;  %v4315_v58 = vadd.f32 %v10348_v5, %v10346_v27 }
 0x53d   : > { %v10352_v22 = vpop.eup %10351  ;;  %v4399_v23 = vpack.c.bf16 %v10350_v42, %v10346_v27  ;;  %v4044_v50 = vpop.xlane.xlu1 %4043 }
 0x53e   : > { %v4209_v33 = vmul.f32 1.442695, %v4125_v39  ;;  %v4211_v4 = vmul.f32 1.442695, %v4126_v57  ;;  %v4127_v6 = vsub.f32 %v12671_v24, %v4044_v50  ;;  %v4128_v18 = vsub.f32 %v12675_v32, %v4044_v50  ;;  %4316 = vadd.xlane.f32.xlu0 %v4315_v58 }
 0x53f   : > { %v4400_v38 = vpack.c.bf16 %v10352_v22, %v10348_v5  ;;  %v4318_v46 = vadd.f32 %v10352_v22, %v10350_v42 }
 0x540   : > { %10361 = vpow2.f32 %v4209_v33  ;;  %v4213_v63 = vmul.f32 1.442695, %v4127_v6  ;;  %v4215_v51 = vmul.f32 1.442695, %v4128_v18 }
 0x541   : > { %10363 = vpow2.f32 %v4211_v4  ;;  %4481 = vmatprep.mubr.bf16.mxu1 %v4400_v38  ;;  %4319 = vadd.xlane.f32.xlu1 %v4318_v46 }
 0x542   : > { %v10354_v37 = vpop.eup %10353  ;;  %10365 = vpow2.f32 %v4213_v63  ;;  %4482 = vmatmul.mubr.bf16.gmra.mrb[12].mxu1 %v4399_v23 }
 0x543   : > { %v10356_v53 = vpop.eup %10355  ;;  %10367 = vpow2.f32 %v4215_v51  ;;  %v4047_v29 = vpop.xlane.xlu0 %4046 }
 0x544   : > { %v10358_v10 = vpop.eup %10357  ;;  %v4129_v24 = vsub.f32 %v12679_v7, %v4047_v29  ;;  %v4130_v32 = vsub.f32 %v12681_v44, %v4047_v29  ;;  %v4321_v14 = vadd.f32 %v10356_v53, %v10354_v37 }
 0x545   : > { %v10360_v19 = vpop.eup %10359  ;;  %v4401_v30 = vpack.c.bf16 %v10358_v10, %v10354_v37  ;;  %v4050_v62 = vpop.xlane.xlu1 %4049 }
 0x546   : > { %v4217_v41 = vmul.f32 1.442695, %v4129_v24  ;;  %v4219_v12 = vmul.f32 1.442695, %v4130_v32  ;;  %v4131_v54 = vsub.f32 %v12683_v55, %v4050_v62  ;;  %v4132_v28 = vsub.f32 %v12687_v25, %v4050_v62  ;;  %4322 = vadd.xlane.f32.xlu0 %v4321_v14 }
 0x547   : > { %v4402_v0 = vpack.c.bf16 %v10360_v19, %v10356_v53  ;;  %v4324_v31 = vadd.f32 %v10360_v19, %v10358_v10 }
 0x548   : > { %10369 = vpow2.f32 %v4217_v41  ;;  %v4221_v60 = vmul.f32 1.442695, %v4131_v54  ;;  %v4223_v16 = vmul.f32 1.442695, %v4132_v28 }
 0x549   : > { %10371 = vpow2.f32 %v4219_v12  ;;  %4489 = vmatprep.mubr.bf16.mxu1 %v4402_v0  ;;  %4325 = vadd.xlane.f32.xlu1 %v4324_v31 }
 0x54a   : > { %v10362_v7 = vpop.eup %10361  ;;  %10373 = vpow2.f32 %v4221_v60  ;;  %4490 = vmatmul.mubr.bf16.gmra.mrb[16].mxu1 %v4401_v30 }
 0x54b   : > { %v10364_v44 = vpop.eup %10363  ;;  %10375 = vpow2.f32 %v4223_v16  ;;  %v4053_v34 = vpop.xlane.xlu0 %4052 }
 0x54c   : > { %v10366_v21 = vpop.eup %10365  ;;  %v4133_v55 = vsub.f32 %v12691_v20, %v4053_v34  ;;  %v4134_v25 = vsub.f32 %v12693_v26, %v4053_v34  ;;  %v4327_v27 = vadd.f32 %v10364_v44, %v10362_v7 }
 0x54d   : > { %v10368_v5 = vpop.eup %10367  ;;  %v4403_v13 = vpack.c.bf16 %v10366_v21, %v10362_v7  ;;  %v4056_v42 = vpop.xlane.xlu1 %4055 }
 0x54e   : > { %v4225_v39 = vmul.f32 1.442695, %v4133_v55  ;;  %v4227_v57 = vmul.f32 1.442695, %v4134_v25  ;;  %v4135_v58 = vsub.f32 %v12695_v8, %v4056_v42  ;;  %v4136_v22 = vsub.f32 %v12699_v43, %v4056_v42  ;;  %4328 = vadd.xlane.f32.xlu0 %v4327_v27 }
 0x54f   : > { %v4404_v23 = vpack.c.bf16 %v10368_v5, %v10364_v44  ;;  %v4330_v50 = vadd.f32 %v10368_v5, %v10366_v21 }
 0x550   : > { %10377 = vpow2.f32 %v4225_v39  ;;  %v4229_v33 = vmul.f32 1.442695, %v4135_v58  ;;  %v4231_v4 = vmul.f32 1.442695, %v4136_v22 }
 0x551   : > { %10379 = vpow2.f32 %v4227_v57  ;;  %4497 = vmatprep.mubr.bf16.mxu1 %v4404_v23  ;;  %4331 = vadd.xlane.f32.xlu1 %v4330_v50 }
 0x552   : > { %v10370_v26 = vpop.eup %10369  ;;  %10381 = vpow2.f32 %v4229_v33  ;;  %4498 = vmatmul.mubr.bf16.gmra.mrb[20].mxu1 %v4403_v13 }
 0x553   : > { %v10372_v20 = vpop.eup %10371  ;;  %10383 = vpow2.f32 %v4231_v4  ;;  %v4059_v6 = vpop.xlane.xlu0 %4058 }
 0x554   : > { %v10374_v18 = vpop.eup %10373  ;;  %v4137_v8 = vsub.f32 %v12703_v40, %v4059_v6  ;;  %v4138_v43 = vsub.f32 %v12705_v47, %v4059_v6  ;;  %v4333_v38 = vadd.f32 %v10372_v20, %v10370_v26 }
 0x555   : > { %v10376_v46 = vpop.eup %10375  ;;  %v4405_v63 = vpack.c.bf16 %v10374_v18, %v10370_v26  ;;  %v4062_v51 = vpop.xlane.xlu1 %4061 }
 0x556   : > { %v4233_v37 = vmul.f32 1.442695, %v4137_v8  ;;  %v4235_v53 = vmul.f32 1.442695, %v4138_v43  ;;  %v4139_v29 = vsub.f32 %v12707_v15, %v4062_v51  ;;  %v4140_v10 = vsub.f32 %v12711_v52, %v4062_v51  ;;  %4334 = vadd.xlane.f32.xlu0 %v4333_v38 }
 0x557   : > { %v4406_v24 = vpack.c.bf16 %v10376_v46, %v10372_v20  ;;  %v4336_v32 = vadd.f32 %v10376_v46, %v10374_v18 }
 0x558   : > { %10385 = vpow2.f32 %v4233_v37  ;;  %v4237_v14 = vmul.f32 1.442695, %v4139_v29  ;;  %v4239_v19 = vmul.f32 1.442695, %v4140_v10 }
 0x559   : > { %10387 = vpow2.f32 %v4235_v53  ;;  %4505 = vmatprep.mubr.bf16.mxu1 %v4406_v24  ;;  %4337 = vadd.xlane.f32.xlu1 %v4336_v32 }
 0x55a   : > { %v10378_v47 = vpop.eup %10377  ;;  %10389 = vpow2.f32 %v4237_v14  ;;  %4506 = vmatmul.mubr.bf16.gmra.mrb[24].mxu1 %v4405_v63  ;;  %v14394_v14 = vld [vmem:[#allocation84_spill] sm:$0xff] }
 0x55b   : > { %v10380_v40 = vpop.eup %10379  ;;  %10391 = vpow2.f32 %v4239_v19  ;;  %v4065_v30 = vpop.xlane.xlu0 %4064 }
 0x55c   : > { %v10382_v62 = vpop.eup %10381  ;;  %v4141_v15 = vsub.f32 %v12715_v45, %v4065_v30  ;;  %v4142_v52 = vsub.f32 %v12717_v1, %v4065_v30  ;;  %v4339_v41 = vadd.f32 %v10380_v40, %v10378_v47 }
 0x55d   : > { %v10384_v12 = vpop.eup %10383  ;;  %v4407_v54 = vpack.c.bf16 %v10382_v62, %v10378_v47  ;;  %v4068_v28 = vpop.xlane.xlu1 %4067 }
 0x55e   : > { %v4241_v0 = vmul.f32 1.442695, %v4141_v15  ;;  %v4243_v31 = vmul.f32 1.442695, %v4142_v52  ;;  %v4143_v60 = vsub.f32 %v12719_v9, %v4068_v28  ;;  %v4144_v16 = vsub.f32 %v12723_v3, %v4068_v28  ;;  %4340 = vadd.xlane.f32.xlu0 %v4339_v41  ;;  %v14395_v52 = vld [vmem:[#allocation85_spill] sm:$0xff] }
 0x55f   : > { %v4408_v7 = vpack.c.bf16 %v10384_v12, %v10380_v40  ;;  %v4342_v44 = vadd.f32 %v10384_v12, %v10382_v62  ;;  %v14396_v12 = vld [vmem:[#allocation86_spill] sm:$0xff] }
 0x560   : > { %10393 = vpow2.f32 %v4241_v0  ;;  %v4245_v34 = vmul.f32 1.442695, %v4143_v60  ;;  %v4247_v21 = vmul.f32 1.442695, %v4144_v16 }
 0x561   : > { %10395 = vpow2.f32 %v4243_v31  ;;  %4513 = vmatprep.mubr.bf16.mxu1 %v4408_v7  ;;  %4343 = vadd.xlane.f32.xlu1 %v4342_v44 }
 0x562   : > { %v10386_v1 = vpop.eup %10385  ;;  %10397 = vpow2.f32 %v4245_v34  ;;  %4514 = vmatmul.mubr.bf16.gmra.mrb[28].mxu1 %v4407_v54  ;;  %v14397_v34 = vld [vmem:[#allocation87_spill] sm:$0xff] }
 0x563   : > { %v10388_v45 = vpop.eup %10387  ;;  %10399 = vpow2.f32 %v4247_v21  ;;  %v4071_v55 = vpop.xlane.xlu0 %4070 }
 0x564   : > { %v10390_v25 = vpop.eup %10389  ;;  %v4145_v9 = vsub.f32 %v12727_v59, %v4071_v55  ;;  %v4146_v3 = vsub.f32 %v12729_v35, %v4071_v55  ;;  %v4345_v27 = vadd.f32 %v10388_v45, %v10386_v1 }
 0x565   : > { %v10392_v5 = vpop.eup %10391  ;;  %v4409_v13 = vpack.c.bf16 %v10390_v25, %v10386_v1  ;;  %v4074_v42 = vpop.xlane.xlu1 %4073  ;;  %v14398_v1 = vld [vmem:[#allocation88_spill] sm:$0xff] }
 0x566   : > { %v4249_v39 = vmul.f32 1.442695, %v4145_v9  ;;  %v4251_v57 = vmul.f32 1.442695, %v4146_v3  ;;  %v4147_v58 = vsub.f32 %v12731_v11, %v4074_v42  ;;  %v4148_v22 = vsub.f32 %v12735_v17, %v4074_v42  ;;  %4346 = vadd.xlane.f32.xlu0 %v4345_v27 }
 0x567   : > { %v4410_v23 = vpack.c.bf16 %v10392_v5, %v10388_v45  ;;  %v4348_v50 = vadd.f32 %v10392_v5, %v10390_v25 }
 0x568   : > { %10401 = vpow2.f32 %v4249_v39  ;;  %v4253_v33 = vmul.f32 1.442695, %v4147_v58  ;;  %v4255_v4 = vmul.f32 1.442695, %v4148_v22  ;;  %v14400_v39 = vld [vmem:[#allocation90_spill] sm:$0xff] }
 0x569   : > { %10403 = vpow2.f32 %v4251_v57  ;;  %4521 = vmatprep.mubr.bf16.mxu1 %v4410_v23  ;;  %4349 = vadd.xlane.f32.xlu1 %v4348_v50 }
 0x56a   : > { %v10394_v35 = vpop.eup %10393  ;;  %10405 = vpow2.f32 %v4253_v33  ;;  %4522 = vmatmul.mubr.bf16.gmra.mrb[32].mxu1 %v4409_v13  ;;  %v14399_v13 = vld [vmem:[#allocation89_spill] sm:$0xff] }
 0x56b   : > { %v10396_v59 = vpop.eup %10395  ;;  %10407 = vpow2.f32 %v4255_v4  ;;  %v4077_v26 = vpop.xlane.xlu0 %4076 }
 0x56c   : > { %v10398_v20 = vpop.eup %10397  ;;  %v4149_v11 = vsub.f32 %v12739_v61, %v4077_v26  ;;  %v4150_v17 = vsub.f32 %v12741_v56, %v4077_v26  ;;  %v4351_v6 = vadd.f32 %v10396_v59, %v10394_v35  ;;  %v14401_v26 = vld [vmem:[#allocation91_spill] sm:$0xff] }
 0x56d   : > { %v10400_v18 = vpop.eup %10399  ;;  %v4411_v8 = vpack.c.bf16 %v10398_v20, %v10394_v35  ;;  %v4080_v43 = vpop.xlane.xlu1 %4079 }
 0x56e   : > { %v4257_v38 = vmul.f32 1.442695, %v4149_v11  ;;  %v4259_v46 = vmul.f32 1.442695, %v4150_v17  ;;  %v4151_v63 = vsub.f32 %v12743_v49, %v4080_v43  ;;  %v4152_v51 = vsub.f32 %v12747_v36, %v4080_v43  ;;  %4352 = vadd.xlane.f32.xlu0 %v4351_v6  ;;  %v14402_v11 = vld [vmem:[#allocation92_spill] sm:$0xff] }
 0x56f   : > { %v4412_v37 = vpack.c.bf16 %v10400_v18, %v10396_v59  ;;  %v4354_v53 = vadd.f32 %v10400_v18, %v10398_v20 }
 0x570   : > { %10409 = vpow2.f32 %v4257_v38  ;;  %v4261_v29 = vmul.f32 1.442695, %v4151_v63  ;;  %v4263_v10 = vmul.f32 1.442695, %v4152_v51  ;;  %v14403_v63 = vld [vmem:[#allocation93_spill] sm:$0xff] }
 0x571   : > { %10411 = vpow2.f32 %v4259_v46  ;;  %4529 = vmatprep.mubr.bf16.mxu1 %v4412_v37  ;;  %4355 = vadd.xlane.f32.xlu1 %v4354_v53  ;;  %v14404_v37 = vld [vmem:[#allocation94_spill] sm:$0xff] }
 0x572   : > { %v10402_v56 = vpop.eup %10401  ;;  %10413 = vpow2.f32 %v4261_v29  ;;  %4530 = vmatmul.mubr.bf16.gmra.mrb[36].mxu1 %v4411_v8 }
 0x573   : > { %v10404_v61 = vpop.eup %10403  ;;  %10415 = vpow2.f32 %v4263_v10  ;;  %v4083_v24 = vpop.xlane.xlu0 %4082 }
 0x574   : > { %v10406_v32 = vpop.eup %10405  ;;  %v4153_v49 = vsub.f32 %v12751_v2, %v4083_v24  ;;  %v4154_v36 = vsub.f32 %v14394_v14, %v4083_v24  ;;  %v4357_v19 = vadd.f32 %v10404_v61, %v10402_v56 }
 0x575   : > { %v10408_v47 = vpop.eup %10407  ;;  %v4413_v40 = vpack.c.bf16 %v10406_v32, %v10402_v56  ;;  %v4086_v30 = vpop.xlane.xlu1 %4085 }
 0x576   : > { %v4265_v62 = vmul.f32 1.442695, %v4153_v49  ;;  %v4267_v15 = vmul.f32 1.442695, %v4154_v36  ;;  %v4155_v41 = vsub.f32 %v14395_v52, %v4086_v30  ;;  %v4156_v54 = vsub.f32 %v14396_v12, %v4086_v30  ;;  %4358 = vadd.xlane.f32.xlu0 %v4357_v19  ;;  %v14406_v30 = vld [vmem:[#allocation96_spill] sm:$0xff] }
 0x577   : > { %v4414_v28 = vpack.c.bf16 %v10408_v47, %v10404_v61  ;;  %v4360_v0 = vadd.f32 %v10408_v47, %v10406_v32  ;;  %v8369_v32 = vld [vmem:[%s14169_s7 + $0x4] sm:$0xf]  ;;  %v14405_v47 = vld [vmem:[#allocation95_spill] sm:$0xff] }
 0x578   : > { %10417 = vpow2.f32 %v4265_v62  ;;  %v4269_v31 = vmul.f32 1.442695, %v4155_v41  ;;  %v4271_v60 = vmul.f32 1.442695, %v4156_v54  ;;  %10125 = vmatprep.subr.msk.bf16.mxu0 %vm4716_vm2, %v8369_v32  ;;  %v4718_v36 = vsel %vm4716_vm2, %v8369_v32, 0  ;;  %v14425_v32 = vld [vmem:[#allocation46_spill] sm:$0xff] }
 0x579   : > { %10419 = vpow2.f32 %v4267_v15  ;;  %4537 = vmatprep.mubr.bf16.mxu1 %v4414_v28  ;;  %4361 = vadd.xlane.f32.xlu1 %v4360_v0 }
 0x57a   : > { %v10410_v2 = vpop.eup %10409  ;;  %10421 = vpow2.f32 %v4269_v31  ;;  %4538 = vmatmul.mubr.bf16.gmra.mrb[40].mxu1 %v4413_v40  ;;  %9806 = vmatpush3.bf16.msra.mxu0 %v4718_v36  ;;  %v14407_v31 = vld [vmem:[#allocation97_spill] sm:$0xff]  ;;  %v14427_v36 = vld [vmem:[#allocation10_spill] sm:$0xff] }
 0x57b   : > { %v10412_v16 = vpop.eup %10411  ;;  %10423 = vpow2.f32 %v4271_v60  ;;  %v4089_v7 = vpop.xlane.xlu0 %4088 }
 0x57c   : > { %v10414_v44 = vpop.eup %10413  ;;  %v4157_v21 = vsub.f32 %v14397_v34, %v4089_v7  ;;  %v4158_v45 = vsub.f32 %v14398_v1, %v4089_v7  ;;  %v4363_v55 = vadd.f32 %v10412_v16, %v10410_v2 }
 0x57d   : > { %v10416_v25 = vpop.eup %10415  ;;  %v4415_v9 = vpack.c.bf16 %v10414_v44, %v10410_v2  ;;  %v4092_v3 = vpop.xlane.xlu1 %4091  ;;  %v12876_v2 = vld [vmem:[%s14169_s7] sm:$0xf] }
 0x57e   : > { %v4273_v27 = vmul.f32 1.442695, %v4157_v21  ;;  %v4275_v5 = vmul.f32 1.442695, %v4158_v45  ;;  %v4159_v42 = vsub.f32 %v14399_v13, %v4092_v3  ;;  %v4160_v57 = vsub.f32 %v14400_v39, %v4092_v3  ;;  %4364 = vadd.xlane.f32.xlu0 %v4363_v55  ;;  %10126 = vmatprep.subr.msk.bf16.mxu0 %vm4716_vm2, %v12876_v2 }
 0x57f   : > { %v4416_v58 = vpack.c.bf16 %v10416_v25, %v10412_v16  ;;  %v4366_v22 = vadd.f32 %v10416_v25, %v10414_v44 }
 0x580   : > { %10425 = vpow2.f32 %v4273_v27  ;;  %v4277_v23 = vmul.f32 1.442695, %v4159_v42  ;;  %v4279_v50 = vmul.f32 1.442695, %v4160_v57 }
 0x581   : > { %10427 = vpow2.f32 %v4275_v5  ;;  %4545 = vmatprep.mubr.bf16.mxu1 %v4416_v58  ;;  %4367 = vadd.xlane.f32.xlu1 %v4366_v22 }
 0x582   : > { %v10418_v33 = vpop.eup %10417  ;;  %10429 = vpow2.f32 %v4277_v23  ;;  %4546 = vmatmul.mubr.bf16.gmra.mrb[44].mxu1 %v4415_v9  ;;  %v14408_v23 = vld [vmem:[#allocation34_spill] sm:$0xff] }
 0x583   : > { %v10420_v4 = vpop.eup %10419  ;;  %10431 = vpow2.f32 %v4279_v50  ;;  %v4095_v35 = vpop.xlane.xlu0 %4094  ;;  %v14409_v50 = vld [vmem:[#allocation4_spill] sm:$0xff] }
 0x584   : > { %v10422_v59 = vpop.eup %10421  ;;  %v4161_v20 = vsub.f32 %v14401_v26, %v4095_v35  ;;  %v4162_v17 = vsub.f32 %v14402_v11, %v4095_v35  ;;  %v4369_v6 = vadd.f32 %v10420_v4, %v10418_v33  ;;  %v5296_v35 = vld [vmem:[#allocation2 + $0x100] sm:$0xff]  ;;  %v14413_v26 = vld [vmem:[#allocation5_spill] sm:$0xff]  ;;  %v14414_v11 = vld [vmem:[#allocation38_spill] sm:$0xff] }
 0x585   : > { %v10424_v18 = vpop.eup %10423  ;;  %v4417_v8 = vpack.c.bf16 %v10422_v59, %v10418_v33  ;;  %v4098_v43 = vpop.xlane.xlu1 %4097  ;;  %v14410_v33 = vld [vmem:[#allocation35_spill] sm:$0xff] }
 0x586   : > { %v4281_v38 = vmul.f32 1.442695, %v4161_v20  ;;  %v4283_v46 = vmul.f32 1.442695, %v4162_v17  ;;  %v4163_v51 = vsub.f32 %v14403_v63, %v4098_v43  ;;  %v4164_v53 = vsub.f32 %v14404_v37, %v4098_v43  ;;  %4370 = vadd.xlane.f32.xlu0 %v4369_v6  ;;  %v5305_v17 = vld [vmem:[#allocation2 + $0x148] sm:$0xff]  ;;  %v14415_v6 = vld [vmem:[#allocation6_spill] sm:$0xff] }
 0x587   : > { %v4418_v29 = vpack.c.bf16 %v10424_v18, %v10420_v4  ;;  %v4372_v10 = vadd.f32 %v10424_v18, %v10422_v59  ;;  %v14411_v4 = vld [vmem:[#allocation36_spill] sm:$0xff]  ;;  %v14412_v59 = vld [vmem:[#allocation37_spill] sm:$0xff]  ;;  %v5378_v20 = vsel %vm658_vm1, %v5296_v35, 0  ;;  %v14416_v18 = vld [vmem:[#allocation39_spill] sm:$0xff] }
 0x588   : > { %10433 = vpow2.f32 %v4281_v38  ;;  %v4285_v56 = vmul.f32 1.442695, %v4163_v51  ;;  %v4287_v61 = vmul.f32 1.442695, %v4164_v53  ;;  %v5297_v43 = vld [vmem:[#allocation2 + $0x108] sm:$0xff]  ;;  %v14419_v63 = vld [vmem:[#allocation42_spill] sm:$0xff] }
 0x589   : > { %10435 = vpow2.f32 %v4283_v46  ;;  %4553 = vmatprep.mubr.bf16.mxu1 %v4418_v29  ;;  %4373 = vadd.xlane.f32.xlu1 %v4372_v10  ;;  %v14418_v38 = vld [vmem:[#allocation41_spill] sm:$0xff]  ;;  %v5381_v46 = vsel %vm658_vm1, %v5297_v43, 0  ;;  %v14420_v51 = vld [vmem:[#allocation7_spill] sm:$0xff]  ;;  %v5306_v37 = vld [vmem:[#allocation2 + $0x150] sm:$0xff] }
 0x58a   : > { %v10426_v24 = vpop.eup %10425  ;;  %10437 = vpow2.f32 %v4285_v56  ;;  %4554 = vmatmul.mubr.bf16.gmra.mrb[48].mxu1 %v4417_v8  ;;  %v14417_v8 = vld [vmem:[#allocation40_spill] sm:$0xff]  ;;  %v14422_v29 = vld [vmem:[#allocation43_spill] sm:$0xff]  ;;  %v5298_v56 = vld [vmem:[#allocation2 + $0x110] sm:$0xff] }
 0x58b   : > { %v10428_v49 = vpop.eup %10427  ;;  %10439 = vpow2.f32 %v4287_v61  ;;  %v4101_v14 = vpop.xlane.xlu0 %4100  ;;  %v14421_v53 = vld [vmem:[#allocation8_spill] sm:$0xff]  ;;  %v14424_v61 = vld [vmem:[#allocation45_spill] sm:$0xff] }
 0x58c   : > { %v10430_v19 = vpop.eup %10429  ;;  %v4165_v40 = vsub.f32 %v14405_v47, %v4101_v14  ;;  %v4166_v62 = vsub.f32 %v14406_v30, %v4101_v14  ;;  %v4375_v15 = vadd.f32 %v10428_v49, %v10426_v24  ;;  %v14423_v10 = vld [vmem:[#allocation44_spill] sm:$0xff]  ;;  %v5307_v14 = vld [vmem:[#allocation2 + $0x158] sm:$0xff]  ;;  %v14430_v30 = vld [vmem:[#allocation49_spill] sm:$0xff] }
 0x58d   : > { %v10432_v52 = vpop.eup %10431  ;;  %v4419_v41 = vpack.c.bf16 %v10430_v19, %v10426_v24  ;;  %v4104_v12 = vpop.xlane.xlu1 %4103  ;;  %v5384_v24 = vsel %vm658_vm1, %v5298_v56, 0  ;;  %v14429_v47 = vld [vmem:[#allocation48_spill] sm:$0xff]  ;;  %v14453_v35 = vld [vmem:[#allocation29_spill] sm:$0xff] }
 0x58e   : > { %v4289_v54 = vmul.f32 1.442695, %v4165_v40  ;;  %v4291_v28 = vmul.f32 1.442695, %v4166_v62  ;;  %4376 = vadd.xlane.f32.xlu0 %v4375_v15  ;;  %v4167_v0 = vsub.f32 %v12791_v48, %v4104_v12  ;;  %v4168_v60 = vsub.f32 %v14407_v31, %v4104_v12  ;;  %v5299_v40 = vld [vmem:[#allocation2 + $0x118] sm:$0xff]  ;;  %v14431_v15 = vld [vmem:[#allocation50_spill] sm:$0xff] }
 0x58f   : > { %v4420_v16 = vpack.c.bf16 %v10432_v52, %v10428_v49  ;;  %v4378_v7 = vadd.f32 %v10432_v52, %v10430_v19  ;;  %v14426_v49 = vld [vmem:[#allocation9_spill] sm:$0xff]  ;;  %v14428_v19 = vld [vmem:[#allocation47_spill] sm:$0xff]  ;;  %v5387_v62 = vsel %vm658_vm1, %v5299_v40, 0  ;;  %v14433_v12 = vld [vmem:[#allocation12_spill] sm:$0xff] }
 0x590   : > { %10441 = vpow2.f32 %v4289_v54  ;;  %v4293_v44 = vmul.f32 1.442695, %v4167_v0  ;;  %v4295_v34 = vmul.f32 1.442695, %v4168_v60  ;;  %v14432_v52 = vld [vmem:[#allocation11_spill] sm:$0xff]  ;;  %v5300_v0 = vld [vmem:[#allocation2 + $0x120] sm:$0xff] }
 0x591   : > { %10443 = vpow2.f32 %v4291_v28  ;;  %4561 = vmatprep.mubr.bf16.mxu1 %v4420_v16  ;;  %4379 = vadd.xlane.f32.xlu1 %v4378_v7  ;;  %v14434_v54 = vld [vmem:[#allocation51_spill] sm:$0xff]  ;;  %v14435_v28 = vld [vmem:[#allocation52_spill] sm:$0xff]  ;;  %v14436_v31 = vld [vmem:[#allocation53_spill] sm:$0xff]  ;;  %v5390_v60 = vsel %vm658_vm1, %v5300_v0, 0 }
 0x592   : > { %v10434_v21 = vpop.eup %10433  ;;  %10445 = vpow2.f32 %v4293_v44  ;;  %4562 = vmatmul.mubr.bf16.gmra.mrb[52].mxu1 %v4419_v41  ;;  %v5308_v41 = vld [vmem:[#allocation2 + $0x160] sm:$0xff]  ;;  %v14437_v16 = vld [vmem:[#allocation54_spill] sm:$0xff]  ;;  %v14438_v7 = vld [vmem:[#allocation13_spill] sm:$0xff] }
 0x593   : > { %v10436_v48 = vpop.eup %10435  ;;  %10447 = vpow2.f32 %v4295_v34  ;;  %v5309_v44 = vld [vmem:[#allocation2 + $0x168] sm:$0xff]  ;;  %v14439_v34 = vld [vmem:[#allocation14_spill] sm:$0xff] }
 0x594   : > { %v10438_v1 = vpop.eup %10437  ;;  %v4381_v45 = vadd.f32 %v10436_v48, %v10434_v21 }
 0x595   : > { %v10440_v55 = vpop.eup %10439  ;;  %v4421_v25 = vpack.c.bf16 %v10438_v1, %v10434_v21  ;;  %v14440_v21 = vld [vmem:[#allocation20_spill] sm:$0xff] }
 0x596   : > { %4382 = vadd.xlane.f32.xlu0 %v4381_v45  ;;  %v4422_v9 = vpack.c.bf16 %v10440_v55, %v10436_v48  ;;  %v4384_v3 = vadd.f32 %v10440_v55, %v10438_v1  ;;  %v14441_v48 = vld [vmem:[#allocation21_spill] sm:$0xff]  ;;  %v14442_v45 = vld [vmem:[#allocation22_spill] sm:$0xff] }
 0x597   : > { %v5301_v1 = vld [vmem:[#allocation2 + $0x128] sm:$0xff] }
 0x598   : > { %4569 = vmatprep.mubr.bf16.mxu1 %v4422_v9  ;;  %4385 = vadd.xlane.f32.xlu1 %v4384_v3  ;;  %v5393_v55 = vsel %vm658_vm1, %v5301_v1, 0  ;;  %v14444_v9 = vld [vmem:[#allocation15_spill] sm:$0xff]  ;;  %v5310_v3 = vld [vmem:[#allocation2 + $0x170] sm:$0xff] }
 0x59a   : > { %v10442_v27 = vpop.eup %10441  ;;  %4570 = vmatmul.mubr.bf16.gmra.mrb[56].mxu1 %v4421_v25  ;;  %v14443_v25 = vld [vmem:[#allocation23_spill] sm:$0xff] }
 0x59b   : > { %v10444_v5 = vpop.eup %10443 }
 0x59c   : > { %v10446_v13 = vpop.eup %10445  ;;  %v4387_v42 = vadd.f32 %v10444_v5, %v10442_v27 }
 0x59d   : > { %v10448_v39 = vpop.eup %10447  ;;  %v4423_v57 = vpack.c.bf16 %v10446_v13, %v10442_v27  ;;  %v14445_v27 = vld [vmem:[#allocation16_spill] sm:$0xff] }
 0x59e   : > { %4388 = vadd.xlane.f32.xlu0 %v4387_v42  ;;  %v4424_v58 = vpack.c.bf16 %v10448_v39, %v10444_v5  ;;  %v4390_v22 = vadd.f32 %v10448_v39, %v10446_v13  ;;  %v14446_v5 = vld [vmem:[#allocation24_spill] sm:$0xff]  ;;  %v14447_v13 = vld [vmem:[#allocation25_spill] sm:$0xff]  ;;  %v5302_v42 = vld [vmem:[#allocation2 + $0x130] sm:$0xff] }
 0x59f   : > { %v14448_v39 = vld [vmem:[#allocation26_spill] sm:$0xff] }
 0x5a0   : > { %4577 = vmatprep.mubr.bf16.mxu1 %v4424_v58  ;;  %4391 = vadd.xlane.f32.xlu1 %v4390_v22  ;;  %v14449_v58 = vld [vmem:[#allocation27_spill] sm:$0xff]  ;;  %v14450_v22 = vld [vmem:[#allocation17_spill] sm:$0xff] }
 0x5a2   : > { %4578 = vmatmul.mubr.bf16.gmra.mrb[60].mxu1 %v4423_v57  ;;  %3115 = vadd.xlane.f32.xlu0 %v14408_v23  ;;  %v5396_v57 = vsel %vm658_vm1, %v5302_v42, 0  ;;  %v5311_v23 = vld [vmem:[#allocation2 + $0x178] sm:$0xff] }
 0x5a3   : > { %9877 = vmatprep.mubr.msk.bf16.mxu1 %vm432_vm0, %v14409_v50 }
 0x5a4   : > { %3118 = vadd.xlane.f32.xlu1 %v14410_v33  ;;  %v14451_v33 = vld [vmem:[#allocation18_spill] sm:$0xff] }
 0x5a6   : > { %3121 = vadd.xlane.f32.xlu0 %v14411_v4  ;;  %v14452_v4 = vld [vmem:[#allocation28_spill] sm:$0xff] }
 0x5a8   : > { %3124 = vadd.xlane.f32.xlu1 %v14412_v59  ;;  %v5303_v59 = vld [vmem:[#allocation2 + $0x138] sm:$0xff] }
 0x5aa   : > { %9878 = vmatmul.mubr.msk.bf16.vlgmr.msra.gmra.mrb[64].mxu1 %vm432_vm0, %v14413_v26  ;;  %3127 = vadd.xlane.f32.xlu0 %v14414_v11  ;;  %v5399_v11 = vsel %vm658_vm1, %v5303_v59, 0 }
 0x5ab   : > { %9074 = vmatpush3.bf16.xpose.msra.mxu1 %v5378_v20  ;;  %9881 = vmatprep.mubr.msk.bf16.mxu1 %vm432_vm0, %v14415_v6  ;;  %v14454_v20 = vld [vmem:[#allocation30_spill] sm:$0xff] }
 0x5ac   : > { %10128 = vmatprep.subr.msk.bf16.mxu1 %vm658_vm1, %v5305_v17  ;;  %3130 = vadd.xlane.f32.xlu1 %v14416_v18  ;;  %v14455_v17 = vld [vmem:[#allocation19_spill] sm:$0xff] }
 0x5ae   : > { %3133 = vadd.xlane.f32.xlu0 %v14417_v8 }
 0x5b0   : > { %3136 = vadd.xlane.f32.xlu1 %v14418_v38 }
 0x5b2   : > { %3139 = vadd.xlane.f32.xlu0 %v14419_v63  ;;  %9882 = vmatmul.mubr.msk.bf16.gmra.mrb[68].mxu1 %vm432_vm0, %v14420_v51 }
 0x5b3   : > { %9076 = vmatpush3.bf16.xpose.msra.mxu1 %v5381_v46  ;;  %9885 = vmatprep.mubr.msk.bf16.mxu1 %vm432_vm0, %v14421_v53  ;;  %v4299_v18 = vpop.xlane.xlu0 %4298 }
 0x5b4   : > { %10129 = vmatprep.subr.msk.bf16.mxu1 %vm658_vm1, %v5306_v37  ;;  %3142 = vadd.xlane.f32.xlu1 %v14422_v29  ;;  %10449 = vrcp.f32 %v4299_v18 }
 0x5b6   : > { %3145 = vadd.xlane.f32.xlu0 %v14423_v10  ;;  %v4302_v8 = vpop.xlane.xlu1 %4301 }
 0x5b7   : > { %10451 = vrcp.f32 %v4302_v8 }
 0x5b8   : > { %3148 = vadd.xlane.f32.xlu1 %v14424_v61 }
 0x5ba   : > { %3151 = vadd.xlane.f32.xlu0 %v14425_v32  ;;  %9886 = vmatmul.mubr.msk.bf16.gmra.mrb[72].mxu1 %vm432_vm0, %v14426_v49 }
 0x5bb   : > { %9078 = vmatpush3.bf16.xpose.msra.mxu1 %v5384_v24  ;;  %9889 = vmatprep.mubr.msk.bf16.mxu1 %vm432_vm0, %v14427_v36  ;;  %v4305_v43 = vpop.xlane.xlu0 %4304 }
 0x5bc   : > { %10130 = vmatprep.subr.msk.bf16.mxu1 %vm658_vm1, %v5307_v14  ;;  %3154 = vadd.xlane.f32.xlu1 %v14428_v19  ;;  %10453 = vrcp.f32 %v4305_v43 }
 0x5be   : > { %3157 = vadd.xlane.f32.xlu0 %v14429_v47  ;;  %v4308_v38 = vpop.xlane.xlu1 %4307  ;;  %v10450_v19 = vpop.eup %10449 }
 0x5bf   : > { %10455 = vrcp.f32 %v4308_v38 }
 0x5c0   : > { %3160 = vadd.xlane.f32.xlu1 %v14430_v30 }
 0x5c1   : > { %v10452_v30 = vpop.eup %10451 }
 0x5c2   : > { %3163 = vadd.xlane.f32.xlu0 %v14431_v15  ;;  %9890 = vmatmul.mubr.msk.bf16.gmra.mrb[76].mxu1 %vm432_vm0, %v14432_v52 }
 0x5c3   : > { %9080 = vmatpush3.bf16.xpose.msra.mxu1 %v5387_v62  ;;  %9893 = vmatprep.mubr.msk.bf16.mxu1 %vm432_vm0, %v14433_v12  ;;  %v4311_v46 = vpop.xlane.xlu0 %4310 }
 0x5c4   : > { %10131 = vmatprep.subr.msk.bf16.mxu1 %vm658_vm1, %v5308_v41  ;;  %3166 = vadd.xlane.f32.xlu1 %v14434_v54  ;;  %v12964_v54 = vld [vmem:[%s14163_s1 + $0x30] sm:$0xff]   ;;  %10457 = vrcp.f32 %v4311_v46 }
 0x5c6   : > { %3169 = vadd.xlane.f32.xlu0 %v14435_v28  ;;  %v4314_v63 = vpop.xlane.xlu1 %4313  ;;  %v10454_v1 = vpop.eup %10453 }
 0x5c7   : > { %10459 = vrcp.f32 %v4314_v63 }
 0x5c8   : > { %3172 = vadd.xlane.f32.xlu1 %v14436_v31 }
 0x5ca   : > { %3175 = vadd.xlane.f32.xlu0 %v14437_v16  ;;  %9894 = vmatmul.mubr.msk.bf16.gmra.mrb[80].mxu1 %vm432_vm0, %v14438_v7 }
 0x5cb   : > { %9082 = vmatpush3.bf16.xpose.msra.mxu1 %v5390_v60  ;;  %9897 = vmatprep.mubr.msk.bf16.mxu1 %vm432_vm0, %v14439_v34  ;;  %v4317_v37 = vpop.xlane.xlu0 %4316 }
 0x5cc   : > { %10132 = vmatprep.subr.msk.bf16.mxu1 %vm658_vm1, %v5309_v44  ;;  %3178 = vadd.xlane.f32.xlu1 %v14440_v21  ;;  %10461 = vrcp.f32 %v4317_v37 }
 0x5ce   : > { %3181 = vadd.xlane.f32.xlu0 %v14441_v48  ;;  %v4320_v29 = vpop.xlane.xlu1 %4319 }
 0x5cf   : > { %10463 = vrcp.f32 %v4320_v29 }
 0x5d0   : > { %3184 = vadd.xlane.f32.xlu1 %v14442_v45 }
 0x5d2   : > { %3187 = vadd.xlane.f32.xlu0 %v14443_v25  ;;  %9898 = vmatmul.mubr.msk.bf16.gmra.mrb[84].mxu1 %vm432_vm0, %v14444_v9  ;;  %v10456_v25 = vpop.eup %10455 }
 0x5d3   : > { %9084 = vmatpush3.bf16.xpose.msra.mxu1 %v5393_v55  ;;  %9901 = vmatprep.mubr.msk.bf16.mxu1 %vm432_vm0, %v14445_v27  ;;  %v4323_v61 = vpop.xlane.xlu0 %4322  ;;  %v10458_v18 = vpop.eup %10457 }
 0x5d4   : > { %10133 = vmatprep.subr.msk.bf16.mxu1 %vm658_vm1, %v5310_v3  ;;  %3190 = vadd.xlane.f32.xlu1 %v14446_v5  ;;  %v10460_v38 = vpop.eup %10459  ;;  %10465 = vrcp.f32 %v4323_v61 }
 0x5d6   : > { %3193 = vadd.xlane.f32.xlu0 %v14447_v13  ;;  %v4326_v47 = vpop.xlane.xlu1 %4325 }
 0x5d7   : > { %10467 = vrcp.f32 %v4326_v47 }
 0x5d8   : > { %3196 = vadd.xlane.f32.xlu1 %v14448_v39 }
 0x5da   : > { %3199 = vadd.xlane.f32.xlu0 %v14449_v58  ;;  %9902 = vmatmul.mubr.msk.bf16.gmra.mrb[88].mxu1 %vm432_vm0, %v14450_v22  ;;  %v4930_v58 = vsel %vm4716_vm2, %v12876_v2, 0 }
 0x5db   : > { %9086 = vmatpush3.bf16.xpose.msra.mxu1 %v5396_v57  ;;  %9905 = vmatprep.mubr.msk.bf16.mxu1 %vm432_vm0, %v14451_v33  ;;  %v12959_v62 = vpop.xlane.xlu0 %4328 }
 0x5dc   : > { %10134 = vmatprep.subr.msk.bf16.mxu1 %vm658_vm1, %v5311_v23  ;;  %3202 = vadd.xlane.f32.xlu1 %v14452_v4  ;;  %10469 = vrcp.f32 %v12959_v62 }
 0x5de   : > { %3205 = vadd.xlane.f32.xlu0 %v14453_v35  ;;  %v12966_v28 = vpop.xlane.xlu1 %4331 }
 0x5df   : > { %10471 = vrcp.f32 %v12966_v28 }
 0x5e0   : > { %3208 = vadd.xlane.f32.xlu1 %v14454_v20 }
 0x5e2   : > { %9906 = vmatmul.mubr.msk.bf16.gmra.mrb[92].mxu1 %vm432_vm0, %v14455_v17  ;;  %v14485_v17 = vld [vmem:[#allocation81_spill] sm:$0xff] }
 0x5e3   : > { %9088 = vmatpush3.bf16.xpose.msra.mxu1 %v5399_v11  ;;  %v12969_v16 = vpop.xlane.xlu0 %4334  ;;  %v5321_v11 = vld [vmem:[#allocation3 + $0x140] sm:$0xff] }
 0x5e4   : > { %9943 = vmatprep.subr.bf16.mxu1 %v12964_v54  ;;  %10473 = vrcp.f32 %v12969_v16 }
 0x5e6   : > { %v12972_v45 = vpop.xlane.xlu1 %4337 }
 0x5e7   : > { %10475 = vrcp.f32 %v12972_v45 }
 0x5eb   : > { %v12974_v3 = vpop.xlane.xlu0 %4340 }
 0x5ec   : > { %10477 = vrcp.f32 %v12974_v3 }
 0x5ee   : > { %v12976_v42 = vpop.xlane.xlu1 %4343 }
 0x5ef   : > { %10479 = vrcp.f32 %v12976_v42 }
 0x5f3   : > { %v12980_v4 = vpop.xlane.xlu0 %4346 }
 0x5f6   : > { %v12983_v8 = vpop.xlane.xlu1 %4349 }
 0x5fb   : > { %v12985_v46 = vpop.xlane.xlu0 %4352 }
 0x5fd   : > { %v8925_v10 = vpop.f32.mrb[0].mxu1 }
 0x5fe   : > { %v8926_v56 = vpop.f32.mrb[1].mxu1  ;;  %v12987_v37 = vpop.xlane.xlu1 %4355 }
 0x5ff   : > { %v8927_v24 = vadd.f32 %v8926_v56, %v8925_v10  ;;  %v8928_v32 = vpop.f32.mrb[2].mxu1 }
 0x600   : > { %v8929_v14 = vpop.f32.mrb[3].mxu1 }
 0x601   : > { %v8930_v40 = vadd.f32 %v8929_v14, %v8928_v32  ;;  %v4618_v15 = vmul.f32 %v10450_v19, %v8927_v24 }
 0x603   : > { %v4619_v41 = vmul.f32 %v10452_v30, %v8930_v40  ;;  %v12989_v29 = vpop.xlane.xlu0 %4358  ;;  %v10462_v40 = vpop.eup %10461 }
 0x605   : > { %v4650_v0 = vpack.c.bf16 %v4619_v41, %v4618_v15  ;;  %v8931_v31 = vpop.f32.mrb[4].mxu1  ;;  %v10464_v41 = vpop.eup %10463 }
 0x606   : > { %v8932_v60 = vpop.f32.mrb[5].mxu1  ;;  %v12992_v30 = vpop.xlane.xlu1 %4361 }
 0x607   : > { %v8933_v44 = vadd.f32 %v8932_v60, %v8931_v31  ;;  %v8934_v21 = vpop.f32.mrb[6].mxu1  ;;  %9807 = vmatprep.mubr.msk.bf16.mxu0 %vm658_vm1, %v4650_v0 }
 0x608   : > { %v8935_v48 = vpop.f32.mrb[7].mxu1 }
 0x609   : > { %v8936_v55 = vadd.f32 %v8935_v48, %v8934_v21  ;;  %v4620_v5 = vmul.f32 %v10454_v1, %v8933_v44 }
 0x60b   : > { %v4621_v13 = vmul.f32 %v10456_v25, %v8936_v55  ;;  %v12994_v0 = vpop.xlane.xlu0 %4364 }
 0x60d   : > { %v4651_v39 = vpack.c.bf16 %v4621_v13, %v4620_v5  ;;  %v8937_v57 = vpop.f32.mrb[8].mxu1  ;;  %v10466_v5 = vpop.eup %10465 }
 0x60e   : > { %v8938_v23 = vpop.f32.mrb[9].mxu1  ;;  %v12996_v44 = vpop.xlane.xlu1 %4367 }
 0x60f   : > { %v8939_v35 = vadd.f32 %v8938_v23, %v8937_v57  ;;  %v8940_v59 = vpop.f32.mrb[10].mxu1  ;;  %9808 = vmatmul.mubr.msk.bf16.vlgmr.msra.gmra.mrb[0].mxu0 %vm658_vm1, %v4651_v39  ;;  %v10468_v57 = vpop.eup %10467 }
 0x610   : > { %9840 = vmatpush3.bf16.msra.mxu0 %v4930_v58  ;;  %v8941_v20 = vpop.f32.mrb[11].mxu1 }
 0x611   : > { %v8942_v43 = vadd.f32 %v8941_v20, %v8940_v59  ;;  %9121 = vmatprep.subr.bf16.mxu0 %v5321_v11  ;;  %v4622_v2 = vmul.f32 %v10458_v18, %v8939_v35 }
 0x613   : > { %v4623_v63 = vmul.f32 %v10460_v38, %v8942_v43  ;;  %v12999_v1 = vpop.xlane.xlu0 %4370 }
 0x615   : > { %v4652_v10 = vpack.c.bf16 %v4623_v63, %v4622_v2  ;;  %v8943_v56 = vpop.f32.mrb[12].mxu1  ;;  %v10470_v2 = vpop.eup %10469 }
 0x616   : > { %v8944_v24 = vpop.f32.mrb[13].mxu1  ;;  %v13003_v13 = vpop.xlane.xlu1 %4373 }
 0x617   : > { %v8945_v32 = vadd.f32 %v8944_v24, %v8943_v56  ;;  %v8946_v14 = vpop.f32.mrb[14].mxu1  ;;  %9811 = vmatprep.mubr.msk.bf16.mxu0 %vm658_vm1, %v4652_v10  ;;  %v10472_v56 = vpop.eup %10471 }
 0x618   : > { %v8947_v19 = vpop.f32.mrb[15].mxu1 }
 0x619   : > { %v8948_v15 = vadd.f32 %v8947_v19, %v8946_v14  ;;  %v4624_v31 = vmul.f32 %v10462_v40, %v8945_v32 }
 0x61b   : > { %v4625_v60 = vmul.f32 %v10464_v41, %v8948_v15  ;;  %v13005_v58 = vpop.xlane.xlu0 %4376 }
 0x61d   : > { %v4653_v61 = vpack.c.bf16 %v4625_v60, %v4624_v31  ;;  %v8949_v21 = vpop.f32.mrb[16].mxu1 }
 0x61e   : > { %v8950_v48 = vpop.f32.mrb[17].mxu1  ;;  %v13007_v59 = vpop.xlane.xlu1 %4379 }
 0x61f   : > { %v8951_v47 = vadd.f32 %v8950_v48, %v8949_v21  ;;  %v8952_v55 = vpop.f32.mrb[18].mxu1  ;;  %9812 = vmatmul.mubr.msk.bf16.gmra.mrb[4].mxu0 %vm658_vm1, %v4653_v61  ;;  %v10474_v61 = vpop.eup %10473 }
 0x620   : > { %v8953_v25 = vpop.f32.mrb[19].mxu1 }
 0x621   : > { %v8954_v39 = vadd.f32 %v8953_v25, %v8952_v55  ;;  %v4626_v23 = vmul.f32 %v10466_v5, %v8951_v47  ;;  %v10476_v47 = vpop.eup %10475 }
 0x623   : > { %v4627_v35 = vmul.f32 %v10468_v57, %v8954_v39  ;;  %v13010_v18 = vpop.xlane.xlu0 %4382 }
 0x625   : > { %v4654_v62 = vpack.c.bf16 %v4627_v35, %v4626_v23  ;;  %v8955_v20 = vpop.f32.mrb[20].mxu1  ;;  %v13014_v63 = vpop.xlane.xlu1 %4385 }
 0x626   : > { %v8956_v11 = vpop.f32.mrb[21].mxu1 }
 0x627   : > { %v8957_v28 = vadd.f32 %v8956_v11, %v8955_v20  ;;  %v8958_v43 = vpop.f32.mrb[22].mxu1  ;;  %9815 = vmatprep.mubr.msk.bf16.mxu0 %vm658_vm1, %v4654_v62  ;;  %v10478_v20 = vpop.eup %10477 }
 0x628   : > { %v8959_v38 = vpop.f32.mrb[23].mxu1 }
 0x629   : > { %v8960_v10 = vadd.f32 %v8959_v38, %v8958_v43  ;;  %v4628_v24 = vmul.f32 %v10470_v2, %v8957_v28  ;;  %v10480_v28 = vpop.eup %10479 }
 0x62b   : > { %v4629_v32 = vmul.f32 %v10472_v56, %v8960_v10  ;;  %v13016_v14 = vpop.xlane.xlu0 %4388 }
 0x62d   : > { %v4655_v19 = vpack.c.bf16 %v4629_v32, %v4628_v24  ;;  %v8961_v16 = vpop.f32.mrb[24].mxu1  ;;  %v13018_v40 = vpop.xlane.xlu1 %4391 }
 0x62e   : > { %v8962_v15 = vpop.f32.mrb[25].mxu1 }
 0x62f   : > { %v8963_v45 = vadd.f32 %v8962_v15, %v8961_v16  ;;  %v8964_v41 = vpop.f32.mrb[26].mxu1  ;;  %9816 = vmatmul.mubr.msk.bf16.gmra.mrb[8].mxu0 %vm658_vm1, %v4655_v19  ;;  %v3116_v31 = vpop.xlane.xlu0 %3115  ;;  %v14456_v16 = vld [vmem:[#allocation31_spill] sm:$0xff] }
 0x630   : > { %v8965_v60 = vpop.f32.mrb[27].mxu1  ;;  %10481 = vrcp.f32 %v3116_v31 }
 0x631   : > { %v8966_v21 = vadd.f32 %v8965_v60, %v8964_v41  ;;  %v3119_v48 = vpop.xlane.xlu1 %3118  ;;  %v4630_v55 = vmul.f32 %v10474_v61, %v8963_v45  ;;  %v14457_v45 = vld [vmem:[#allocation32_spill] sm:$0xff] }
 0x632   : > { %10483 = vrcp.f32 %v3119_v48 }
 0x633   : > { %v4631_v25 = vmul.f32 %v10476_v47, %v8966_v21  ;;  %v3122_v5 = vpop.xlane.xlu0 %3121  ;;  %v14484_v47 = vld [vmem:[#allocation80_spill] sm:$0xff] }
 0x634   : > { %10485 = vrcp.f32 %v3122_v5 }
 0x635   : > { %10487 = vrcp.f32 %v12980_v4  ;;  %v4656_v3 = vpack.c.bf16 %v4631_v25, %v4630_v55  ;;  %v8967_v42 = vpop.f32.mrb[28].mxu1  ;;  %v3125_v39 = vpop.xlane.xlu1 %3124 }
 0x636   : > { %v8968_v57 = vpop.f32.mrb[29].mxu1  ;;  %10489 = vrcp.f32 %v3125_v39  ;;  %v14459_v39 = vld [vmem:[#allocation55_spill] sm:$0xff] }
 0x637   : > { %10491 = vrcp.f32 %v12983_v8  ;;  %v8969_v23 = vadd.f32 %v8968_v57, %v8967_v42  ;;  %v8970_v35 = vpop.f32.mrb[30].mxu1  ;;  %9819 = vmatprep.mubr.msk.bf16.mxu0 %vm658_vm1, %v4656_v3  ;;  %v3128_v62 = vpop.xlane.xlu0 %3127  ;;  %v14458_v3 = vld [vmem:[#allocation33_spill] sm:$0xff] }
 0x638   : > { %v8971_v11 = vpop.f32.mrb[31].mxu1  ;;  %10493 = vrcp.f32 %v3128_v62 }
 0x639   : > { %v8972_v43 = vadd.f32 %v8971_v11, %v8970_v35  ;;  %v3131_v38 = vpop.xlane.xlu1 %3130  ;;  %v4632_v4 = vmul.f32 %v10478_v20, %v8969_v23 }
 0x63a   : > { %v10482_v2 = vpop.eup %10481  ;;  %10495 = vrcp.f32 %v3131_v38 }
 0x63b   : > { %v4633_v10 = vmul.f32 %v10480_v28, %v8972_v43  ;;  %v3134_v56 = vpop.xlane.xlu0 %3133  ;;  %v13028_v15 = vmul.f32 %v10482_v2, %v14456_v16 }
 0x63c   : > { %v10484_v24 = vpop.eup %10483  ;;  %10497 = vrcp.f32 %v3134_v56 }
 0x63d   : > { %10499 = vrcp.f32 %v12985_v46  ;;  %v4657_v8 = vpack.c.bf16 %v4633_v10, %v4632_v4  ;;  %v8973_v32 = vpop.f32.mrb[32].mxu1  ;;  %v3137_v19 = vpop.xlane.xlu1 %3136  ;;  %v13031_v41 = vmul.f32 %v10484_v24, %v14457_v45  ;;  %v14460_v10 = vld [vmem:[#allocation56_spill] sm:$0xff]  ;;  %v14461_v24 = vld [vmem:[#allocation57_spill] sm:$0xff] }
 0x63e   : > { %v10486_v31 = vpop.eup %10485  ;;  %v8974_v60 = vpop.f32.mrb[33].mxu1  ;;  %10501 = vrcp.f32 %v3137_v19 }
 0x63f   : > { %v10488_v61 = vpop.eup %10487  ;;  %10503 = vrcp.f32 %v12987_v37  ;;  %v8975_v21 = vadd.f32 %v8974_v60, %v8973_v32  ;;  %v8976_v48 = vpop.f32.mrb[34].mxu1  ;;  %9820 = vmatmul.mubr.msk.bf16.gmra.mrb[12].mxu0 %vm658_vm1, %v4657_v8  ;;  %v13038_v42 = vmul.f32 %v10486_v31, %v14458_v3 }
 0x640   : > { %v3140_v46 = vpop.xlane.xlu0 %3139  ;;  %v10490_v55 = vpop.eup %10489 }
 0x641   : > { %v8977_v25 = vpop.f32.mrb[35].mxu1  ;;  %10505 = vrcp.f32 %v3140_v46  ;;  %v10492_v5 = vpop.eup %10491  ;;  %v13041_v57 = vmul.f32 %v10490_v55, %v14459_v39  ;;  %v4634_v20 = vmul.f32 %v10488_v61, %v8975_v21  ;;  %v14462_v46 = vld [vmem:[#allocation58_spill] sm:$0xff] }
 0x642   : > { %v8978_v23 = vadd.f32 %v8977_v25, %v8976_v48  ;;  %v3143_v37 = vpop.xlane.xlu1 %3142  ;;  %v10494_v35 = vpop.eup %10493  ;;  %v14463_v25 = vld [vmem:[#allocation59_spill] sm:$0xff] }
 0x643   : > { %10507 = vrcp.f32 %v3143_v37  ;;  %v13047_v56 = vmul.f32 %v10494_v35, %v14460_v10  ;;  %v14465_v10 = vld [vmem:[#allocation61_spill] sm:$0xff] }
 0x644   : > { %v4635_v11 = vmul.f32 %v10492_v5, %v8978_v23  ;;  %v3146_v28 = vpop.xlane.xlu0 %3145  ;;  %v10496_v43 = vpop.eup %10495 }
 0x645   : > { %10509 = vrcp.f32 %v3146_v28  ;;  %v8979_v2 = vpop.f32.mrb[36].mxu1  ;;  %v13050_v8 = vmul.f32 %v10496_v43, %v14461_v24 }
 0x646   : > { %10511 = vrcp.f32 %v12989_v29  ;;  %v4658_v38 = vpack.c.bf16 %v4635_v11, %v4634_v20  ;;  %v3149_v4 = vpop.xlane.xlu1 %3148  ;;  %v10498_v32 = vpop.eup %10497 }
 0x647   : > { %v8980_v19 = vpop.f32.mrb[37].mxu1  ;;  %10513 = vrcp.f32 %v3149_v4  ;;  %v10500_v16 = vpop.eup %10499  ;;  %v13057_v55 = vmul.f32 %v10498_v32, %v14462_v46  ;;  %v14466_v46 = vld [vmem:[#allocation62_spill] sm:$0xff] }
 0x648   : > { %10515 = vrcp.f32 %v12992_v30  ;;  %v8981_v45 = vadd.f32 %v8980_v19, %v8979_v2  ;;  %v8982_v31 = vpop.f32.mrb[38].mxu1  ;;  %9823 = vmatprep.mubr.msk.bf16.mxu0 %vm658_vm1, %v4658_v38  ;;  %v3152_v29 = vpop.xlane.xlu0 %3151  ;;  %v14464_v2 = vld [vmem:[#allocation60_spill] sm:$0xff] }
 0x649   : > { %v10502_v61 = vpop.eup %10501  ;;  %v8983_v21 = vpop.f32.mrb[39].mxu1  ;;  %10517 = vrcp.f32 %v3152_v29  ;;  %v14476_v29 = vld [vmem:[#allocation72_spill] sm:$0xff] }
 0x64a   : > { %v10504_v48 = vpop.eup %10503  ;;  %v13060_v5 = vmul.f32 %v10502_v61, %v14463_v25  ;;  %v8984_v3 = vadd.f32 %v8983_v21, %v8982_v31  ;;  %v3155_v30 = vpop.xlane.xlu1 %3154  ;;  %v4636_v37 = vmul.f32 %v10500_v16, %v8981_v45 }
 0x64b   : > { %v10506_v39 = vpop.eup %10505  ;;  %10519 = vrcp.f32 %v3155_v30 }
 0x64c   : > { %v4637_v35 = vmul.f32 %v10504_v48, %v8984_v3  ;;  %v3158_v20 = vpop.xlane.xlu0 %3157  ;;  %v13066_v4 = vmul.f32 %v10506_v39, %v14464_v2  ;;  %v14467_v3 = vld [vmem:[#allocation63_spill] sm:$0xff] }
 0x64d   : > { %v10508_v11 = vpop.eup %10507  ;;  %10521 = vrcp.f32 %v3158_v20  ;;  %v8985_v43 = vpop.f32.mrb[40].mxu1 }
 0x64e   : > { %10523 = vrcp.f32 %v12994_v0  ;;  %v4659_v28 = vpack.c.bf16 %v4637_v35, %v4636_v37  ;;  %v3161_v38 = vpop.xlane.xlu1 %3160  ;;  %v13069_v24 = vmul.f32 %v10508_v11, %v14465_v10  ;;  %v8986_v19 = vpop.f32.mrb[41].mxu1 }
 0x64f   : > { %v10510_v32 = vpop.eup %10509  ;;  %10525 = vrcp.f32 %v3161_v38  ;;  %v8987_v16 = vadd.f32 %v8986_v19, %v8985_v43  ;;  %v8988_v45 = vpop.f32.mrb[42].mxu1 }
 0x650   : > { %v10512_v31 = vpop.eup %10511  ;;  %10527 = vrcp.f32 %v12996_v44  ;;  %9824 = vmatmul.mubr.msk.bf16.gmra.mrb[16].mxu0 %vm658_vm1, %v4659_v28  ;;  %v3164_v0 = vpop.xlane.xlu0 %3163  ;;  %v13076_v25 = vmul.f32 %v10510_v32, %v14466_v46  ;;  %v14468_v32 = vld [vmem:[#allocation64_spill] sm:$0xff] }
 0x651   : > { %v10514_v61 = vpop.eup %10513  ;;  %v8989_v21 = vpop.f32.mrb[43].mxu1  ;;  %10529 = vrcp.f32 %v3164_v0  ;;  %v4638_v20 = vmul.f32 %v10512_v31, %v8987_v16 }
 0x652   : > { %v10516_v48 = vpop.eup %10515  ;;  %v13079_v30 = vmul.f32 %v10514_v61, %v14467_v3  ;;  %v8990_v39 = vadd.f32 %v8989_v21, %v8988_v45  ;;  %v3167_v44 = vpop.xlane.xlu1 %3166  ;;  %v14469_v45 = vld [vmem:[#allocation65_spill] sm:$0xff] }
 0x653   : > { %v10518_v37 = vpop.eup %10517  ;;  %10531 = vrcp.f32 %v3167_v44 }
 0x654   : > { %v4639_v11 = vmul.f32 %v10516_v48, %v8990_v39  ;;  %v3170_v28 = vpop.xlane.xlu0 %3169  ;;  %v13085_v19 = vmul.f32 %v10518_v37, %v14468_v32  ;;  %v14470_v37 = vld [vmem:[#allocation66_spill] sm:$0xff]  ;;  %v14472_v48 = vld [vmem:[#allocation68_spill] sm:$0xff] }
 0x655   : > { %v10520_v43 = vpop.eup %10519  ;;  %10533 = vrcp.f32 %v3170_v28  ;;  %v8991_v2 = vpop.f32.mrb[44].mxu1 }
 0x656   : > { %10535 = vrcp.f32 %v12999_v1  ;;  %v4660_v38 = vpack.c.bf16 %v4639_v11, %v4638_v20  ;;  %v3173_v10 = vpop.xlane.xlu1 %3172  ;;  %v13088_v0 = vmul.f32 %v10520_v43, %v14469_v45  ;;  %v8992_v21 = vpop.f32.mrb[45].mxu1  ;;  %v14471_v11 = vld [vmem:[#allocation67_spill] sm:$0xff] }
 0x657   : > { %v10522_v61 = vpop.eup %10521  ;;  %10537 = vrcp.f32 %v3173_v10  ;;  %v8993_v31 = vadd.f32 %v8992_v21, %v8991_v2  ;;  %v8994_v16 = vpop.f32.mrb[46].mxu1 }
 0x658   : > { %v10524_v46 = vpop.eup %10523  ;;  %10539 = vrcp.f32 %v13003_v13  ;;  %9827 = vmatprep.mubr.msk.bf16.mxu0 %vm658_vm1, %v4660_v38  ;;  %v3176_v1 = vpop.xlane.xlu0 %3175  ;;  %v13095_v20 = vmul.f32 %v10522_v61, %v14470_v37 }
 0x659   : > { %v10526_v3 = vpop.eup %10525  ;;  %v8995_v39 = vpop.f32.mrb[47].mxu1  ;;  %10541 = vrcp.f32 %v3176_v1  ;;  %v4640_v10 = vmul.f32 %v10524_v46, %v8993_v31 }
 0x65a   : > { %v10528_v44 = vpop.eup %10527  ;;  %v13098_v28 = vmul.f32 %v10526_v3, %v14471_v11  ;;  %v8996_v43 = vadd.f32 %v8995_v39, %v8994_v16  ;;  %v3179_v13 = vpop.xlane.xlu1 %3178  ;;  %v14473_v16 = vld [vmem:[#allocation69_spill] sm:$0xff] }
 0x65b   : > { %v10530_v2 = vpop.eup %10529  ;;  %10543 = vrcp.f32 %v3179_v13 }
 0x65c   : > { %v4641_v32 = vmul.f32 %v10528_v44, %v8996_v43  ;;  %v3182_v45 = vpop.xlane.xlu0 %3181  ;;  %v13104_v3 = vmul.f32 %v10530_v2, %v14472_v48 }
 0x65d   : > { %v10532_v21 = vpop.eup %10531  ;;  %10545 = vrcp.f32 %v3182_v45  ;;  %v8997_v61 = vpop.f32.mrb[48].mxu1  ;;  %v14475_v45 = vld [vmem:[#allocation71_spill] sm:$0xff] }
 0x65e   : > { %10547 = vrcp.f32 %v13005_v58  ;;  %v4661_v1 = vpack.c.bf16 %v4641_v32, %v4640_v10  ;;  %v3185_v37 = vpop.xlane.xlu1 %3184  ;;  %v13107_v39 = vmul.f32 %v10532_v21, %v14473_v16  ;;  %v8998_v13 = vpop.f32.mrb[49].mxu1  ;;  %v14474_v10 = vld [vmem:[#allocation70_spill] sm:$0xff] }
 0x65f   : > { %v10534_v11 = vpop.eup %10533  ;;  %10549 = vrcp.f32 %v3185_v37  ;;  %v8999_v46 = vadd.f32 %v8998_v13, %v8997_v61  ;;  %v9000_v31 = vpop.f32.mrb[50].mxu1 }
 0x660   : > { %v10536_v38 = vpop.eup %10535  ;;  %10551 = vrcp.f32 %v13007_v59  ;;  %9828 = vmatmul.mubr.msk.bf16.gmra.mrb[20].mxu0 %vm658_vm1, %v4661_v1  ;;  %v3188_v58 = vpop.xlane.xlu0 %3187  ;;  %v13114_v32 = vmul.f32 %v10534_v11, %v14474_v10 }
 0x661   : > { %v10538_v43 = vpop.eup %10537  ;;  %v9001_v48 = vpop.f32.mrb[51].mxu1  ;;  %10553 = vrcp.f32 %v3188_v58  ;;  %v4642_v16 = vmul.f32 %v10536_v38, %v8999_v46 }
 0x662   : > { %v10540_v2 = vpop.eup %10539  ;;  %v13117_v21 = vmul.f32 %v10538_v43, %v14475_v45  ;;  %v9002_v37 = vadd.f32 %v9001_v48, %v9000_v31  ;;  %v3191_v59 = vpop.xlane.xlu1 %3190  ;;  %v14477_v31 = vld [vmem:[#allocation73_spill] sm:$0xff] }
 0x663   : > { %v10542_v61 = vpop.eup %10541  ;;  %10555 = vrcp.f32 %v3191_v59 }
 0x664   : > { %v4643_v13 = vmul.f32 %v10540_v2, %v9002_v37  ;;  %v3194_v44 = vpop.xlane.xlu0 %3193  ;;  %v13123_v43 = vmul.f32 %v10542_v61, %v14476_v29 }
 0x665   : > { %v10544_v35 = vpop.eup %10543  ;;  %10557 = vrcp.f32 %v3194_v44  ;;  %v9003_v11 = vpop.f32.mrb[52].mxu1 }
 0x666   : > { %10559 = vrcp.f32 %v13010_v18  ;;  %v4662_v58 = vpack.c.bf16 %v4643_v13, %v4642_v16  ;;  %v3197_v10 = vpop.xlane.xlu1 %3196  ;;  %v13126_v48 = vmul.f32 %v10544_v35, %v14477_v31  ;;  %v9004_v59 = vpop.f32.mrb[53].mxu1  ;;  %v14478_v35 = vld [vmem:[#allocation74_spill] sm:$0xff]  ;;  %v14479_v16 = vld [vmem:[#allocation75_spill] sm:$0xff] }
 0x667   : > { %v10546_v45 = vpop.eup %10545  ;;  %10561 = vrcp.f32 %v3197_v10  ;;  %v9005_v38 = vadd.f32 %v9004_v59, %v9003_v11  ;;  %v9006_v46 = vpop.f32.mrb[54].mxu1 }
 0x668   : > { %v10548_v1 = vpop.eup %10547  ;;  %10563 = vrcp.f32 %v13014_v63  ;;  %9831 = vmatprep.mubr.msk.bf16.mxu0 %vm658_vm1, %v4662_v58  ;;  %v3200_v18 = vpop.xlane.xlu0 %3199  ;;  %v13133_v61 = vmul.f32 %v10546_v45, %v14478_v35  ;;  %v14480_v45 = vld [vmem:[#allocation76_spill] sm:$0xff] }
 0x669   : > { %v10550_v2 = vpop.eup %10549  ;;  %v9007_v29 = vpop.f32.mrb[55].mxu1  ;;  %10565 = vrcp.f32 %v3200_v18  ;;  %v4644_v31 = vmul.f32 %v10548_v1, %v9005_v38 }
 0x66a   : > { %v10552_v37 = vpop.eup %10551  ;;  %v13136_v13 = vmul.f32 %v10550_v2, %v14479_v16  ;;  %v9008_v10 = vadd.f32 %v9007_v29, %v9006_v46  ;;  %v3203_v63 = vpop.xlane.xlu1 %3202  ;;  %v14481_v2 = vld [vmem:[#allocation77_spill] sm:$0xff] }
 0x66b   : > { %v10554_v11 = vpop.eup %10553  ;;  %10567 = vrcp.f32 %v3203_v63 }
 0x66c   : > { %v4645_v59 = vmul.f32 %v10552_v37, %v9008_v10  ;;  %v3206_v44 = vpop.xlane.xlu0 %3205  ;;  %v13141_v35 = vmul.f32 %v10554_v11, %v14480_v45 }
 0x66d   : > { %v10556_v23 = vpop.eup %10555  ;;  %10569 = vrcp.f32 %v3206_v44  ;;  %v9009_v60 = vpop.f32.mrb[56].mxu1 }
 0x66e   : > { %v4663_v18 = vpack.c.bf16 %v4645_v59, %v4644_v31  ;;  %v3209_v62 = vpop.xlane.xlu1 %3208  ;;  %v13144_v16 = vmul.f32 %v10556_v23, %v14481_v2  ;;  %v9010_v29 = vpop.f32.mrb[57].mxu1  ;;  %v14482_v23 = vld [vmem:[#allocation78_spill] sm:$0xff]  ;;  %v14483_v59 = vld [vmem:[#allocation79_spill] sm:$0xff] }
 0x66f   : > { %v10558_v46 = vpop.eup %10557  ;;  %10571 = vrcp.f32 %v3209_v62  ;;  %v9011_v1 = vadd.f32 %v9010_v29, %v9009_v60  ;;  %v9012_v38 = vpop.f32.mrb[58].mxu1 }
 0x670   : > { %v10560_v63 = vpop.eup %10559  ;;  %10573 = vrcp.f32 %v13016_v14  ;;  %9832 = vmatmul.mubr.msk.bf16.gmra.mrb[24].mxu0 %vm658_vm1, %v4663_v18  ;;  %v9013_v10 = vpop.f32.mrb[59].mxu1  ;;  %v13152_v31 = vmul.f32 %v10558_v46, %v14482_v23 }
 0x671   : > { %v10562_v37 = vpop.eup %10561  ;;  %10575 = vrcp.f32 %v13018_v40  ;;  %v9014_v45 = vadd.f32 %v9013_v10, %v9012_v38  ;;  %v4646_v18 = vmul.f32 %v10560_v63, %v9011_v1  ;;  %v13179_v38 = vld [vmem:[%s14164_s2 + $0x2] ss:$0 sm:$0xff] }
 0x672   : > { %v10564_v11 = vpop.eup %10563  ;;  %v13155_v62 = vmul.f32 %v10562_v37, %v14483_v59 }
 0x673   : > { %v10566_v14 = vpop.eup %10565  ;;  %v4647_v2 = vmul.f32 %v10564_v11, %v9014_v45  ;;  %v14486_v11 = vld [vmem:[#allocation82_spill] sm:$0xff] }
 0x674   : > { %v13160_v40 = vmul.f32 %v10566_v14, %v14484_v47  ;;  %v14487_v47 = vld [vmem:[#allocation83_spill] sm:$0xff] }
 0x675   : > { %v10568_v29 = vpop.eup %10567  ;;  %v4664_v44 = vpack.c.bf16 %v4647_v2, %v4646_v18  ;;  %v9015_v58 = vpop.f32.mrb[60].mxu1 }
 0x676   : > { %v13163_v33 = vmul.f32 %v10568_v29, %v14485_v17  ;;  %v9016_v23 = vpop.f32.mrb[61].mxu1 }
 0x677   : > { %v10570_v46 = vpop.eup %10569  ;;  %v9017_v37 = vadd.f32 %v9016_v23, %v9015_v58  ;;  %v9018_v59 = vpop.f32.mrb[62].mxu1  ;;  %9835 = vmatprep.mubr.msk.bf16.mxu0 %vm658_vm1, %v4664_v44 }
 0x678   : > { %v9019_v1 = vpop.f32.mrb[63].mxu1  ;;  %v13169_v45 = vmul.f32 %v10570_v46, %v14486_v11 }
 0x679   : > { %v10572_v63 = vpop.eup %10571  ;;  %v9020_v17 = vadd.f32 %v9019_v1, %v9018_v59  ;;  %v14488_v1 = vpack.c.bf16 %v13031_v41, %v13028_v15 }
 0x67a   : > { %v10574_v10 = vpop.eup %10573  ;;  %v13172_v14 = vmul.f32 %v10572_v63, %v14487_v47 }
 0x67b   : > { %v10576_v18 = vpop.eup %10575  ;;  %v4648_v2 = vmul.f32 %v10574_v10, %v9017_v37 }
 0x67c   : > { %v3482_v58 = vpack.c.bf16 %v13172_v14, %v13169_v45  ;;  %v4649_v29 = vmul.f32 %v10576_v18, %v9020_v17 }
 0x67d   : > { %v9879_v23 = vpop.f32.mrb[64].mxu1 }
 0x67e   : > { %v4665_v44 = vpack.c.bf16 %v4649_v29, %v4648_v2  ;;  %v5152_v60 = vpop.f32.mrb[65].mxu1  ;;  %v5161_v63 = vadd.f32 %v9879_v23, %v13179_v38  ;;  %v10192_v2 = vld [vmem:[%s14163_s1 + $0x38] sm:$0xff]   ;;  %v5313_v29 = vld [vmem:[#allocation3 + $0x100] sm:$0xff] }
 0x67f   : > { %v9880_v46 = vpop.f32.mrb[66].mxu1  ;;  %v5153_v10 = vadd.f32 %v13179_v38, %v5152_v60  ;;  %v14489_v60 = vpack.c.bf16 %v13041_v57, %v13038_v42  ;;  %v5314_v57 = vld [vmem:[#allocation3 + $0x108] sm:$0xff] }
 0x680   : > { %9836 = vmatmul.mubr.msk.bf16.gmra.mrb[28].mxu0 %vm658_vm1, %v4665_v44  ;;  %v5164_v59 = vadd.f32 %v9880_v46, %v13179_v38  ;;  %v5155_v37 = vpop.f32.mrb[67].mxu1  ;;  %v5322_v46 = vld [vmem:[#allocation3 + $0x148] sm:$0xff] }
 0x681   : > { %9841 = vmatprep.mubr.msk.bf16.mxu0 %vm658_vm1, %v14488_v1  ;;  %v5156_v11 = vadd.f32 %v13179_v38, %v5155_v37  ;;  %v14490_v1 = vpack.c.bf16 %v13050_v8, %v13047_v56  ;;  %v6732_v37 = vld [vmem:[#allocation2 + $0x1c0] sm:$0xff] }
 0x682   : > { %v5280_v47 = vpack.c.bf16 %v5164_v59, %v5161_v63 }
 0x683   : > { %v5279_v17 = vpack.c.bf16 %v5156_v11, %v5153_v10  ;;  %v5323_v11 = vld [vmem:[#allocation3 + $0x150] sm:$0xff] }
 0x685   : > { %9089 = vmatprep.mubr.msk.bf16.mxu1 %vm658_vm1, %v5279_v17  ;;  %v9883_v18 = vpop.f32.mrb[68].mxu1 }
 0x686   : > { %9090 = vmatmul.mubr.msk.bf16.vlgmr.msra.gmra.mrb[96].mxu1 %vm658_vm1, %v5279_v17  ;;  %v5177_v15 = vadd.f32 %v9883_v18, %v13179_v38  ;;  %v5168_v41 = vpop.f32.mrb[69].mxu1  ;;  %v14491_v18 = vpack.c.bf16 %v13060_v5, %v13057_v55 }
 0x687   : > { %9944 = vmatpush3.bf16.msra.mxu1 %v12964_v54  ;;  %v5169_v44 = vadd.f32 %v13179_v38, %v5168_v41  ;;  %v9884_v23 = vpop.f32.mrb[70].mxu1  ;;  %9091 = vmatprep.mubr.msk.bf16.mxu1 %vm658_vm1, %v5280_v47 }
 0x688   : > { %9842 = vmatmul.mubr.msk.bf16.vlgmr.msra.gmra.mrb[0].mxu0 %vm658_vm1, %v14489_v60  ;;  %v5180_v63 = vadd.f32 %v9884_v23, %v13179_v38  ;;  %v5171_v59 = vpop.f32.mrb[71].mxu1  ;;  %9945 = vmatprep.subr.bf16.mxu1 %v10192_v2  ;;  %v14492_v60 = vpack.c.bf16 %v13069_v24, %v13066_v4  ;;  %v5316_v23 = vld [vmem:[#allocation3 + $0x118] sm:$0xff] }
 0x689   : > { %9122 = vmatpush3.bf16.msra.mxu0 %v5313_v29  ;;  %9845 = vmatprep.mubr.msk.bf16.mxu0 %vm658_vm1, %v14490_v1  ;;  %v5172_v54 = vadd.f32 %v13179_v38, %v5171_v59  ;;  %v14493_v1 = vpack.c.bf16 %v13079_v30, %v13076_v25 }
 0x68a   : > { %9123 = vmatprep.subr.bf16.mxu0 %v5322_v46  ;;  %v5282_v42 = vpack.c.bf16 %v5180_v63, %v5177_v15  ;;  %v5325_v63 = vld [vmem:[#allocation3 + $0x160] sm:$0xff] }
 0x68b   : > { %9946 = vmatpush3.bf16.msra.mxu1 %v10192_v2  ;;  %v5281_v10 = vpack.c.bf16 %v5172_v54, %v5169_v44  ;;  %v5315_v2 = vld [vmem:[#allocation3 + $0x110] sm:$0xff]  ;;  %v5317_v54 = vld [vmem:[#allocation3 + $0x120] sm:$0xff] }
 0x68c   : > { %10136 = vmatprep.subr.msk.bf16.mxu1 %vm658_vm1, %v6732_v37 }
 0x68d   : > { %9124 = vmatpush3.bf16.msra.mxu0 %v5314_v57  ;;  %v9887_v17 = vpop.f32.mrb[72].mxu1 }
 0x68e   : > { %9125 = vmatprep.subr.bf16.mxu0 %v5323_v11  ;;  %9092 = vmatmul.mubr.msk.bf16.gmra.mrb[100].mxu1 %vm658_vm1, %v5280_v47  ;;  %v5193_v56 = vadd.f32 %v9887_v17, %v13179_v38  ;;  %v5184_v8 = vpop.f32.mrb[73].mxu1  ;;  %v5324_v47 = vld [vmem:[#allocation3 + $0x158] sm:$0xff]  ;;  %v14494_v11 = vpack.c.bf16 %v13088_v0, %v13085_v19 }
 0x68f   : > { %9093 = vmatprep.mubr.msk.bf16.mxu1 %vm658_vm1, %v5281_v10  ;;  %v5185_v15 = vadd.f32 %v13179_v38, %v5184_v8  ;;  %v9888_v41 = vpop.f32.mrb[74].mxu1  ;;  %v5318_v8 = vld [vmem:[#allocation3 + $0x128] sm:$0xff] }
 0x690   : > { %9846 = vmatmul.mubr.msk.bf16.gmra.mrb[4].mxu0 %vm658_vm1, %v14491_v18  ;;  %v5196_v29 = vadd.f32 %v9888_v41, %v13179_v38  ;;  %v5187_v44 = vpop.f32.mrb[75].mxu1  ;;  %v14495_v41 = vpack.c.bf16 %v13098_v28, %v13095_v20 }
 0x691   : > { %9126 = vmatpush3.bf16.msra.mxu0 %v5315_v2  ;;  %9849 = vmatprep.mubr.msk.bf16.mxu0 %vm658_vm1, %v14492_v60  ;;  %v5188_v55 = vadd.f32 %v13179_v38, %v5187_v44  ;;  %v5327_v2 = vld [vmem:[#allocation3 + $0x170] sm:$0xff]  ;;  %v14496_v44 = vpack.c.bf16 %v13107_v39, %v13104_v3  ;;  %v14497_v3 = vpack.c.bf16 %v13117_v21, %v13114_v32 }
 0x692   : > { %9127 = vmatprep.subr.bf16.mxu0 %v5324_v47  ;;  %v13224_v5 = vpack.c.bf16 %v5196_v29, %v5193_v56  ;;  %v5319_v60 = vld [vmem:[#allocation3 + $0x130] sm:$0xff] }
 0x693   : > { %v5283_v46 = vpack.c.bf16 %v5188_v55, %v5185_v15 }
 0x695   : > { %9128 = vmatpush3.bf16.msra.mxu0 %v5316_v23  ;;  %v9891_v59 = vpop.f32.mrb[76].mxu1 }
 0x696   : > { %9129 = vmatprep.subr.bf16.mxu0 %v5325_v63  ;;  %9094 = vmatmul.mubr.msk.bf16.gmra.mrb[104].mxu1 %vm658_vm1, %v5281_v10  ;;  %v5209_v4 = vadd.f32 %v9891_v59, %v13179_v38  ;;  %v5200_v24 = vpop.f32.mrb[77].mxu1  ;;  %v5326_v10 = vld [vmem:[#allocation3 + $0x168] sm:$0xff]  ;;  %v5320_v63 = vld [vmem:[#allocation3 + $0x138] sm:$0xff] }
 0x697   : > { %9095 = vmatprep.mubr.msk.bf16.mxu1 %vm658_vm1, %v5282_v42  ;;  %v5201_v57 = vadd.f32 %v13179_v38, %v5200_v24  ;;  %v9892_v37 = vpop.f32.mrb[78].mxu1 }
 0x698   : > { %9850 = vmatmul.mubr.msk.bf16.gmra.mrb[8].mxu0 %vm658_vm1, %v14493_v1  ;;  %v5212_v17 = vadd.f32 %v9892_v37, %v13179_v38  ;;  %v5203_v56 = vpop.f32.mrb[79].mxu1 }
 0x699   : > { %9130 = vmatpush3.bf16.msra.mxu0 %v5317_v54  ;;  %9853 = vmatprep.mubr.msk.bf16.mxu0 %vm658_vm1, %v14494_v11  ;;  %v5204_v25 = vadd.f32 %v13179_v38, %v5203_v56 }
 0x69a   : > { %9131 = vmatprep.subr.bf16.mxu0 %v5326_v10  ;;  %v13240_v30 = vpack.c.bf16 %v5212_v17, %v5209_v4 }
 0x69b   : > { %v5285_v18 = vpack.c.bf16 %v5204_v25, %v5201_v57  ;;  %v14498_v57 = vpack.c.bf16 %v13126_v48, %v13123_v43  ;;  %v14499_v25 = vpack.c.bf16 %v13136_v13, %v13133_v61 }
 0x69d   : > { %9132 = vmatpush3.bf16.msra.mxu0 %v5318_v8  ;;  %v9895_v15 = vpop.f32.mrb[80].mxu1  ;;  %v14500_v8 = vpack.c.bf16 %v13144_v16, %v13141_v35 }
 0x69e   : > { %9133 = vmatprep.subr.bf16.mxu0 %v5327_v2  ;;  %9096 = vmatmul.mubr.msk.bf16.gmra.mrb[108].mxu1 %vm658_vm1, %v5282_v42  ;;  %v5225_v19 = vadd.f32 %v9895_v15, %v13179_v38  ;;  %v5216_v0 = vpop.f32.mrb[81].mxu1  ;;  %v5328_v42 = vld [vmem:[#allocation3 + $0x178] sm:$0xff] }
 0x69f   : > { %9097 = vmatprep.mubr.msk.bf16.mxu1 %vm658_vm1, %v5283_v46  ;;  %v5217_v47 = vadd.f32 %v13179_v38, %v5216_v0  ;;  %v9896_v29 = vpop.f32.mrb[82].mxu1 }
 0x6a0   : > { %9854 = vmatmul.mubr.msk.bf16.gmra.mrb[12].mxu0 %vm658_vm1, %v14495_v41  ;;  %v5228_v55 = vadd.f32 %v9896_v29, %v13179_v38  ;;  %v5219_v23 = vpop.f32.mrb[83].mxu1 }
 0x6a1   : > { %9134 = vmatpush3.bf16.msra.mxu0 %v5319_v60  ;;  %9857 = vmatprep.mubr.msk.bf16.mxu0 %vm658_vm1, %v14496_v44  ;;  %v5220_v20 = vadd.f32 %v13179_v38, %v5219_v23  ;;  %v14501_v60 = vpack.c.bf16 %v13155_v62, %v13152_v31 }
 0x6a2   : > { %9135 = vmatprep.subr.bf16.mxu0 %v5328_v42  ;;  %v5288_v28 = vpack.c.bf16 %v5228_v55, %v5225_v19 }
 0x6a3   : > { %v5287_v59 = vpack.c.bf16 %v5220_v20, %v5217_v47  ;;  %v14502_v47 = vpack.c.bf16 %v13163_v33, %v13160_v40  ;;  %v6724_v33 = vld [vmem:[#allocation2 + $0x180] sm:$0xff]  ;;  %v6733_v40 = vld [vmem:[#allocation2 + $0x1c8] sm:$0xff]  ;;  %v14503_v20 = vld [vmem:[#allocation18_spill] sm:$0xff] }
 0x6a4   : > { %v6806_v62 = vsel %vm658_vm1, %v6724_v33, 0 }
 0x6a5   : > { %9136 = vmatpush3.bf16.msra.mxu0 %v5320_v63  ;;  %v9899_v4 = vpop.f32.mrb[84].mxu1  ;;  %v14504_v63 = vld [vmem:[#allocation19_spill] sm:$0xff] }
 0x6a6   : > { %9098 = vmatmul.mubr.msk.bf16.gmra.mrb[112].mxu1 %vm658_vm1, %v5283_v46  ;;  %v5241_v24 = vadd.f32 %v9899_v4, %v13179_v38  ;;  %v5232_v1 = vpop.f32.mrb[85].mxu1 }
 0x6a7   : > { %9099 = vmatprep.mubr.msk.bf16.mxu1 %vm658_vm1, %v13224_v5  ;;  %v5233_v39 = vadd.f32 %v13179_v38, %v5232_v1  ;;  %v9900_v54 = vpop.f32.mrb[86].mxu1 }
 0x6a8   : > { %9858 = vmatmul.mubr.msk.bf16.gmra.mrb[16].mxu0 %vm658_vm1, %v14497_v3  ;;  %v5244_v46 = vadd.f32 %v9900_v54, %v13179_v38  ;;  %v5235_v37 = vpop.f32.mrb[87].mxu1 }
 0x6a9   : > { %9861 = vmatprep.mubr.msk.bf16.mxu0 %vm658_vm1, %v14498_v57  ;;  %v5236_v11 = vadd.f32 %v13179_v38, %v5235_v37 }
 0x6aa   : > { %v5290_v10 = vpack.c.bf16 %v5244_v46, %v5241_v24 }
 0x6ab   : > { %v5289_v32 = vpack.c.bf16 %v5236_v11, %v5233_v39 }
 0x6ad   : > { %v9903_v21 = vpop.f32.mrb[88].mxu1 }
 0x6ae   : > { %9100 = vmatmul.mubr.msk.bf16.gmra.mrb[116].mxu1 %vm658_vm1, %v13224_v5  ;;  %v5257_v17 = vadd.f32 %v9903_v21, %v13179_v38  ;;  %v5248_v56 = vpop.f32.mrb[89].mxu1 }
 0x6af   : > { %9101 = vmatprep.mubr.msk.bf16.mxu1 %vm658_vm1, %v5285_v18  ;;  %v5249_v43 = vadd.f32 %v13179_v38, %v5248_v56  ;;  %v9904_v48 = vpop.f32.mrb[90].mxu1 }
 0x6b0   : > { %9862 = vmatmul.mubr.msk.bf16.gmra.mrb[20].mxu0 %vm658_vm1, %v14499_v25  ;;  %v5260_v5 = vadd.f32 %v9904_v48, %v13179_v38  ;;  %v5251_v2 = vpop.f32.mrb[91].mxu1 }
 0x6b1   : > { %9865 = vmatprep.mubr.msk.bf16.mxu0 %vm658_vm1, %v14500_v8  ;;  %v5252_v15 = vadd.f32 %v13179_v38, %v5251_v2 }
 0x6b2   : > { %v5292_v19 = vpack.c.bf16 %v5260_v5, %v5257_v17 }
 0x6b3   : > { %v5291_v0 = vpack.c.bf16 %v5252_v15, %v5249_v43 }
 0x6b5   : > { %v9907_v61 = vpop.f32.mrb[92].mxu1 }
 0x6b6   : > { %9102 = vmatmul.mubr.msk.bf16.gmra.mrb[120].mxu1 %vm658_vm1, %v5285_v18  ;;  %v5273_v13 = vadd.f32 %v9907_v61, %v13179_v38  ;;  %v5264_v41 = vpop.f32.mrb[93].mxu1 }
 0x6b7   : > { %9103 = vmatprep.mubr.msk.bf16.mxu1 %vm658_vm1, %v13240_v30  ;;  %v5265_v35 = vadd.f32 %v13179_v38, %v5264_v41  ;;  %v9908_v16 = vpop.f32.mrb[94].mxu1 }
 0x6b8   : > { %9866 = vmatmul.mubr.msk.bf16.gmra.mrb[24].mxu0 %vm658_vm1, %v14501_v60  ;;  %v5276_v18 = vadd.f32 %v9908_v16, %v13179_v38  ;;  %v5267_v29 = vpop.f32.mrb[95].mxu1  ;;  %v13433_v60 = vld [vmem:[%s14169_s7 + $0x8] sm:$0xf] }
 0x6b9   : > { %9869 = vmatprep.mubr.msk.bf16.mxu0 %vm658_vm1, %v14502_v47  ;;  %v5268_v44 = vadd.f32 %v13179_v38, %v5267_v29  ;;  %v6725_v38 = vld [vmem:[#allocation2 + $0x188] sm:$0xff]  ;;  %10135 = vmatprep.subr.msk.bf16.mxu0 %vm4716_vm2, %v13433_v60 }
 0x6ba   : > { %v5294_v42 = vpack.c.bf16 %v5276_v18, %v5273_v13  ;;  %v6809_v45 = vsel %vm658_vm1, %v6725_v38, 0 }
 0x6bb   : > { %v5293_v31 = vpack.c.bf16 %v5268_v44, %v5265_v35 }
 0x6be   : > { %9104 = vmatmul.mubr.msk.bf16.gmra.mrb[124].mxu1 %vm658_vm1, %v13240_v30 }
 0x6bf   : > { %9105 = vmatprep.mubr.msk.bf16.mxu1 %vm658_vm1, %v5287_v59 }
 0x6c0   : > { %9870 = vmatmul.mubr.msk.bf16.gmra.mrb[28].mxu0 %vm658_vm1, %v3482_v58 }
 0x6c6   : > { %9106 = vmatmul.mubr.msk.bf16.gmra.mrb[128].mxu1 %vm658_vm1, %v5287_v59 }
 0x6c7   : > { %9107 = vmatprep.mubr.msk.bf16.mxu1 %vm658_vm1, %v5288_v28 }
 0x6ce   : > { %9108 = vmatmul.mubr.msk.bf16.gmra.mrb[132].mxu1 %vm658_vm1, %v5288_v28 }
 0x6cf   : > { %9109 = vmatprep.mubr.msk.bf16.mxu1 %vm658_vm1, %v5289_v32 }
 0x6d6   : > { %9110 = vmatmul.mubr.msk.bf16.gmra.mrb[136].mxu1 %vm658_vm1, %v5289_v32 }
 0x6d7   : > { %9111 = vmatprep.mubr.msk.bf16.mxu1 %vm658_vm1, %v5290_v10 }
 0x6de   : > { %9112 = vmatmul.mubr.msk.bf16.gmra.mrb[140].mxu1 %vm658_vm1, %v5290_v10 }
 0x6df   : > { %9113 = vmatprep.mubr.msk.bf16.mxu1 %vm658_vm1, %v5291_v0 }
 0x6e6   : > { %9114 = vmatmul.mubr.msk.bf16.gmra.mrb[144].mxu1 %vm658_vm1, %v5291_v0 }
 0x6e7   : > { %9115 = vmatprep.mubr.msk.bf16.mxu1 %vm658_vm1, %v5292_v19 }
 0x6ee   : > { %9116 = vmatmul.mubr.msk.bf16.gmra.mrb[148].mxu1 %vm658_vm1, %v5292_v19 }
 0x6ef   : > { %9117 = vmatprep.mubr.msk.bf16.mxu1 %vm658_vm1, %v5293_v31 }
 0x6f6   : > { %9118 = vmatmul.mubr.msk.bf16.gmra.mrb[152].mxu1 %vm658_vm1, %v5293_v31 }
 0x6f7   : > { %9119 = vmatprep.mubr.msk.bf16.mxu1 %vm658_vm1, %v5294_v42 }
 0x6fe   : > { %9120 = vmatmul.mubr.msk.bf16.gmra.mrb[156].mxu1 %vm658_vm1, %v5294_v42 }
 0x6ff   : > { %9947 = vmatprep.mubr.msk.bf16.mxu1 %vm432_vm0, %v14409_v50  ;;  %v6734_v50 = vld [vmem:[#allocation2 + $0x1d0] sm:$0xff] }
 0x706   : > { %9948 = vmatmul.mubr.msk.bf16.vlgmr.msra.gmra.mrb[160].mxu1 %vm432_vm0, %v14413_v26  ;;  %v6726_v26 = vld [vmem:[#allocation2 + $0x190] sm:$0xff] }
 0x707   : > { %9269 = vmatpush3.bf16.xpose.msra.mxu1 %v6806_v62  ;;  %9951 = vmatprep.mubr.msk.bf16.mxu1 %vm432_vm0, %v14415_v6  ;;  %v6812_v14 = vsel %vm658_vm1, %v6726_v26, 0  ;;  %v6735_v6 = vld [vmem:[#allocation2 + $0x1d8] sm:$0xff] }
 0x708   : > { %10137 = vmatprep.subr.msk.bf16.mxu1 %vm658_vm1, %v6733_v40 }
 0x70e   : > { %9952 = vmatmul.mubr.msk.bf16.gmra.mrb[164].mxu1 %vm432_vm0, %v14420_v51  ;;  %v6727_v51 = vld [vmem:[#allocation2 + $0x198] sm:$0xff] }
 0x70f   : > { %9271 = vmatpush3.bf16.xpose.msra.mxu1 %v6809_v45  ;;  %9955 = vmatprep.mubr.msk.bf16.mxu1 %vm432_vm0, %v14421_v53  ;;  %v6815_v58 = vsel %vm658_vm1, %v6727_v51, 0  ;;  %v6736_v53 = vld [vmem:[#allocation2 + $0x1e0] sm:$0xff] }
 0x710   : > { %10138 = vmatprep.subr.msk.bf16.mxu1 %vm658_vm1, %v6734_v50 }
 0x716   : > { %9956 = vmatmul.mubr.msk.bf16.gmra.mrb[168].mxu1 %vm432_vm0, %v14426_v49  ;;  %v6728_v49 = vld [vmem:[#allocation2 + $0x1a0] sm:$0xff] }
 0x717   : > { %9273 = vmatpush3.bf16.xpose.msra.mxu1 %v6812_v14  ;;  %9959 = vmatprep.mubr.msk.bf16.mxu1 %vm432_vm0, %v14427_v36  ;;  %v6818_v30 = vsel %vm658_vm1, %v6728_v49, 0  ;;  %v6737_v36 = vld [vmem:[#allocation2 + $0x1e8] sm:$0xff] }
 0x718   : > { %10139 = vmatprep.subr.msk.bf16.mxu1 %vm658_vm1, %v6735_v6 }
 0x71e   : > { %9960 = vmatmul.mubr.msk.bf16.gmra.mrb[172].mxu1 %vm432_vm0, %v14432_v52  ;;  %v6729_v52 = vld [vmem:[#allocation2 + $0x1a8] sm:$0xff] }
 0x71f   : > { %9275 = vmatpush3.bf16.xpose.msra.mxu1 %v6815_v58  ;;  %9963 = vmatprep.mubr.msk.bf16.mxu1 %vm432_vm0, %v14433_v12  ;;  %v6821_v55 = vsel %vm658_vm1, %v6729_v52, 0  ;;  %v6738_v12 = vld [vmem:[#allocation2 + $0x1f0] sm:$0xff] }
 0x720   : > { %10140 = vmatprep.subr.msk.bf16.mxu1 %vm658_vm1, %v6736_v53 }
 0x726   : > { %9964 = vmatmul.mubr.msk.bf16.gmra.mrb[176].mxu1 %vm432_vm0, %v14438_v7  ;;  %v6730_v7 = vld [vmem:[#allocation2 + $0x1b0] sm:$0xff] }
 0x727   : > { %9277 = vmatpush3.bf16.xpose.msra.mxu1 %v6818_v30  ;;  %9967 = vmatprep.mubr.msk.bf16.mxu1 %vm432_vm0, %v14439_v34  ;;  %v6824_v23 = vsel %vm658_vm1, %v6730_v7, 0  ;;  %v6739_v34 = vld [vmem:[#allocation2 + $0x1f8] sm:$0xff] }
 0x728   : > { %10141 = vmatprep.subr.msk.bf16.mxu1 %vm658_vm1, %v6737_v36 }
 0x72e   : > { %9968 = vmatmul.mubr.msk.bf16.gmra.mrb[180].mxu1 %vm432_vm0, %v14444_v9  ;;  %v6731_v9 = vld [vmem:[#allocation2 + $0x1b8] sm:$0xff] }
 0x72f   : > { %9279 = vmatpush3.bf16.xpose.msra.mxu1 %v6821_v55  ;;  %9971 = vmatprep.mubr.msk.bf16.mxu1 %vm432_vm0, %v14445_v27  ;;  %v6827_v28 = vsel %vm658_vm1, %v6731_v9, 0 }
 0x730   : > { %10142 = vmatprep.subr.msk.bf16.mxu1 %vm658_vm1, %v6738_v12 }
 0x736   : > { %9972 = vmatmul.mubr.msk.bf16.gmra.mrb[184].mxu1 %vm432_vm0, %v14450_v22 }
 0x737   : > { %9281 = vmatpush3.bf16.xpose.msra.mxu1 %v6824_v23  ;;  %9975 = vmatprep.mubr.msk.bf16.mxu1 %vm432_vm0, %v14503_v20 }
 0x738   : > { %10143 = vmatprep.subr.msk.bf16.mxu1 %vm658_vm1, %v6739_v34 }
 0x73e   : > { %9976 = vmatmul.mubr.msk.bf16.gmra.mrb[188].mxu1 %vm432_vm0, %v14504_v63 }
 0x73f   : > { %9283 = vmatpush3.bf16.xpose.msra.mxu1 %v6827_v28 }
 0x759   : > { %v13370_v27 = vpop.f32.mrb[96].mxu1 }
 0x75a   : > { %v13372_v59 = vpop.f32.mrb[97].mxu1 }
 0x75b   : > { %v5618_v22 = vmax.f32 %v13370_v27, %v13372_v59  ;;  %v13376_v4 = vpop.f32.mrb[98].mxu1 }
 0x75c   : > { %v13378_v24 = vpop.f32.mrb[99].mxu1 }
 0x75d   : > { %v5621_v1 = vmax.f32 %v13376_v4, %v13378_v24  ;;  %5619 = vmax.xlane.f32.xlu0 %v5618_v22 }
 0x75f   : > { %5622 = vmax.xlane.f32.xlu1 %v5621_v1 }
 0x761   : > { %v13382_v3 = vpop.f32.mrb[100].mxu1 }
 0x762   : > { %v13384_v39 = vpop.f32.mrb[101].mxu1 }
 0x763   : > { %v5624_v54 = vmax.f32 %v13382_v3, %v13384_v39  ;;  %v13388_v57 = vpop.f32.mrb[102].mxu1 }
 0x764   : > { %v13390_v46 = vpop.f32.mrb[103].mxu1 }
 0x765   : > { %v5627_v37 = vmax.f32 %v13388_v57, %v13390_v46  ;;  %5625 = vmax.xlane.f32.xlu0 %v5624_v54 }
 0x767   : > { %5628 = vmax.xlane.f32.xlu1 %v5627_v37 }
 0x769   : > { %v13394_v11 = vpop.f32.mrb[104].mxu1 }
 0x76a   : > { %v13396_v10 = vpop.f32.mrb[105].mxu1 }
 0x76b   : > { %v5630_v32 = vmax.f32 %v13394_v11, %v13396_v10  ;;  %v13400_v21 = vpop.f32.mrb[106].mxu1 }
 0x76c   : > { %v13402_v17 = vpop.f32.mrb[107].mxu1 }
 0x76d   : > { %v5633_v56 = vmax.f32 %v13400_v21, %v13402_v17  ;;  %5631 = vmax.xlane.f32.xlu0 %v5630_v32 }
 0x76f   : > { %5634 = vmax.xlane.f32.xlu1 %v5633_v56 }
 0x771   : > { %v13406_v25 = vpop.f32.mrb[108].mxu1 }
 0x772   : > { %v13408_v43 = vpop.f32.mrb[109].mxu1 }
 0x773   : > { %v5636_v48 = vmax.f32 %v13406_v25, %v13408_v43  ;;  %v13412_v8 = vpop.f32.mrb[110].mxu1 }
 0x774   : > { %v13414_v5 = vpop.f32.mrb[111].mxu1 }
 0x775   : > { %v5639_v2 = vmax.f32 %v13412_v8, %v13414_v5  ;;  %5637 = vmax.xlane.f32.xlu0 %v5636_v48 }
 0x777   : > { %5640 = vmax.xlane.f32.xlu1 %v5639_v2 }
 0x779   : > { %v13418_v15 = vpop.f32.mrb[112].mxu1 }
 0x77a   : > { %v13420_v19 = vpop.f32.mrb[113].mxu1 }
 0x77b   : > { %v5642_v0 = vmax.f32 %v13418_v15, %v13420_v19  ;;  %v13424_v61 = vpop.f32.mrb[114].mxu1 }
 0x77c   : > { %v13426_v13 = vpop.f32.mrb[115].mxu1 }
 0x77d   : > { %v5645_v41 = vmax.f32 %v13424_v61, %v13426_v13  ;;  %5643 = vmax.xlane.f32.xlu0 %v5642_v0 }
 0x77f   : > { %5646 = vmax.xlane.f32.xlu1 %v5645_v41 }
 0x781   : > { %v13437_v35 = vpop.f32.mrb[116].mxu1 }
 0x782   : > { %v13439_v16 = vpop.f32.mrb[117].mxu1 }
 0x783   : > { %v5648_v47 = vmax.f32 %v13437_v35, %v13439_v16  ;;  %v13443_v18 = vpop.f32.mrb[118].mxu1 }
 0x784   : > { %v13445_v29 = vpop.f32.mrb[119].mxu1 }
 0x785   : > { %v5651_v44 = vmax.f32 %v13443_v18, %v13445_v29  ;;  %5649 = vmax.xlane.f32.xlu0 %v5648_v47 }
 0x787   : > { %5652 = vmax.xlane.f32.xlu1 %v5651_v44 }
 0x789   : > { %v13449_v42 = vpop.f32.mrb[120].mxu1 }
 0x78a   : > { %v13451_v31 = vpop.f32.mrb[121].mxu1 }
 0x78b   : > { %v5654_v33 = vmax.f32 %v13449_v42, %v13451_v31  ;;  %v13455_v62 = vpop.f32.mrb[122].mxu1 }
 0x78c   : > { %v13457_v40 = vpop.f32.mrb[123].mxu1 }
 0x78d   : > { %v5657_v38 = vmax.f32 %v13455_v62, %v13457_v40  ;;  %5655 = vmax.xlane.f32.xlu0 %v5654_v33 }
 0x78f   : > { %5658 = vmax.xlane.f32.xlu1 %v5657_v38 }
 0x791   : > { %v13461_v45 = vpop.f32.mrb[124].mxu1 }
 0x792   : > { %v13463_v50 = vpop.f32.mrb[125].mxu1 }
 0x793   : > { %v5660_v26 = vmax.f32 %v13461_v45, %v13463_v50  ;;  %v13467_v14 = vpop.f32.mrb[126].mxu1 }
 0x794   : > { %v13469_v6 = vpop.f32.mrb[127].mxu1 }
 0x795   : > { %v5663_v51 = vmax.f32 %v13467_v14, %v13469_v6  ;;  %5661 = vmax.xlane.f32.xlu0 %v5660_v26 }
 0x797   : > { %5664 = vmax.xlane.f32.xlu1 %v5663_v51 }
 0x799   : > { %v13473_v58 = vpop.f32.mrb[128].mxu1 }
 0x79a   : > { %v13475_v53 = vpop.f32.mrb[129].mxu1 }
 0x79b   : > { %v5666_v49 = vmax.f32 %v13473_v58, %v13475_v53  ;;  %v13479_v30 = vpop.f32.mrb[130].mxu1 }
 0x79c   : > { %v13481_v36 = vpop.f32.mrb[131].mxu1 }
 0x79d   : > { %v5669_v52 = vmax.f32 %v13479_v30, %v13481_v36  ;;  %5667 = vmax.xlane.f32.xlu0 %v5666_v49 }
 0x79f   : > { %5670 = vmax.xlane.f32.xlu1 %v5669_v52 }
 0x7a1   : > { %v13485_v55 = vpop.f32.mrb[132].mxu1 }
 0x7a2   : > { %v13487_v12 = vpop.f32.mrb[133].mxu1 }
 0x7a3   : > { %v5672_v7 = vmax.f32 %v13485_v55, %v13487_v12  ;;  %v13491_v23 = vpop.f32.mrb[134].mxu1 }
 0x7a4   : > { %v13493_v34 = vpop.f32.mrb[135].mxu1 }
 0x7a5   : > { %v5675_v20 = vmax.f32 %v13491_v23, %v13493_v34  ;;  %5673 = vmax.xlane.f32.xlu0 %v5672_v7 }
 0x7a7   : > { %5676 = vmax.xlane.f32.xlu1 %v5675_v20 }
 0x7a9   : > { %v13497_v9 = vpop.f32.mrb[136].mxu1 }
 0x7aa   : > { %v13499_v28 = vpop.f32.mrb[137].mxu1 }
 0x7ab   : > { %v5678_v63 = vmax.f32 %v13497_v9, %v13499_v28  ;;  %v13503_v22 = vpop.f32.mrb[138].mxu1 }
 0x7ac   : > { %v13505_v1 = vpop.f32.mrb[139].mxu1 }
 0x7ad   : > { %v5681_v54 = vmax.f32 %v13503_v22, %v13505_v1  ;;  %5679 = vmax.xlane.f32.xlu0 %v5678_v63 }
 0x7af   : > { %5682 = vmax.xlane.f32.xlu1 %v5681_v54 }
 0x7b1   : > { %v13509_v37 = vpop.f32.mrb[140].mxu1 }
 0x7b2   : > { %14505 = vst [vmem:[#allocation84_spill] sm:$0xff] %v13509_v37  ;;  %v13511_v32 = vpop.f32.mrb[141].mxu1 }
 0x7b3   : > { %14506 = vst [vmem:[#allocation85_spill] sm:$0xff] %v13511_v32  ;;  %v5684_v56 = vmax.f32 %v13509_v37, %v13511_v32  ;;  %v13515_v48 = vpop.f32.mrb[142].mxu1 }
 0x7b4   : > { %14507 = vst [vmem:[#allocation86_spill] sm:$0xff] %v13515_v48  ;;  %v13517_v2 = vpop.f32.mrb[143].mxu1 }
 0x7b5   : > { %14508 = vst [vmem:[#allocation87_spill] sm:$0xff] %v13517_v2  ;;  %v5687_v0 = vmax.f32 %v13515_v48, %v13517_v2  ;;  %5685 = vmax.xlane.f32.xlu0 %v5684_v56 }
 0x7b7   : > { %5688 = vmax.xlane.f32.xlu1 %v5687_v0 }
 0x7b9   : > { %v13521_v41 = vpop.f32.mrb[144].mxu1 }
 0x7ba   : > { %14509 = vst [vmem:[#allocation88_spill] sm:$0xff] %v13521_v41  ;;  %v13523_v47 = vpop.f32.mrb[145].mxu1 }
 0x7bb   : > { %14510 = vst [vmem:[#allocation89_spill] sm:$0xff] %v13523_v47  ;;  %v5690_v44 = vmax.f32 %v13521_v41, %v13523_v47  ;;  %v13527_v33 = vpop.f32.mrb[146].mxu1 }
 0x7bc   : > { %14511 = vst [vmem:[#allocation90_spill] sm:$0xff] %v13527_v33  ;;  %v13529_v38 = vpop.f32.mrb[147].mxu1 }
 0x7bd   : > { %14512 = vst [vmem:[#allocation91_spill] sm:$0xff] %v13529_v38  ;;  %v5693_v26 = vmax.f32 %v13527_v33, %v13529_v38  ;;  %5691 = vmax.xlane.f32.xlu0 %v5690_v44 }
 0x7bf   : > { %5694 = vmax.xlane.f32.xlu1 %v5693_v26 }
 0x7c1   : > { %v13533_v51 = vpop.f32.mrb[148].mxu1 }
 0x7c2   : > { %14513 = vst [vmem:[#allocation92_spill] sm:$0xff] %v13533_v51  ;;  %v13535_v49 = vpop.f32.mrb[149].mxu1 }
 0x7c3   : > { %14514 = vst [vmem:[#allocation93_spill] sm:$0xff] %v13535_v49  ;;  %v5696_v52 = vmax.f32 %v13533_v51, %v13535_v49  ;;  %v13539_v7 = vpop.f32.mrb[150].mxu1 }
 0x7c4   : > { %14515 = vst [vmem:[#allocation94_spill] sm:$0xff] %v13539_v7  ;;  %v13541_v20 = vpop.f32.mrb[151].mxu1 }
 0x7c5   : > { %14516 = vst [vmem:[#allocation95_spill] sm:$0xff] %v13541_v20  ;;  %v5699_v63 = vmax.f32 %v13539_v7, %v13541_v20  ;;  %5697 = vmax.xlane.f32.xlu0 %v5696_v52 }
 0x7c7   : > { %5700 = vmax.xlane.f32.xlu1 %v5699_v63 }
 0x7c9   : > { %v13545_v54 = vpop.f32.mrb[152].mxu1 }
 0x7ca   : > { %14517 = vst [vmem:[#allocation96_spill] sm:$0xff] %v13545_v54  ;;  %v13547_v56 = vpop.f32.mrb[153].mxu1 }
 0x7cb   : > { %14518 = vst [vmem:[#allocation97_spill] sm:$0xff] %v13547_v56  ;;  %v5702_v0 = vmax.f32 %v13545_v54, %v13547_v56  ;;  %v13551_v44 = vpop.f32.mrb[154].mxu1 }
 0x7cc   : > { %14519 = vst [vmem:[#allocation34_spill] sm:$0xff] %v13551_v44  ;;  %v13553_v26 = vpop.f32.mrb[155].mxu1 }
 0x7cd   : > { %14520 = vst [vmem:[#allocation4_spill] sm:$0xff] %v13553_v26  ;;  %v5705_v49 = vmax.f32 %v13551_v44, %v13553_v26  ;;  %5703 = vmax.xlane.f32.xlu0 %v5702_v0 }
 0x7cf   : > { %5706 = vmax.xlane.f32.xlu1 %v5705_v49  ;;  %v13572_v49 = vld [vmem:[%s14164_s2 + $0x3] ss:$0 sm:$0xff] }
 0x7d1   : > { %v13557_v51 = vpop.f32.mrb[156].mxu1 }
 0x7d2   : > { %14521 = vst [vmem:[#allocation35_spill] sm:$0xff] %v13557_v51  ;;  %v13559_v52 = vpop.f32.mrb[157].mxu1 }
 0x7d3   : > { %14522 = vst [vmem:[#allocation36_spill] sm:$0xff] %v13559_v52  ;;  %v5708_v63 = vmax.f32 %v13557_v51, %v13559_v52  ;;  %v13563_v20 = vpop.f32.mrb[158].mxu1 }
 0x7d4   : > { %14523 = vst [vmem:[#allocation37_spill] sm:$0xff] %v13563_v20  ;;  %v13565_v7 = vpop.f32.mrb[159].mxu1 }
 0x7d5   : > { %14524 = vst [vmem:[#allocation5_spill] sm:$0xff] %v13565_v7  ;;  %v5711_v56 = vmax.f32 %v13563_v20, %v13565_v7  ;;  %5709 = vmax.xlane.f32.xlu0 %v5708_v63 }
 0x7d7   : > { %5712 = vmax.xlane.f32.xlu1 %v5711_v56 }
 0x7d9   : > { %v9949_v0 = vpop.f32.mrb[160].mxu1 }
 0x7da   : > { %v6589_v26 = vadd.f32 %v9949_v0, %v13572_v49  ;;  %v6580_v44 = vpop.f32.mrb[161].mxu1 }
 0x7db   : > { %v9950_v54 = vpop.f32.mrb[162].mxu1  ;;  %v6581_v38 = vadd.f32 %v13572_v49, %v6580_v44 }
 0x7dc   : > { %v6592_v52 = vadd.f32 %v9950_v54, %v13572_v49  ;;  %v6583_v51 = vpop.f32.mrb[163].mxu1 }
 0x7dd   : > { %v6584_v33 = vadd.f32 %v13572_v49, %v6583_v51 }
 0x7de   : > { %v6708_v7 = vpack.c.bf16 %v6592_v52, %v6589_v26 }
 0x7df   : > { %v6707_v63 = vpack.c.bf16 %v6584_v33, %v6581_v38 }
 0x7e1   : > { %9284 = vmatprep.mubr.msk.bf16.mxu1 %vm658_vm1, %v6707_v63  ;;  %v9953_v56 = vpop.f32.mrb[164].mxu1 }
 0x7e2   : > { %9285 = vmatmul.mubr.msk.bf16.vlgmr.msra.gmra.mrb[192].mxu1 %vm658_vm1, %v6707_v63  ;;  %v6605_v20 = vadd.f32 %v9953_v56, %v13572_v49  ;;  %v6596_v47 = vpop.f32.mrb[165].mxu1 }
 0x7e3   : > { %9286 = vmatprep.mubr.msk.bf16.mxu1 %vm658_vm1, %v6708_v7  ;;  %v6597_v0 = vadd.f32 %v13572_v49, %v6596_v47  ;;  %v9954_v54 = vpop.f32.mrb[166].mxu1 }
 0x7e4   : > { %v6608_v41 = vadd.f32 %v9954_v54, %v13572_v49  ;;  %v6599_v44 = vpop.f32.mrb[167].mxu1 }
 0x7e5   : > { %v6600_v51 = vadd.f32 %v13572_v49, %v6599_v44 }
 0x7e6   : > { %v6710_v26 = vpack.c.bf16 %v6608_v41, %v6605_v20 }
 0x7e7   : > { %v6709_v33 = vpack.c.bf16 %v6600_v51, %v6597_v0 }
 0x7e9   : > { %v9957_v38 = vpop.f32.mrb[168].mxu1 }
 0x7ea   : > { %v5620_v52 = vpop.xlane.xlu0 %5619  ;;  %9287 = vmatmul.mubr.msk.bf16.gmra.mrb[196].mxu1 %vm658_vm1, %v6708_v7  ;;  %v6621_v63 = vadd.f32 %v9957_v38, %v13572_v49  ;;  %v6612_v56 = vpop.f32.mrb[169].mxu1 }
 0x7eb   : > { %v5714_v2 = vsub.f32 %v13370_v27, %v5620_v52  ;;  %v5715_v48 = vsub.f32 %v13372_v59, %v5620_v52  ;;  %9288 = vmatprep.mubr.msk.bf16.mxu1 %vm658_vm1, %v6709_v33  ;;  %v9958_v47 = vpop.f32.mrb[170].mxu1  ;;  %v6613_v32 = vadd.f32 %v13572_v49, %v6612_v56 }
 0x7ec   : > { %v5623_v54 = vpop.xlane.xlu1 %5622  ;;  %v6624_v41 = vadd.f32 %v9958_v47, %v13572_v49  ;;  %v6615_v20 = vpop.f32.mrb[171].mxu1 }
 0x7ed   : > { %v5778_v0 = vmul.f32 1.442695, %v5714_v2  ;;  %v5780_v44 = vmul.f32 1.442695, %v5715_v48  ;;  %v5716_v7 = vsub.f32 %v13376_v4, %v5623_v54  ;;  %v5717_v51 = vsub.f32 %v13378_v24, %v5623_v54 }
 0x7ee   : > { %v13594_v38 = vpack.c.bf16 %v6624_v41, %v6621_v63  ;;  %v6616_v27 = vadd.f32 %v13572_v49, %v6615_v20 }
 0x7ef   : > { %10577 = vpow2.f32 %v5778_v0  ;;  %v5782_v59 = vmul.f32 1.442695, %v5716_v7  ;;  %v5784_v52 = vmul.f32 1.442695, %v5717_v51 }
 0x7f0   : > { %10579 = vpow2.f32 %v5780_v44  ;;  %v13597_v37 = vpack.c.bf16 %v6616_v27, %v6613_v32 }
 0x7f1   : > { %10581 = vpow2.f32 %v5782_v59  ;;  %v9961_v56 = vpop.f32.mrb[172].mxu1 }
 0x7f2   : > { %10583 = vpow2.f32 %v5784_v52  ;;  %v5626_v47 = vpop.xlane.xlu0 %5625  ;;  %9289 = vmatmul.mubr.msk.bf16.gmra.mrb[200].mxu1 %vm658_vm1, %v6709_v33  ;;  %v6637_v4 = vadd.f32 %v9961_v56, %v13572_v49  ;;  %v6628_v48 = vpop.f32.mrb[173].mxu1 }
 0x7f3   : > { %v5718_v24 = vsub.f32 %v13382_v3, %v5626_v47  ;;  %v5719_v2 = vsub.f32 %v13384_v39, %v5626_v47  ;;  %9290 = vmatprep.mubr.msk.bf16.mxu1 %vm658_vm1, %v6710_v26  ;;  %v9962_v63 = vpop.f32.mrb[174].mxu1  ;;  %v6629_v32 = vadd.f32 %v13572_v49, %v6628_v48 }
 0x7f4   : > { %v5629_v54 = vpop.xlane.xlu1 %5628  ;;  %v6640_v41 = vadd.f32 %v9962_v63, %v13572_v49  ;;  %v6631_v20 = vpop.f32.mrb[175].mxu1 }
 0x7f5   : > { %v5786_v0 = vmul.f32 1.442695, %v5718_v24  ;;  %v5788_v44 = vmul.f32 1.442695, %v5719_v2  ;;  %v5720_v33 = vsub.f32 %v13388_v57, %v5629_v54  ;;  %v5721_v7 = vsub.f32 %v13390_v46, %v5629_v54 }
 0x7f6   : > { %v13608_v51 = vpack.c.bf16 %v6640_v41, %v6637_v4  ;;  %v6632_v3 = vadd.f32 %v13572_v49, %v6631_v20 }
 0x7f7   : > { %10585 = vpow2.f32 %v5786_v0  ;;  %v5790_v39 = vmul.f32 1.442695, %v5720_v33  ;;  %v5792_v27 = vmul.f32 1.442695, %v5721_v7 }
 0x7f8   : > { %10587 = vpow2.f32 %v5788_v44  ;;  %v13611_v59 = vpack.c.bf16 %v6632_v3, %v6629_v32 }
 0x7f9   : > { %v10578_v52 = vpop.eup %10577  ;;  %10589 = vpow2.f32 %v5790_v39  ;;  %v9965_v56 = vpop.f32.mrb[176].mxu1 }
 0x7fa   : > { %v10580_v47 = vpop.eup %10579  ;;  %10591 = vpow2.f32 %v5792_v27  ;;  %v5632_v48 = vpop.xlane.xlu0 %5631  ;;  %9291 = vmatmul.mubr.msk.bf16.gmra.mrb[204].mxu1 %vm658_vm1, %v6710_v26  ;;  %v6653_v57 = vadd.f32 %v9965_v56, %v13572_v49 }
 0x7fb   : > { %v6644_v46 = vpop.f32.mrb[177].mxu1  ;;  %v10582_v4 = vpop.eup %10581  ;;  %v5722_v24 = vsub.f32 %v13394_v11, %v5632_v48  ;;  %v5723_v2 = vsub.f32 %v13396_v10, %v5632_v48  ;;  %v5906_v63 = vadd.f32 %v10580_v47, %v10578_v52  ;;  %9292 = vmatprep.mubr.msk.bf16.mxu1 %vm658_vm1, %v13597_v37 }
 0x7fc   : > { %v9966_v54 = vpop.f32.mrb[178].mxu1  ;;  %v10584_v32 = vpop.eup %10583  ;;  %v6002_v41 = vpack.c.bf16 %v10582_v4, %v10578_v52  ;;  %v6645_v0 = vadd.f32 %v13572_v49, %v6644_v46  ;;  %v6326_v46 = vsel %vm4716_vm2, %v13433_v60, 0 }
 0x7fd   : > { %v5635_v20 = vpop.xlane.xlu1 %5634  ;;  %v6656_v26 = vadd.f32 %v9966_v54, %v13572_v49  ;;  %v6647_v44 = vpop.f32.mrb[179].mxu1  ;;  %v5794_v33 = vmul.f32 1.442695, %v5722_v24  ;;  %v5796_v7 = vmul.f32 1.442695, %v5723_v2  ;;  %5907 = vadd.xlane.f32.xlu0 %v5906_v63  ;;  %v6003_v3 = vpack.c.bf16 %v10584_v32, %v10580_v47 }
 0x7fe   : > { %v5724_v11 = vsub.f32 %v13400_v21, %v5635_v20  ;;  %v5725_v10 = vsub.f32 %v13402_v17, %v5635_v20  ;;  %v5909_v39 = vadd.f32 %v10584_v32, %v10582_v4  ;;  %v6648_v56 = vadd.f32 %v13572_v49, %v6647_v44 }
 0x7ff   : > { %v13623_v27 = vpack.c.bf16 %v6656_v26, %v6653_v57  ;;  %10593 = vpow2.f32 %v5794_v33  ;;  %6066 = vmatprep.mubr.bf16.mxu0 %v6003_v3  ;;  %v6749_v57 = vld [vmem:[#allocation3 + $0x1c0] sm:$0xff] }
 0x800   : > { %v5798_v52 = vmul.f32 1.442695, %v5724_v11  ;;  %v5800_v48 = vmul.f32 1.442695, %v5725_v10  ;;  %10595 = vpow2.f32 %v5796_v7  ;;  %5910 = vadd.xlane.f32.xlu1 %v5909_v39  ;;  %v13628_v24 = vpack.c.bf16 %v6648_v56, %v6645_v0  ;;  %6067 = vmatmul.mubr.bf16.vlgmr.msra.gmra.mrb[32].mxu0 %v6002_v41 }
 0x801   : > { %v10586_v21 = vpop.eup %10585  ;;  %v9969_v17 = vpop.f32.mrb[180].mxu1  ;;  %9910 = vmatpush3.bf16.msra.mxu0 %v6326_v46 }
 0x802   : > { %10597 = vpow2.f32 %v5798_v52  ;;  %v10588_v47 = vpop.eup %10587  ;;  %v5638_v4 = vpop.xlane.xlu0 %5637  ;;  %9293 = vmatmul.mubr.msk.bf16.gmra.mrb[208].mxu1 %vm658_vm1, %v13597_v37  ;;  %v6669_v2 = vadd.f32 %v9969_v17, %v13572_v49  ;;  %9316 = vmatprep.subr.bf16.mxu0 %v6749_v57 }
 0x803   : > { %10599 = vpow2.f32 %v5800_v48  ;;  %v6660_v60 = vpop.f32.mrb[181].mxu1  ;;  %v10590_v63 = vpop.eup %10589  ;;  %v5726_v54 = vsub.f32 %v13406_v25, %v5638_v4  ;;  %v5727_v32 = vsub.f32 %v13408_v43, %v5638_v4  ;;  %9294 = vmatprep.mubr.msk.bf16.mxu1 %vm658_vm1, %v13594_v38  ;;  %v5912_v41 = vadd.f32 %v10588_v47, %v10586_v21 }
 0x804   : > { %v9970_v20 = vpop.f32.mrb[182].mxu1  ;;  %v10592_v0 = vpop.eup %10591  ;;  %v6004_v26 = vpack.c.bf16 %v10590_v63, %v10586_v21  ;;  %v6661_v33 = vadd.f32 %v13572_v49, %v6660_v60 }
 0x805   : > { %v5641_v44 = vpop.xlane.xlu1 %5640  ;;  %v6672_v37 = vadd.f32 %v9970_v20, %v13572_v49  ;;  %v6663_v7 = vpop.f32.mrb[183].mxu1  ;;  %v5802_v11 = vmul.f32 1.442695, %v5726_v54  ;;  %v5804_v10 = vmul.f32 1.442695, %v5727_v32  ;;  %5913 = vadd.xlane.f32.xlu0 %v5912_v41  ;;  %v6005_v3 = vpack.c.bf16 %v10592_v0, %v10588_v47 }
 0x806   : > { %v5728_v25 = vsub.f32 %v13412_v8, %v5641_v44  ;;  %v5729_v43 = vsub.f32 %v13414_v5, %v5641_v44  ;;  %v5915_v39 = vadd.f32 %v10592_v0, %v10590_v63  ;;  %v6664_v52 = vadd.f32 %v13572_v49, %v6663_v7 }
 0x807   : > { %v13641_v56 = vpack.c.bf16 %v6672_v37, %v6669_v2  ;;  %10601 = vpow2.f32 %v5802_v11  ;;  %6074 = vmatprep.mubr.bf16.mxu0 %v6005_v3 }
 0x808   : > { %v5806_v48 = vmul.f32 1.442695, %v5728_v25  ;;  %v5808_v46 = vmul.f32 1.442695, %v5729_v43  ;;  %10603 = vpow2.f32 %v5804_v10  ;;  %5916 = vadd.xlane.f32.xlu1 %v5915_v39  ;;  %v13644_v21 = vpack.c.bf16 %v6664_v52, %v6661_v33  ;;  %6075 = vmatmul.mubr.bf16.gmra.mrb[36].mxu0 %v6004_v26 }
 0x809   : > { %v10594_v17 = vpop.eup %10593  ;;  %v9973_v8 = vpop.f32.mrb[184].mxu1 }
 0x80a   : > { %10605 = vpow2.f32 %v5806_v48  ;;  %v10596_v57 = vpop.eup %10595  ;;  %v5644_v5 = vpop.xlane.xlu0 %5643  ;;  %9295 = vmatmul.mubr.msk.bf16.gmra.mrb[212].mxu1 %vm658_vm1, %v13594_v38  ;;  %v6685_v47 = vadd.f32 %v9973_v8, %v13572_v49 }
 0x80b   : > { %10607 = vpow2.f32 %v5808_v46  ;;  %v6676_v4 = vpop.f32.mrb[185].mxu1  ;;  %v5730_v60 = vsub.f32 %v13418_v15, %v5644_v5  ;;  %v5731_v63 = vsub.f32 %v13420_v19, %v5644_v5  ;;  %v5918_v54 = vadd.f32 %v10596_v57, %v10594_v17  ;;  %9296 = vmatprep.mubr.msk.bf16.mxu1 %vm658_vm1, %v13611_v59 }
 0x80c   : > { %v10598_v2 = vpop.eup %10597  ;;  %v6677_v32 = vadd.f32 %v13572_v49, %v6676_v4  ;;  %v9974_v41 = vpop.f32.mrb[186].mxu1 }
 0x80d   : > { %v10600_v20 = vpop.eup %10599  ;;  %v6006_v0 = vpack.c.bf16 %v10598_v2, %v10594_v17  ;;  %v5647_v26 = vpop.xlane.xlu1 %5646  ;;  %v6688_v38 = vadd.f32 %v9974_v41, %v13572_v49  ;;  %v5810_v33 = vmul.f32 1.442695, %v5730_v60  ;;  %v5812_v37 = vmul.f32 1.442695, %v5731_v63  ;;  %5919 = vadd.xlane.f32.xlu0 %v5918_v54 }
 0x80e   : > { %v6679_v44 = vpop.f32.mrb[187].mxu1  ;;  %v5732_v15 = vsub.f32 %v13424_v61, %v5647_v26  ;;  %v5733_v19 = vsub.f32 %v13426_v13, %v5647_v26  ;;  %v6007_v7 = vpack.c.bf16 %v10600_v20, %v10596_v57  ;;  %v5921_v11 = vadd.f32 %v10600_v20, %v10598_v2 }
 0x80f   : > { %v13657_v10 = vpack.c.bf16 %v6688_v38, %v6685_v47  ;;  %v6680_v25 = vadd.f32 %v13572_v49, %v6679_v44  ;;  %10609 = vpow2.f32 %v5810_v33 }
 0x810   : > { %v5814_v43 = vmul.f32 1.442695, %v5732_v15  ;;  %v5816_v3 = vmul.f32 1.442695, %v5733_v19  ;;  %10611 = vpow2.f32 %v5812_v37  ;;  %6082 = vmatprep.mubr.bf16.mxu0 %v6007_v7  ;;  %5922 = vadd.xlane.f32.xlu1 %v5921_v11 }
 0x811   : > { %v13660_v39 = vpack.c.bf16 %v6680_v25, %v6677_v32  ;;  %v10602_v52 = vpop.eup %10601  ;;  %6083 = vmatmul.mubr.bf16.gmra.mrb[40].mxu0 %v6006_v0  ;;  %v9977_v61 = vpop.f32.mrb[188].mxu1 }
 0x812   : > { %10613 = vpow2.f32 %v5814_v43  ;;  %v10604_v48 = vpop.eup %10603  ;;  %v5650_v13 = vpop.xlane.xlu0 %5649  ;;  %9297 = vmatmul.mubr.msk.bf16.gmra.mrb[216].mxu1 %vm658_vm1, %v13611_v59  ;;  %v6701_v46 = vadd.f32 %v9977_v61, %v13572_v49 }
 0x813   : > { %10615 = vpow2.f32 %v5816_v3  ;;  %v6692_v17 = vpop.f32.mrb[189].mxu1  ;;  %v5734_v57 = vsub.f32 %v13437_v35, %v5650_v13  ;;  %v5735_v5 = vsub.f32 %v13439_v16, %v5650_v13  ;;  %9298 = vmatprep.mubr.msk.bf16.mxu1 %vm658_vm1, %v13608_v51  ;;  %v5924_v47 = vadd.f32 %v10604_v48, %v10602_v52 }
 0x814   : > { %v10606_v8 = vpop.eup %10605  ;;  %v6693_v4 = vadd.f32 %v13572_v49, %v6692_v17  ;;  %v9978_v2 = vpop.f32.mrb[190].mxu1 }
 0x815   : > { %v10608_v60 = vpop.eup %10607  ;;  %v6008_v63 = vpack.c.bf16 %v10606_v8, %v10602_v52  ;;  %v5653_v54 = vpop.xlane.xlu1 %5652  ;;  %v6704_v59 = vadd.f32 %v9978_v2, %v13572_v49  ;;  %v5818_v41 = vmul.f32 1.442695, %v5734_v57  ;;  %v5820_v20 = vmul.f32 1.442695, %v5735_v5  ;;  %5925 = vadd.xlane.f32.xlu0 %v5924_v47 }
 0x816   : > { %v6695_v32 = vpop.f32.mrb[191].mxu1  ;;  %v5736_v35 = vsub.f32 %v13443_v18, %v5653_v54  ;;  %v5737_v16 = vsub.f32 %v13445_v29, %v5653_v54  ;;  %v6009_v0 = vpack.c.bf16 %v10608_v60, %v10604_v48  ;;  %v5927_v26 = vadd.f32 %v10608_v60, %v10606_v8 }
 0x817   : > { %v13673_v38 = vpack.c.bf16 %v6704_v59, %v6701_v46  ;;  %v6696_v44 = vadd.f32 %v13572_v49, %v6695_v32  ;;  %10617 = vpow2.f32 %v5818_v41 }
 0x818   : > { %v5822_v33 = vmul.f32 1.442695, %v5736_v35  ;;  %v5824_v37 = vmul.f32 1.442695, %v5737_v16  ;;  %10619 = vpow2.f32 %v5820_v20  ;;  %6090 = vmatprep.mubr.bf16.mxu0 %v6009_v0  ;;  %5928 = vadd.xlane.f32.xlu1 %v5927_v26 }
 0x819   : > { %v13676_v15 = vpack.c.bf16 %v6696_v44, %v6693_v4  ;;  %v10610_v19 = vpop.eup %10609  ;;  %6091 = vmatmul.mubr.bf16.gmra.mrb[44].mxu0 %v6008_v63 }
 0x81a   : > { %10621 = vpow2.f32 %v5822_v33  ;;  %v10612_v18 = vpop.eup %10611  ;;  %v5656_v29 = vpop.xlane.xlu0 %5655  ;;  %9299 = vmatmul.mubr.msk.bf16.gmra.mrb[220].mxu1 %vm658_vm1, %v13608_v51 }
 0x81b   : > { %10623 = vpow2.f32 %v5824_v37  ;;  %v5738_v49 = vsub.f32 %v13449_v42, %v5656_v29  ;;  %v5739_v11 = vsub.f32 %v13451_v31, %v5656_v29  ;;  %v5930_v25 = vadd.f32 %v10612_v18, %v10610_v19  ;;  %9300 = vmatprep.mubr.msk.bf16.mxu1 %vm658_vm1, %v13628_v24 }
 0x81c   : > { %v10614_v7 = vpop.eup %10613  ;;  %v5659_v52 = vpop.xlane.xlu1 %5658 }
 0x81d   : > { %v10616_v43 = vpop.eup %10615  ;;  %v6010_v3 = vpack.c.bf16 %v10614_v7, %v10610_v19  ;;  %v5826_v61 = vmul.f32 1.442695, %v5738_v49  ;;  %v5828_v48 = vmul.f32 1.442695, %v5739_v11  ;;  %5931 = vadd.xlane.f32.xlu0 %v5930_v25  ;;  %v5740_v13 = vsub.f32 %v13455_v62, %v5659_v52 }
 0x81e   : > { %v5741_v46 = vsub.f32 %v13457_v40, %v5659_v52  ;;  %v6011_v51 = vpack.c.bf16 %v10616_v43, %v10612_v18  ;;  %v5933_v17 = vadd.f32 %v10616_v43, %v10614_v7 }
 0x81f   : > { %10625 = vpow2.f32 %v5826_v61  ;;  %v5830_v42 = vmul.f32 1.442695, %v5740_v13 }
 0x820   : > { %v5832_v8 = vmul.f32 1.442695, %v5741_v46  ;;  %10627 = vpow2.f32 %v5828_v48  ;;  %6098 = vmatprep.mubr.bf16.mxu0 %v6011_v51  ;;  %5934 = vadd.xlane.f32.xlu1 %v5933_v17 }
 0x821   : > { %v10618_v31 = vpop.eup %10617  ;;  %10629 = vpow2.f32 %v5830_v42  ;;  %6099 = vmatmul.mubr.bf16.gmra.mrb[48].mxu0 %v6010_v3 }
 0x822   : > { %v10620_v57 = vpop.eup %10619  ;;  %10631 = vpow2.f32 %v5832_v8  ;;  %v5662_v5 = vpop.xlane.xlu0 %5661  ;;  %9301 = vmatmul.mubr.msk.bf16.gmra.mrb[224].mxu1 %vm658_vm1, %v13628_v24 }
 0x823   : > { %v5742_v40 = vsub.f32 %v13461_v45, %v5662_v5  ;;  %v5743_v47 = vsub.f32 %v13463_v50, %v5662_v5  ;;  %9302 = vmatprep.mubr.msk.bf16.mxu1 %vm658_vm1, %v13623_v27  ;;  %v5936_v4 = vadd.f32 %v10620_v57, %v10618_v31 }
 0x824   : > { %v10622_v62 = vpop.eup %10621  ;;  %v5665_v63 = vpop.xlane.xlu1 %5664 }
 0x825   : > { %v10624_v2 = vpop.eup %10623  ;;  %v6012_v60 = vpack.c.bf16 %v10622_v62, %v10618_v31  ;;  %v5834_v54 = vmul.f32 1.442695, %v5742_v40  ;;  %v5836_v59 = vmul.f32 1.442695, %v5743_v47  ;;  %5937 = vadd.xlane.f32.xlu0 %v5936_v4  ;;  %v5744_v32 = vsub.f32 %v13467_v14, %v5665_v63 }
 0x826   : > { %v5745_v41 = vsub.f32 %v13469_v6, %v5665_v63  ;;  %v6013_v24 = vpack.c.bf16 %v10624_v2, %v10620_v57  ;;  %v5939_v20 = vadd.f32 %v10624_v2, %v10622_v62 }
 0x827   : > { %10633 = vpow2.f32 %v5834_v54  ;;  %v5838_v45 = vmul.f32 1.442695, %v5744_v32 }
 0x828   : > { %v5840_v35 = vmul.f32 1.442695, %v5745_v41  ;;  %10635 = vpow2.f32 %v5836_v59  ;;  %6106 = vmatprep.mubr.bf16.mxu0 %v6013_v24  ;;  %5940 = vadd.xlane.f32.xlu1 %v5939_v20 }
 0x829   : > { %v10626_v50 = vpop.eup %10625  ;;  %10637 = vpow2.f32 %v5838_v45  ;;  %6107 = vmatmul.mubr.bf16.gmra.mrb[52].mxu0 %v6012_v60 }
 0x82a   : > { %v10628_v16 = vpop.eup %10627  ;;  %10639 = vpow2.f32 %v5840_v35  ;;  %v5668_v0 = vpop.xlane.xlu0 %5667  ;;  %9303 = vmatmul.mubr.msk.bf16.gmra.mrb[228].mxu1 %vm658_vm1, %v13623_v27  ;;  %v14525_v35 = vld [vmem:[#allocation84_spill] sm:$0xff] }
 0x82b   : > { %v10630_v14 = vpop.eup %10629  ;;  %v5746_v6 = vsub.f32 %v13473_v58, %v5668_v0  ;;  %v5747_v26 = vsub.f32 %v13475_v53, %v5668_v0  ;;  %v5942_v44 = vadd.f32 %v10628_v16, %v10626_v50  ;;  %9304 = vmatprep.mubr.msk.bf16.mxu1 %vm658_vm1, %v13644_v21 }
 0x82c   : > { %v10632_v33 = vpop.eup %10631  ;;  %v6014_v37 = vpack.c.bf16 %v10630_v14, %v10626_v50  ;;  %v5671_v19 = vpop.xlane.xlu1 %5670  ;;  %v14526_v50 = vld [vmem:[#allocation85_spill] sm:$0xff] }
 0x82d   : > { %v5842_v18 = vmul.f32 1.442695, %v5746_v6  ;;  %v5844_v29 = vmul.f32 1.442695, %v5747_v26  ;;  %5943 = vadd.xlane.f32.xlu0 %v5942_v44  ;;  %v5748_v7 = vsub.f32 %v13479_v30, %v5671_v19  ;;  %v5749_v49 = vsub.f32 %v13481_v36, %v5671_v19 }
 0x82e   : > { %v6015_v27 = vpack.c.bf16 %v10632_v33, %v10628_v16  ;;  %v5945_v11 = vadd.f32 %v10632_v33, %v10630_v14 }
 0x82f   : > { %10641 = vpow2.f32 %v5842_v18  ;;  %v5846_v58 = vmul.f32 1.442695, %v5748_v7  ;;  %v5848_v25 = vmul.f32 1.442695, %v5749_v49  ;;  %v14528_v18 = vld [vmem:[#allocation87_spill] sm:$0xff] }
 0x830   : > { %10643 = vpow2.f32 %v5844_v29  ;;  %6114 = vmatprep.mubr.bf16.mxu0 %v6015_v27  ;;  %5946 = vadd.xlane.f32.xlu1 %v5945_v11 }
 0x831   : > { %v10634_v53 = vpop.eup %10633  ;;  %10645 = vpow2.f32 %v5846_v58  ;;  %6115 = vmatmul.mubr.bf16.gmra.mrb[56].mxu0 %v6014_v37  ;;  %v14527_v37 = vld [vmem:[#allocation86_spill] sm:$0xff] }
 0x832   : > { %v10636_v43 = vpop.eup %10635  ;;  %10647 = vpow2.f32 %v5848_v25  ;;  %v5674_v3 = vpop.xlane.xlu0 %5673  ;;  %9305 = vmatmul.mubr.msk.bf16.gmra.mrb[232].mxu1 %vm658_vm1, %v13644_v21 }
 0x833   : > { %v10638_v30 = vpop.eup %10637  ;;  %v5750_v36 = vsub.f32 %v13485_v55, %v5674_v3  ;;  %v5751_v52 = vsub.f32 %v13487_v12, %v5674_v3  ;;  %9306 = vmatprep.mubr.msk.bf16.mxu1 %vm658_vm1, %v13641_v56  ;;  %v5948_v61 = vadd.f32 %v10636_v43, %v10634_v53 }
 0x834   : > { %v10640_v48 = vpop.eup %10639  ;;  %v6016_v13 = vpack.c.bf16 %v10638_v30, %v10634_v53  ;;  %v5677_v46 = vpop.xlane.xlu1 %5676 }
 0x835   : > { %v5850_v51 = vmul.f32 1.442695, %v5750_v36  ;;  %v5852_v17 = vmul.f32 1.442695, %v5751_v52  ;;  %5949 = vadd.xlane.f32.xlu0 %v5948_v61  ;;  %v5752_v42 = vsub.f32 %v13491_v23, %v5677_v46  ;;  %v5753_v8 = vsub.f32 %v13493_v34, %v5677_v46 }
 0x836   : > { %v6017_v21 = vpack.c.bf16 %v10640_v48, %v10636_v43  ;;  %v5951_v31 = vadd.f32 %v10640_v48, %v10638_v30  ;;  %v14529_v43 = vld [vmem:[#allocation88_spill] sm:$0xff]  ;;  %v14530_v30 = vld [vmem:[#allocation89_spill] sm:$0xff] }
 0x837   : > { %10649 = vpow2.f32 %v5850_v51  ;;  %v5854_v55 = vmul.f32 1.442695, %v5752_v42  ;;  %v5856_v57 = vmul.f32 1.442695, %v5753_v8  ;;  %v14532_v8 = vld [vmem:[#allocation91_spill] sm:$0xff] }
 0x838   : > { %10651 = vpow2.f32 %v5852_v17  ;;  %6122 = vmatprep.mubr.bf16.mxu0 %v6017_v21  ;;  %5952 = vadd.xlane.f32.xlu1 %v5951_v31  ;;  %v14531_v17 = vld [vmem:[#allocation90_spill] sm:$0xff] }
 0x839   : > { %v10642_v12 = vpop.eup %10641  ;;  %10653 = vpow2.f32 %v5854_v55  ;;  %6123 = vmatmul.mubr.bf16.gmra.mrb[60].mxu0 %v6016_v13 }
 0x83a   : > { %v10644_v5 = vpop.eup %10643  ;;  %10655 = vpow2.f32 %v5856_v57  ;;  %v5680_v62 = vpop.xlane.xlu0 %5679  ;;  %9307 = vmatmul.mubr.msk.bf16.gmra.mrb[236].mxu1 %vm658_vm1, %v13641_v56 }
 0x83b   : > { %v10646_v23 = vpop.eup %10645  ;;  %v5754_v34 = vsub.f32 %v13497_v9, %v5680_v62  ;;  %v5755_v40 = vsub.f32 %v13499_v28, %v5680_v62  ;;  %v5954_v47 = vadd.f32 %v10644_v5, %v10642_v12  ;;  %9308 = vmatprep.mubr.msk.bf16.mxu1 %vm658_vm1, %v13660_v39 }
 0x83c   : > { %v10648_v4 = vpop.eup %10647  ;;  %v6018_v2 = vpack.c.bf16 %v10646_v23, %v10642_v12  ;;  %v5683_v60 = vpop.xlane.xlu1 %5682 }
 0x83d   : > { %v5858_v63 = vmul.f32 1.442695, %v5754_v34  ;;  %v5860_v54 = vmul.f32 1.442695, %v5755_v40  ;;  %5955 = vadd.xlane.f32.xlu0 %v5954_v47  ;;  %v5756_v59 = vsub.f32 %v13503_v22, %v5683_v60  ;;  %v5757_v32 = vsub.f32 %v13505_v1, %v5683_v60  ;;  %v14533_v34 = vld [vmem:[#allocation92_spill] sm:$0xff]  ;;  %v14534_v47 = vld [vmem:[#allocation93_spill] sm:$0xff] }
 0x83e   : > { %v6019_v56 = vpack.c.bf16 %v10648_v4, %v10644_v5  ;;  %v5957_v41 = vadd.f32 %v10648_v4, %v10646_v23 }
 0x83f   : > { %10657 = vpow2.f32 %v5858_v63  ;;  %v5862_v9 = vmul.f32 1.442695, %v5756_v59  ;;  %v5864_v24 = vmul.f32 1.442695, %v5757_v32 }
 0x840   : > { %10659 = vpow2.f32 %v5860_v54  ;;  %6130 = vmatprep.mubr.bf16.mxu0 %v6019_v56  ;;  %5958 = vadd.xlane.f32.xlu1 %v5957_v41  ;;  %v14535_v56 = vld [vmem:[#allocation94_spill] sm:$0xff] }
 0x841   : > { %v10650_v28 = vpop.eup %10649  ;;  %10661 = vpow2.f32 %v5862_v9  ;;  %6131 = vmatmul.mubr.bf16.gmra.mrb[64].mxu0 %v6018_v2  ;;  %v14536_v9 = vld [vmem:[#allocation95_spill] sm:$0xff] }
 0x842   : > { %v10652_v20 = vpop.eup %10651  ;;  %10663 = vpow2.f32 %v5864_v24  ;;  %v5686_v45 = vpop.xlane.xlu0 %5685  ;;  %9309 = vmatmul.mubr.msk.bf16.gmra.mrb[240].mxu1 %vm658_vm1, %v13660_v39 }
 0x843   : > { %v10654_v22 = vpop.eup %10653  ;;  %v5758_v1 = vsub.f32 %v14525_v35, %v5686_v45  ;;  %v5759_v16 = vsub.f32 %v14526_v50, %v5686_v45  ;;  %9310 = vmatprep.mubr.msk.bf16.mxu1 %vm658_vm1, %v13657_v10  ;;  %v5960_v0 = vadd.f32 %v10652_v20, %v10650_v28 }
 0x844   : > { %v10656_v14 = vpop.eup %10655  ;;  %v6020_v6 = vpack.c.bf16 %v10654_v22, %v10650_v28  ;;  %v5689_v26 = vpop.xlane.xlu1 %5688 }
 0x845   : > { %v5866_v44 = vmul.f32 1.442695, %v5758_v1  ;;  %v5868_v33 = vmul.f32 1.442695, %v5759_v16  ;;  %5961 = vadd.xlane.f32.xlu0 %v5960_v0  ;;  %v5760_v19 = vsub.f32 %v14527_v37, %v5689_v26  ;;  %v5761_v29 = vsub.f32 %v14528_v18, %v5689_v26  ;;  %v14537_v16 = vld [vmem:[#allocation96_spill] sm:$0xff] }
 0x846   : > { %v6021_v39 = vpack.c.bf16 %v10656_v14, %v10652_v20  ;;  %v5963_v7 = vadd.f32 %v10656_v14, %v10654_v22  ;;  %v14538_v14 = vld [vmem:[#allocation97_spill] sm:$0xff] }
 0x847   : > { %10665 = vpow2.f32 %v5866_v44  ;;  %v5870_v49 = vmul.f32 1.442695, %v5760_v19  ;;  %v5872_v27 = vmul.f32 1.442695, %v5761_v29  ;;  %v14539_v29 = vld [vmem:[#allocation34_spill] sm:$0xff] }
 0x848   : > { %10667 = vpow2.f32 %v5868_v33  ;;  %6138 = vmatprep.mubr.bf16.mxu0 %v6021_v39  ;;  %5964 = vadd.xlane.f32.xlu1 %v5963_v7  ;;  %v14540_v7 = vld [vmem:[#allocation4_spill] sm:$0xff] }
 0x849   : > { %v10658_v11 = vpop.eup %10657  ;;  %10669 = vpow2.f32 %v5870_v49  ;;  %6139 = vmatmul.mubr.bf16.gmra.mrb[68].mxu0 %v6020_v6 }
 0x84a   : > { %v10660_v58 = vpop.eup %10659  ;;  %10671 = vpow2.f32 %v5872_v27  ;;  %v5692_v25 = vpop.xlane.xlu0 %5691  ;;  %9311 = vmatmul.mubr.msk.bf16.gmra.mrb[244].mxu1 %vm658_vm1, %v13657_v10 }
 0x84b   : > { %v10662_v53 = vpop.eup %10661  ;;  %v5762_v3 = vsub.f32 %v14529_v43, %v5692_v25  ;;  %v5763_v36 = vsub.f32 %v14530_v30, %v5692_v25  ;;  %v5966_v52 = vadd.f32 %v10660_v58, %v10658_v11  ;;  %9312 = vmatprep.mubr.msk.bf16.mxu1 %vm658_vm1, %v13676_v15  ;;  %v14541_v30 = vld [vmem:[#allocation35_spill] sm:$0xff] }
 0x84c   : > { %v10664_v61 = vpop.eup %10663  ;;  %v6022_v48 = vpack.c.bf16 %v10662_v53, %v10658_v11  ;;  %v5695_v13 = vpop.xlane.xlu1 %5694 }
 0x84d   : > { %v5874_v46 = vmul.f32 1.442695, %v5762_v3  ;;  %v5876_v51 = vmul.f32 1.442695, %v5763_v36  ;;  %5967 = vadd.xlane.f32.xlu0 %v5966_v52  ;;  %v5764_v42 = vsub.f32 %v14531_v17, %v5695_v13  ;;  %v5765_v21 = vsub.f32 %v14532_v8, %v5695_v13  ;;  %v14542_v52 = vld [vmem:[#allocation36_spill] sm:$0xff]  ;;  %v14543_v8 = vld [vmem:[#allocation37_spill] sm:$0xff] }
 0x84e   : > { %v6023_v10 = vpack.c.bf16 %v10664_v61, %v10660_v58  ;;  %v5969_v31 = vadd.f32 %v10664_v61, %v10662_v53 }
 0x84f   : > { %10673 = vpow2.f32 %v5874_v46  ;;  %v5878_v55 = vmul.f32 1.442695, %v5764_v42  ;;  %v5880_v57 = vmul.f32 1.442695, %v5765_v21 }
 0x850   : > { %10675 = vpow2.f32 %v5876_v51  ;;  %6146 = vmatprep.mubr.bf16.mxu0 %v6023_v10  ;;  %5970 = vadd.xlane.f32.xlu1 %v5969_v31  ;;  %v14544_v10 = vld [vmem:[#allocation5_spill] sm:$0xff] }
 0x851   : > { %v10666_v12 = vpop.eup %10665  ;;  %10677 = vpow2.f32 %v5878_v55  ;;  %6147 = vmatmul.mubr.bf16.gmra.mrb[72].mxu0 %v6022_v48 }
 0x852   : > { %v10668_v5 = vpop.eup %10667  ;;  %10679 = vpow2.f32 %v5880_v57  ;;  %v5698_v62 = vpop.xlane.xlu0 %5697  ;;  %9313 = vmatmul.mubr.msk.bf16.gmra.mrb[248].mxu1 %vm658_vm1, %v13676_v15 }
 0x853   : > { %v10670_v23 = vpop.eup %10669  ;;  %v5766_v40 = vsub.f32 %v14533_v34, %v5698_v62  ;;  %v5767_v4 = vsub.f32 %v14534_v47, %v5698_v62  ;;  %9314 = vmatprep.mubr.msk.bf16.mxu1 %vm658_vm1, %v13673_v38  ;;  %v5972_v2 = vadd.f32 %v10668_v5, %v10666_v12 }
 0x854   : > { %v10672_v60 = vpop.eup %10671  ;;  %v6024_v63 = vpack.c.bf16 %v10670_v23, %v10666_v12  ;;  %v5701_v54 = vpop.xlane.xlu1 %5700 }
 0x855   : > { %v5882_v59 = vmul.f32 1.442695, %v5766_v40  ;;  %v5884_v32 = vmul.f32 1.442695, %v5767_v4  ;;  %5973 = vadd.xlane.f32.xlu0 %v5972_v2  ;;  %v5768_v41 = vsub.f32 %v14535_v56, %v5701_v54  ;;  %v5769_v24 = vsub.f32 %v14536_v9, %v5701_v54 }
 0x856   : > { %v6025_v15 = vpack.c.bf16 %v10672_v60, %v10668_v5  ;;  %v5975_v28 = vadd.f32 %v10672_v60, %v10670_v23 }
 0x857   : > { %10681 = vpow2.f32 %v5882_v59  ;;  %v5886_v20 = vmul.f32 1.442695, %v5768_v41  ;;  %v5888_v45 = vmul.f32 1.442695, %v5769_v24 }
 0x858   : > { %10683 = vpow2.f32 %v5884_v32  ;;  %6154 = vmatprep.mubr.bf16.mxu0 %v6025_v15  ;;  %5976 = vadd.xlane.f32.xlu1 %v5975_v28 }
 0x859   : > { %v10674_v22 = vpop.eup %10673  ;;  %10685 = vpow2.f32 %v5886_v20  ;;  %6155 = vmatmul.mubr.bf16.gmra.mrb[76].mxu0 %v6024_v63 }
 0x85a   : > { %v10676_v35 = vpop.eup %10675  ;;  %10687 = vpow2.f32 %v5888_v45  ;;  %v5704_v1 = vpop.xlane.xlu0 %5703  ;;  %9315 = vmatmul.mubr.msk.bf16.gmra.mrb[252].mxu1 %vm658_vm1, %v13673_v38 }
 0x85b   : > { %v10678_v50 = vpop.eup %10677  ;;  %v5770_v0 = vsub.f32 %v14537_v16, %v5704_v1  ;;  %v5771_v6 = vsub.f32 %v14538_v14, %v5704_v1  ;;  %v5978_v26 = vadd.f32 %v10676_v35, %v10674_v22 }
 0x85c   : > { %v10680_v44 = vpop.eup %10679  ;;  %v6026_v33 = vpack.c.bf16 %v10678_v50, %v10674_v22  ;;  %v5707_v37 = vpop.xlane.xlu1 %5706 }
 0x85d   : > { %v5890_v19 = vmul.f32 1.442695, %v5770_v0  ;;  %v5892_v18 = vmul.f32 1.442695, %v5771_v6  ;;  %5979 = vadd.xlane.f32.xlu0 %v5978_v26  ;;  %v5772_v39 = vsub.f32 %v14539_v29, %v5707_v37  ;;  %v5773_v49 = vsub.f32 %v14540_v7, %v5707_v37 }
 0x85e   : > { %v6027_v27 = vpack.c.bf16 %v10680_v44, %v10676_v35  ;;  %v5981_v11 = vadd.f32 %v10680_v44, %v10678_v50 }
 0x85f   : > { %10689 = vpow2.f32 %v5890_v19  ;;  %v5894_v38 = vmul.f32 1.442695, %v5772_v39  ;;  %v5896_v58 = vmul.f32 1.442695, %v5773_v49 }
 0x860   : > { %10691 = vpow2.f32 %v5892_v18  ;;  %6162 = vmatprep.mubr.bf16.mxu0 %v6027_v27  ;;  %5982 = vadd.xlane.f32.xlu1 %v5981_v11 }
 0x861   : > { %v10682_v25 = vpop.eup %10681  ;;  %10693 = vpow2.f32 %v5894_v38  ;;  %6163 = vmatmul.mubr.bf16.gmra.mrb[80].mxu0 %v6026_v33 }
 0x862   : > { %v10684_v53 = vpop.eup %10683  ;;  %10695 = vpow2.f32 %v5896_v58  ;;  %v5710_v43 = vpop.xlane.xlu0 %5709 }
 0x863   : > { %v10686_v3 = vpop.eup %10685  ;;  %v5774_v36 = vsub.f32 %v14541_v30, %v5710_v43  ;;  %v5775_v61 = vsub.f32 %v14542_v52, %v5710_v43  ;;  %v5984_v48 = vadd.f32 %v10684_v53, %v10682_v25 }
 0x864   : > { %v10688_v13 = vpop.eup %10687  ;;  %v6028_v46 = vpack.c.bf16 %v10686_v3, %v10682_v25  ;;  %v5713_v51 = vpop.xlane.xlu1 %5712 }
 0x865   : > { %v5898_v17 = vmul.f32 1.442695, %v5774_v36  ;;  %v5900_v42 = vmul.f32 1.442695, %v5775_v61  ;;  %5985 = vadd.xlane.f32.xlu0 %v5984_v48  ;;  %v5776_v21 = vsub.f32 %v14543_v8, %v5713_v51  ;;  %v5777_v31 = vsub.f32 %v14544_v10, %v5713_v51 }
 0x866   : > { %v6029_v55 = vpack.c.bf16 %v10688_v13, %v10684_v53  ;;  %v5987_v57 = vadd.f32 %v10688_v13, %v10686_v3 }
 0x867   : > { %10697 = vpow2.f32 %v5898_v17  ;;  %v5902_v12 = vmul.f32 1.442695, %v5776_v21  ;;  %v5904_v5 = vmul.f32 1.442695, %v5777_v31 }
 0x868   : > { %10699 = vpow2.f32 %v5900_v42  ;;  %6170 = vmatprep.mubr.bf16.mxu0 %v6029_v55  ;;  %5988 = vadd.xlane.f32.xlu1 %v5987_v57 }
 0x869   : > { %v10690_v62 = vpop.eup %10689  ;;  %10701 = vpow2.f32 %v5902_v12  ;;  %6171 = vmatmul.mubr.bf16.gmra.mrb[84].mxu0 %v6028_v46 }
 0x86a   : > { %v10692_v23 = vpop.eup %10691  ;;  %10703 = vpow2.f32 %v5904_v5 }
 0x86b   : > { %v10694_v34 = vpop.eup %10693  ;;  %v5990_v40 = vadd.f32 %v10692_v23, %v10690_v62 }
 0x86c   : > { %v10696_v47 = vpop.eup %10695  ;;  %v6030_v4 = vpack.c.bf16 %v10694_v34, %v10690_v62 }
 0x86d   : > { %5991 = vadd.xlane.f32.xlu0 %v5990_v40  ;;  %v6031_v2 = vpack.c.bf16 %v10696_v47, %v10692_v23  ;;  %v5993_v60 = vadd.f32 %v10696_v47, %v10694_v34 }
 0x86f   : > { %6178 = vmatprep.mubr.bf16.mxu0 %v6031_v2  ;;  %5994 = vadd.xlane.f32.xlu1 %v5993_v60 }
 0x871   : > { %v10698_v63 = vpop.eup %10697  ;;  %6179 = vmatmul.mubr.bf16.gmra.mrb[88].mxu0 %v6030_v4 }
 0x872   : > { %v10700_v54 = vpop.eup %10699 }
 0x873   : > { %v10702_v59 = vpop.eup %10701  ;;  %v5996_v32 = vadd.f32 %v10700_v54, %v10698_v63 }
 0x874   : > { %v10704_v56 = vpop.eup %10703  ;;  %v6032_v41 = vpack.c.bf16 %v10702_v59, %v10698_v63 }
 0x875   : > { %5997 = vadd.xlane.f32.xlu0 %v5996_v32  ;;  %v6033_v9 = vpack.c.bf16 %v10704_v56, %v10700_v54  ;;  %v5999_v24 = vadd.f32 %v10704_v56, %v10702_v59 }
 0x877   : > { %6186 = vmatprep.mubr.bf16.mxu0 %v6033_v9  ;;  %6000 = vadd.xlane.f32.xlu1 %v5999_v24 }
 0x879   : > { %6187 = vmatmul.mubr.bf16.gmra.mrb[92].mxu0 %v6032_v41 }
 0x88a   : > { %v5908_v29 = vpop.xlane.xlu0 %5907 }
 0x88b   : > { %10705 = vrcp.f32 %v5908_v29  ;;  %v6741_v29 = vld [vmem:[#allocation3 + $0x180] sm:$0xff] }
 0x88d   : > { %v5911_v39 = vpop.xlane.xlu1 %5910 }
 0x88e   : > { %10707 = vrcp.f32 %v5911_v39 }
 0x892   : > { %v5914_v25 = vpop.xlane.xlu0 %5913 }
 0x893   : > { %10709 = vrcp.f32 %v5914_v25 }
 0x895   : > { %v5917_v53 = vpop.xlane.xlu1 %5916  ;;  %v10706_v13 = vpop.eup %10705 }
 0x896   : > { %10711 = vrcp.f32 %v5917_v53 }
 0x898   : > { %v10708_v42 = vpop.eup %10707 }
 0x89a   : > { %v5920_v55 = vpop.xlane.xlu0 %5919 }
 0x89b   : > { %10713 = vrcp.f32 %v5920_v55 }
 0x89d   : > { %v5923_v57 = vpop.xlane.xlu1 %5922  ;;  %v10710_v2 = vpop.eup %10709 }
 0x89e   : > { %10715 = vrcp.f32 %v5923_v57 }
 0x8a0   : > { %v10712_v59 = vpop.eup %10711 }
 0x8a2   : > { %v5926_v24 = vpop.xlane.xlu0 %5925 }
 0x8a3   : > { %10717 = vrcp.f32 %v5926_v24 }
 0x8a5   : > { %v10714_v53 = vpop.eup %10713 }
 0x8b5   : > { %v13752_v15 = vpop.f32.mrb[192].mxu1 }
 0x8b6   : > { %v13754_v28 = vpop.f32.mrb[193].mxu1 }
 0x8b7   : > { %v7046_v20 = vmax.f32 %v13752_v15, %v13754_v28  ;;  %v13758_v45 = vpop.f32.mrb[194].mxu1 }
 0x8b8   : > { %v13760_v22 = vpop.f32.mrb[195].mxu1 }
 0x8b9   : > { %v7049_v35 = vmax.f32 %v13758_v45, %v13760_v22  ;;  %7047 = vmax.xlane.f32.xlu0 %v7046_v20  ;;  %v5929_v20 = vpop.xlane.xlu1 %5928 }
 0x8ba   : > { %10719 = vrcp.f32 %v5929_v20 }
 0x8bb   : > { %7050 = vmax.xlane.f32.xlu1 %v7049_v35 }
 0x8bd   : > { %v13764_v1 = vpop.f32.mrb[196].mxu1 }
 0x8be   : > { %v13766_v50 = vpop.f32.mrb[197].mxu1 }
 0x8bf   : > { %v7052_v16 = vmax.f32 %v13764_v1, %v13766_v50  ;;  %v13770_v0 = vpop.f32.mrb[198].mxu1 }
 0x8c0   : > { %v13772_v14 = vpop.f32.mrb[199].mxu1 }
 0x8c1   : > { %v7055_v6 = vmax.f32 %v13770_v0, %v13772_v14  ;;  %7053 = vmax.xlane.f32.xlu0 %v7052_v16 }
 0x8c3   : > { %7056 = vmax.xlane.f32.xlu1 %v7055_v6 }
 0x8c5   : > { %v13776_v26 = vpop.f32.mrb[200].mxu1 }
 0x8c6   : > { %v13778_v44 = vpop.f32.mrb[201].mxu1 }
 0x8c7   : > { %v7058_v33 = vmax.f32 %v13776_v26, %v13778_v44  ;;  %v13782_v37 = vpop.f32.mrb[202].mxu1 }
 0x8c8   : > { %v13784_v19 = vpop.f32.mrb[203].mxu1 }
 0x8c9   : > { %v7061_v18 = vmax.f32 %v13782_v37, %v13784_v19  ;;  %7059 = vmax.xlane.f32.xlu0 %v7058_v33 }
 0x8cb   : > { %7062 = vmax.xlane.f32.xlu1 %v7061_v18 }
 0x8cd   : > { %v13788_v7 = vpop.f32.mrb[204].mxu1 }
 0x8ce   : > { %v13790_v49 = vpop.f32.mrb[205].mxu1 }
 0x8cf   : > { %v7064_v27 = vmax.f32 %v13788_v7, %v13790_v49  ;;  %v13794_v11 = vpop.f32.mrb[206].mxu1 }
 0x8d0   : > { %v13796_v38 = vpop.f32.mrb[207].mxu1 }
 0x8d1   : > { %v7067_v58 = vmax.f32 %v13794_v11, %v13796_v38  ;;  %7065 = vmax.xlane.f32.xlu0 %v7064_v27 }
 0x8d3   : > { %7068 = vmax.xlane.f32.xlu1 %v7067_v58  ;;  %v9137_v43 = vpop.f32.mrb[32].mxu0  ;;  %v6750_v58 = vld [vmem:[#allocation3 + $0x1c8] sm:$0xff] }
 0x8d4   : > { %v9138_v3 = vpop.f32.mrb[33].mxu0 }
 0x8d5   : > { %v9139_v30 = vadd.f32 %v9138_v3, %v9137_v43  ;;  %v9140_v36 = vpop.f32.mrb[34].mxu0  ;;  %v13800_v52 = vpop.f32.mrb[208].mxu1 }
 0x8d6   : > { %v9141_v61 = vpop.f32.mrb[35].mxu0  ;;  %v13802_v48 = vpop.f32.mrb[209].mxu1 }
 0x8d7   : > { %v9142_v46 = vadd.f32 %v9141_v61, %v9140_v36  ;;  %v7070_v51 = vmax.f32 %v13800_v52, %v13802_v48  ;;  %v13806_v17 = vpop.f32.mrb[210].mxu1  ;;  %v6227_v21 = vmul.f32 %v10706_v13, %v9139_v30  ;;  %v10716_v36 = vpop.eup %10715 }
 0x8d8   : > { %v13808_v8 = vpop.f32.mrb[211].mxu1 }
 0x8d9   : > { %v6228_v10 = vmul.f32 %v10708_v42, %v9142_v46  ;;  %v7073_v31 = vmax.f32 %v13806_v17, %v13808_v8  ;;  %7071 = vmax.xlane.f32.xlu0 %v7070_v51  ;;  %v6742_v42 = vld [vmem:[#allocation3 + $0x188] sm:$0xff] }
 0x8db   : > { %v6259_v12 = vpack.c.bf16 %v6228_v10, %v6227_v21  ;;  %v9143_v5 = vpop.f32.mrb[36].mxu0  ;;  %7074 = vmax.xlane.f32.xlu1 %v7073_v31  ;;  %v5932_v21 = vpop.xlane.xlu0 %5931  ;;  %v6751_v10 = vld [vmem:[#allocation3 + $0x1d0] sm:$0xff] }
 0x8dc   : > { %v9144_v62 = vpop.f32.mrb[37].mxu0  ;;  %v5935_v31 = vpop.xlane.xlu1 %5934  ;;  %10721 = vrcp.f32 %v5932_v21 }
 0x8dd   : > { %v9145_v23 = vadd.f32 %v9144_v62, %v9143_v5  ;;  %v9146_v34 = vpop.f32.mrb[38].mxu0  ;;  %9911 = vmatprep.mubr.msk.bf16.mxu0 %vm658_vm1, %v6259_v12  ;;  %v13813_v40 = vpop.f32.mrb[212].mxu1  ;;  %10723 = vrcp.f32 %v5935_v31 }
 0x8de   : > { %v9147_v47 = vpop.f32.mrb[39].mxu0  ;;  %v13815_v4 = vpop.f32.mrb[213].mxu1 }
 0x8df   : > { %v9148_v60 = vadd.f32 %v9147_v47, %v9146_v34  ;;  %v7076_v63 = vmax.f32 %v13813_v40, %v13815_v4  ;;  %v13819_v54 = vpop.f32.mrb[214].mxu1  ;;  %v6229_v56 = vmul.f32 %v10710_v2, %v9145_v23  ;;  %v6743_v23 = vld [vmem:[#allocation3 + $0x190] sm:$0xff]  ;;  %v6752_v2 = vld [vmem:[#allocation3 + $0x1d8] sm:$0xff] }
 0x8e0   : > { %v13821_v32 = vpop.f32.mrb[215].mxu1 }
 0x8e1   : > { %v6230_v41 = vmul.f32 %v10712_v59, %v9148_v60  ;;  %v7079_v9 = vmax.f32 %v13819_v54, %v13821_v32  ;;  %7077 = vmax.xlane.f32.xlu0 %v7076_v63  ;;  %v10718_v63 = vpop.eup %10717 }
 0x8e3   : > { %v6260_v35 = vpack.c.bf16 %v6230_v41, %v6229_v56  ;;  %7080 = vmax.xlane.f32.xlu1 %v7079_v9  ;;  %v10720_v9 = vpop.eup %10719 }
 0x8e4   : > { %v9149_v16 = vpop.f32.mrb[40].mxu0 }
 0x8e5   : > { %v9150_v6 = vpop.f32.mrb[41].mxu0  ;;  %9912 = vmatmul.mubr.msk.bf16.vlgmr.msra.gmra.mrb[0].mxu0 %vm658_vm1, %v6260_v35  ;;  %v13826_v39 = vpop.f32.mrb[216].mxu1 }
 0x8e6   : > { %v9151_v33 = vadd.f32 %v9150_v6, %v9149_v16  ;;  %v9152_v18 = vpop.f32.mrb[42].mxu0  ;;  %9317 = vmatpush3.bf16.msra.mxu0 %v6741_v29  ;;  %v13828_v25 = vpop.f32.mrb[217].mxu1  ;;  %v6744_v6 = vld [vmem:[#allocation3 + $0x198] sm:$0xff] }
 0x8e7   : > { %v9153_v27 = vpop.f32.mrb[43].mxu0  ;;  %9318 = vmatprep.subr.bf16.mxu0 %v6750_v58  ;;  %v7082_v3 = vmax.f32 %v13826_v39, %v13828_v25  ;;  %v13832_v30 = vpop.f32.mrb[218].mxu1 }
 0x8e8   : > { %v9154_v43 = vadd.f32 %v9153_v27, %v9152_v18  ;;  %v13834_v61 = vpop.f32.mrb[219].mxu1  ;;  %v6231_v13 = vmul.f32 %v10714_v53, %v9151_v33  ;;  %v5938_v33 = vpop.xlane.xlu0 %5937  ;;  %v6753_v18 = vld [vmem:[#allocation3 + $0x1e0] sm:$0xff] }
 0x8e9   : > { %v7085_v51 = vmax.f32 %v13832_v30, %v13834_v61  ;;  %7083 = vmax.xlane.f32.xlu0 %v7082_v3  ;;  %v5941_v29 = vpop.xlane.xlu1 %5940  ;;  %10725 = vrcp.f32 %v5938_v33  ;;  %v10722_v21 = vpop.eup %10721  ;;  %v6747_v33 = vld [vmem:[#allocation3 + $0x1b0] sm:$0xff] }
 0x8ea   : > { %v6232_v46 = vmul.f32 %v10716_v36, %v9154_v43  ;;  %9319 = vmatpush3.bf16.msra.mxu0 %v6742_v42  ;;  %v6745_v36 = vld [vmem:[#allocation3 + $0x1a0] sm:$0xff]  ;;  %10727 = vrcp.f32 %v5941_v29 }
 0x8eb   : > { %9320 = vmatprep.subr.bf16.mxu0 %v6751_v10  ;;  %7086 = vmax.xlane.f32.xlu1 %v7085_v51  ;;  %v6754_v51 = vld [vmem:[#allocation3 + $0x1e8] sm:$0xff] }
 0x8ec   : > { %v6261_v55 = vpack.c.bf16 %v6232_v46, %v6231_v13  ;;  %v9155_v57 = vpop.f32.mrb[44].mxu0 }
 0x8ed   : > { %v9156_v12 = vpop.f32.mrb[45].mxu0  ;;  %v13839_v34 = vpop.f32.mrb[220].mxu1 }
 0x8ee   : > { %v9157_v5 = vadd.f32 %v9156_v12, %v9155_v57  ;;  %v9158_v62 = vpop.f32.mrb[46].mxu0  ;;  %9915 = vmatprep.mubr.msk.bf16.mxu0 %vm658_vm1, %v6261_v55  ;;  %9321 = vmatpush3.bf16.msra.mxu0 %v6743_v23  ;;  %v13841_v60 = vpop.f32.mrb[221].mxu1 }
 0x8ef   : > { %v9159_v47 = vpop.f32.mrb[47].mxu0  ;;  %9322 = vmatprep.subr.bf16.mxu0 %v6752_v2  ;;  %v7088_v56 = vmax.f32 %v13839_v34, %v13841_v60  ;;  %v13845_v41 = vpop.f32.mrb[222].mxu1 }
 0x8f0   : > { %v9160_v59 = vadd.f32 %v9159_v47, %v9158_v62  ;;  %v13847_v24 = vpop.f32.mrb[223].mxu1  ;;  %v6233_v20 = vmul.f32 %v10718_v63, %v9157_v5  ;;  %v10724_v57 = vpop.eup %10723  ;;  %v6746_v47 = vld [vmem:[#allocation3 + $0x1a8] sm:$0xff]  ;;  %v6755_v63 = vld [vmem:[#allocation3 + $0x1f0] sm:$0xff] }
 0x8f1   : > { %v7091_v16 = vmax.f32 %v13845_v41, %v13847_v24  ;;  %7089 = vmax.xlane.f32.xlu0 %v7088_v56  ;;  %v5944_v2 = vpop.xlane.xlu0 %5943 }
 0x8f2   : > { %v6234_v35 = vmul.f32 %v10720_v9, %v9160_v59  ;;  %9323 = vmatpush3.bf16.msra.mxu0 %v6744_v6  ;;  %v5947_v59 = vpop.xlane.xlu1 %5946  ;;  %10729 = vrcp.f32 %v5944_v2 }
 0x8f3   : > { %9324 = vmatprep.subr.bf16.mxu0 %v6753_v18  ;;  %7092 = vmax.xlane.f32.xlu1 %v7091_v16  ;;  %10731 = vrcp.f32 %v5947_v59 }
 0x8f4   : > { %v6262_v27 = vpack.c.bf16 %v6234_v35, %v6233_v20  ;;  %v9161_v58 = vpop.f32.mrb[48].mxu0 }
 0x8f5   : > { %v9162_v53 = vpop.f32.mrb[49].mxu0  ;;  %v13852_v13 = vpop.f32.mrb[224].mxu1 }
 0x8f6   : > { %v9163_v43 = vadd.f32 %v9162_v53, %v9161_v58  ;;  %v9164_v3 = vpop.f32.mrb[50].mxu0  ;;  %9916 = vmatmul.mubr.msk.bf16.gmra.mrb[4].mxu0 %vm658_vm1, %v6262_v27  ;;  %v13854_v42 = vpop.f32.mrb[225].mxu1  ;;  %v6756_v27 = vld [vmem:[#allocation3 + $0x1f8] sm:$0xff] }
 0x8f7   : > { %9325 = vmatpush3.bf16.msra.mxu0 %v6745_v36  ;;  %v9165_v46 = vpop.f32.mrb[51].mxu0  ;;  %v7094_v31 = vmax.f32 %v13852_v13, %v13854_v42  ;;  %v13858_v55 = vpop.f32.mrb[226].mxu1 }
 0x8f8   : > { %v9166_v10 = vadd.f32 %v9165_v46, %v9164_v3  ;;  %9326 = vmatprep.subr.bf16.mxu0 %v6754_v51  ;;  %v13860_v12 = vpop.f32.mrb[227].mxu1  ;;  %v6235_v5 = vmul.f32 %v10722_v21, %v9163_v43  ;;  %v10726_v43 = vpop.eup %10725 }
 0x8f9   : > { %v7097_v23 = vmax.f32 %v13858_v55, %v13860_v12  ;;  %7095 = vmax.xlane.f32.xlu0 %v7094_v31  ;;  %v10728_v46 = vpop.eup %10727  ;;  %v6748_v31 = vld [vmem:[#allocation3 + $0x1b8] sm:$0xff] }
 0x8fa   : > { %v6236_v62 = vmul.f32 %v10724_v57, %v9166_v10  ;;  %v5950_v57 = vpop.xlane.xlu0 %5949 }
 0x8fb   : > { %9327 = vmatpush3.bf16.msra.mxu0 %v6746_v47  ;;  %7098 = vmax.xlane.f32.xlu1 %v7097_v23  ;;  %10733 = vrcp.f32 %v5950_v57 }
 0x8fc   : > { %v6263_v56 = vpack.c.bf16 %v6236_v62, %v6235_v5  ;;  %9328 = vmatprep.subr.bf16.mxu0 %v6755_v63  ;;  %v9167_v9 = vpop.f32.mrb[52].mxu0  ;;  %v5953_v5 = vpop.xlane.xlu1 %5952 }
 0x8fd   : > { %v9168_v20 = vpop.f32.mrb[53].mxu0  ;;  %v13864_v35 = vpop.f32.mrb[228].mxu1  ;;  %10735 = vrcp.f32 %v5953_v5 }
 0x8fe   : > { %v9169_v16 = vadd.f32 %v9168_v20, %v9167_v9  ;;  %v9170_v6 = vpop.f32.mrb[54].mxu0  ;;  %9919 = vmatprep.mubr.msk.bf16.mxu0 %vm658_vm1, %v6263_v56  ;;  %v13867_v18 = vpop.f32.mrb[229].mxu1 }
 0x8ff   : > { %9329 = vmatpush3.bf16.msra.mxu0 %v6747_v33  ;;  %v9171_v29 = vpop.f32.mrb[55].mxu0  ;;  %v7100_v58 = vmax.f32 %v13864_v35, %v13867_v18  ;;  %v13871_v53 = vpop.f32.mrb[230].mxu1 }
 0x900   : > { %v9172_v3 = vadd.f32 %v9171_v29, %v9170_v6  ;;  %9330 = vmatprep.subr.bf16.mxu0 %v6756_v27  ;;  %v13873_v36 = vpop.f32.mrb[231].mxu1  ;;  %v6237_v21 = vmul.f32 %v10726_v43, %v9169_v16  ;;  %v10730_v6 = vpop.eup %10729 }
 0x901   : > { %v7103_v51 = vmax.f32 %v13871_v53, %v13873_v36  ;;  %7101 = vmax.xlane.f32.xlu0 %v7100_v58  ;;  %v10732_v27 = vpop.eup %10731 }
 0x902   : > { %v6238_v10 = vmul.f32 %v10728_v46, %v9172_v3  ;;  %v5956_v46 = vpop.xlane.xlu0 %5955 }
 0x903   : > { %9331 = vmatpush3.bf16.msra.mxu0 %v6748_v31  ;;  %7104 = vmax.xlane.f32.xlu1 %v7103_v51  ;;  %v5959_v51 = vpop.xlane.xlu1 %5958  ;;  %10737 = vrcp.f32 %v5956_v46 }
 0x904   : > { %v6264_v62 = vpack.c.bf16 %v6238_v10, %v6237_v21  ;;  %v9173_v23 = vpop.f32.mrb[56].mxu0  ;;  %10739 = vrcp.f32 %v5959_v51 }
 0x905   : > { %v9174_v47 = vpop.f32.mrb[57].mxu0  ;;  %v13877_v2 = vpop.f32.mrb[232].mxu1 }
 0x906   : > { %v9175_v63 = vadd.f32 %v9174_v47, %v9173_v23  ;;  %v9176_v59 = vpop.f32.mrb[58].mxu0  ;;  %9920 = vmatmul.mubr.msk.bf16.gmra.mrb[8].mxu0 %vm658_vm1, %v6264_v62  ;;  %v13880_v56 = vpop.f32.mrb[233].mxu1 }
 0x907   : > { %v9177_v9 = vpop.f32.mrb[59].mxu0  ;;  %v7106_v20 = vmax.f32 %v13877_v2, %v13880_v56  ;;  %v13884_v16 = vpop.f32.mrb[234].mxu1 }
 0x908   : > { %v9178_v33 = vadd.f32 %v9177_v9, %v9176_v59  ;;  %v13886_v29 = vpop.f32.mrb[235].mxu1  ;;  %v6239_v43 = vmul.f32 %v10730_v6, %v9175_v63  ;;  %v10734_v9 = vpop.eup %10733 }
 0x909   : > { %14545 = vst [vmem:[#allocation38_spill] sm:$0xff] %v13886_v29  ;;  %v7109_v58 = vmax.f32 %v13884_v16, %v13886_v29  ;;  %7107 = vmax.xlane.f32.xlu0 %v7106_v20  ;;  %v5965_v46 = vpop.xlane.xlu1 %5964 }
 0x90a   : > { %v6240_v3 = vmul.f32 %v10732_v27, %v9178_v33  ;;  %v10736_v33 = vpop.eup %10735 }
 0x90b   : > { %7110 = vmax.xlane.f32.xlu1 %v7109_v58 }
 0x90c   : > { %v6265_v21 = vpack.c.bf16 %v6240_v3, %v6239_v43  ;;  %v9179_v10 = vpop.f32.mrb[60].mxu0  ;;  %v5962_v3 = vpop.xlane.xlu0 %5961 }
 0x90d   : > { %v9180_v31 = vpop.f32.mrb[61].mxu0  ;;  %v13890_v57 = vpop.f32.mrb[236].mxu1  ;;  %10741 = vrcp.f32 %v5962_v3 }
 0x90e   : > { %14546 = vst [vmem:[#allocation6_spill] sm:$0xff] %v13890_v57  ;;  %v9181_v5 = vadd.f32 %v9180_v31, %v9179_v10  ;;  %v9182_v62 = vpop.f32.mrb[62].mxu0  ;;  %9923 = vmatprep.mubr.msk.bf16.mxu0 %vm658_vm1, %v6265_v21  ;;  %v13893_v23 = vpop.f32.mrb[237].mxu1  ;;  %10743 = vrcp.f32 %v5965_v46 }
 0x90f   : > { %14547 = vst [vmem:[#allocation39_spill] sm:$0xff] %v13893_v23  ;;  %v9183_v47 = vpop.f32.mrb[63].mxu0  ;;  %v7112_v63 = vmax.f32 %v13890_v57, %v13893_v23  ;;  %v13897_v59 = vpop.f32.mrb[238].mxu1 }
 0x910   : > { %14548 = vst [vmem:[#allocation40_spill] sm:$0xff] %v13897_v59  ;;  %v9184_v20 = vadd.f32 %v9183_v47, %v9182_v62  ;;  %v13899_v6 = vpop.f32.mrb[239].mxu1  ;;  %v6241_v58 = vmul.f32 %v10734_v9, %v9181_v5  ;;  %v10738_v9 = vpop.eup %10737 }
 0x911   : > { %14549 = vst [vmem:[#allocation41_spill] sm:$0xff] %v13899_v6  ;;  %v7115_v27 = vmax.f32 %v13897_v59, %v13899_v6  ;;  %7113 = vmax.xlane.f32.xlu0 %v7112_v63  ;;  %v5971_v46 = vpop.xlane.xlu1 %5970 }
 0x912   : > { %v6242_v43 = vmul.f32 %v10736_v33, %v9184_v20 }
 0x913   : > { %7116 = vmax.xlane.f32.xlu1 %v7115_v27  ;;  %v10740_v27 = vpop.eup %10739 }
 0x914   : > { %v6266_v51 = vpack.c.bf16 %v6242_v43, %v6241_v58  ;;  %v9185_v21 = vpop.f32.mrb[64].mxu0 }
 0x915   : > { %v9186_v10 = vpop.f32.mrb[65].mxu0  ;;  %v13903_v31 = vpop.f32.mrb[240].mxu1 }
 0x916   : > { %14550 = vst [vmem:[#allocation42_spill] sm:$0xff] %v13903_v31  ;;  %v9187_v23 = vadd.f32 %v9186_v10, %v9185_v21  ;;  %v9188_v62 = vpop.f32.mrb[66].mxu0  ;;  %9924 = vmatmul.mubr.msk.bf16.gmra.mrb[12].mxu0 %vm658_vm1, %v6266_v51  ;;  %v13906_v47 = vpop.f32.mrb[241].mxu1 }
 0x917   : > { %14551 = vst [vmem:[#allocation7_spill] sm:$0xff] %v13906_v47  ;;  %v9189_v6 = vpop.f32.mrb[67].mxu0  ;;  %v7118_v5 = vmax.f32 %v13903_v31, %v13906_v47  ;;  %v13910_v63 = vpop.f32.mrb[242].mxu1 }
 0x918   : > { %14552 = vst [vmem:[#allocation8_spill] sm:$0xff] %v13910_v63  ;;  %v9190_v20 = vadd.f32 %v9189_v6, %v9188_v62  ;;  %v13912_v33 = vpop.f32.mrb[243].mxu1  ;;  %v6243_v43 = vmul.f32 %v10738_v9, %v9187_v23  ;;  %v5968_v51 = vpop.xlane.xlu0 %5967 }
 0x919   : > { %14553 = vst [vmem:[#allocation43_spill] sm:$0xff] %v13912_v33  ;;  %v7121_v58 = vmax.f32 %v13910_v63, %v13912_v33  ;;  %7119 = vmax.xlane.f32.xlu0 %v7118_v5  ;;  %10745 = vrcp.f32 %v5968_v51  ;;  %v10742_v9 = vpop.eup %10741 }
 0x91a   : > { %v6244_v3 = vmul.f32 %v10740_v27, %v9190_v20  ;;  %10747 = vrcp.f32 %v5971_v46  ;;  %v5977_v46 = vpop.xlane.xlu1 %5976 }
 0x91b   : > { %7122 = vmax.xlane.f32.xlu1 %v7121_v58  ;;  %v10744_v58 = vpop.eup %10743 }
 0x91c   : > { %v6267_v21 = vpack.c.bf16 %v6244_v3, %v6243_v43  ;;  %v9191_v10 = vpop.f32.mrb[68].mxu0  ;;  %v5974_v51 = vpop.xlane.xlu0 %5973 }
 0x91d   : > { %v9192_v59 = vpop.f32.mrb[69].mxu0  ;;  %v13916_v47 = vpop.f32.mrb[244].mxu1  ;;  %10749 = vrcp.f32 %v5974_v51 }
 0x91e   : > { %14554 = vst [vmem:[#allocation44_spill] sm:$0xff] %v13916_v47  ;;  %v9193_v31 = vadd.f32 %v9192_v59, %v9191_v10  ;;  %v9194_v6 = vpop.f32.mrb[70].mxu0  ;;  %9927 = vmatprep.mubr.msk.bf16.mxu0 %vm658_vm1, %v6267_v21  ;;  %v13919_v62 = vpop.f32.mrb[245].mxu1  ;;  %10751 = vrcp.f32 %v5977_v46 }
 0x91f   : > { %14555 = vst [vmem:[#allocation45_spill] sm:$0xff] %v13919_v62  ;;  %v9195_v33 = vpop.f32.mrb[71].mxu0  ;;  %v7124_v23 = vmax.f32 %v13916_v47, %v13919_v62  ;;  %v13923_v5 = vpop.f32.mrb[246].mxu1 }
 0x920   : > { %14556 = vst [vmem:[#allocation46_spill] sm:$0xff] %v13923_v5  ;;  %v9196_v20 = vadd.f32 %v9195_v33, %v9194_v6  ;;  %v13925_v27 = vpop.f32.mrb[247].mxu1  ;;  %v6245_v43 = vmul.f32 %v10742_v9, %v9193_v31  ;;  %v5980_v51 = vpop.xlane.xlu0 %5979 }
 0x921   : > { %14557 = vst [vmem:[#allocation9_spill] sm:$0xff] %v13925_v27  ;;  %v7127_v59 = vmax.f32 %v13923_v5, %v13925_v27  ;;  %7125 = vmax.xlane.f32.xlu0 %v7124_v23  ;;  %v5983_v46 = vpop.xlane.xlu1 %5982  ;;  %10753 = vrcp.f32 %v5980_v51 }
 0x922   : > { %v6246_v3 = vmul.f32 %v10744_v58, %v9196_v20  ;;  %10755 = vrcp.f32 %v5983_v46 }
 0x923   : > { %7128 = vmax.xlane.f32.xlu1 %v7127_v59  ;;  %v10746_v9 = vpop.eup %10745 }
 0x924   : > { %v6268_v21 = vpack.c.bf16 %v6246_v3, %v6245_v43  ;;  %v9197_v10 = vpop.f32.mrb[72].mxu0  ;;  %v10748_v59 = vpop.eup %10747 }
 0x925   : > { %v9198_v63 = vpop.f32.mrb[73].mxu0  ;;  %v13929_v62 = vpop.f32.mrb[248].mxu1 }
 0x926   : > { %14558 = vst [vmem:[#allocation10_spill] sm:$0xff] %v13929_v62  ;;  %v9199_v47 = vadd.f32 %v9198_v63, %v9197_v10  ;;  %v9200_v33 = vpop.f32.mrb[74].mxu0  ;;  %9928 = vmatmul.mubr.msk.bf16.gmra.mrb[16].mxu0 %vm658_vm1, %v6268_v21  ;;  %v13932_v6 = vpop.f32.mrb[249].mxu1 }
 0x927   : > { %14559 = vst [vmem:[#allocation47_spill] sm:$0xff] %v13932_v6  ;;  %v9201_v27 = vpop.f32.mrb[75].mxu0  ;;  %v7130_v31 = vmax.f32 %v13929_v62, %v13932_v6  ;;  %v13936_v23 = vpop.f32.mrb[250].mxu1 }
 0x928   : > { %14560 = vst [vmem:[#allocation48_spill] sm:$0xff] %v13936_v23  ;;  %v9202_v20 = vadd.f32 %v9201_v27, %v9200_v33  ;;  %v13938_v58 = vpop.f32.mrb[251].mxu1  ;;  %v6247_v43 = vmul.f32 %v10746_v9, %v9199_v47  ;;  %v10750_v9 = vpop.eup %10749 }
 0x929   : > { %14561 = vst [vmem:[#allocation49_spill] sm:$0xff] %v13938_v58  ;;  %v7133_v63 = vmax.f32 %v13936_v23, %v13938_v58  ;;  %7131 = vmax.xlane.f32.xlu0 %v7130_v31  ;;  %v5986_v51 = vpop.xlane.xlu0 %5985  ;;  %v5989_v46 = vpop.xlane.xlu1 %5988 }
 0x92a   : > { %v6248_v3 = vmul.f32 %v10748_v59, %v9202_v20  ;;  %10757 = vrcp.f32 %v5986_v51 }
 0x92b   : > { %7134 = vmax.xlane.f32.xlu1 %v7133_v63  ;;  %v10752_v63 = vpop.eup %10751  ;;  %10759 = vrcp.f32 %v5989_v46 }
 0x92c   : > { %v6269_v21 = vpack.c.bf16 %v6248_v3, %v6247_v43  ;;  %v9203_v10 = vpop.f32.mrb[76].mxu0 }
 0x92d   : > { %v9204_v5 = vpop.f32.mrb[77].mxu0  ;;  %v13942_v6 = vpop.f32.mrb[252].mxu1 }
 0x92e   : > { %14562 = vst [vmem:[#allocation50_spill] sm:$0xff] %v13942_v6  ;;  %v9205_v62 = vadd.f32 %v9204_v5, %v9203_v10  ;;  %v9206_v27 = vpop.f32.mrb[78].mxu0  ;;  %9931 = vmatprep.mubr.msk.bf16.mxu0 %vm658_vm1, %v6269_v21  ;;  %v13945_v33 = vpop.f32.mrb[253].mxu1 }
 0x92f   : > { %14563 = vst [vmem:[#allocation11_spill] sm:$0xff] %v13945_v33  ;;  %v9207_v58 = vpop.f32.mrb[79].mxu0  ;;  %v7136_v47 = vmax.f32 %v13942_v6, %v13945_v33  ;;  %v13949_v31 = vpop.f32.mrb[254].mxu1 }
 0x930   : > { %v9208_v20 = vadd.f32 %v9207_v58, %v9206_v27  ;;  %v13951_v59 = vpop.f32.mrb[255].mxu1  ;;  %v6249_v43 = vmul.f32 %v10750_v9, %v9205_v62  ;;  %v10754_v27 = vpop.eup %10753 }
 0x931   : > { %14564 = vst [vmem:[#allocation12_spill] sm:$0xff] %v13951_v59  ;;  %v7139_v5 = vmax.f32 %v13949_v31, %v13951_v59  ;;  %7137 = vmax.xlane.f32.xlu0 %v7136_v47  ;;  %v10756_v29 = vpop.eup %10755  ;;  %v5992_v62 = vpop.xlane.xlu0 %5991 }
 0x932   : > { %v6250_v3 = vmul.f32 %v10752_v63, %v9208_v20  ;;  %v5995_v9 = vpop.xlane.xlu1 %5994  ;;  %10761 = vrcp.f32 %v5992_v62 }
 0x933   : > { %7140 = vmax.xlane.f32.xlu1 %v7139_v5  ;;  %10763 = vrcp.f32 %v5995_v9 }
 0x934   : > { %v6270_v21 = vpack.c.bf16 %v6250_v3, %v6249_v43  ;;  %v9209_v10 = vpop.f32.mrb[80].mxu0  ;;  %v10758_v51 = vpop.eup %10757 }
 0x935   : > { %v9210_v23 = vpop.f32.mrb[81].mxu0 }
 0x936   : > { %v9211_v33 = vadd.f32 %v9210_v23, %v9209_v10  ;;  %v9212_v6 = vpop.f32.mrb[82].mxu0  ;;  %9932 = vmatmul.mubr.msk.bf16.gmra.mrb[20].mxu0 %vm658_vm1, %v6270_v21  ;;  %v10760_v21 = vpop.eup %10759 }
 0x937   : > { %v9213_v58 = vpop.f32.mrb[83].mxu0  ;;  %v5998_v10 = vpop.xlane.xlu0 %5997 }
 0x938   : > { %v9214_v57 = vadd.f32 %v9213_v58, %v9212_v6  ;;  %v6251_v59 = vmul.f32 %v10754_v27, %v9211_v33  ;;  %v6001_v33 = vpop.xlane.xlu1 %6000  ;;  %10765 = vrcp.f32 %v5998_v10 }
 0x939   : > { %10767 = vrcp.f32 %v6001_v33 }
 0x93a   : > { %v6252_v47 = vmul.f32 %v10756_v29, %v9214_v57 }
 0x93c   : > { %v6271_v20 = vpack.c.bf16 %v6252_v47, %v6251_v59  ;;  %v9215_v63 = vpop.f32.mrb[84].mxu0 }
 0x93d   : > { %v9216_v5 = vpop.f32.mrb[85].mxu0 }
 0x93e   : > { %v9217_v43 = vadd.f32 %v9216_v5, %v9215_v63  ;;  %v9218_v3 = vpop.f32.mrb[86].mxu0  ;;  %9935 = vmatprep.mubr.msk.bf16.mxu0 %vm658_vm1, %v6271_v20  ;;  %v10762_v5 = vpop.eup %10761 }
 0x93f   : > { %v9219_v23 = vpop.f32.mrb[87].mxu0 }
 0x940   : > { %v9220_v46 = vadd.f32 %v9219_v23, %v9218_v3  ;;  %v6253_v6 = vmul.f32 %v10758_v51, %v9217_v43  ;;  %v10764_v23 = vpop.eup %10763 }
 0x942   : > { %v6254_v58 = vmul.f32 %v10760_v21, %v9220_v46 }
 0x944   : > { %v6272_v29 = vpack.c.bf16 %v6254_v58, %v6253_v6  ;;  %v9221_v57 = vpop.f32.mrb[88].mxu0 }
 0x945   : > { %v9222_v27 = vpop.f32.mrb[89].mxu0 }
 0x946   : > { %v9223_v59 = vadd.f32 %v9222_v27, %v9221_v57  ;;  %v9224_v47 = vpop.f32.mrb[90].mxu0  ;;  %9936 = vmatmul.mubr.msk.bf16.gmra.mrb[24].mxu0 %vm658_vm1, %v6272_v29  ;;  %v7048_v62 = vpop.xlane.xlu0 %7047 }
 0x947   : > { %v9225_v20 = vpop.f32.mrb[91].mxu0  ;;  %v7142_v9 = vsub.f32 %v13752_v15, %v7048_v62  ;;  %v7143_v63 = vsub.f32 %v13754_v28, %v7048_v62 }
 0x948   : > { %v9226_v3 = vadd.f32 %v9225_v20, %v9224_v47  ;;  %v7051_v43 = vpop.xlane.xlu1 %7050  ;;  %v6255_v6 = vmul.f32 %v10762_v5, %v9223_v59  ;;  %v10766_v59 = vpop.eup %10765 }
 0x949   : > { %v7206_v51 = vmul.f32 1.442695, %v7142_v9  ;;  %v7208_v46 = vmul.f32 1.442695, %v7143_v63  ;;  %v7144_v21 = vsub.f32 %v13758_v45, %v7051_v43  ;;  %v7145_v10 = vsub.f32 %v13760_v22, %v7051_v43  ;;  %v10768_v5 = vpop.eup %10767 }
 0x94a   : > { %v6256_v58 = vmul.f32 %v10764_v23, %v9226_v3 }
 0x94b   : > { %10769 = vpow2.f32 %v7206_v51  ;;  %v7210_v29 = vmul.f32 1.442695, %v7144_v21  ;;  %v7212_v33 = vmul.f32 1.442695, %v7145_v10 }
 0x94c   : > { %v6273_v57 = vpack.c.bf16 %v6256_v58, %v6255_v6  ;;  %10771 = vpow2.f32 %v7208_v46  ;;  %v9227_v15 = vpop.f32.mrb[92].mxu0 }
 0x94d   : > { %10773 = vpow2.f32 %v7210_v29  ;;  %v9228_v28 = vpop.f32.mrb[93].mxu0 }
 0x94e   : > { %10775 = vpow2.f32 %v7212_v33  ;;  %v9229_v27 = vadd.f32 %v9228_v28, %v9227_v15  ;;  %v9230_v47 = vpop.f32.mrb[94].mxu0  ;;  %9939 = vmatprep.mubr.msk.bf16.mxu0 %vm658_vm1, %v6273_v57  ;;  %v7054_v62 = vpop.xlane.xlu0 %7053 }
 0x94f   : > { %v9231_v20 = vpop.f32.mrb[95].mxu0  ;;  %v7146_v45 = vsub.f32 %v13764_v1, %v7054_v62  ;;  %v7147_v22 = vsub.f32 %v13766_v50, %v7054_v62 }
 0x950   : > { %v9232_v9 = vadd.f32 %v9231_v20, %v9230_v47  ;;  %v7057_v63 = vpop.xlane.xlu1 %7056  ;;  %v6257_v46 = vmul.f32 %v10766_v59, %v9229_v27 }
 0x951   : > { %v7214_v3 = vmul.f32 1.442695, %v7146_v45  ;;  %v7216_v43 = vmul.f32 1.442695, %v7147_v22  ;;  %v7148_v23 = vsub.f32 %v13770_v0, %v7057_v63  ;;  %v7149_v51 = vsub.f32 %v13772_v14, %v7057_v63 }
 0x952   : > { %v6258_v21 = vmul.f32 %v10768_v5, %v9232_v9 }
 0x953   : > { %10777 = vpow2.f32 %v7214_v3  ;;  %v7218_v10 = vmul.f32 1.442695, %v7148_v23  ;;  %v7220_v6 = vmul.f32 1.442695, %v7149_v51 }
 0x954   : > { %v6274_v58 = vpack.c.bf16 %v6258_v21, %v6257_v46  ;;  %10779 = vpow2.f32 %v7216_v43 }
 0x955   : > { %v10770_v1 = vpop.eup %10769  ;;  %10781 = vpow2.f32 %v7218_v10 }
 0x956   : > { %v10772_v50 = vpop.eup %10771  ;;  %10783 = vpow2.f32 %v7220_v6  ;;  %9940 = vmatmul.mubr.msk.bf16.gmra.mrb[28].mxu0 %vm658_vm1, %v6274_v58  ;;  %v7060_v29 = vpop.xlane.xlu0 %7059 }
 0x957   : > { %v10774_v33 = vpop.eup %10773  ;;  %v7150_v57 = vsub.f32 %v13776_v26, %v7060_v29  ;;  %v7151_v0 = vsub.f32 %v13778_v44, %v7060_v29  ;;  %v7334_v14 = vadd.f32 %v10772_v50, %v10770_v1 }
 0x958   : > { %v10776_v15 = vpop.eup %10775  ;;  %v7430_v28 = vpack.c.bf16 %v10774_v33, %v10770_v1  ;;  %v7063_v27 = vpop.xlane.xlu1 %7062 }
 0x959   : > { %v7222_v47 = vmul.f32 1.442695, %v7150_v57  ;;  %v7224_v62 = vmul.f32 1.442695, %v7151_v0  ;;  %7335 = vadd.xlane.f32.xlu0 %v7334_v14  ;;  %v7152_v20 = vsub.f32 %v13782_v37, %v7063_v27  ;;  %v7153_v45 = vsub.f32 %v13784_v19, %v7063_v27 }
 0x95a   : > { %v7431_v22 = vpack.c.bf16 %v10776_v15, %v10772_v50  ;;  %v7337_v59 = vadd.f32 %v10776_v15, %v10774_v33 }
 0x95b   : > { %10785 = vpow2.f32 %v7222_v47  ;;  %v7226_v9 = vmul.f32 1.442695, %v7152_v20  ;;  %v7228_v63 = vmul.f32 1.442695, %v7153_v45 }
 0x95c   : > { %10787 = vpow2.f32 %v7224_v62  ;;  %7494 = vmatprep.mubr.bf16.mxu0 %v7431_v22  ;;  %7338 = vadd.xlane.f32.xlu1 %v7337_v59 }
 0x95d   : > { %v10778_v26 = vpop.eup %10777  ;;  %10789 = vpow2.f32 %v7226_v9 }
 0x95e   : > { %v10780_v44 = vpop.eup %10779  ;;  %10791 = vpow2.f32 %v7228_v63  ;;  %7495 = vmatmul.mubr.bf16.vlgmr.msra.gmra.mrb[96].mxu0 %v7430_v28  ;;  %v7066_v5 = vpop.xlane.xlu0 %7065 }
 0x95f   : > { %v10782_v3 = vpop.eup %10781  ;;  %v7154_v43 = vsub.f32 %v13788_v7, %v7066_v5  ;;  %v7155_v37 = vsub.f32 %v13790_v49, %v7066_v5  ;;  %v7340_v19 = vadd.f32 %v10780_v44, %v10778_v26 }
 0x960   : > { %v10784_v23 = vpop.eup %10783  ;;  %v7432_v51 = vpack.c.bf16 %v10782_v3, %v10778_v26  ;;  %v7069_v46 = vpop.xlane.xlu1 %7068 }
 0x961   : > { %v7230_v21 = vmul.f32 1.442695, %v7154_v43  ;;  %v7232_v10 = vmul.f32 1.442695, %v7155_v37  ;;  %7341 = vadd.xlane.f32.xlu0 %v7340_v19  ;;  %v7156_v6 = vsub.f32 %v13794_v11, %v7069_v46  ;;  %v7157_v58 = vsub.f32 %v13796_v38, %v7069_v46 }
 0x962   : > { %v7433_v1 = vpack.c.bf16 %v10784_v23, %v10780_v44  ;;  %v7343_v50 = vadd.f32 %v10784_v23, %v10782_v3 }
 0x963   : > { %10793 = vpow2.f32 %v7230_v21  ;;  %v7234_v29 = vmul.f32 1.442695, %v7156_v6  ;;  %v7236_v33 = vmul.f32 1.442695, %v7157_v58 }
 0x964   : > { %10795 = vpow2.f32 %v7232_v10  ;;  %7502 = vmatprep.mubr.bf16.mxu0 %v7433_v1  ;;  %7344 = vadd.xlane.f32.xlu1 %v7343_v50 }
 0x965   : > { %v10786_v7 = vpop.eup %10785  ;;  %10797 = vpow2.f32 %v7234_v29 }
 0x966   : > { %v10788_v49 = vpop.eup %10787  ;;  %10799 = vpow2.f32 %v7236_v33  ;;  %7503 = vmatmul.mubr.bf16.gmra.mrb[100].mxu0 %v7432_v51  ;;  %v7072_v0 = vpop.xlane.xlu0 %7071 }
 0x967   : > { %v10790_v57 = vpop.eup %10789  ;;  %v7346_v14 = vadd.f32 %v10788_v49, %v10786_v7  ;;  %v7158_v38 = vsub.f32 %v13800_v52, %v7072_v0  ;;  %v7159_v28 = vsub.f32 %v13802_v48, %v7072_v0 }
 0x968   : > { %v10792_v15 = vpop.eup %10791  ;;  %v7434_v11 = vpack.c.bf16 %v10790_v57, %v10786_v7  ;;  %v7075_v27 = vpop.xlane.xlu1 %7074 }
 0x969   : > { %7347 = vadd.xlane.f32.xlu0 %v7346_v14  ;;  %v7435_v47 = vpack.c.bf16 %v10792_v15, %v10788_v49  ;;  %v7349_v62 = vadd.f32 %v10792_v15, %v10790_v57  ;;  %v7238_v20 = vmul.f32 1.442695, %v7158_v38  ;;  %v7240_v45 = vmul.f32 1.442695, %v7159_v28  ;;  %v8499_v57 = vld [vmem:[%s14169_s7 + $0xc] sm:$0xf] }
 0x96a   : > { %v7160_v22 = vsub.f32 %v13806_v17, %v7075_v27  ;;  %v7161_v59 = vsub.f32 %v13808_v8, %v7075_v27  ;;  %10144 = vmatprep.subr.msk.bf16.mxu0 %vm4716_vm2, %v8499_v57 }
 0x96b   : > { %7510 = vmatprep.mubr.bf16.mxu0 %v7435_v47  ;;  %7350 = vadd.xlane.f32.xlu1 %v7349_v62  ;;  %10801 = vpow2.f32 %v7238_v20 }
 0x96c   : > { %v7242_v9 = vmul.f32 1.442695, %v7160_v22  ;;  %v7244_v63 = vmul.f32 1.442695, %v7161_v59  ;;  %10803 = vpow2.f32 %v7240_v45 }
 0x96d   : > { %v10794_v26 = vpop.eup %10793 }
 0x96e   : > { %v10796_v52 = vpop.eup %10795  ;;  %10805 = vpow2.f32 %v7242_v9  ;;  %7511 = vmatmul.mubr.bf16.gmra.mrb[104].mxu0 %v7434_v11  ;;  %v7078_v44 = vpop.xlane.xlu0 %7077 }
 0x96f   : > { %v10798_v48 = vpop.eup %10797  ;;  %10807 = vpow2.f32 %v7244_v63  ;;  %v7352_v5 = vadd.f32 %v10796_v52, %v10794_v26  ;;  %v7162_v17 = vsub.f32 %v13813_v40, %v7078_v44  ;;  %v7163_v8 = vsub.f32 %v13815_v4, %v7078_v44 }
 0x970   : > { %v10800_v3 = vpop.eup %10799  ;;  %v7436_v43 = vpack.c.bf16 %v10798_v48, %v10794_v26  ;;  %v7081_v37 = vpop.xlane.xlu1 %7080 }
 0x971   : > { %7353 = vadd.xlane.f32.xlu0 %v7352_v5  ;;  %v7437_v19 = vpack.c.bf16 %v10800_v3, %v10796_v52  ;;  %v7355_v23 = vadd.f32 %v10800_v3, %v10798_v48  ;;  %v7246_v51 = vmul.f32 1.442695, %v7162_v17  ;;  %v7248_v46 = vmul.f32 1.442695, %v7163_v8 }
 0x972   : > { %v7164_v21 = vsub.f32 %v13819_v54, %v7081_v37  ;;  %v7165_v10 = vsub.f32 %v13821_v32, %v7081_v37 }
 0x973   : > { %7518 = vmatprep.mubr.bf16.mxu0 %v7437_v19  ;;  %7356 = vadd.xlane.f32.xlu1 %v7355_v23  ;;  %10809 = vpow2.f32 %v7246_v51 }
 0x974   : > { %v7250_v6 = vmul.f32 1.442695, %v7164_v21  ;;  %v7252_v58 = vmul.f32 1.442695, %v7165_v10  ;;  %10811 = vpow2.f32 %v7248_v46 }
 0x975   : > { %v10802_v1 = vpop.eup %10801 }
 0x976   : > { %10813 = vpow2.f32 %v7250_v6  ;;  %7519 = vmatmul.mubr.bf16.gmra.mrb[108].mxu0 %v7436_v43  ;;  %v10804_v40 = vpop.eup %10803  ;;  %v7084_v4 = vpop.xlane.xlu0 %7083 }
 0x977   : > { %10815 = vpow2.f32 %v7252_v58  ;;  %v7166_v29 = vsub.f32 %v13826_v39, %v7084_v4  ;;  %v7167_v33 = vsub.f32 %v13828_v25, %v7084_v4  ;;  %v7358_v54 = vadd.f32 %v10804_v40, %v10802_v1 }
 0x978   : > { %v10806_v50 = vpop.eup %10805  ;;  %v7087_v49 = vpop.xlane.xlu1 %7086  ;;  %v7754_v25 = vsel %vm4716_vm2, %v8499_v57, 0 }
 0x979   : > { %v10808_v7 = vpop.eup %10807  ;;  %v7438_v32 = vpack.c.bf16 %v10806_v50, %v10802_v1  ;;  %v7254_v0 = vmul.f32 1.442695, %v7166_v29  ;;  %v7256_v14 = vmul.f32 1.442695, %v7167_v33  ;;  %7359 = vadd.xlane.f32.xlu0 %v7358_v54  ;;  %v7168_v15 = vsub.f32 %v13832_v30, %v7087_v49  ;;  %9980 = vmatpush3.bf16.msra.mxu0 %v7754_v25 }
 0x97a   : > { %v7169_v11 = vsub.f32 %v13834_v61, %v7087_v49  ;;  %v7439_v39 = vpack.c.bf16 %v10808_v7, %v10804_v40  ;;  %v7361_v38 = vadd.f32 %v10808_v7, %v10806_v50 }
 0x97b   : > { %10817 = vpow2.f32 %v7254_v0  ;;  %v7258_v28 = vmul.f32 1.442695, %v7168_v15 }
 0x97c   : > { %v7260_v27 = vmul.f32 1.442695, %v7169_v11  ;;  %10819 = vpow2.f32 %v7256_v14  ;;  %7526 = vmatprep.mubr.bf16.mxu0 %v7439_v39  ;;  %7362 = vadd.xlane.f32.xlu1 %v7361_v38 }
 0x97d   : > { %v10810_v47 = vpop.eup %10809  ;;  %10821 = vpow2.f32 %v7258_v28 }
 0x97e   : > { %7527 = vmatmul.mubr.bf16.gmra.mrb[112].mxu0 %v7438_v32  ;;  %v10812_v62 = vpop.eup %10811  ;;  %10823 = vpow2.f32 %v7260_v27  ;;  %v7090_v30 = vpop.xlane.xlu0 %7089 }
 0x97f   : > { %v7170_v20 = vsub.f32 %v13839_v34, %v7090_v30  ;;  %v7171_v45 = vsub.f32 %v13841_v60, %v7090_v30  ;;  %v7364_v22 = vadd.f32 %v10812_v62, %v10810_v47 }
 0x980   : > { %v10814_v61 = vpop.eup %10813  ;;  %v7093_v63 = vpop.xlane.xlu1 %7092 }
 0x981   : > { %v10816_v59 = vpop.eup %10815  ;;  %v7440_v9 = vpack.c.bf16 %v10814_v61, %v10810_v47  ;;  %v7262_v26 = vmul.f32 1.442695, %v7170_v20  ;;  %v7264_v52 = vmul.f32 1.442695, %v7171_v45  ;;  %7365 = vadd.xlane.f32.xlu0 %v7364_v22  ;;  %v7172_v48 = vsub.f32 %v13845_v41, %v7093_v63 }
 0x982   : > { %v7173_v44 = vsub.f32 %v13847_v24, %v7093_v63  ;;  %v7441_v5 = vpack.c.bf16 %v10816_v59, %v10812_v62  ;;  %v7367_v3 = vadd.f32 %v10816_v59, %v10814_v61  ;;  %v14565_v59 = vld [vmem:[#allocation38_spill] sm:$0xff] }
 0x983   : > { %10825 = vpow2.f32 %v7262_v26  ;;  %v7266_v43 = vmul.f32 1.442695, %v7172_v48 }
 0x984   : > { %v7268_v17 = vmul.f32 1.442695, %v7173_v44  ;;  %10827 = vpow2.f32 %v7264_v52  ;;  %7534 = vmatprep.mubr.bf16.mxu0 %v7441_v5  ;;  %7368 = vadd.xlane.f32.xlu1 %v7367_v3  ;;  %v14566_v3 = vld [vmem:[#allocation6_spill] sm:$0xff] }
 0x985   : > { %v10818_v34 = vpop.eup %10817  ;;  %10829 = vpow2.f32 %v7266_v43  ;;  %v14567_v43 = vld [vmem:[#allocation39_spill] sm:$0xff] }
 0x986   : > { %7535 = vmatmul.mubr.bf16.gmra.mrb[116].mxu0 %v7440_v9  ;;  %v10820_v60 = vpop.eup %10819  ;;  %10831 = vpow2.f32 %v7268_v17  ;;  %v7096_v8 = vpop.xlane.xlu0 %7095 }
 0x987   : > { %v10822_v37 = vpop.eup %10821  ;;  %v7174_v19 = vsub.f32 %v13852_v13, %v7096_v8  ;;  %v7175_v41 = vsub.f32 %v13854_v42, %v7096_v8  ;;  %v7370_v24 = vadd.f32 %v10820_v60, %v10818_v34 }
 0x988   : > { %v10824_v23 = vpop.eup %10823  ;;  %v7442_v51 = vpack.c.bf16 %v10822_v37, %v10818_v34  ;;  %v7099_v46 = vpop.xlane.xlu1 %7098 }
 0x989   : > { %v7270_v21 = vmul.f32 1.442695, %v7174_v19  ;;  %v7272_v10 = vmul.f32 1.442695, %v7175_v41  ;;  %7371 = vadd.xlane.f32.xlu0 %v7370_v24  ;;  %v7176_v6 = vsub.f32 %v13858_v55, %v7099_v46  ;;  %v7177_v58 = vsub.f32 %v13860_v12, %v7099_v46  ;;  %v14568_v24 = vld [vmem:[#allocation40_spill] sm:$0xff] }
 0x98a   : > { %v7443_v1 = vpack.c.bf16 %v10824_v23, %v10820_v60  ;;  %v7373_v40 = vadd.f32 %v10824_v23, %v10822_v37 }
 0x98b   : > { %10833 = vpow2.f32 %v7270_v21  ;;  %v7274_v4 = vmul.f32 1.442695, %v7176_v6  ;;  %v7276_v50 = vmul.f32 1.442695, %v7177_v58 }
 0x98c   : > { %10835 = vpow2.f32 %v7272_v10  ;;  %7542 = vmatprep.mubr.bf16.mxu0 %v7443_v1  ;;  %7374 = vadd.xlane.f32.xlu1 %v7373_v40 }
 0x98d   : > { %v10826_v13 = vpop.eup %10825  ;;  %10837 = vpow2.f32 %v7274_v4 }
 0x98e   : > { %7543 = vmatmul.mubr.bf16.gmra.mrb[120].mxu0 %v7442_v51  ;;  %v7102_v42 = vpop.xlane.xlu0 %7101  ;;  %v10828_v29 = vpop.eup %10827  ;;  %10839 = vpow2.f32 %v7276_v50  ;;  %v14569_v51 = vld [vmem:[#allocation41_spill] sm:$0xff] }
 0x98f   : > { %v7178_v33 = vsub.f32 %v13864_v35, %v7102_v42  ;;  %v7179_v55 = vsub.f32 %v13867_v18, %v7102_v42  ;;  %v10830_v54 = vpop.eup %10829  ;;  %v7376_v12 = vadd.f32 %v10828_v29, %v10826_v13 }
 0x990   : > { %v7105_v7 = vpop.xlane.xlu1 %7104  ;;  %v10832_v32 = vpop.eup %10831  ;;  %v7444_v49 = vpack.c.bf16 %v10830_v54, %v10826_v13  ;;  %v14570_v13 = vld [vmem:[#allocation42_spill] sm:$0xff] }
 0x991   : > { %v7278_v57 = vmul.f32 1.442695, %v7178_v33  ;;  %v7280_v0 = vmul.f32 1.442695, %v7179_v55  ;;  %v7180_v14 = vsub.f32 %v13871_v53, %v7105_v7  ;;  %7377 = vadd.xlane.f32.xlu0 %v7376_v12  ;;  %v7181_v15 = vsub.f32 %v13873_v36, %v7105_v7 }
 0x992   : > { %v7445_v11 = vpack.c.bf16 %v10832_v32, %v10828_v29  ;;  %v7379_v39 = vadd.f32 %v10832_v32, %v10830_v54  ;;  %v14571_v29 = vld [vmem:[#allocation7_spill] sm:$0xff] }
 0x993   : > { %10841 = vpow2.f32 %v7278_v57  ;;  %v7282_v38 = vmul.f32 1.442695, %v7180_v14  ;;  %v7284_v35 = vmul.f32 1.442695, %v7181_v15  ;;  %v14572_v57 = vld [vmem:[#allocation8_spill] sm:$0xff]  ;;  %v14573_v14 = vld [vmem:[#allocation43_spill] sm:$0xff] }
 0x994   : > { %10843 = vpow2.f32 %v7280_v0  ;;  %7550 = vmatprep.mubr.bf16.mxu0 %v7445_v11  ;;  %7380 = vadd.xlane.f32.xlu1 %v7379_v39 }
 0x995   : > { %10845 = vpow2.f32 %v7282_v38  ;;  %v10834_v18 = vpop.eup %10833 }
 0x996   : > { %10847 = vpow2.f32 %v7284_v35  ;;  %7551 = vmatmul.mubr.bf16.gmra.mrb[124].mxu0 %v7444_v49  ;;  %v7108_v25 = vpop.xlane.xlu0 %7107  ;;  %v10836_v28 = vpop.eup %10835 }
 0x997   : > { %v7182_v27 = vsub.f32 %v13877_v2, %v7108_v25  ;;  %v7183_v53 = vsub.f32 %v13880_v56, %v7108_v25  ;;  %v10838_v47 = vpop.eup %10837  ;;  %v7382_v36 = vadd.f32 %v10836_v28, %v10834_v18 }
 0x998   : > { %v7111_v62 = vpop.xlane.xlu1 %7110  ;;  %v10840_v30 = vpop.eup %10839  ;;  %v7446_v61 = vpack.c.bf16 %v10838_v47, %v10834_v18 }
 0x999   : > { %v7286_v20 = vmul.f32 1.442695, %v7182_v27  ;;  %v7288_v45 = vmul.f32 1.442695, %v7183_v53  ;;  %v7184_v22 = vsub.f32 %v13884_v16, %v7111_v62  ;;  %7383 = vadd.xlane.f32.xlu0 %v7382_v36  ;;  %v7185_v9 = vsub.f32 %v14565_v59, %v7111_v62  ;;  %v14574_v53 = vld [vmem:[#allocation44_spill] sm:$0xff]  ;;  %v14575_v36 = vld [vmem:[#allocation45_spill] sm:$0xff] }
 0x99a   : > { %v7447_v63 = vpack.c.bf16 %v10840_v30, %v10836_v28  ;;  %v7385_v26 = vadd.f32 %v10840_v30, %v10838_v47 }
 0x99b   : > { %10849 = vpow2.f32 %v7286_v20  ;;  %v7290_v52 = vmul.f32 1.442695, %v7184_v22  ;;  %v7292_v2 = vmul.f32 1.442695, %v7185_v9  ;;  %v14576_v9 = vld [vmem:[#allocation46_spill] sm:$0xff] }
 0x99c   : > { %10851 = vpow2.f32 %v7288_v45  ;;  %7558 = vmatprep.mubr.bf16.mxu0 %v7447_v63  ;;  %7386 = vadd.xlane.f32.xlu1 %v7385_v26  ;;  %v14577_v26 = vld [vmem:[#allocation9_spill] sm:$0xff] }
 0x99d   : > { %v10842_v56 = vpop.eup %10841  ;;  %10853 = vpow2.f32 %v7290_v52 }
 0x99e   : > { %v10844_v48 = vpop.eup %10843  ;;  %10855 = vpow2.f32 %v7292_v2  ;;  %7559 = vmatmul.mubr.bf16.gmra.mrb[128].mxu0 %v7446_v61  ;;  %v7114_v44 = vpop.xlane.xlu0 %7113 }
 0x99f   : > { %v10846_v5 = vpop.eup %10845  ;;  %v7186_v16 = vsub.f32 %v14566_v3, %v7114_v44  ;;  %v7187_v17 = vsub.f32 %v14567_v43, %v7114_v44  ;;  %v7388_v34 = vadd.f32 %v10844_v48, %v10842_v56 }
 0x9a0   : > { %v10848_v60 = vpop.eup %10847  ;;  %v7448_v8 = vpack.c.bf16 %v10846_v5, %v10842_v56  ;;  %v7117_v37 = vpop.xlane.xlu1 %7116 }
 0x9a1   : > { %v7294_v19 = vmul.f32 1.442695, %v7186_v16  ;;  %v7296_v41 = vmul.f32 1.442695, %v7187_v17  ;;  %7389 = vadd.xlane.f32.xlu0 %v7388_v34  ;;  %v7188_v23 = vsub.f32 %v14568_v24, %v7117_v37  ;;  %v7189_v46 = vsub.f32 %v14569_v51, %v7117_v37  ;;  %v14578_v17 = vld [vmem:[#allocation10_spill] sm:$0xff] }
 0x9a2   : > { %v7449_v21 = vpack.c.bf16 %v10848_v60, %v10844_v48  ;;  %v7391_v10 = vadd.f32 %v10848_v60, %v10846_v5  ;;  %v14579_v60 = vld [vmem:[#allocation47_spill] sm:$0xff] }
 0x9a3   : > { %10857 = vpow2.f32 %v7294_v19  ;;  %v7298_v6 = vmul.f32 1.442695, %v7188_v23  ;;  %v7300_v58 = vmul.f32 1.442695, %v7189_v46  ;;  %v14580_v46 = vld [vmem:[#allocation48_spill] sm:$0xff] }
 0x9a4   : > { %10859 = vpow2.f32 %v7296_v41  ;;  %7566 = vmatprep.mubr.bf16.mxu0 %v7449_v21  ;;  %7392 = vadd.xlane.f32.xlu1 %v7391_v10  ;;  %v14581_v10 = vld [vmem:[#allocation49_spill] sm:$0xff] }
 0x9a5   : > { %v10850_v1 = vpop.eup %10849  ;;  %10861 = vpow2.f32 %v7298_v6 }
 0x9a6   : > { %v10852_v40 = vpop.eup %10851  ;;  %10863 = vpow2.f32 %v7300_v58  ;;  %7567 = vmatmul.mubr.bf16.gmra.mrb[132].mxu0 %v7448_v8  ;;  %v7120_v4 = vpop.xlane.xlu0 %7119 }
 0x9a7   : > { %v10854_v50 = vpop.eup %10853  ;;  %v7190_v42 = vsub.f32 %v14570_v13, %v7120_v4  ;;  %v7191_v33 = vsub.f32 %v14571_v29, %v7120_v4  ;;  %v7394_v55 = vadd.f32 %v10852_v40, %v10850_v1 }
 0x9a8   : > { %v10856_v54 = vpop.eup %10855  ;;  %v7450_v12 = vpack.c.bf16 %v10854_v50, %v10850_v1  ;;  %v7123_v7 = vpop.xlane.xlu1 %7122 }
 0x9a9   : > { %v7302_v32 = vmul.f32 1.442695, %v7190_v42  ;;  %v7304_v49 = vmul.f32 1.442695, %v7191_v33  ;;  %7395 = vadd.xlane.f32.xlu0 %v7394_v55  ;;  %v7192_v0 = vsub.f32 %v14572_v57, %v7123_v7  ;;  %v7193_v15 = vsub.f32 %v14573_v14, %v7123_v7  ;;  %v14582_v33 = vld [vmem:[#allocation50_spill] sm:$0xff] }
 0x9aa   : > { %v7451_v11 = vpack.c.bf16 %v10856_v54, %v10852_v40  ;;  %v7397_v39 = vadd.f32 %v10856_v54, %v10854_v50  ;;  %v14583_v54 = vld [vmem:[#allocation11_spill] sm:$0xff] }
 0x9ab   : > { %10865 = vpow2.f32 %v7302_v32  ;;  %v7306_v38 = vmul.f32 1.442695, %v7192_v0  ;;  %v7308_v35 = vmul.f32 1.442695, %v7193_v15 }
 0x9ac   : > { %10867 = vpow2.f32 %v7304_v49  ;;  %7574 = vmatprep.mubr.bf16.mxu0 %v7451_v11  ;;  %7398 = vadd.xlane.f32.xlu1 %v7397_v39  ;;  %v14584_v11 = vld [vmem:[#allocation12_spill] sm:$0xff] }
 0x9ad   : > { %v10858_v18 = vpop.eup %10857  ;;  %10869 = vpow2.f32 %v7306_v38 }
 0x9ae   : > { %v10860_v25 = vpop.eup %10859  ;;  %10871 = vpow2.f32 %v7308_v35  ;;  %7575 = vmatmul.mubr.bf16.gmra.mrb[136].mxu0 %v7450_v12  ;;  %v7126_v28 = vpop.xlane.xlu0 %7125 }
 0x9af   : > { %v10862_v27 = vpop.eup %10861  ;;  %v7194_v47 = vsub.f32 %v14574_v53, %v7126_v28  ;;  %v7195_v62 = vsub.f32 %v14575_v36, %v7126_v28  ;;  %v7400_v30 = vadd.f32 %v10860_v25, %v10858_v18 }
 0x9b0   : > { %v10864_v61 = vpop.eup %10863  ;;  %v7452_v20 = vpack.c.bf16 %v10862_v27, %v10858_v18  ;;  %v7129_v45 = vpop.xlane.xlu1 %7128 }
 0x9b1   : > { %v7310_v22 = vmul.f32 1.442695, %v7194_v47  ;;  %v7312_v59 = vmul.f32 1.442695, %v7195_v62  ;;  %7401 = vadd.xlane.f32.xlu0 %v7400_v30  ;;  %v7196_v63 = vsub.f32 %v14576_v9, %v7129_v45  ;;  %v7197_v52 = vsub.f32 %v14577_v26, %v7129_v45 }
 0x9b2   : > { %v7453_v2 = vpack.c.bf16 %v10864_v61, %v10860_v25  ;;  %v7403_v56 = vadd.f32 %v10864_v61, %v10862_v27 }
 0x9b3   : > { %10873 = vpow2.f32 %v7310_v22  ;;  %v7314_v48 = vmul.f32 1.442695, %v7196_v63  ;;  %v7316_v44 = vmul.f32 1.442695, %v7197_v52 }
 0x9b4   : > { %10875 = vpow2.f32 %v7312_v59  ;;  %7582 = vmatprep.mubr.bf16.mxu0 %v7453_v2  ;;  %7404 = vadd.xlane.f32.xlu1 %v7403_v56 }
 0x9b5   : > { %v10866_v5 = vpop.eup %10865  ;;  %10877 = vpow2.f32 %v7314_v48 }
 0x9b6   : > { %v10868_v3 = vpop.eup %10867  ;;  %10879 = vpow2.f32 %v7316_v44  ;;  %7583 = vmatmul.mubr.bf16.gmra.mrb[140].mxu0 %v7452_v20  ;;  %v7132_v16 = vpop.xlane.xlu0 %7131 }
 0x9b7   : > { %v10870_v43 = vpop.eup %10869  ;;  %v7198_v34 = vsub.f32 %v14578_v17, %v7132_v16  ;;  %v7199_v8 = vsub.f32 %v14579_v60, %v7132_v16  ;;  %v7406_v37 = vadd.f32 %v10868_v3, %v10866_v5 }
 0x9b8   : > { %v10872_v19 = vpop.eup %10871  ;;  %v7454_v41 = vpack.c.bf16 %v10870_v43, %v10866_v5  ;;  %v7135_v24 = vpop.xlane.xlu1 %7134 }
 0x9b9   : > { %v7318_v23 = vmul.f32 1.442695, %v7198_v34  ;;  %v7320_v51 = vmul.f32 1.442695, %v7199_v8  ;;  %7407 = vadd.xlane.f32.xlu0 %v7406_v37  ;;  %v7200_v21 = vsub.f32 %v14580_v46, %v7135_v24  ;;  %v7201_v6 = vsub.f32 %v14581_v10, %v7135_v24 }
 0x9ba   : > { %v7455_v58 = vpack.c.bf16 %v10872_v19, %v10868_v3  ;;  %v7409_v1 = vadd.f32 %v10872_v19, %v10870_v43 }
 0x9bb   : > { %10881 = vpow2.f32 %v7318_v23  ;;  %v7322_v40 = vmul.f32 1.442695, %v7200_v21  ;;  %v7324_v4 = vmul.f32 1.442695, %v7201_v6 }
 0x9bc   : > { %10883 = vpow2.f32 %v7320_v51  ;;  %7590 = vmatprep.mubr.bf16.mxu0 %v7455_v58  ;;  %7410 = vadd.xlane.f32.xlu1 %v7409_v1 }
 0x9bd   : > { %v10874_v50 = vpop.eup %10873  ;;  %10885 = vpow2.f32 %v7322_v40 }
 0x9be   : > { %v10876_v13 = vpop.eup %10875  ;;  %10887 = vpow2.f32 %v7324_v4  ;;  %7591 = vmatmul.mubr.bf16.gmra.mrb[144].mxu0 %v7454_v41  ;;  %v7138_v42 = vpop.xlane.xlu0 %7137 }
 0x9bf   : > { %v10878_v29 = vpop.eup %10877  ;;  %v7202_v55 = vsub.f32 %v14582_v33, %v7138_v42  ;;  %v7203_v12 = vsub.f32 %v14583_v54, %v7138_v42  ;;  %v7412_v7 = vadd.f32 %v10876_v13, %v10874_v50 }
 0x9c0   : > { %v10880_v32 = vpop.eup %10879  ;;  %v7456_v49 = vpack.c.bf16 %v10878_v29, %v10874_v50  ;;  %v7141_v57 = vpop.xlane.xlu1 %7140 }
 0x9c1   : > { %v7326_v0 = vmul.f32 1.442695, %v7202_v55  ;;  %v7328_v14 = vmul.f32 1.442695, %v7203_v12  ;;  %7413 = vadd.xlane.f32.xlu0 %v7412_v7  ;;  %v7204_v15 = vsub.f32 %v13949_v31, %v7141_v57  ;;  %v7205_v39 = vsub.f32 %v14584_v11, %v7141_v57 }
 0x9c2   : > { %v7457_v38 = vpack.c.bf16 %v10880_v32, %v10876_v13  ;;  %v7415_v35 = vadd.f32 %v10880_v32, %v10878_v29 }
 0x9c3   : > { %10889 = vpow2.f32 %v7326_v0  ;;  %v7330_v18 = vmul.f32 1.442695, %v7204_v15  ;;  %v7332_v25 = vmul.f32 1.442695, %v7205_v39 }
 0x9c4   : > { %10891 = vpow2.f32 %v7328_v14  ;;  %7598 = vmatprep.mubr.bf16.mxu0 %v7457_v38  ;;  %7416 = vadd.xlane.f32.xlu1 %v7415_v35 }
 0x9c5   : > { %v10882_v28 = vpop.eup %10881  ;;  %10893 = vpow2.f32 %v7330_v18 }
 0x9c6   : > { %v10884_v27 = vpop.eup %10883  ;;  %10895 = vpow2.f32 %v7332_v25  ;;  %7599 = vmatmul.mubr.bf16.gmra.mrb[148].mxu0 %v7456_v49 }
 0x9c7   : > { %v10886_v53 = vpop.eup %10885  ;;  %v7418_v47 = vadd.f32 %v10884_v27, %v10882_v28 }
 0x9c8   : > { %v10888_v36 = vpop.eup %10887  ;;  %v7458_v62 = vpack.c.bf16 %v10886_v53, %v10882_v28 }
 0x9c9   : > { %7419 = vadd.xlane.f32.xlu0 %v7418_v47  ;;  %v7459_v31 = vpack.c.bf16 %v10888_v36, %v10884_v27  ;;  %v7421_v30 = vadd.f32 %v10888_v36, %v10886_v53 }
 0x9cb   : > { %7606 = vmatprep.mubr.bf16.mxu0 %v7459_v31  ;;  %7422 = vadd.xlane.f32.xlu1 %v7421_v30 }
 0x9cd   : > { %v10890_v61 = vpop.eup %10889 }
 0x9ce   : > { %v10892_v20 = vpop.eup %10891  ;;  %7607 = vmatmul.mubr.bf16.gmra.mrb[152].mxu0 %v7458_v62 }
 0x9cf   : > { %v10894_v45 = vpop.eup %10893  ;;  %v7424_v22 = vadd.f32 %v10892_v20, %v10890_v61 }
 0x9d0   : > { %v10896_v59 = vpop.eup %10895  ;;  %v7460_v9 = vpack.c.bf16 %v10894_v45, %v10890_v61 }
 0x9d1   : > { %7425 = vadd.xlane.f32.xlu0 %v7424_v22  ;;  %v7461_v63 = vpack.c.bf16 %v10896_v59, %v10892_v20  ;;  %v7427_v26 = vadd.f32 %v10896_v59, %v10894_v45 }
 0x9d3   : > { %7614 = vmatprep.mubr.bf16.mxu0 %v7461_v63  ;;  %7428 = vadd.xlane.f32.xlu1 %v7427_v26 }
 0x9d6   : > { %7615 = vmatmul.mubr.bf16.gmra.mrb[156].mxu0 %v7460_v9 }
 0x9e6   : > { %v7336_v52 = vpop.xlane.xlu0 %7335 }
 0x9e7   : > { %10897 = vrcp.f32 %v7336_v52 }
 0x9e9   : > { %v7339_v2 = vpop.xlane.xlu1 %7338 }
 0x9ea   : > { %10899 = vrcp.f32 %v7339_v2 }
 0x9ee   : > { %v7342_v56 = vpop.xlane.xlu0 %7341 }
 0x9ef   : > { %10901 = vrcp.f32 %v7342_v56 }
 0x9f1   : > { %v7345_v48 = vpop.xlane.xlu1 %7344  ;;  %v10898_v17 = vpop.eup %10897 }
 0x9f2   : > { %10903 = vrcp.f32 %v7345_v48 }
 0x9f4   : > { %v10900_v60 = vpop.eup %10899 }
 0x9f6   : > { %v7348_v19 = vpop.xlane.xlu0 %7347 }
 0x9f7   : > { %10905 = vrcp.f32 %v7348_v19 }
 0x9f8   : > { %v7351_v41 = vpop.xlane.xlu1 %7350 }
 0x9f9   : > { %10907 = vrcp.f32 %v7351_v41  ;;  %v10902_v6 = vpop.eup %10901 }
 0x9fc   : > { %v10904_v1 = vpop.eup %10903 }
 0x9fe   : > { %v7354_v50 = vpop.xlane.xlu0 %7353 }
 0x9ff   : > { %10909 = vrcp.f32 %v7354_v50 }
 0xa00   : > { %v7357_v13 = vpop.xlane.xlu1 %7356 }
 0xa01   : > { %10911 = vrcp.f32 %v7357_v13  ;;  %v10906_v7 = vpop.eup %10905 }
 0xa03   : > { %v10908_v49 = vpop.eup %10907 }
 0xa06   : > { %v7360_v14 = vpop.xlane.xlu0 %7359 }
 0xa07   : > { %10913 = vrcp.f32 %v7360_v14 }
 0xa09   : > { %v7363_v15 = vpop.xlane.xlu1 %7362  ;;  %v10910_v28 = vpop.eup %10909 }
 0xa0a   : > { %10915 = vrcp.f32 %v7363_v15 }
 0xa0b   : > { %v10912_v53 = vpop.eup %10911 }
 0xa0e   : > { %v7366_v62 = vpop.xlane.xlu0 %7365 }
 0xa0f   : > { %10917 = vrcp.f32 %v7366_v62 }
 0xa11   : > { %v7369_v31 = vpop.xlane.xlu1 %7368  ;;  %v10914_v9 = vpop.eup %10913 }
 0xa12   : > { %10919 = vrcp.f32 %v7369_v31 }
 0xa14   : > { %v10916_v26 = vpop.eup %10915 }
 0xa16   : > { %v7372_v56 = vpop.xlane.xlu0 %7371 }
 0xa17   : > { %10921 = vrcp.f32 %v7372_v56 }
 0xa19   : > { %v7375_v48 = vpop.xlane.xlu1 %7374 }
 0xa1a   : > { %10923 = vrcp.f32 %v7375_v48 }
 0xa1e   : > { %v7378_v41 = vpop.xlane.xlu0 %7377 }
 0xa1f   : > { %10925 = vrcp.f32 %v7378_v41 }
 0xa26   : > { %v7384_v13 = vpop.xlane.xlu0 %7383 }
 0xa2e   : > { %v7390_v15 = vpop.xlane.xlu0 %7389 }
 0xa31   : > { %v9332_v44 = vpop.f32.mrb[96].mxu0 }
 0xa32   : > { %v9333_v5 = vpop.f32.mrb[97].mxu0 }
 0xa33   : > { %v9334_v3 = vadd.f32 %v9333_v5, %v9332_v44  ;;  %v9335_v16 = vpop.f32.mrb[98].mxu0 }
 0xa34   : > { %v9336_v43 = vpop.f32.mrb[99].mxu0 }
 0xa35   : > { %v9337_v34 = vadd.f32 %v9336_v43, %v9335_v16  ;;  %v7655_v8 = vmul.f32 %v10898_v17, %v9334_v3 }
 0xa36   : > { %v7396_v31 = vpop.xlane.xlu0 %7395 }
 0xa37   : > { %v7656_v37 = vmul.f32 %v10900_v60, %v9337_v34  ;;  %v10918_v34 = vpop.eup %10917 }
 0xa39   : > { %v7687_v24 = vpack.c.bf16 %v7656_v37, %v7655_v8  ;;  %v9338_v23 = vpop.f32.mrb[100].mxu0  ;;  %v10920_v8 = vpop.eup %10919 }
 0xa3a   : > { %v9339_v51 = vpop.f32.mrb[101].mxu0 }
 0xa3b   : > { %v9340_v46 = vadd.f32 %v9339_v51, %v9338_v23  ;;  %v9341_v21 = vpop.f32.mrb[102].mxu0  ;;  %9981 = vmatprep.mubr.msk.bf16.mxu0 %vm658_vm1, %v7687_v24  ;;  %v7381_v24 = vpop.xlane.xlu1 %7380 }
 0xa3c   : > { %v9342_v10 = vpop.f32.mrb[103].mxu0  ;;  %10927 = vrcp.f32 %v7381_v24 }
 0xa3d   : > { %v9343_v58 = vadd.f32 %v9342_v10, %v9341_v21  ;;  %v7657_v40 = vmul.f32 %v10902_v6, %v9340_v46  ;;  %10929 = vrcp.f32 %v7384_v13 }
 0xa3e   : > { %v7402_v48 = vpop.xlane.xlu0 %7401 }
 0xa3f   : > { %v7658_v4 = vmul.f32 %v10904_v1, %v9343_v58  ;;  %v10922_v58 = vpop.eup %10921 }
 0xa41   : > { %v7688_v42 = vpack.c.bf16 %v7658_v4, %v7657_v40  ;;  %v9344_v29 = vpop.f32.mrb[104].mxu0  ;;  %v10924_v40 = vpop.eup %10923 }
 0xa42   : > { %v9345_v33 = vpop.f32.mrb[105].mxu0 }
 0xa43   : > { %v9346_v55 = vadd.f32 %v9345_v33, %v9344_v29  ;;  %v9347_v54 = vpop.f32.mrb[106].mxu0  ;;  %9982 = vmatmul.mubr.msk.bf16.vlgmr.msra.gmra.mrb[0].mxu0 %vm658_vm1, %v7688_v42  ;;  %v7387_v42 = vpop.xlane.xlu1 %7386 }
 0xa44   : > { %v9348_v12 = vpop.f32.mrb[107].mxu0  ;;  %10931 = vrcp.f32 %v7387_v42 }
 0xa45   : > { %v9349_v32 = vadd.f32 %v9348_v12, %v9347_v54  ;;  %v7659_v57 = vmul.f32 %v10906_v7, %v9346_v55  ;;  %10933 = vrcp.f32 %v7390_v15 }
 0xa46   : > { %v7408_v24 = vpop.xlane.xlu0 %7407 }
 0xa47   : > { %v7660_v0 = vmul.f32 %v10908_v49, %v9349_v32  ;;  %v10926_v32 = vpop.eup %10925 }
 0xa49   : > { %v7689_v11 = vpack.c.bf16 %v7660_v0, %v7659_v57  ;;  %v9350_v39 = vpop.f32.mrb[108].mxu0  ;;  %v10928_v57 = vpop.eup %10927 }
 0xa4a   : > { %v9351_v38 = vpop.f32.mrb[109].mxu0 }
 0xa4b   : > { %v9352_v35 = vadd.f32 %v9351_v38, %v9350_v39  ;;  %v9353_v18 = vpop.f32.mrb[110].mxu0  ;;  %9985 = vmatprep.mubr.msk.bf16.mxu0 %vm658_vm1, %v7689_v11  ;;  %v7393_v11 = vpop.xlane.xlu1 %7392 }
 0xa4c   : > { %v9354_v25 = vpop.f32.mrb[111].mxu0  ;;  %10935 = vrcp.f32 %v7393_v11 }
 0xa4d   : > { %v9355_v27 = vadd.f32 %v9354_v25, %v9353_v18  ;;  %v7661_v47 = vmul.f32 %v10910_v28, %v9352_v35  ;;  %10937 = vrcp.f32 %v7396_v31 }
 0xa4e   : > { %v7414_v42 = vpop.xlane.xlu0 %7413 }
 0xa4f   : > { %v7662_v36 = vmul.f32 %v10912_v53, %v9355_v27  ;;  %v10930_v27 = vpop.eup %10929 }
 0xa51   : > { %v7690_v30 = vpack.c.bf16 %v7662_v36, %v7661_v47  ;;  %v9356_v61 = vpop.f32.mrb[112].mxu0  ;;  %v10932_v47 = vpop.eup %10931 }
 0xa52   : > { %v9357_v20 = vpop.f32.mrb[113].mxu0 }
 0xa53   : > { %v9358_v45 = vadd.f32 %v9357_v20, %v9356_v61  ;;  %v9359_v22 = vpop.f32.mrb[114].mxu0  ;;  %9986 = vmatmul.mubr.msk.bf16.gmra.mrb[4].mxu0 %vm658_vm1, %v7690_v30  ;;  %v7399_v30 = vpop.xlane.xlu1 %7398 }
 0xa54   : > { %v9360_v59 = vpop.f32.mrb[115].mxu0  ;;  %10939 = vrcp.f32 %v7399_v30 }
 0xa55   : > { %v9361_v63 = vadd.f32 %v9360_v59, %v9359_v22  ;;  %v7663_v52 = vmul.f32 %v10914_v9, %v9358_v45  ;;  %10941 = vrcp.f32 %v7402_v48 }
 0xa56   : > { %v7420_v11 = vpop.xlane.xlu0 %7419 }
 0xa57   : > { %v7664_v2 = vmul.f32 %v10916_v26, %v9361_v63  ;;  %v10934_v63 = vpop.eup %10933 }
 0xa59   : > { %v7691_v44 = vpack.c.bf16 %v7664_v2, %v7663_v52  ;;  %v9362_v5 = vpop.f32.mrb[116].mxu0  ;;  %v10936_v52 = vpop.eup %10935 }
 0xa5a   : > { %v9363_v3 = vpop.f32.mrb[117].mxu0 }
 0xa5b   : > { %v9364_v16 = vadd.f32 %v9363_v3, %v9362_v5  ;;  %v9365_v43 = vpop.f32.mrb[118].mxu0  ;;  %9989 = vmatprep.mubr.msk.bf16.mxu0 %vm658_vm1, %v7691_v44  ;;  %v7405_v44 = vpop.xlane.xlu1 %7404 }
 0xa5c   : > { %v9366_v17 = vpop.f32.mrb[119].mxu0  ;;  %10943 = vrcp.f32 %v7405_v44 }
 0xa5d   : > { %v9367_v60 = vadd.f32 %v9366_v17, %v9365_v43  ;;  %v7665_v37 = vmul.f32 %v10918_v34, %v9364_v16  ;;  %10945 = vrcp.f32 %v7408_v24  ;;  %v14048_v24 = vld [vmem:[%s14170_s8] ss:$0 sm:$0xff] }
 0xa5e   : > { %v7426_v30 = vpop.xlane.xlu0 %7425 }
 0xa5f   : > { %v7666_v19 = vmul.f32 %v10920_v8, %v9367_v60  ;;  %v10938_v60 = vpop.eup %10937 }
 0xa61   : > { %v7692_v23 = vpack.c.bf16 %v7666_v19, %v7665_v37  ;;  %v9368_v51 = vpop.f32.mrb[120].mxu0  ;;  %v10940_v37 = vpop.eup %10939 }
 0xa62   : > { %v9369_v46 = vpop.f32.mrb[121].mxu0 }
 0xa63   : > { %v9370_v21 = vadd.f32 %v9369_v46, %v9368_v51  ;;  %v9371_v10 = vpop.f32.mrb[122].mxu0  ;;  %9990 = vmatmul.mubr.msk.bf16.gmra.mrb[8].mxu0 %vm658_vm1, %v7692_v23  ;;  %v7411_v23 = vpop.xlane.xlu1 %7410 }
 0xa64   : > { %v9372_v6 = vpop.f32.mrb[123].mxu0  ;;  %10947 = vrcp.f32 %v7411_v23 }
 0xa65   : > { %v9373_v1 = vadd.f32 %v9372_v6, %v9371_v10  ;;  %v7667_v4 = vmul.f32 %v10922_v58, %v9370_v21  ;;  %10949 = vrcp.f32 %v7414_v42 }
 0xa67   : > { %v7668_v50 = vmul.f32 %v10924_v40, %v9373_v1  ;;  %v10942_v1 = vpop.eup %10941 }
 0xa69   : > { %v7693_v29 = vpack.c.bf16 %v7668_v50, %v7667_v4  ;;  %v9374_v33 = vpop.f32.mrb[124].mxu0  ;;  %v10944_v4 = vpop.eup %10943 }
 0xa6a   : > { %v9375_v55 = vpop.f32.mrb[125].mxu0 }
 0xa6b   : > { %v9376_v54 = vadd.f32 %v9375_v55, %v9374_v33  ;;  %v9377_v12 = vpop.f32.mrb[126].mxu0  ;;  %9993 = vmatprep.mubr.msk.bf16.mxu0 %vm658_vm1, %v7693_v29  ;;  %v7417_v29 = vpop.xlane.xlu1 %7416 }
 0xa6c   : > { %v9378_v7 = vpop.f32.mrb[127].mxu0  ;;  %10951 = vrcp.f32 %v7417_v29 }
 0xa6d   : > { %v9379_v49 = vadd.f32 %v9378_v7, %v9377_v12  ;;  %v7669_v0 = vmul.f32 %v10926_v32, %v9376_v54  ;;  %10953 = vrcp.f32 %v7420_v11 }
 0xa6f   : > { %v7670_v14 = vmul.f32 %v10928_v57, %v9379_v49  ;;  %v10946_v49 = vpop.eup %10945 }
 0xa71   : > { %v7694_v39 = vpack.c.bf16 %v7670_v14, %v7669_v0  ;;  %v9380_v38 = vpop.f32.mrb[128].mxu0  ;;  %v10948_v0 = vpop.eup %10947 }
 0xa72   : > { %v9381_v35 = vpop.f32.mrb[129].mxu0 }
 0xa73   : > { %v9382_v18 = vadd.f32 %v9381_v35, %v9380_v38  ;;  %v9383_v25 = vpop.f32.mrb[130].mxu0  ;;  %9994 = vmatmul.mubr.msk.bf16.gmra.mrb[12].mxu0 %vm658_vm1, %v7694_v39  ;;  %v7423_v39 = vpop.xlane.xlu1 %7422 }
 0xa74   : > { %v9384_v28 = vpop.f32.mrb[131].mxu0  ;;  %10955 = vrcp.f32 %v7423_v39 }
 0xa75   : > { %v9385_v53 = vadd.f32 %v9384_v28, %v9383_v25  ;;  %v7671_v36 = vmul.f32 %v10930_v27, %v9382_v18  ;;  %10957 = vrcp.f32 %v7426_v30 }
 0xa77   : > { %v7672_v62 = vmul.f32 %v10932_v47, %v9385_v53  ;;  %v10950_v53 = vpop.eup %10949 }
 0xa79   : > { %v7695_v61 = vpack.c.bf16 %v7672_v62, %v7671_v36  ;;  %v9386_v20 = vpop.f32.mrb[132].mxu0  ;;  %v10952_v36 = vpop.eup %10951 }
 0xa7a   : > { %v9387_v45 = vpop.f32.mrb[133].mxu0 }
 0xa7b   : > { %v9388_v22 = vadd.f32 %v9387_v45, %v9386_v20  ;;  %v9389_v59 = vpop.f32.mrb[134].mxu0  ;;  %9997 = vmatprep.mubr.msk.bf16.mxu0 %vm658_vm1, %v7695_v61  ;;  %v7429_v61 = vpop.xlane.xlu1 %7428 }
 0xa7c   : > { %v9390_v9 = vpop.f32.mrb[135].mxu0  ;;  %10959 = vrcp.f32 %v7429_v61 }
 0xa7d   : > { %v9391_v26 = vadd.f32 %v9390_v9, %v9389_v59  ;;  %v7673_v2 = vmul.f32 %v10934_v63, %v9388_v22 }
 0xa7f   : > { %v7674_v56 = vmul.f32 %v10936_v52, %v9391_v26  ;;  %v10954_v26 = vpop.eup %10953 }
 0xa81   : > { %v7696_v5 = vpack.c.bf16 %v7674_v56, %v7673_v2  ;;  %v9392_v3 = vpop.f32.mrb[136].mxu0  ;;  %v10956_v2 = vpop.eup %10955 }
 0xa82   : > { %v9393_v16 = vpop.f32.mrb[137].mxu0 }
 0xa83   : > { %v9394_v43 = vadd.f32 %v9393_v16, %v9392_v3  ;;  %v9395_v17 = vpop.f32.mrb[138].mxu0  ;;  %9998 = vmatmul.mubr.msk.bf16.gmra.mrb[16].mxu0 %vm658_vm1, %v7696_v5 }
 0xa84   : > { %v9396_v34 = vpop.f32.mrb[139].mxu0 }
 0xa85   : > { %v9397_v8 = vadd.f32 %v9396_v34, %v9395_v17  ;;  %v7675_v19 = vmul.f32 %v10938_v60, %v9394_v43  ;;  %v10958_v34 = vpop.eup %10957 }
 0xa87   : > { %v7676_v41 = vmul.f32 %v10940_v37, %v9397_v8  ;;  %v10960_v8 = vpop.eup %10959 }
 0xa89   : > { %v7697_v51 = vpack.c.bf16 %v7676_v41, %v7675_v19  ;;  %v9398_v46 = vpop.f32.mrb[140].mxu0 }
 0xa8a   : > { %v9399_v21 = vpop.f32.mrb[141].mxu0 }
 0xa8b   : > { %v9400_v10 = vadd.f32 %v9399_v21, %v9398_v46  ;;  %v9401_v6 = vpop.f32.mrb[142].mxu0  ;;  %10001 = vmatprep.mubr.msk.bf16.mxu0 %vm658_vm1, %v7697_v51 }
 0xa8c   : > { %v9402_v58 = vpop.f32.mrb[143].mxu0 }
 0xa8d   : > { %v9403_v40 = vadd.f32 %v9402_v58, %v9401_v6  ;;  %v7677_v50 = vmul.f32 %v10942_v1, %v9400_v10 }
 0xa8f   : > { %v7678_v13 = vmul.f32 %v10944_v4, %v9403_v40 }
 0xa91   : > { %v7698_v33 = vpack.c.bf16 %v7678_v13, %v7677_v50  ;;  %v9404_v55 = vpop.f32.mrb[144].mxu0 }
 0xa92   : > { %v9405_v54 = vpop.f32.mrb[145].mxu0 }
 0xa93   : > { %v9406_v12 = vadd.f32 %v9405_v54, %v9404_v55  ;;  %v9407_v7 = vpop.f32.mrb[146].mxu0  ;;  %10002 = vmatmul.mubr.msk.bf16.gmra.mrb[20].mxu0 %vm658_vm1, %v7698_v33 }
 0xa94   : > { %v9408_v32 = vpop.f32.mrb[147].mxu0 }
 0xa95   : > { %v9409_v57 = vadd.f32 %v9408_v32, %v9407_v7  ;;  %v7679_v14 = vmul.f32 %v10946_v49, %v9406_v12 }
 0xa97   : > { %v7680_v15 = vmul.f32 %v10948_v0, %v9409_v57 }
 0xa99   : > { %v7699_v38 = vpack.c.bf16 %v7680_v15, %v7679_v14  ;;  %v9410_v35 = vpop.f32.mrb[148].mxu0 }
 0xa9a   : > { %v9411_v18 = vpop.f32.mrb[149].mxu0 }
 0xa9b   : > { %v9412_v25 = vadd.f32 %v9411_v18, %v9410_v35  ;;  %v9413_v28 = vpop.f32.mrb[150].mxu0  ;;  %10005 = vmatprep.mubr.msk.bf16.mxu0 %vm658_vm1, %v7699_v38 }
 0xa9c   : > { %v9414_v27 = vpop.f32.mrb[151].mxu0 }
 0xa9d   : > { %v9415_v47 = vadd.f32 %v9414_v27, %v9413_v28  ;;  %v7681_v62 = vmul.f32 %v10950_v53, %v9412_v25 }
 0xa9f   : > { %v7682_v31 = vmul.f32 %v10952_v36, %v9415_v47 }
 0xaa1   : > { %v7700_v20 = vpack.c.bf16 %v7682_v31, %v7681_v62  ;;  %v9416_v45 = vpop.f32.mrb[152].mxu0 }
 0xaa2   : > { %v9417_v22 = vpop.f32.mrb[153].mxu0 }
 0xaa3   : > { %v9418_v59 = vadd.f32 %v9417_v22, %v9416_v45  ;;  %v9419_v9 = vpop.f32.mrb[154].mxu0  ;;  %10006 = vmatmul.mubr.msk.bf16.gmra.mrb[24].mxu0 %vm658_vm1, %v7700_v20 }
 0xaa4   : > { %v9420_v63 = vpop.f32.mrb[155].mxu0 }
 0xaa5   : > { %v9421_v52 = vadd.f32 %v9420_v63, %v9419_v9  ;;  %v7683_v56 = vmul.f32 %v10954_v26, %v9418_v59 }
 0xaa7   : > { %v7684_v48 = vmul.f32 %v10956_v2, %v9421_v52 }
 0xaa9   : > { %v7701_v44 = vpack.c.bf16 %v7684_v48, %v7683_v56  ;;  %v9422_v5 = vpop.f32.mrb[156].mxu0 }
 0xaaa   : > { %v9423_v3 = vpop.f32.mrb[157].mxu0 }
 0xaab   : > { %v9424_v16 = vadd.f32 %v9423_v3, %v9422_v5  ;;  %v9425_v43 = vpop.f32.mrb[158].mxu0  ;;  %10009 = vmatprep.mubr.msk.bf16.mxu0 %vm658_vm1, %v7701_v44 }
 0xaac   : > { %v9426_v17 = vpop.f32.mrb[159].mxu0 }
 0xaad   : > { %v9427_v60 = vadd.f32 %v9426_v17, %v9425_v43  ;;  %v7685_v37 = vmul.f32 %v10958_v34, %v9424_v16 }
 0xaaf   : > { %v7686_v19 = vmul.f32 %v10960_v8, %v9427_v60 }
 0xab1   : > { %v7702_v41 = vpack.c.bf16 %v7686_v19, %v7685_v37 }
 0xab3   : > { %10010 = vmatmul.mubr.msk.bf16.gmra.mrb[28].mxu0 %vm658_vm1, %v7702_v41 }
 0xb16   : > { %v9983_v23 = vpop.f32.mrb[0].mxu0 }
 0xb17   : > { %v7958_v51 = vadd.f32 %v9983_v23, %v14048_v24  ;;  %v7790_v46 = vpop.f32.mrb[1].mxu0 }
 0xb18   : > { %v7956_v21 = vadd.f32 %v14048_v24, %v7790_v46  ;;  %v9984_v10 = vpop.f32.mrb[2].mxu0 }
 0xb19   : > { %7990 = vst.msk [vmem:[%s14055_s20 + $0x10] sm:$0xff] %vm432_vm0, %v7958_v51  ;;  %v7959_v6 = vadd.f32 %v9984_v10, %v14048_v24  ;;  %v7793_v58 = vpop.f32.mrb[3].mxu0 }
 0xb1a   : > { %7988 = vst.msk [vmem:[%s14055_s20] sm:$0xff] %vm432_vm0, %v7956_v21  ;;  %v7957_v1 = vadd.f32 %v14048_v24, %v7793_v58 }
 0xb1b   : > { %7991 = vst.msk [vmem:[%s14055_s20 + $0x18] sm:$0xff] %vm432_vm0, %v7959_v6 }
 0xb1c   : > { %7989 = vst.msk [vmem:[%s14055_s20 + $0x8] sm:$0xff] %vm432_vm0, %v7957_v1 }
 0xb26   : > { %v9987_v40 = vpop.f32.mrb[4].mxu0 }
 0xb27   : > { %v7962_v4 = vadd.f32 %v9987_v40, %v14048_v24  ;;  %v7806_v50 = vpop.f32.mrb[5].mxu0 }
 0xb28   : > { %v7960_v13 = vadd.f32 %v14048_v24, %v7806_v50  ;;  %v9988_v42 = vpop.f32.mrb[6].mxu0 }
 0xb29   : > { %7994 = vst.msk [vmem:[%s14055_s20 + $0x30] sm:$0xff] %vm432_vm0, %v7962_v4  ;;  %v7963_v29 = vadd.f32 %v9988_v42, %v14048_v24  ;;  %v7809_v33 = vpop.f32.mrb[7].mxu0 }
 0xb2a   : > { %7992 = vst.msk [vmem:[%s14055_s20 + $0x20] sm:$0xff] %vm432_vm0, %v7960_v13  ;;  %v7961_v55 = vadd.f32 %v14048_v24, %v7809_v33 }
 0xb2b   : > { %7995 = vst.msk [vmem:[%s14055_s20 + $0x38] sm:$0xff] %vm432_vm0, %v7963_v29 }
 0xb2c   : > { %7993 = vst.msk [vmem:[%s14055_s20 + $0x28] sm:$0xff] %vm432_vm0, %v7961_v55 }
 0xb36   : > { %v9991_v54 = vpop.f32.mrb[8].mxu0 }
 0xb37   : > { %v7966_v12 = vadd.f32 %v9991_v54, %v14048_v24  ;;  %v7822_v7 = vpop.f32.mrb[9].mxu0 }
 0xb38   : > { %v7964_v32 = vadd.f32 %v14048_v24, %v7822_v7  ;;  %v9992_v49 = vpop.f32.mrb[10].mxu0 }
 0xb39   : > { %7998 = vst.msk [vmem:[%s14055_s20 + $0x50] sm:$0xff] %vm432_vm0, %v7966_v12  ;;  %v7967_v57 = vadd.f32 %v9992_v49, %v14048_v24  ;;  %v7825_v0 = vpop.f32.mrb[11].mxu0 }
 0xb3a   : > { %7996 = vst.msk [vmem:[%s14055_s20 + $0x40] sm:$0xff] %vm432_vm0, %v7964_v32  ;;  %v7965_v14 = vadd.f32 %v14048_v24, %v7825_v0 }
 0xb3b   : > { %7999 = vst.msk [vmem:[%s14055_s20 + $0x58] sm:$0xff] %vm432_vm0, %v7967_v57 }
 0xb3c   : > { %7997 = vst.msk [vmem:[%s14055_s20 + $0x48] sm:$0xff] %vm432_vm0, %v7965_v14 }
 0xb46   : > { %v9995_v15 = vpop.f32.mrb[12].mxu0 }
 0xb47   : > { %v7970_v11 = vadd.f32 %v9995_v15, %v14048_v24  ;;  %v7838_v39 = vpop.f32.mrb[13].mxu0 }
 0xb48   : > { %v7968_v38 = vadd.f32 %v14048_v24, %v7838_v39  ;;  %v9996_v35 = vpop.f32.mrb[14].mxu0 }
 0xb49   : > { %8002 = vst.msk [vmem:[%s14055_s20 + $0x70] sm:$0xff] %vm432_vm0, %v7970_v11  ;;  %v7971_v18 = vadd.f32 %v9996_v35, %v14048_v24  ;;  %v7841_v25 = vpop.f32.mrb[15].mxu0 }
 0xb4a   : > { %8000 = vst.msk [vmem:[%s14055_s20 + $0x60] sm:$0xff] %vm432_vm0, %v7968_v38  ;;  %v7969_v28 = vadd.f32 %v14048_v24, %v7841_v25 }
 0xb4b   : > { %8003 = vst.msk [vmem:[%s14055_s20 + $0x78] sm:$0xff] %vm432_vm0, %v7971_v18 }
 0xb4c   : > { %8001 = vst.msk [vmem:[%s14055_s20 + $0x68] sm:$0xff] %vm432_vm0, %v7969_v28 }
 0xb56   : > { %v9999_v27 = vpop.f32.mrb[16].mxu0 }
 0xb57   : > { %v7974_v53 = vadd.f32 %v9999_v27, %v14048_v24  ;;  %v7854_v47 = vpop.f32.mrb[17].mxu0 }
 0xb58   : > { %v7972_v36 = vadd.f32 %v14048_v24, %v7854_v47  ;;  %v10000_v62 = vpop.f32.mrb[18].mxu0 }
 0xb59   : > { %8006 = vst.msk [vmem:[%s14055_s20 + $0x90] sm:$0xff] %vm432_vm0, %v7974_v53  ;;  %v7975_v31 = vadd.f32 %v10000_v62, %v14048_v24  ;;  %v7857_v30 = vpop.f32.mrb[19].mxu0 }
 0xb5a   : > { %8004 = vst.msk [vmem:[%s14055_s20 + $0x80] sm:$0xff] %vm432_vm0, %v7972_v36  ;;  %v7973_v61 = vadd.f32 %v14048_v24, %v7857_v30 }
 0xb5b   : > { %8007 = vst.msk [vmem:[%s14055_s20 + $0x98] sm:$0xff] %vm432_vm0, %v7975_v31 }
 0xb5c   : > { %8005 = vst.msk [vmem:[%s14055_s20 + $0x88] sm:$0xff] %vm432_vm0, %v7973_v61 }
 0xb66   : > { %v10003_v20 = vpop.f32.mrb[20].mxu0 }
 0xb67   : > { %v7978_v45 = vadd.f32 %v10003_v20, %v14048_v24  ;;  %v7870_v22 = vpop.f32.mrb[21].mxu0 }
 0xb68   : > { %v7976_v59 = vadd.f32 %v14048_v24, %v7870_v22  ;;  %v10004_v9 = vpop.f32.mrb[22].mxu0 }
 0xb69   : > { %8010 = vst.msk [vmem:[%s14055_s20 + $0xb0] sm:$0xff] %vm432_vm0, %v7978_v45  ;;  %v7979_v63 = vadd.f32 %v10004_v9, %v14048_v24  ;;  %v7873_v26 = vpop.f32.mrb[23].mxu0 }
 0xb6a   : > { %8008 = vst.msk [vmem:[%s14055_s20 + $0xa0] sm:$0xff] %vm432_vm0, %v7976_v59  ;;  %v7977_v52 = vadd.f32 %v14048_v24, %v7873_v26 }
 0xb6b   : > { %8011 = vst.msk [vmem:[%s14055_s20 + $0xb8] sm:$0xff] %vm432_vm0, %v7979_v63 }
 0xb6c   : > { %8009 = vst.msk [vmem:[%s14055_s20 + $0xa8] sm:$0xff] %vm432_vm0, %v7977_v52 }
 0xb76   : > { %v10007_v2 = vpop.f32.mrb[24].mxu0 }
 0xb77   : > { %v7982_v56 = vadd.f32 %v10007_v2, %v14048_v24  ;;  %v7886_v48 = vpop.f32.mrb[25].mxu0 }
 0xb78   : > { %v7980_v44 = vadd.f32 %v14048_v24, %v7886_v48  ;;  %v10008_v5 = vpop.f32.mrb[26].mxu0 }
 0xb79   : > { %8014 = vst.msk [vmem:[%s14055_s20 + $0xd0] sm:$0xff] %vm432_vm0, %v7982_v56  ;;  %v7983_v3 = vadd.f32 %v10008_v5, %v14048_v24  ;;  %v7889_v16 = vpop.f32.mrb[27].mxu0 }
 0xb7a   : > { %8012 = vst.msk [vmem:[%s14055_s20 + $0xc0] sm:$0xff] %vm432_vm0, %v7980_v44  ;;  %v7981_v43 = vadd.f32 %v14048_v24, %v7889_v16 }
 0xb7b   : > { %8015 = vst.msk [vmem:[%s14055_s20 + $0xd8] sm:$0xff] %vm432_vm0, %v7983_v3 }
 0xb7c   : > { %8013 = vst.msk [vmem:[%s14055_s20 + $0xc8] sm:$0xff] %vm432_vm0, %v7981_v43 }
 0xb86   : > { %v10011_v17 = vpop.f32.mrb[28].mxu0 }
 0xb87   : > { %v7986_v34 = vadd.f32 %v10011_v17, %v14048_v24  ;;  %v7902_v60 = vpop.f32.mrb[29].mxu0 }
 0xb88   : > { %v7984_v8 = vadd.f32 %v14048_v24, %v7902_v60  ;;  %v10012_v37 = vpop.f32.mrb[30].mxu0 }
 0xb89   : > { %8018 = vst.msk [vmem:[%s14055_s20 + $0xf0] sm:$0xff] %vm432_vm0, %v7986_v34  ;;  %v7987_v19 = vadd.f32 %v10012_v37, %v14048_v24  ;;  %v7905_v41 = vpop.f32.mrb[31].mxu0 }
 0xb8a   : > { %8016 = vst.msk [vmem:[%s14055_s20 + $0xe0] sm:$0xff] %vm432_vm0, %v7984_v8  ;;  %v7985_v23 = vadd.f32 %v14048_v24, %v7905_v41 }
 0xb8b   : > { %8019 = vst.msk [vmem:[%s14055_s20 + $0xf8] sm:$0xff] %vm432_vm0, %v7987_v19 }
 0xb8c   : > { %8017 = vst.msk [vmem:[%s14055_s20 + $0xe8] sm:$0xff] %vm432_vm0, %v7985_v23 }
 0xb8d PF: > { %s19_s11 = sadd.s32 1, %s10983_s11   ;;  %s14585_s30 = smov %s10979_s10 }
 0xb8e   : > { %p16_p5 = scmp.ge.s32.totalorder %s19_s11, 4   ;;  %s14586_s10 = smov %s14588_s12 }
 0xb90   :  { %18 = sbr.rel (!%p16_p5) target bundleno = 2 (0x2), region = 124 }

</bundles_post_ra>
